<compile_context>
chip_gen: v7x
topology: tpu7x:2x2x1
jax: 0.10.0
libtpu: 0.0.40
codegen_flags: <defaults>
</compile_context>

<pallas_src>
import functools

import numpy as np
import jax
import jax.numpy as jnp
from jax.experimental import pallas as pl
from jax.experimental.pallas import tpu as pltpu

THRESH = 0.5
DECAY = 0.2
TIME_WINDOW = 10

# Geometry fixed by the PyTorch module.
H1 = W1 = 28                    # conv1 spatial
H2 = W2 = 14                    # conv2 spatial (after pool1)
H3 = W3 = 7                     # after pool2
C1_IN, C1_OUT = 1, 4
C2_IN, C2_OUT = 4, 4
FC1_OUT, FC2_OUT = 144, 10

HW1, HW1P = H1 * W1, 7 * 128    # 784 -> 896 lanes (multiple of 128)
HW2, HW2P = H2 * W2, 2 * 128    # 196 -> 256 lanes
HW3 = H3 * W3                   # 49


# --------------------------- fused Pallas kernel ----------------------------

def _scnn_kernel(inp_ref, rand_ref, w1_ref, b1_ref, w2_ref, b2_ref,
                 mask1_ref, mask2_ref, pool1_ref,
                 fc1w_ref, fc1b_ref, fc2w_ref, fc2b_ref,
                 out_ref,
                 c1_mem, c2_mem, h1_mem, h2_mem):
    f32 = jnp.float32
    t = pl.program_id(1)

    @pl.when(t == 0)
    def _init():                    # fresh batch block: zero all LIF state
        c1_mem[...] = jnp.zeros_like(c1_mem)
        c2_mem[...] = jnp.zeros_like(c2_mem)
        h1_mem[...] = jnp.zeros_like(h1_mem)
        h2_mem[...] = jnp.zeros_like(h2_mem)
        out_ref[...] = jnp.zeros_like(out_ref)

    def lif_update(mem_view, z):
        # mem = mem * decay * (1 - spike_prev) + z ; spike = (mem > thresh)
        # spike_prev is recomputed from the stored membrane (identical value).
        prev = mem_view[...]
        prev_spk = (prev > THRESH).astype(f32)
        new_mem = prev * DECAY * (1.0 - prev_spk) + z
        mem_view[...] = new_mem
        return (new_mem > THRESH).astype(f32)

    def conv3x3(inputs, width, w_ref, b_ref, n_out, mask_ref):
        # inputs: per-input-channel (bb, HWpad) slabs, spatial flattened
        # row-major on the lane axis.  Returns n_out pre-activation slabs.
        size = inputs[0].shape[-1]
        accs = [None] * n_out
        for ci, x in enumerate(inputs):
            for kh in range(3):
                for kw in range(3):
                    k = kh * 3 + kw
                    off = (kh - 1) * width + (kw - 1)          # flat tap offset
                    rolled = x if off == 0 else pltpu.roll(
                        x, shift=(-off) % size, axis=1)
                    tap = rolled * mask_ref[k]                 # zero OOB taps
                    for co in range(n_out):
                        term = w_ref[co, ci * 9 + k] * tap     # SMEM scalar
                        accs[co] = term if accs[co] is None else accs[co] + term
        return [accs[co] + b_ref[0, co] for co in range(n_out)]

    # ---- Poisson-like spike encoding of the input:  x > rand ----
    x_spk = (inp_ref[...] > rand_ref[0]).astype(f32)           # (bb, 896)

    # ---- conv1 (1 -> 4, 3x3, pad 1) + LIF ----
    z1 = conv3x3([x_spk], W1, w1_ref, b1_ref, C1_OUT, mask1_ref)
    spk1 = [lif_update(c1_mem.at[co], z1[co]) for co in range(C1_OUT)]

    # ---- avg_pool2d(2): 28x28 -> 14x14 as MXU matmuls (0.25-valued matrix) --
    pw1 = pool1_ref[...]
    pooled1 = [jnp.dot(s, pw1, preferred_element_type=f32) for s in spk1]

    # ---- conv2 (4 -> 4, 3x3, pad 1) + LIF ----
    z2 = conv3x3(pooled1, W2, w2_ref, b2_ref, C2_OUT, mask2_ref)
    spk2 = [lif_update(c2_mem.at[co], z2[co]) for co in range(C2_OUT)]

    # ---- avg_pool2d(2) 14x14 -> 7x7 + NCHW flatten + fc1: folded into the
    # fc1 weight, so this is a single lane-dense (bb,1024)x(1024,144) matmul.
    spk2_cat = jnp.concatenate(spk2, axis=1)                   # (bb, 4*256)
    zf1 = fc1b_ref[...] + jnp.dot(spk2_cat, fc1w_ref[...],
                                  preferred_element_type=f32)
    h1_spk = lif_update(h1_mem, zf1)

    # ---- fc2 + LIF, spike-count accumulation ----
    zf2 = fc2b_ref[...] + jnp.dot(h1_spk, fc2w_ref[...],
                                  preferred_element_type=f32)
    h2_spk = lif_update(h2_mem, zf2)

    out_ref[...] += h2_spk          # output block stays VMEM-resident over t

    @pl.when(t == pl.num_programs(1) - 1)
    def _finalize():
        out_ref[...] = out_ref[...] * (1.0 / pl.num_programs(1))


# --------------------------- structural constants ---------------------------

def _pooling_matrix(h, w, in_pad, out_cols):
    """2x2 average pooling of an (h, w) grid (row-major, lane-flattened) as a
    right-matmul.  Lane-padding rows (>= h*w) and padding columns are zero."""
    wo = w // 2
    m = np.zeros((in_pad, out_cols), np.float32)
    for y in range(h):
        for x in range(w):
            m[y * w + x, (y // 2) * wo + (x // 2)] = 0.25
    return m


def _shift_masks(h, w, pad):
    """masks[k, 0, y*w+x] = 1 where conv tap k = kh*3+kw reads in-bounds."""
    m = np.zeros((9, 1, pad), np.float32)
    for kh in range(3):
        for kw in range(3):
            dy, dx = kh - 1, kw - 1
            k = kh * 3 + kw
            for y in range(h):
                for x in range(w):
                    if 0 <= y + dy < h and 0 <= x + dx < w:
                        m[k, 0, y * w + x] = 1.0
    return m


# ------------------------------- parameters ---------------------------------

def init_params(key):
    """PyTorch-default-style init in the module's natural layouts."""
    ks = jax.random.split(key, 8)

    def u(k, shape, fan_in):
        bound = 1.0 / float(fan_in) ** 0.5
        return jax.random.uniform(k, shape, jnp.float32, -bound, bound)

    return dict(
        conv1_w=u(ks[0], (C1_OUT, C1_IN, 3, 3), C1_IN * 9),
        conv1_b=u(ks[1], (C1_OUT,), C1_IN * 9),
        conv2_w=u(ks[2], (C2_OUT, C2_IN, 3, 3), C2_IN * 9),
        conv2_b=u(ks[3], (C2_OUT,), C2_IN * 9),
        fc1_w=u(ks[4], (FC1_OUT, HW3 * C2_OUT), HW3 * C2_OUT),   # (144, 196)
        fc1_b=u(ks[5], (FC1_OUT,), HW3 * C2_OUT),
        fc2_w=u(ks[6], (FC2_OUT, FC1_OUT), FC1_OUT),             # (10, 144)
        fc2_b=u(ks[7], (FC2_OUT,), FC1_OUT),
    )


def pack_params(p):
    """Re-lay-out natural params + structural constants for the fused kernel."""
    pool2 = _pooling_matrix(H2, W2, HW2P, HW3)                   # (256, 49)
    # Fold avg_pool2d(2) (14x14 -> 7x7) and the NCHW flatten (c*49 + y*7 + x)
    # into fc1: row index of the fused weight is c*256 + (y14*14 + x14).
    # Each pool row has a single 0.25 tap, so this fold is numerically exact.
    fc1_by_c = np.asarray(p["fc1_w"], np.float64).T.reshape(C2_OUT, HW3, FC1_OUT)
    fc1_fused = np.einsum("pq,cqf->cpf", pool2.astype(np.float64), fc1_by_c)
    fc1_fused = fc1_fused.reshape(C2_OUT * HW2P, FC1_OUT).astype(np.float32)
    return dict(
        # conv weights as (out_ch, in_ch*9) scalar tables (SMEM), tap k=kh*3+kw
        conv1_w=p["conv1_w"].reshape(C1_OUT, C1_IN * 9),
        conv1_b=p["conv1_b"].reshape(1, C1_OUT),
        conv2_w=p["conv2_w"].reshape(C2_OUT, C2_IN * 9),
        conv2_b=p["conv2_b"].reshape(1, C2_OUT),
        fc1_w=jnp.asarray(fc1_fused),                            # (1024, 144)
        fc1_b=p["fc1_b"].reshape(1, FC1_OUT),
        fc2_w=p["fc2_w"].T,                                      # (144, 10)
        fc2_b=p["fc2_b"].reshape(1, FC2_OUT),
        pool1=jnp.asarray(_pooling_matrix(H1, W1, HW1P, HW2P)),  # (896, 256)
        mask1=jnp.asarray(_shift_masks(H1, W1, HW1P)),
        mask2=jnp.asarray(_shift_masks(H2, W2, HW2P)),
    )


# -------------------------------- forward -----------------------------------

def _pick_batch_block(b):
    # Second-to-last block dims must be a multiple of 8 or the full extent.
    return 8 if b % 8 == 0 else b


@functools.partial(jax.jit, static_argnames=("time_window",))
def scnn_forward(params, inp, rand, time_window=TIME_WINDOW):
    f32 = jnp.float32
    B = inp.shape[0]
    T = time_window

    # Flatten spatial onto the lane axis and zero-pad 784 -> 896 lanes.
    inp2 = jnp.pad(inp.reshape(B, HW1).astype(f32), ((0, 0), (0, HW1P - HW1)))
    rnd2 = jnp.pad(rand.reshape(T, B, HW1).astype(f32),
                   ((0, 0), (0, 0), (0, HW1P - HW1)))

    bb = _pick_batch_block(B)
    grid = (B // bb, T)

    def vmem2(shape):
        return pl.BlockSpec(shape, lambda b, t: (0, 0))

    def vmem3(shape):
        return pl.BlockSpec(shape, lambda b, t: (0, 0, 0))

    smem = pl.BlockSpec(memory_space=pltpu.MemorySpace.SMEM)

    out = pl.pallas_call(
        _scnn_kernel,
        out_shape=jax.ShapeDtypeStruct((B, FC2_OUT), f32),
        grid=grid,
        in_specs=[
            pl.BlockSpec((bb, HW1P), lambda b, t: (b, 0)),        # input image
            pl.BlockSpec((1, bb, HW1P), lambda b, t: (t, b, 0)),  # rand[t]
            smem, smem, smem, smem,                               # conv w / b
            vmem3((9, 1, HW1P)),                                  # conv1 masks
            vmem3((9, 1, HW2P)),                                  # conv2 masks
            vmem2((HW1P, HW2P)),                                  # pool1 matrix
            vmem2((C2_OUT * HW2P, FC1_OUT)),                      # fused fc1 w
            vmem2((1, FC1_OUT)),                                  # fc1 bias
            vmem2((FC1_OUT, FC2_OUT)),                            # fc2 weight
            vmem2((1, FC2_OUT)),                                  # fc2 bias
        ],
        out_specs=pl.BlockSpec((bb, FC2_OUT), lambda b, t: (b, 0)),
        scratch_shapes=[
            pltpu.VMEM((C1_OUT, bb, HW1P), f32),   # conv1 membranes
            pltpu.VMEM((C2_OUT, bb, HW2P), f32),   # conv2 membranes
            pltpu.VMEM((bb, FC1_OUT), f32),        # fc1 membrane
            pltpu.VMEM((bb, FC2_OUT), f32),        # fc2 membrane
        ],
        compiler_params=pltpu.CompilerParams(
            dimension_semantics=("parallel", "arbitrary")),
    )(inp2, rnd2,
      params["conv1_w"], params["conv1_b"],
      params["conv2_w"], params["conv2_b"],
      params["mask1"], params["mask2"],
      params["pool1"],
      params["fc1_w"], params["fc1_b"],
      params["fc2_w"], params["fc2_b"])
    return out


# ----------------------------- pure-JAX reference ----------------------------

def scnn_reference(params, inp, rand):
    """Mirrors the PyTorch forward in plain JAX (f32 / HIGHEST precision)."""
    hi = jax.lax.Precision.HIGHEST
    f32 = jnp.float32
    T, B = rand.shape[0], inp.shape[0]

    def conv(x, w, b):
        y = jax.lax.conv_general_dilated(
            x, w, (1, 1), ((1, 1), (1, 1)),
            dimension_numbers=("NCHW", "OIHW", "NCHW"), precision=hi)
        return y + b.reshape(1, -1, 1, 1)

    def pool(x):
        b_, c, h, w = x.shape
        return x.reshape(b_, c, h // 2, 2, w // 2, 2).mean(axis=(3, 5))

    c1_mem = jnp.zeros((B, C1_OUT, H1, W1), f32); c1_spk = c1_mem
    c2_mem = jnp.zeros((B, C2_OUT, H2, W2), f32); c2_spk = c2_mem
    h1_mem = jnp.zeros((B, FC1_OUT), f32); h1_spk = h1_mem
    h2_mem = jnp.zeros((B, FC2_OUT), f32); h2_spk = h2_mem
    h2_sum = jnp.zeros((B, FC2_OUT), f32)
    for t in range(T):
        x = (inp > rand[t]).astype(f32)
        c1_mem = c1_mem * DECAY * (1.0 - c1_spk) + conv(x, params["conv1_w"],
                                                        params["conv1_b"])
        c1_spk = (c1_mem > THRESH).astype(f32)
        c2_mem = c2_mem * DECAY * (1.0 - c2_spk) + conv(pool(c1_spk),
                                                        params["conv2_w"],
                                                        params["conv2_b"])
        c2_spk = (c2_mem > THRESH).astype(f32)
        p2 = pool(c2_spk).reshape(B, -1)
        h1_mem = h1_mem * DECAY * (1.0 - h1_spk) + (
            jnp.dot(p2, params["fc1_w"].T, precision=hi) + params["fc1_b"])
        h1_spk = (h1_mem > THRESH).astype(f32)
        h2_mem = h2_mem * DECAY * (1.0 - h2_spk) + (
            jnp.dot(h1_spk, params["fc2_w"].T, precision=hi) + params["fc2_b"])
        h2_spk = (h2_mem > THRESH).astype(f32)
        h2_sum = h2_sum + h2_spk
    return h2_sum / T


# ---------------------------------- main -------------------------------------

if __name__ == "__main__":
    key = jax.random.PRNGKey(0)
    k_param, k_inp, k_rand = jax.random.split(key, 3)

    B = 2  # module hardcodes batch 100; spatial/feature dims must stay 28/196/144/10
    nat_params = init_params(k_param)
    packed_params = pack_params(nat_params)
    inp = jax.random.uniform(k_inp, (B, 1, H1, W1), jnp.float32)
    rand = jax.random.uniform(k_rand, (TIME_WINDOW, B, 1, H1, W1), jnp.float32)

    out = jax.block_until_ready(scnn_forward(packed_params, inp, rand))
    assert out.shape == (B, FC2_OUT) and out.dtype == jnp.float32
    # Outputs are mean spike counts over the time window -> finite, in [0, 1].
    assert bool(jnp.all(jnp.isfinite(out)))
    assert bool(jnp.all((out >= 0.0) & (out <= 1.0)))

    # Reference check.  Spiking nets are threshold-discontinuous: fp-ordering
    # differences can flip individual spikes (each flip moves an output by
    # 1/T = 0.1), so allow a couple of flips while catching structural errors.
    ref = jax.block_until_ready(jax.jit(scnn_reference)(nat_params, inp, rand))
    err = float(jnp.max(jnp.abs(out - ref)))
    assert err <= 0.2 + 1e-6, f"kernel vs reference mismatch: max|diff|={err}"

    print("KERNEL_OK")
</pallas_src>

<mosaic_0001>
module attributes {stable_mosaic.version = 11 : i64} {
  func.func @_scnn_kernel(%arg0: i32, %arg1: i32, %arg2: memref<2x896xf32, #tpu.memory_space<vmem>>, %arg3: memref<1x2x896xf32, #tpu.memory_space<vmem>>, %arg4: memref<4x9xf32, #tpu.memory_space<smem>>, %arg5: memref<1x4xf32, #tpu.memory_space<smem>>, %arg6: memref<4x36xf32, #tpu.memory_space<smem>>, %arg7: memref<1x4xf32, #tpu.memory_space<smem>>, %arg8: memref<9x1x896xf32, #tpu.memory_space<vmem>>, %arg9: memref<9x1x256xf32, #tpu.memory_space<vmem>>, %arg10: memref<896x256xf32, #tpu.memory_space<vmem>>, %arg11: memref<1024x144xf32, #tpu.memory_space<vmem>>, %arg12: memref<1x144xf32, #tpu.memory_space<vmem>>, %arg13: memref<144x10xf32, #tpu.memory_space<vmem>>, %arg14: memref<1x10xf32, #tpu.memory_space<vmem>>, %arg15: memref<2x10xf32, #tpu.memory_space<vmem>>, %arg16: memref<4x2x896xf32, #tpu.memory_space<vmem>>, %arg17: memref<4x2x256xf32, #tpu.memory_space<vmem>>, %arg18: memref<2x144xf32, #tpu.memory_space<vmem>>, %arg19: memref<2x10xf32, #tpu.memory_space<vmem>>) attributes {dimension_semantics = [#tpu.dimension_semantics<parallel>, #tpu.dimension_semantics<arbitrary>], iteration_bounds = array<i64: 1, 10>, scalar_prefetch = 0 : i64, scratch_operands = 4 : i64, tpu.core_type = #tpu.core_type<tc>, window_params = [{transform_indices = @transform_0, window_bounds = array<i64: 2, 896>}, {transform_indices = @transform_1, window_bounds = array<i64: 1, 2, 896>}, {transform_indices = @transform_2, window_bounds = array<i64: 4, 9>}, {transform_indices = @transform_3, window_bounds = array<i64: 1, 4>}, {transform_indices = @transform_4, window_bounds = array<i64: 4, 36>}, {transform_indices = @transform_5, window_bounds = array<i64: 1, 4>}, {pipeline_mode = #tpu.pipeline_mode<synchronous>, transform_indices = @transform_6, window_bounds = array<i64: 9, 1, 896>}, {pipeline_mode = #tpu.pipeline_mode<synchronous>, transform_indices = @transform_7, window_bounds = array<i64: 9, 1, 256>}, {pipeline_mode = #tpu.pipeline_mode<synchronous>, transform_indices = @transform_8, window_bounds = array<i64: 896, 256>}, {pipeline_mode = #tpu.pipeline_mode<synchronous>, transform_indices = @transform_9, window_bounds = array<i64: 1024, 144>}, {pipeline_mode = #tpu.pipeline_mode<synchronous>, transform_indices = @transform_10, window_bounds = array<i64: 1, 144>}, {pipeline_mode = #tpu.pipeline_mode<synchronous>, transform_indices = @transform_11, window_bounds = array<i64: 144, 10>}, {pipeline_mode = #tpu.pipeline_mode<synchronous>, transform_indices = @transform_12, window_bounds = array<i64: 1, 10>}, {transform_indices = @transform_13, window_bounds = array<i64: 2, 10>}]} {
    %c0_i32 = arith.constant 0 : i32
    %0 = arith.cmpi eq, %arg1, %c0_i32 : i32
    %1 = arith.extui %0 : i1 to i32
    %c0_i32_0 = arith.constant 0 : i32
    %2 = arith.cmpi ne, %1, %c0_i32_0 : i32
    scf.if %2 {
      %cst_622 = arith.constant 0.000000e+00 : f32
      %1171 = vector.broadcast %cst_622 : f32 to vector<4x2x896xf32>
      %c0_623 = arith.constant 0 : index
      %c0_624 = arith.constant 0 : index
      %c0_625 = arith.constant 0 : index
      %1172 = vector.load %arg16[%c0_623, %c0_624, %c0_625] : memref<4x2x896xf32, #tpu.memory_space<vmem>>, vector<4x2x896xf32>
      tpu.vector_store %arg16[%c0_623, %c0_624, %c0_625], %1171 {strides = array<i32>} : memref<4x2x896xf32, #tpu.memory_space<vmem>>, vector<4x2x896xf32>,
      %cst_626 = arith.constant 0.000000e+00 : f32
      %1173 = vector.broadcast %cst_626 : f32 to vector<4x2x256xf32>
      %c0_627 = arith.constant 0 : index
      %c0_628 = arith.constant 0 : index
      %c0_629 = arith.constant 0 : index
      %1174 = vector.load %arg17[%c0_627, %c0_628, %c0_629] : memref<4x2x256xf32, #tpu.memory_space<vmem>>, vector<4x2x256xf32>
      tpu.vector_store %arg17[%c0_627, %c0_628, %c0_629], %1173 {strides = array<i32>} : memref<4x2x256xf32, #tpu.memory_space<vmem>>, vector<4x2x256xf32>,
      %cst_630 = arith.constant 0.000000e+00 : f32
      %1175 = vector.broadcast %cst_630 : f32 to vector<2x144xf32>
      %c0_631 = arith.constant 0 : index
      %c0_632 = arith.constant 0 : index
      %1176 = vector.load %arg18[%c0_631, %c0_632] : memref<2x144xf32, #tpu.memory_space<vmem>>, vector<2x144xf32>
      tpu.vector_store %arg18[%c0_631, %c0_632], %1175 {strides = array<i32>} : memref<2x144xf32, #tpu.memory_space<vmem>>, vector<2x144xf32>,
      %cst_633 = arith.constant 0.000000e+00 : f32
      %1177 = vector.broadcast %cst_633 : f32 to vector<2x10xf32>
      %c0_634 = arith.constant 0 : index
      %c0_635 = arith.constant 0 : index
      %1178 = vector.load %arg19[%c0_634, %c0_635] : memref<2x10xf32, #tpu.memory_space<vmem>>, vector<2x10xf32>
      tpu.vector_store %arg19[%c0_634, %c0_635], %1177 {strides = array<i32>} : memref<2x10xf32, #tpu.memory_space<vmem>>, vector<2x10xf32>,
      %cst_636 = arith.constant 0.000000e+00 : f32
      %1179 = vector.broadcast %cst_636 : f32 to vector<2x10xf32>
      %c0_637 = arith.constant 0 : index
      %c0_638 = arith.constant 0 : index
      %1180 = vector.load %arg15[%c0_637, %c0_638] : memref<2x10xf32, #tpu.memory_space<vmem>>, vector<2x10xf32>
      tpu.vector_store %arg15[%c0_637, %c0_638], %1179 {strides = array<i32>} : memref<2x10xf32, #tpu.memory_space<vmem>>, vector<2x10xf32>,
    } else {
    }
    %c0 = arith.constant 0 : index
    %c0_1 = arith.constant 0 : index
    %3 = vector.load %arg2[%c0, %c0_1] : memref<2x896xf32, #tpu.memory_space<vmem>>, vector<2x896xf32>
    %c0_2 = arith.constant 0 : index
    %c0_3 = arith.constant 0 : index
    %c0_4 = arith.constant 0 : index
    %4 = vector.load %arg3[%c0_2, %c0_3, %c0_4] : memref<1x2x896xf32, #tpu.memory_space<vmem>>, vector<1x2x896xf32>
    %5 = vector.shape_cast %4 : vector<1x2x896xf32> to vector<2x896xf32>
    %6 = arith.cmpf ogt, %3, %5 : vector<2x896xf32>
    %7 = arith.extui %6 : vector<2x896xi1> to vector<2x896xi32>
    %8 = arith.sitofp %7 : vector<2x896xi32> to vector<2x896xf32>
    %c29_i32 = arith.constant 29 : i32
    %9 = tpu.dynamic_rotate %8 by %c29_i32 dim 1 : vector<2x896xf32>, i32 -> vector<2x896xf32>
    %c0_5 = arith.constant 0 : index
    %c0_6 = arith.constant 0 : index
    %c0_7 = arith.constant 0 : index
    %10 = vector.load %arg8[%c0_5, %c0_6, %c0_7] : memref<9x1x896xf32, #tpu.memory_space<vmem>>, vector<1x1x896xf32>
    %11 = vector.shape_cast %10 : vector<1x1x896xf32> to vector<1x896xf32>
    %12 = vector.broadcast %11 : vector<1x896xf32> to vector<2x896xf32>
    %13 = arith.mulf %9, %12 : vector<2x896xf32>
    %c0_8 = arith.constant 0 : index
    %c0_9 = arith.constant 0 : index
    %14 = memref.load %arg4[%c0_8, %c0_9] : memref<4x9xf32, #tpu.memory_space<smem>>
    %15 = vector.broadcast %14 : f32 to vector<2x896xf32>
    %16 = arith.mulf %15, %13 : vector<2x896xf32>
    %c1 = arith.constant 1 : index
    %c0_10 = arith.constant 0 : index
    %17 = memref.load %arg4[%c1, %c0_10] : memref<4x9xf32, #tpu.memory_space<smem>>
    %18 = vector.broadcast %17 : f32 to vector<2x896xf32>
    %19 = arith.mulf %18, %13 : vector<2x896xf32>
    %c2 = arith.constant 2 : index
    %c0_11 = arith.constant 0 : index
    %20 = memref.load %arg4[%c2, %c0_11] : memref<4x9xf32, #tpu.memory_space<smem>>
    %21 = vector.broadcast %20 : f32 to vector<2x896xf32>
    %22 = arith.mulf %21, %13 : vector<2x896xf32>
    %c3 = arith.constant 3 : index
    %c0_12 = arith.constant 0 : index
    %23 = memref.load %arg4[%c3, %c0_12] : memref<4x9xf32, #tpu.memory_space<smem>>
    %24 = vector.broadcast %23 : f32 to vector<2x896xf32>
    %25 = arith.mulf %24, %13 : vector<2x896xf32>
    %c28_i32 = arith.constant 28 : i32
    %26 = tpu.dynamic_rotate %8 by %c28_i32 dim 1 : vector<2x896xf32>, i32 -> vector<2x896xf32>
    %c1_13 = arith.constant 1 : index
    %c0_14 = arith.constant 0 : index
    %c0_15 = arith.constant 0 : index
    %27 = vector.load %arg8[%c1_13, %c0_14, %c0_15] : memref<9x1x896xf32, #tpu.memory_space<vmem>>, vector<1x1x896xf32>
    %28 = vector.shape_cast %27 : vector<1x1x896xf32> to vector<1x896xf32>
    %29 = vector.broadcast %28 : vector<1x896xf32> to vector<2x896xf32>
    %30 = arith.mulf %26, %29 : vector<2x896xf32>
    %c0_16 = arith.constant 0 : index
    %c1_17 = arith.constant 1 : index
    %31 = memref.load %arg4[%c0_16, %c1_17] : memref<4x9xf32, #tpu.memory_space<smem>>
    %32 = vector.broadcast %31 : f32 to vector<2x896xf32>
    %33 = arith.mulf %32, %30 : vector<2x896xf32>
    %34 = arith.addf %16, %33 : vector<2x896xf32>
    %c1_18 = arith.constant 1 : index
    %c1_19 = arith.constant 1 : index
    %35 = memref.load %arg4[%c1_18, %c1_19] : memref<4x9xf32, #tpu.memory_space<smem>>
    %36 = vector.broadcast %35 : f32 to vector<2x896xf32>
    %37 = arith.mulf %36, %30 : vector<2x896xf32>
    %38 = arith.addf %19, %37 : vector<2x896xf32>
    %c2_20 = arith.constant 2 : index
    %c1_21 = arith.constant 1 : index
    %39 = memref.load %arg4[%c2_20, %c1_21] : memref<4x9xf32, #tpu.memory_space<smem>>
    %40 = vector.broadcast %39 : f32 to vector<2x896xf32>
    %41 = arith.mulf %40, %30 : vector<2x896xf32>
    %42 = arith.addf %22, %41 : vector<2x896xf32>
    %c3_22 = arith.constant 3 : index
    %c1_23 = arith.constant 1 : index
    %43 = memref.load %arg4[%c3_22, %c1_23] : memref<4x9xf32, #tpu.memory_space<smem>>
    %44 = vector.broadcast %43 : f32 to vector<2x896xf32>
    %45 = arith.mulf %44, %30 : vector<2x896xf32>
    %46 = arith.addf %25, %45 : vector<2x896xf32>
    %c27_i32 = arith.constant 27 : i32
    %47 = tpu.dynamic_rotate %8 by %c27_i32 dim 1 : vector<2x896xf32>, i32 -> vector<2x896xf32>
    %c2_24 = arith.constant 2 : index
    %c0_25 = arith.constant 0 : index
    %c0_26 = arith.constant 0 : index
    %48 = vector.load %arg8[%c2_24, %c0_25, %c0_26] : memref<9x1x896xf32, #tpu.memory_space<vmem>>, vector<1x1x896xf32>
    %49 = vector.shape_cast %48 : vector<1x1x896xf32> to vector<1x896xf32>
    %50 = vector.broadcast %49 : vector<1x896xf32> to vector<2x896xf32>
    %51 = arith.mulf %47, %50 : vector<2x896xf32>
    %c0_27 = arith.constant 0 : index
    %c2_28 = arith.constant 2 : index
    %52 = memref.load %arg4[%c0_27, %c2_28] : memref<4x9xf32, #tpu.memory_space<smem>>
    %53 = vector.broadcast %52 : f32 to vector<2x896xf32>
    %54 = arith.mulf %53, %51 : vector<2x896xf32>
    %55 = arith.addf %34, %54 : vector<2x896xf32>
    %c1_29 = arith.constant 1 : index
    %c2_30 = arith.constant 2 : index
    %56 = memref.load %arg4[%c1_29, %c2_30] : memref<4x9xf32, #tpu.memory_space<smem>>
    %57 = vector.broadcast %56 : f32 to vector<2x896xf32>
    %58 = arith.mulf %57, %51 : vector<2x896xf32>
    %59 = arith.addf %38, %58 : vector<2x896xf32>
    %c2_31 = arith.constant 2 : index
    %c2_32 = arith.constant 2 : index
    %60 = memref.load %arg4[%c2_31, %c2_32] : memref<4x9xf32, #tpu.memory_space<smem>>
    %61 = vector.broadcast %60 : f32 to vector<2x896xf32>
    %62 = arith.mulf %61, %51 : vector<2x896xf32>
    %63 = arith.addf %42, %62 : vector<2x896xf32>
    %c3_33 = arith.constant 3 : index
    %c2_34 = arith.constant 2 : index
    %64 = memref.load %arg4[%c3_33, %c2_34] : memref<4x9xf32, #tpu.memory_space<smem>>
    %65 = vector.broadcast %64 : f32 to vector<2x896xf32>
    %66 = arith.mulf %65, %51 : vector<2x896xf32>
    %67 = arith.addf %46, %66 : vector<2x896xf32>
    %c1_i32 = arith.constant 1 : i32
    %68 = tpu.dynamic_rotate %8 by %c1_i32 dim 1 : vector<2x896xf32>, i32 -> vector<2x896xf32>
    %c3_35 = arith.constant 3 : index
    %c0_36 = arith.constant 0 : index
    %c0_37 = arith.constant 0 : index
    %69 = vector.load %arg8[%c3_35, %c0_36, %c0_37] : memref<9x1x896xf32, #tpu.memory_space<vmem>>, vector<1x1x896xf32>
    %70 = vector.shape_cast %69 : vector<1x1x896xf32> to vector<1x896xf32>
    %71 = vector.broadcast %70 : vector<1x896xf32> to vector<2x896xf32>
    %72 = arith.mulf %68, %71 : vector<2x896xf32>
    %c0_38 = arith.constant 0 : index
    %c3_39 = arith.constant 3 : index
    %73 = memref.load %arg4[%c0_38, %c3_39] : memref<4x9xf32, #tpu.memory_space<smem>>
    %74 = vector.broadcast %73 : f32 to vector<2x896xf32>
    %75 = arith.mulf %74, %72 : vector<2x896xf32>
    %76 = arith.addf %55, %75 : vector<2x896xf32>
    %c1_40 = arith.constant 1 : index
    %c3_41 = arith.constant 3 : index
    %77 = memref.load %arg4[%c1_40, %c3_41] : memref<4x9xf32, #tpu.memory_space<smem>>
    %78 = vector.broadcast %77 : f32 to vector<2x896xf32>
    %79 = arith.mulf %78, %72 : vector<2x896xf32>
    %80 = arith.addf %59, %79 : vector<2x896xf32>
    %c2_42 = arith.constant 2 : index
    %c3_43 = arith.constant 3 : index
    %81 = memref.load %arg4[%c2_42, %c3_43] : memref<4x9xf32, #tpu.memory_space<smem>>
    %82 = vector.broadcast %81 : f32 to vector<2x896xf32>
    %83 = arith.mulf %82, %72 : vector<2x896xf32>
    %84 = arith.addf %63, %83 : vector<2x896xf32>
    %c3_44 = arith.constant 3 : index
    %c3_45 = arith.constant 3 : index
    %85 = memref.load %arg4[%c3_44, %c3_45] : memref<4x9xf32, #tpu.memory_space<smem>>
    %86 = vector.broadcast %85 : f32 to vector<2x896xf32>
    %87 = arith.mulf %86, %72 : vector<2x896xf32>
    %88 = arith.addf %67, %87 : vector<2x896xf32>
    %c4 = arith.constant 4 : index
    %c0_46 = arith.constant 0 : index
    %c0_47 = arith.constant 0 : index
    %89 = vector.load %arg8[%c4, %c0_46, %c0_47] : memref<9x1x896xf32, #tpu.memory_space<vmem>>, vector<1x1x896xf32>
    %90 = vector.shape_cast %89 : vector<1x1x896xf32> to vector<1x896xf32>
    %91 = vector.broadcast %90 : vector<1x896xf32> to vector<2x896xf32>
    %92 = arith.mulf %8, %91 : vector<2x896xf32>
    %c0_48 = arith.constant 0 : index
    %c4_49 = arith.constant 4 : index
    %93 = memref.load %arg4[%c0_48, %c4_49] : memref<4x9xf32, #tpu.memory_space<smem>>
    %94 = vector.broadcast %93 : f32 to vector<2x896xf32>
    %95 = arith.mulf %94, %92 : vector<2x896xf32>
    %96 = arith.addf %76, %95 : vector<2x896xf32>
    %c1_50 = arith.constant 1 : index
    %c4_51 = arith.constant 4 : index
    %97 = memref.load %arg4[%c1_50, %c4_51] : memref<4x9xf32, #tpu.memory_space<smem>>
    %98 = vector.broadcast %97 : f32 to vector<2x896xf32>
    %99 = arith.mulf %98, %92 : vector<2x896xf32>
    %100 = arith.addf %80, %99 : vector<2x896xf32>
    %c2_52 = arith.constant 2 : index
    %c4_53 = arith.constant 4 : index
    %101 = memref.load %arg4[%c2_52, %c4_53] : memref<4x9xf32, #tpu.memory_space<smem>>
    %102 = vector.broadcast %101 : f32 to vector<2x896xf32>
    %103 = arith.mulf %102, %92 : vector<2x896xf32>
    %104 = arith.addf %84, %103 : vector<2x896xf32>
    %c3_54 = arith.constant 3 : index
    %c4_55 = arith.constant 4 : index
    %105 = memref.load %arg4[%c3_54, %c4_55] : memref<4x9xf32, #tpu.memory_space<smem>>
    %106 = vector.broadcast %105 : f32 to vector<2x896xf32>
    %107 = arith.mulf %106, %92 : vector<2x896xf32>
    %108 = arith.addf %88, %107 : vector<2x896xf32>
    %c895_i32 = arith.constant 895 : i32
    %109 = tpu.dynamic_rotate %8 by %c895_i32 dim 1 : vector<2x896xf32>, i32 -> vector<2x896xf32>
    %c5 = arith.constant 5 : index
    %c0_56 = arith.constant 0 : index
    %c0_57 = arith.constant 0 : index
    %110 = vector.load %arg8[%c5, %c0_56, %c0_57] : memref<9x1x896xf32, #tpu.memory_space<vmem>>, vector<1x1x896xf32>
    %111 = vector.shape_cast %110 : vector<1x1x896xf32> to vector<1x896xf32>
    %112 = vector.broadcast %111 : vector<1x896xf32> to vector<2x896xf32>
    %113 = arith.mulf %109, %112 : vector<2x896xf32>
    %c0_58 = arith.constant 0 : index
    %c5_59 = arith.constant 5 : index
    %114 = memref.load %arg4[%c0_58, %c5_59] : memref<4x9xf32, #tpu.memory_space<smem>>
    %115 = vector.broadcast %114 : f32 to vector<2x896xf32>
    %116 = arith.mulf %115, %113 : vector<2x896xf32>
    %117 = arith.addf %96, %116 : vector<2x896xf32>
    %c1_60 = arith.constant 1 : index
    %c5_61 = arith.constant 5 : index
    %118 = memref.load %arg4[%c1_60, %c5_61] : memref<4x9xf32, #tpu.memory_space<smem>>
    %119 = vector.broadcast %118 : f32 to vector<2x896xf32>
    %120 = arith.mulf %119, %113 : vector<2x896xf32>
    %121 = arith.addf %100, %120 : vector<2x896xf32>
    %c2_62 = arith.constant 2 : index
    %c5_63 = arith.constant 5 : index
    %122 = memref.load %arg4[%c2_62, %c5_63] : memref<4x9xf32, #tpu.memory_space<smem>>
    %123 = vector.broadcast %122 : f32 to vector<2x896xf32>
    %124 = arith.mulf %123, %113 : vector<2x896xf32>
    %125 = arith.addf %104, %124 : vector<2x896xf32>
    %c3_64 = arith.constant 3 : index
    %c5_65 = arith.constant 5 : index
    %126 = memref.load %arg4[%c3_64, %c5_65] : memref<4x9xf32, #tpu.memory_space<smem>>
    %127 = vector.broadcast %126 : f32 to vector<2x896xf32>
    %128 = arith.mulf %127, %113 : vector<2x896xf32>
    %129 = arith.addf %108, %128 : vector<2x896xf32>
    %c869_i32 = arith.constant 869 : i32
    %130 = tpu.dynamic_rotate %8 by %c869_i32 dim 1 : vector<2x896xf32>, i32 -> vector<2x896xf32>
    %c6 = arith.constant 6 : index
    %c0_66 = arith.constant 0 : index
    %c0_67 = arith.constant 0 : index
    %131 = vector.load %arg8[%c6, %c0_66, %c0_67] : memref<9x1x896xf32, #tpu.memory_space<vmem>>, vector<1x1x896xf32>
    %132 = vector.shape_cast %131 : vector<1x1x896xf32> to vector<1x896xf32>
    %133 = vector.broadcast %132 : vector<1x896xf32> to vector<2x896xf32>
    %134 = arith.mulf %130, %133 : vector<2x896xf32>
    %c0_68 = arith.constant 0 : index
    %c6_69 = arith.constant 6 : index
    %135 = memref.load %arg4[%c0_68, %c6_69] : memref<4x9xf32, #tpu.memory_space<smem>>
    %136 = vector.broadcast %135 : f32 to vector<2x896xf32>
    %137 = arith.mulf %136, %134 : vector<2x896xf32>
    %138 = arith.addf %117, %137 : vector<2x896xf32>
    %c1_70 = arith.constant 1 : index
    %c6_71 = arith.constant 6 : index
    %139 = memref.load %arg4[%c1_70, %c6_71] : memref<4x9xf32, #tpu.memory_space<smem>>
    %140 = vector.broadcast %139 : f32 to vector<2x896xf32>
    %141 = arith.mulf %140, %134 : vector<2x896xf32>
    %142 = arith.addf %121, %141 : vector<2x896xf32>
    %c2_72 = arith.constant 2 : index
    %c6_73 = arith.constant 6 : index
    %143 = memref.load %arg4[%c2_72, %c6_73] : memref<4x9xf32, #tpu.memory_space<smem>>
    %144 = vector.broadcast %143 : f32 to vector<2x896xf32>
    %145 = arith.mulf %144, %134 : vector<2x896xf32>
    %146 = arith.addf %125, %145 : vector<2x896xf32>
    %c3_74 = arith.constant 3 : index
    %c6_75 = arith.constant 6 : index
    %147 = memref.load %arg4[%c3_74, %c6_75] : memref<4x9xf32, #tpu.memory_space<smem>>
    %148 = vector.broadcast %147 : f32 to vector<2x896xf32>
    %149 = arith.mulf %148, %134 : vector<2x896xf32>
    %150 = arith.addf %129, %149 : vector<2x896xf32>
    %c868_i32 = arith.constant 868 : i32
    %151 = tpu.dynamic_rotate %8 by %c868_i32 dim 1 : vector<2x896xf32>, i32 -> vector<2x896xf32>
    %c7 = arith.constant 7 : index
    %c0_76 = arith.constant 0 : index
    %c0_77 = arith.constant 0 : index
    %152 = vector.load %arg8[%c7, %c0_76, %c0_77] : memref<9x1x896xf32, #tpu.memory_space<vmem>>, vector<1x1x896xf32>
    %153 = vector.shape_cast %152 : vector<1x1x896xf32> to vector<1x896xf32>
    %154 = vector.broadcast %153 : vector<1x896xf32> to vector<2x896xf32>
    %155 = arith.mulf %151, %154 : vector<2x896xf32>
    %c0_78 = arith.constant 0 : index
    %c7_79 = arith.constant 7 : index
    %156 = memref.load %arg4[%c0_78, %c7_79] : memref<4x9xf32, #tpu.memory_space<smem>>
    %157 = vector.broadcast %156 : f32 to vector<2x896xf32>
    %158 = arith.mulf %157, %155 : vector<2x896xf32>
    %159 = arith.addf %138, %158 : vector<2x896xf32>
    %c1_80 = arith.constant 1 : index
    %c7_81 = arith.constant 7 : index
    %160 = memref.load %arg4[%c1_80, %c7_81] : memref<4x9xf32, #tpu.memory_space<smem>>
    %161 = vector.broadcast %160 : f32 to vector<2x896xf32>
    %162 = arith.mulf %161, %155 : vector<2x896xf32>
    %163 = arith.addf %142, %162 : vector<2x896xf32>
    %c2_82 = arith.constant 2 : index
    %c7_83 = arith.constant 7 : index
    %164 = memref.load %arg4[%c2_82, %c7_83] : memref<4x9xf32, #tpu.memory_space<smem>>
    %165 = vector.broadcast %164 : f32 to vector<2x896xf32>
    %166 = arith.mulf %165, %155 : vector<2x896xf32>
    %167 = arith.addf %146, %166 : vector<2x896xf32>
    %c3_84 = arith.constant 3 : index
    %c7_85 = arith.constant 7 : index
    %168 = memref.load %arg4[%c3_84, %c7_85] : memref<4x9xf32, #tpu.memory_space<smem>>
    %169 = vector.broadcast %168 : f32 to vector<2x896xf32>
    %170 = arith.mulf %169, %155 : vector<2x896xf32>
    %171 = arith.addf %150, %170 : vector<2x896xf32>
    %c867_i32 = arith.constant 867 : i32
    %172 = tpu.dynamic_rotate %8 by %c867_i32 dim 1 : vector<2x896xf32>, i32 -> vector<2x896xf32>
    %c8 = arith.constant 8 : index
    %c0_86 = arith.constant 0 : index
    %c0_87 = arith.constant 0 : index
    %173 = vector.load %arg8[%c8, %c0_86, %c0_87] : memref<9x1x896xf32, #tpu.memory_space<vmem>>, vector<1x1x896xf32>
    %174 = vector.shape_cast %173 : vector<1x1x896xf32> to vector<1x896xf32>
    %175 = vector.broadcast %174 : vector<1x896xf32> to vector<2x896xf32>
    %176 = arith.mulf %172, %175 : vector<2x896xf32>
    %c0_88 = arith.constant 0 : index
    %c8_89 = arith.constant 8 : index
    %177 = memref.load %arg4[%c0_88, %c8_89] : memref<4x9xf32, #tpu.memory_space<smem>>
    %178 = vector.broadcast %177 : f32 to vector<2x896xf32>
    %179 = arith.mulf %178, %176 : vector<2x896xf32>
    %180 = arith.addf %159, %179 : vector<2x896xf32>
    %c1_90 = arith.constant 1 : index
    %c8_91 = arith.constant 8 : index
    %181 = memref.load %arg4[%c1_90, %c8_91] : memref<4x9xf32, #tpu.memory_space<smem>>
    %182 = vector.broadcast %181 : f32 to vector<2x896xf32>
    %183 = arith.mulf %182, %176 : vector<2x896xf32>
    %184 = arith.addf %163, %183 : vector<2x896xf32>
    %c2_92 = arith.constant 2 : index
    %c8_93 = arith.constant 8 : index
    %185 = memref.load %arg4[%c2_92, %c8_93] : memref<4x9xf32, #tpu.memory_space<smem>>
    %186 = vector.broadcast %185 : f32 to vector<2x896xf32>
    %187 = arith.mulf %186, %176 : vector<2x896xf32>
    %188 = arith.addf %167, %187 : vector<2x896xf32>
    %c3_94 = arith.constant 3 : index
    %c8_95 = arith.constant 8 : index
    %189 = memref.load %arg4[%c3_94, %c8_95] : memref<4x9xf32, #tpu.memory_space<smem>>
    %190 = vector.broadcast %189 : f32 to vector<2x896xf32>
    %191 = arith.mulf %190, %176 : vector<2x896xf32>
    %192 = arith.addf %171, %191 : vector<2x896xf32>
    %c0_96 = arith.constant 0 : index
    %c0_97 = arith.constant 0 : index
    %193 = memref.load %arg5[%c0_96, %c0_97] : memref<1x4xf32, #tpu.memory_space<smem>>
    %194 = vector.broadcast %193 : f32 to vector<2x896xf32>
    %195 = arith.addf %180, %194 : vector<2x896xf32>
    %c0_98 = arith.constant 0 : index
    %c1_99 = arith.constant 1 : index
    %196 = memref.load %arg5[%c0_98, %c1_99] : memref<1x4xf32, #tpu.memory_space<smem>>
    %197 = vector.broadcast %196 : f32 to vector<2x896xf32>
    %198 = arith.addf %184, %197 : vector<2x896xf32>
    %c0_100 = arith.constant 0 : index
    %c2_101 = arith.constant 2 : index
    %199 = memref.load %arg5[%c0_100, %c2_101] : memref<1x4xf32, #tpu.memory_space<smem>>
    %200 = vector.broadcast %199 : f32 to vector<2x896xf32>
    %201 = arith.addf %188, %200 : vector<2x896xf32>
    %c0_102 = arith.constant 0 : index
    %c3_103 = arith.constant 3 : index
    %202 = memref.load %arg5[%c0_102, %c3_103] : memref<1x4xf32, #tpu.memory_space<smem>>
    %203 = vector.broadcast %202 : f32 to vector<2x896xf32>
    %204 = arith.addf %192, %203 : vector<2x896xf32>
    %c0_104 = arith.constant 0 : index
    %c0_105 = arith.constant 0 : index
    %c0_106 = arith.constant 0 : index
    %205 = vector.load %arg16[%c0_104, %c0_105, %c0_106] : memref<4x2x896xf32, #tpu.memory_space<vmem>>, vector<1x2x896xf32>
    %206 = vector.shape_cast %205 : vector<1x2x896xf32> to vector<2x896xf32>
    %cst = arith.constant 5.000000e-01 : f32
    %207 = vector.broadcast %cst : f32 to vector<2x896xf32>
    %208 = arith.cmpf ogt, %206, %207 : vector<2x896xf32>
    %209 = arith.extui %208 : vector<2x896xi1> to vector<2x896xi32>
    %210 = arith.sitofp %209 : vector<2x896xi32> to vector<2x896xf32>
    %cst_107 = arith.constant 2.000000e-01 : f32
    %211 = vector.broadcast %cst_107 : f32 to vector<2x896xf32>
    %212 = arith.mulf %206, %211 : vector<2x896xf32>
    %cst_108 = arith.constant 1.000000e+00 : f32
    %213 = vector.broadcast %cst_108 : f32 to vector<2x896xf32>
    %214 = arith.subf %213, %210 : vector<2x896xf32>
    %215 = arith.mulf %212, %214 : vector<2x896xf32>
    %216 = arith.addf %215, %195 : vector<2x896xf32>
    %c0_109 = arith.constant 0 : index
    %c0_110 = arith.constant 0 : index
    %c0_111 = arith.constant 0 : index
    %217 = vector.load %arg16[%c0_109, %c0_110, %c0_111] : memref<4x2x896xf32, #tpu.memory_space<vmem>>, vector<1x2x896xf32>
    %218 = vector.shape_cast %217 : vector<1x2x896xf32> to vector<2x896xf32>
    %219 = vector.shape_cast %216 : vector<2x896xf32> to vector<1x2x896xf32>
    tpu.vector_store %arg16[%c0_109, %c0_110, %c0_111], %219 {strides = array<i32>} : memref<4x2x896xf32, #tpu.memory_space<vmem>>, vector<1x2x896xf32>,
    %cst_112 = arith.constant 5.000000e-01 : f32
    %220 = vector.broadcast %cst_112 : f32 to vector<2x896xf32>
    %221 = arith.cmpf ogt, %216, %220 : vector<2x896xf32>
    %222 = arith.extui %221 : vector<2x896xi1> to vector<2x896xi32>
    %223 = arith.sitofp %222 : vector<2x896xi32> to vector<2x896xf32>
    %c1_113 = arith.constant 1 : index
    %c0_114 = arith.constant 0 : index
    %c0_115 = arith.constant 0 : index
    %224 = vector.load %arg16[%c1_113, %c0_114, %c0_115] : memref<4x2x896xf32, #tpu.memory_space<vmem>>, vector<1x2x896xf32>
    %225 = vector.shape_cast %224 : vector<1x2x896xf32> to vector<2x896xf32>
    %cst_116 = arith.constant 5.000000e-01 : f32
    %226 = vector.broadcast %cst_116 : f32 to vector<2x896xf32>
    %227 = arith.cmpf ogt, %225, %226 : vector<2x896xf32>
    %228 = arith.extui %227 : vector<2x896xi1> to vector<2x896xi32>
    %229 = arith.sitofp %228 : vector<2x896xi32> to vector<2x896xf32>
    %cst_117 = arith.constant 2.000000e-01 : f32
    %230 = vector.broadcast %cst_117 : f32 to vector<2x896xf32>
    %231 = arith.mulf %225, %230 : vector<2x896xf32>
    %cst_118 = arith.constant 1.000000e+00 : f32
    %232 = vector.broadcast %cst_118 : f32 to vector<2x896xf32>
    %233 = arith.subf %232, %229 : vector<2x896xf32>
    %234 = arith.mulf %231, %233 : vector<2x896xf32>
    %235 = arith.addf %234, %198 : vector<2x896xf32>
    %c1_119 = arith.constant 1 : index
    %c0_120 = arith.constant 0 : index
    %c0_121 = arith.constant 0 : index
    %236 = vector.load %arg16[%c1_119, %c0_120, %c0_121] : memref<4x2x896xf32, #tpu.memory_space<vmem>>, vector<1x2x896xf32>
    %237 = vector.shape_cast %236 : vector<1x2x896xf32> to vector<2x896xf32>
    %238 = vector.shape_cast %235 : vector<2x896xf32> to vector<1x2x896xf32>
    tpu.vector_store %arg16[%c1_119, %c0_120, %c0_121], %238 {strides = array<i32>} : memref<4x2x896xf32, #tpu.memory_space<vmem>>, vector<1x2x896xf32>,
    %cst_122 = arith.constant 5.000000e-01 : f32
    %239 = vector.broadcast %cst_122 : f32 to vector<2x896xf32>
    %240 = arith.cmpf ogt, %235, %239 : vector<2x896xf32>
    %241 = arith.extui %240 : vector<2x896xi1> to vector<2x896xi32>
    %242 = arith.sitofp %241 : vector<2x896xi32> to vector<2x896xf32>
    %c2_123 = arith.constant 2 : index
    %c0_124 = arith.constant 0 : index
    %c0_125 = arith.constant 0 : index
    %243 = vector.load %arg16[%c2_123, %c0_124, %c0_125] : memref<4x2x896xf32, #tpu.memory_space<vmem>>, vector<1x2x896xf32>
    %244 = vector.shape_cast %243 : vector<1x2x896xf32> to vector<2x896xf32>
    %cst_126 = arith.constant 5.000000e-01 : f32
    %245 = vector.broadcast %cst_126 : f32 to vector<2x896xf32>
    %246 = arith.cmpf ogt, %244, %245 : vector<2x896xf32>
    %247 = arith.extui %246 : vector<2x896xi1> to vector<2x896xi32>
    %248 = arith.sitofp %247 : vector<2x896xi32> to vector<2x896xf32>
    %cst_127 = arith.constant 2.000000e-01 : f32
    %249 = vector.broadcast %cst_127 : f32 to vector<2x896xf32>
    %250 = arith.mulf %244, %249 : vector<2x896xf32>
    %cst_128 = arith.constant 1.000000e+00 : f32
    %251 = vector.broadcast %cst_128 : f32 to vector<2x896xf32>
    %252 = arith.subf %251, %248 : vector<2x896xf32>
    %253 = arith.mulf %250, %252 : vector<2x896xf32>
    %254 = arith.addf %253, %201 : vector<2x896xf32>
    %c2_129 = arith.constant 2 : index
    %c0_130 = arith.constant 0 : index
    %c0_131 = arith.constant 0 : index
    %255 = vector.load %arg16[%c2_129, %c0_130, %c0_131] : memref<4x2x896xf32, #tpu.memory_space<vmem>>, vector<1x2x896xf32>
    %256 = vector.shape_cast %255 : vector<1x2x896xf32> to vector<2x896xf32>
    %257 = vector.shape_cast %254 : vector<2x896xf32> to vector<1x2x896xf32>
    tpu.vector_store %arg16[%c2_129, %c0_130, %c0_131], %257 {strides = array<i32>} : memref<4x2x896xf32, #tpu.memory_space<vmem>>, vector<1x2x896xf32>,
    %cst_132 = arith.constant 5.000000e-01 : f32
    %258 = vector.broadcast %cst_132 : f32 to vector<2x896xf32>
    %259 = arith.cmpf ogt, %254, %258 : vector<2x896xf32>
    %260 = arith.extui %259 : vector<2x896xi1> to vector<2x896xi32>
    %261 = arith.sitofp %260 : vector<2x896xi32> to vector<2x896xf32>
    %c3_133 = arith.constant 3 : index
    %c0_134 = arith.constant 0 : index
    %c0_135 = arith.constant 0 : index
    %262 = vector.load %arg16[%c3_133, %c0_134, %c0_135] : memref<4x2x896xf32, #tpu.memory_space<vmem>>, vector<1x2x896xf32>
    %263 = vector.shape_cast %262 : vector<1x2x896xf32> to vector<2x896xf32>
    %cst_136 = arith.constant 5.000000e-01 : f32
    %264 = vector.broadcast %cst_136 : f32 to vector<2x896xf32>
    %265 = arith.cmpf ogt, %263, %264 : vector<2x896xf32>
    %266 = arith.extui %265 : vector<2x896xi1> to vector<2x896xi32>
    %267 = arith.sitofp %266 : vector<2x896xi32> to vector<2x896xf32>
    %cst_137 = arith.constant 2.000000e-01 : f32
    %268 = vector.broadcast %cst_137 : f32 to vector<2x896xf32>
    %269 = arith.mulf %263, %268 : vector<2x896xf32>
    %cst_138 = arith.constant 1.000000e+00 : f32
    %270 = vector.broadcast %cst_138 : f32 to vector<2x896xf32>
    %271 = arith.subf %270, %267 : vector<2x896xf32>
    %272 = arith.mulf %269, %271 : vector<2x896xf32>
    %273 = arith.addf %272, %204 : vector<2x896xf32>
    %c3_139 = arith.constant 3 : index
    %c0_140 = arith.constant 0 : index
    %c0_141 = arith.constant 0 : index
    %274 = vector.load %arg16[%c3_139, %c0_140, %c0_141] : memref<4x2x896xf32, #tpu.memory_space<vmem>>, vector<1x2x896xf32>
    %275 = vector.shape_cast %274 : vector<1x2x896xf32> to vector<2x896xf32>
    %276 = vector.shape_cast %273 : vector<2x896xf32> to vector<1x2x896xf32>
    tpu.vector_store %arg16[%c3_139, %c0_140, %c0_141], %276 {strides = array<i32>} : memref<4x2x896xf32, #tpu.memory_space<vmem>>, vector<1x2x896xf32>,
    %cst_142 = arith.constant 5.000000e-01 : f32
    %277 = vector.broadcast %cst_142 : f32 to vector<2x896xf32>
    %278 = arith.cmpf ogt, %273, %277 : vector<2x896xf32>
    %279 = arith.extui %278 : vector<2x896xi1> to vector<2x896xi32>
    %280 = arith.sitofp %279 : vector<2x896xi32> to vector<2x896xf32>
    %c0_143 = arith.constant 0 : index
    %c0_144 = arith.constant 0 : index
    %281 = vector.load %arg10[%c0_143, %c0_144] : memref<896x256xf32, #tpu.memory_space<vmem>>, vector<896x256xf32>
    %cst_145 = arith.constant dense<0.000000e+00> : vector<2x256xf32>
    %282 = tpu.matmul %223, %281, %cst_145 {dimension_numbers = #tpu.dot_dimension_numbers<[1], [0], [0], [1], [0, 0, 1, 1], [], []>} : vector<2x896xf32>, vector<896x256xf32>, vector<2x256xf32> -> vector<2x256xf32>
    %cst_146 = arith.constant dense<0.000000e+00> : vector<2x256xf32>
    %283 = tpu.matmul %242, %281, %cst_146 {dimension_numbers = #tpu.dot_dimension_numbers<[1], [0], [0], [1], [0, 0, 1, 1], [], []>} : vector<2x896xf32>, vector<896x256xf32>, vector<2x256xf32> -> vector<2x256xf32>
    %cst_147 = arith.constant dense<0.000000e+00> : vector<2x256xf32>
    %284 = tpu.matmul %261, %281, %cst_147 {dimension_numbers = #tpu.dot_dimension_numbers<[1], [0], [0], [1], [0, 0, 1, 1], [], []>} : vector<2x896xf32>, vector<896x256xf32>, vector<2x256xf32> -> vector<2x256xf32>
    %cst_148 = arith.constant dense<0.000000e+00> : vector<2x256xf32>
    %285 = tpu.matmul %280, %281, %cst_148 {dimension_numbers = #tpu.dot_dimension_numbers<[1], [0], [0], [1], [0, 0, 1, 1], [], []>} : vector<2x896xf32>, vector<896x256xf32>, vector<2x256xf32> -> vector<2x256xf32>
    %c15_i32 = arith.constant 15 : i32
    %286 = tpu.dynamic_rotate %282 by %c15_i32 dim 1 : vector<2x256xf32>, i32 -> vector<2x256xf32>
    %c0_149 = arith.constant 0 : index
    %c0_150 = arith.constant 0 : index
    %c0_151 = arith.constant 0 : index
    %287 = vector.load %arg9[%c0_149, %c0_150, %c0_151] : memref<9x1x256xf32, #tpu.memory_space<vmem>>, vector<1x1x256xf32>
    %288 = vector.shape_cast %287 : vector<1x1x256xf32> to vector<1x256xf32>
    %289 = vector.broadcast %288 : vector<1x256xf32> to vector<2x256xf32>
    %290 = arith.mulf %286, %289 : vector<2x256xf32>
    %c0_152 = arith.constant 0 : index
    %c0_153 = arith.constant 0 : index
    %291 = memref.load %arg6[%c0_152, %c0_153] : memref<4x36xf32, #tpu.memory_space<smem>>
    %292 = vector.broadcast %291 : f32 to vector<2x256xf32>
    %293 = arith.mulf %292, %290 : vector<2x256xf32>
    %c1_154 = arith.constant 1 : index
    %c0_155 = arith.constant 0 : index
    %294 = memref.load %arg6[%c1_154, %c0_155] : memref<4x36xf32, #tpu.memory_space<smem>>
    %295 = vector.broadcast %294 : f32 to vector<2x256xf32>
    %296 = arith.mulf %295, %290 : vector<2x256xf32>
    %c2_156 = arith.constant 2 : index
    %c0_157 = arith.constant 0 : index
    %297 = memref.load %arg6[%c2_156, %c0_157] : memref<4x36xf32, #tpu.memory_space<smem>>
    %298 = vector.broadcast %297 : f32 to vector<2x256xf32>
    %299 = arith.mulf %298, %290 : vector<2x256xf32>
    %c3_158 = arith.constant 3 : index
    %c0_159 = arith.constant 0 : index
    %300 = memref.load %arg6[%c3_158, %c0_159] : memref<4x36xf32, #tpu.memory_space<smem>>
    %301 = vector.broadcast %300 : f32 to vector<2x256xf32>
    %302 = arith.mulf %301, %290 : vector<2x256xf32>
    %c14_i32 = arith.constant 14 : i32
    %303 = tpu.dynamic_rotate %282 by %c14_i32 dim 1 : vector<2x256xf32>, i32 -> vector<2x256xf32>
    %c1_160 = arith.constant 1 : index
    %c0_161 = arith.constant 0 : index
    %c0_162 = arith.constant 0 : index
    %304 = vector.load %arg9[%c1_160, %c0_161, %c0_162] : memref<9x1x256xf32, #tpu.memory_space<vmem>>, vector<1x1x256xf32>
    %305 = vector.shape_cast %304 : vector<1x1x256xf32> to vector<1x256xf32>
    %306 = vector.broadcast %305 : vector<1x256xf32> to vector<2x256xf32>
    %307 = arith.mulf %303, %306 : vector<2x256xf32>
    %c0_163 = arith.constant 0 : index
    %c1_164 = arith.constant 1 : index
    %308 = memref.load %arg6[%c0_163, %c1_164] : memref<4x36xf32, #tpu.memory_space<smem>>
    %309 = vector.broadcast %308 : f32 to vector<2x256xf32>
    %310 = arith.mulf %309, %307 : vector<2x256xf32>
    %311 = arith.addf %293, %310 : vector<2x256xf32>
    %c1_165 = arith.constant 1 : index
    %c1_166 = arith.constant 1 : index
    %312 = memref.load %arg6[%c1_165, %c1_166] : memref<4x36xf32, #tpu.memory_space<smem>>
    %313 = vector.broadcast %312 : f32 to vector<2x256xf32>
    %314 = arith.mulf %313, %307 : vector<2x256xf32>
    %315 = arith.addf %296, %314 : vector<2x256xf32>
    %c2_167 = arith.constant 2 : index
    %c1_168 = arith.constant 1 : index
    %316 = memref.load %arg6[%c2_167, %c1_168] : memref<4x36xf32, #tpu.memory_space<smem>>
    %317 = vector.broadcast %316 : f32 to vector<2x256xf32>
    %318 = arith.mulf %317, %307 : vector<2x256xf32>
    %319 = arith.addf %299, %318 : vector<2x256xf32>
    %c3_169 = arith.constant 3 : index
    %c1_170 = arith.constant 1 : index
    %320 = memref.load %arg6[%c3_169, %c1_170] : memref<4x36xf32, #tpu.memory_space<smem>>
    %321 = vector.broadcast %320 : f32 to vector<2x256xf32>
    %322 = arith.mulf %321, %307 : vector<2x256xf32>
    %323 = arith.addf %302, %322 : vector<2x256xf32>
    %c13_i32 = arith.constant 13 : i32
    %324 = tpu.dynamic_rotate %282 by %c13_i32 dim 1 : vector<2x256xf32>, i32 -> vector<2x256xf32>
    %c2_171 = arith.constant 2 : index
    %c0_172 = arith.constant 0 : index
    %c0_173 = arith.constant 0 : index
    %325 = vector.load %arg9[%c2_171, %c0_172, %c0_173] : memref<9x1x256xf32, #tpu.memory_space<vmem>>, vector<1x1x256xf32>
    %326 = vector.shape_cast %325 : vector<1x1x256xf32> to vector<1x256xf32>
    %327 = vector.broadcast %326 : vector<1x256xf32> to vector<2x256xf32>
    %328 = arith.mulf %324, %327 : vector<2x256xf32>
    %c0_174 = arith.constant 0 : index
    %c2_175 = arith.constant 2 : index
    %329 = memref.load %arg6[%c0_174, %c2_175] : memref<4x36xf32, #tpu.memory_space<smem>>
    %330 = vector.broadcast %329 : f32 to vector<2x256xf32>
    %331 = arith.mulf %330, %328 : vector<2x256xf32>
    %332 = arith.addf %311, %331 : vector<2x256xf32>
    %c1_176 = arith.constant 1 : index
    %c2_177 = arith.constant 2 : index
    %333 = memref.load %arg6[%c1_176, %c2_177] : memref<4x36xf32, #tpu.memory_space<smem>>
    %334 = vector.broadcast %333 : f32 to vector<2x256xf32>
    %335 = arith.mulf %334, %328 : vector<2x256xf32>
    %336 = arith.addf %315, %335 : vector<2x256xf32>
    %c2_178 = arith.constant 2 : index
    %c2_179 = arith.constant 2 : index
    %337 = memref.load %arg6[%c2_178, %c2_179] : memref<4x36xf32, #tpu.memory_space<smem>>
    %338 = vector.broadcast %337 : f32 to vector<2x256xf32>
    %339 = arith.mulf %338, %328 : vector<2x256xf32>
    %340 = arith.addf %319, %339 : vector<2x256xf32>
    %c3_180 = arith.constant 3 : index
    %c2_181 = arith.constant 2 : index
    %341 = memref.load %arg6[%c3_180, %c2_181] : memref<4x36xf32, #tpu.memory_space<smem>>
    %342 = vector.broadcast %341 : f32 to vector<2x256xf32>
    %343 = arith.mulf %342, %328 : vector<2x256xf32>
    %344 = arith.addf %323, %343 : vector<2x256xf32>
    %c1_i32_182 = arith.constant 1 : i32
    %345 = tpu.dynamic_rotate %282 by %c1_i32_182 dim 1 : vector<2x256xf32>, i32 -> vector<2x256xf32>
    %c3_183 = arith.constant 3 : index
    %c0_184 = arith.constant 0 : index
    %c0_185 = arith.constant 0 : index
    %346 = vector.load %arg9[%c3_183, %c0_184, %c0_185] : memref<9x1x256xf32, #tpu.memory_space<vmem>>, vector<1x1x256xf32>
    %347 = vector.shape_cast %346 : vector<1x1x256xf32> to vector<1x256xf32>
    %348 = vector.broadcast %347 : vector<1x256xf32> to vector<2x256xf32>
    %349 = arith.mulf %345, %348 : vector<2x256xf32>
    %c0_186 = arith.constant 0 : index
    %c3_187 = arith.constant 3 : index
    %350 = memref.load %arg6[%c0_186, %c3_187] : memref<4x36xf32, #tpu.memory_space<smem>>
    %351 = vector.broadcast %350 : f32 to vector<2x256xf32>
    %352 = arith.mulf %351, %349 : vector<2x256xf32>
    %353 = arith.addf %332, %352 : vector<2x256xf32>
    %c1_188 = arith.constant 1 : index
    %c3_189 = arith.constant 3 : index
    %354 = memref.load %arg6[%c1_188, %c3_189] : memref<4x36xf32, #tpu.memory_space<smem>>
    %355 = vector.broadcast %354 : f32 to vector<2x256xf32>
    %356 = arith.mulf %355, %349 : vector<2x256xf32>
    %357 = arith.addf %336, %356 : vector<2x256xf32>
    %c2_190 = arith.constant 2 : index
    %c3_191 = arith.constant 3 : index
    %358 = memref.load %arg6[%c2_190, %c3_191] : memref<4x36xf32, #tpu.memory_space<smem>>
    %359 = vector.broadcast %358 : f32 to vector<2x256xf32>
    %360 = arith.mulf %359, %349 : vector<2x256xf32>
    %361 = arith.addf %340, %360 : vector<2x256xf32>
    %c3_192 = arith.constant 3 : index
    %c3_193 = arith.constant 3 : index
    %362 = memref.load %arg6[%c3_192, %c3_193] : memref<4x36xf32, #tpu.memory_space<smem>>
    %363 = vector.broadcast %362 : f32 to vector<2x256xf32>
    %364 = arith.mulf %363, %349 : vector<2x256xf32>
    %365 = arith.addf %344, %364 : vector<2x256xf32>
    %c4_194 = arith.constant 4 : index
    %c0_195 = arith.constant 0 : index
    %c0_196 = arith.constant 0 : index
    %366 = vector.load %arg9[%c4_194, %c0_195, %c0_196] : memref<9x1x256xf32, #tpu.memory_space<vmem>>, vector<1x1x256xf32>
    %367 = vector.shape_cast %366 : vector<1x1x256xf32> to vector<1x256xf32>
    %368 = vector.broadcast %367 : vector<1x256xf32> to vector<2x256xf32>
    %369 = arith.mulf %282, %368 : vector<2x256xf32>
    %c0_197 = arith.constant 0 : index
    %c4_198 = arith.constant 4 : index
    %370 = memref.load %arg6[%c0_197, %c4_198] : memref<4x36xf32, #tpu.memory_space<smem>>
    %371 = vector.broadcast %370 : f32 to vector<2x256xf32>
    %372 = arith.mulf %371, %369 : vector<2x256xf32>
    %373 = arith.addf %353, %372 : vector<2x256xf32>
    %c1_199 = arith.constant 1 : index
    %c4_200 = arith.constant 4 : index
    %374 = memref.load %arg6[%c1_199, %c4_200] : memref<4x36xf32, #tpu.memory_space<smem>>
    %375 = vector.broadcast %374 : f32 to vector<2x256xf32>
    %376 = arith.mulf %375, %369 : vector<2x256xf32>
    %377 = arith.addf %357, %376 : vector<2x256xf32>
    %c2_201 = arith.constant 2 : index
    %c4_202 = arith.constant 4 : index
    %378 = memref.load %arg6[%c2_201, %c4_202] : memref<4x36xf32, #tpu.memory_space<smem>>
    %379 = vector.broadcast %378 : f32 to vector<2x256xf32>
    %380 = arith.mulf %379, %369 : vector<2x256xf32>
    %381 = arith.addf %361, %380 : vector<2x256xf32>
    %c3_203 = arith.constant 3 : index
    %c4_204 = arith.constant 4 : index
    %382 = memref.load %arg6[%c3_203, %c4_204] : memref<4x36xf32, #tpu.memory_space<smem>>
    %383 = vector.broadcast %382 : f32 to vector<2x256xf32>
    %384 = arith.mulf %383, %369 : vector<2x256xf32>
    %385 = arith.addf %365, %384 : vector<2x256xf32>
    %c255_i32 = arith.constant 255 : i32
    %386 = tpu.dynamic_rotate %282 by %c255_i32 dim 1 : vector<2x256xf32>, i32 -> vector<2x256xf32>
    %c5_205 = arith.constant 5 : index
    %c0_206 = arith.constant 0 : index
    %c0_207 = arith.constant 0 : index
    %387 = vector.load %arg9[%c5_205, %c0_206, %c0_207] : memref<9x1x256xf32, #tpu.memory_space<vmem>>, vector<1x1x256xf32>
    %388 = vector.shape_cast %387 : vector<1x1x256xf32> to vector<1x256xf32>
    %389 = vector.broadcast %388 : vector<1x256xf32> to vector<2x256xf32>
    %390 = arith.mulf %386, %389 : vector<2x256xf32>
    %c0_208 = arith.constant 0 : index
    %c5_209 = arith.constant 5 : index
    %391 = memref.load %arg6[%c0_208, %c5_209] : memref<4x36xf32, #tpu.memory_space<smem>>
    %392 = vector.broadcast %391 : f32 to vector<2x256xf32>
    %393 = arith.mulf %392, %390 : vector<2x256xf32>
    %394 = arith.addf %373, %393 : vector<2x256xf32>
    %c1_210 = arith.constant 1 : index
    %c5_211 = arith.constant 5 : index
    %395 = memref.load %arg6[%c1_210, %c5_211] : memref<4x36xf32, #tpu.memory_space<smem>>
    %396 = vector.broadcast %395 : f32 to vector<2x256xf32>
    %397 = arith.mulf %396, %390 : vector<2x256xf32>
    %398 = arith.addf %377, %397 : vector<2x256xf32>
    %c2_212 = arith.constant 2 : index
    %c5_213 = arith.constant 5 : index
    %399 = memref.load %arg6[%c2_212, %c5_213] : memref<4x36xf32, #tpu.memory_space<smem>>
    %400 = vector.broadcast %399 : f32 to vector<2x256xf32>
    %401 = arith.mulf %400, %390 : vector<2x256xf32>
    %402 = arith.addf %381, %401 : vector<2x256xf32>
    %c3_214 = arith.constant 3 : index
    %c5_215 = arith.constant 5 : index
    %403 = memref.load %arg6[%c3_214, %c5_215] : memref<4x36xf32, #tpu.memory_space<smem>>
    %404 = vector.broadcast %403 : f32 to vector<2x256xf32>
    %405 = arith.mulf %404, %390 : vector<2x256xf32>
    %406 = arith.addf %385, %405 : vector<2x256xf32>
    %c243_i32 = arith.constant 243 : i32
    %407 = tpu.dynamic_rotate %282 by %c243_i32 dim 1 : vector<2x256xf32>, i32 -> vector<2x256xf32>
    %c6_216 = arith.constant 6 : index
    %c0_217 = arith.constant 0 : index
    %c0_218 = arith.constant 0 : index
    %408 = vector.load %arg9[%c6_216, %c0_217, %c0_218] : memref<9x1x256xf32, #tpu.memory_space<vmem>>, vector<1x1x256xf32>
    %409 = vector.shape_cast %408 : vector<1x1x256xf32> to vector<1x256xf32>
    %410 = vector.broadcast %409 : vector<1x256xf32> to vector<2x256xf32>
    %411 = arith.mulf %407, %410 : vector<2x256xf32>
    %c0_219 = arith.constant 0 : index
    %c6_220 = arith.constant 6 : index
    %412 = memref.load %arg6[%c0_219, %c6_220] : memref<4x36xf32, #tpu.memory_space<smem>>
    %413 = vector.broadcast %412 : f32 to vector<2x256xf32>
    %414 = arith.mulf %413, %411 : vector<2x256xf32>
    %415 = arith.addf %394, %414 : vector<2x256xf32>
    %c1_221 = arith.constant 1 : index
    %c6_222 = arith.constant 6 : index
    %416 = memref.load %arg6[%c1_221, %c6_222] : memref<4x36xf32, #tpu.memory_space<smem>>
    %417 = vector.broadcast %416 : f32 to vector<2x256xf32>
    %418 = arith.mulf %417, %411 : vector<2x256xf32>
    %419 = arith.addf %398, %418 : vector<2x256xf32>
    %c2_223 = arith.constant 2 : index
    %c6_224 = arith.constant 6 : index
    %420 = memref.load %arg6[%c2_223, %c6_224] : memref<4x36xf32, #tpu.memory_space<smem>>
    %421 = vector.broadcast %420 : f32 to vector<2x256xf32>
    %422 = arith.mulf %421, %411 : vector<2x256xf32>
    %423 = arith.addf %402, %422 : vector<2x256xf32>
    %c3_225 = arith.constant 3 : index
    %c6_226 = arith.constant 6 : index
    %424 = memref.load %arg6[%c3_225, %c6_226] : memref<4x36xf32, #tpu.memory_space<smem>>
    %425 = vector.broadcast %424 : f32 to vector<2x256xf32>
    %426 = arith.mulf %425, %411 : vector<2x256xf32>
    %427 = arith.addf %406, %426 : vector<2x256xf32>
    %c242_i32 = arith.constant 242 : i32
    %428 = tpu.dynamic_rotate %282 by %c242_i32 dim 1 : vector<2x256xf32>, i32 -> vector<2x256xf32>
    %c7_227 = arith.constant 7 : index
    %c0_228 = arith.constant 0 : index
    %c0_229 = arith.constant 0 : index
    %429 = vector.load %arg9[%c7_227, %c0_228, %c0_229] : memref<9x1x256xf32, #tpu.memory_space<vmem>>, vector<1x1x256xf32>
    %430 = vector.shape_cast %429 : vector<1x1x256xf32> to vector<1x256xf32>
    %431 = vector.broadcast %430 : vector<1x256xf32> to vector<2x256xf32>
    %432 = arith.mulf %428, %431 : vector<2x256xf32>
    %c0_230 = arith.constant 0 : index
    %c7_231 = arith.constant 7 : index
    %433 = memref.load %arg6[%c0_230, %c7_231] : memref<4x36xf32, #tpu.memory_space<smem>>
    %434 = vector.broadcast %433 : f32 to vector<2x256xf32>
    %435 = arith.mulf %434, %432 : vector<2x256xf32>
    %436 = arith.addf %415, %435 : vector<2x256xf32>
    %c1_232 = arith.constant 1 : index
    %c7_233 = arith.constant 7 : index
    %437 = memref.load %arg6[%c1_232, %c7_233] : memref<4x36xf32, #tpu.memory_space<smem>>
    %438 = vector.broadcast %437 : f32 to vector<2x256xf32>
    %439 = arith.mulf %438, %432 : vector<2x256xf32>
    %440 = arith.addf %419, %439 : vector<2x256xf32>
    %c2_234 = arith.constant 2 : index
    %c7_235 = arith.constant 7 : index
    %441 = memref.load %arg6[%c2_234, %c7_235] : memref<4x36xf32, #tpu.memory_space<smem>>
    %442 = vector.broadcast %441 : f32 to vector<2x256xf32>
    %443 = arith.mulf %442, %432 : vector<2x256xf32>
    %444 = arith.addf %423, %443 : vector<2x256xf32>
    %c3_236 = arith.constant 3 : index
    %c7_237 = arith.constant 7 : index
    %445 = memref.load %arg6[%c3_236, %c7_237] : memref<4x36xf32, #tpu.memory_space<smem>>
    %446 = vector.broadcast %445 : f32 to vector<2x256xf32>
    %447 = arith.mulf %446, %432 : vector<2x256xf32>
    %448 = arith.addf %427, %447 : vector<2x256xf32>
    %c241_i32 = arith.constant 241 : i32
    %449 = tpu.dynamic_rotate %282 by %c241_i32 dim 1 : vector<2x256xf32>, i32 -> vector<2x256xf32>
    %c8_238 = arith.constant 8 : index
    %c0_239 = arith.constant 0 : index
    %c0_240 = arith.constant 0 : index
    %450 = vector.load %arg9[%c8_238, %c0_239, %c0_240] : memref<9x1x256xf32, #tpu.memory_space<vmem>>, vector<1x1x256xf32>
    %451 = vector.shape_cast %450 : vector<1x1x256xf32> to vector<1x256xf32>
    %452 = vector.broadcast %451 : vector<1x256xf32> to vector<2x256xf32>
    %453 = arith.mulf %449, %452 : vector<2x256xf32>
    %c0_241 = arith.constant 0 : index
    %c8_242 = arith.constant 8 : index
    %454 = memref.load %arg6[%c0_241, %c8_242] : memref<4x36xf32, #tpu.memory_space<smem>>
    %455 = vector.broadcast %454 : f32 to vector<2x256xf32>
    %456 = arith.mulf %455, %453 : vector<2x256xf32>
    %457 = arith.addf %436, %456 : vector<2x256xf32>
    %c1_243 = arith.constant 1 : index
    %c8_244 = arith.constant 8 : index
    %458 = memref.load %arg6[%c1_243, %c8_244] : memref<4x36xf32, #tpu.memory_space<smem>>
    %459 = vector.broadcast %458 : f32 to vector<2x256xf32>
    %460 = arith.mulf %459, %453 : vector<2x256xf32>
    %461 = arith.addf %440, %460 : vector<2x256xf32>
    %c2_245 = arith.constant 2 : index
    %c8_246 = arith.constant 8 : index
    %462 = memref.load %arg6[%c2_245, %c8_246] : memref<4x36xf32, #tpu.memory_space<smem>>
    %463 = vector.broadcast %462 : f32 to vector<2x256xf32>
    %464 = arith.mulf %463, %453 : vector<2x256xf32>
    %465 = arith.addf %444, %464 : vector<2x256xf32>
    %c3_247 = arith.constant 3 : index
    %c8_248 = arith.constant 8 : index
    %466 = memref.load %arg6[%c3_247, %c8_248] : memref<4x36xf32, #tpu.memory_space<smem>>
    %467 = vector.broadcast %466 : f32 to vector<2x256xf32>
    %468 = arith.mulf %467, %453 : vector<2x256xf32>
    %469 = arith.addf %448, %468 : vector<2x256xf32>
    %c15_i32_249 = arith.constant 15 : i32
    %470 = tpu.dynamic_rotate %283 by %c15_i32_249 dim 1 : vector<2x256xf32>, i32 -> vector<2x256xf32>
    %c0_250 = arith.constant 0 : index
    %c0_251 = arith.constant 0 : index
    %c0_252 = arith.constant 0 : index
    %471 = vector.load %arg9[%c0_250, %c0_251, %c0_252] : memref<9x1x256xf32, #tpu.memory_space<vmem>>, vector<1x1x256xf32>
    %472 = vector.shape_cast %471 : vector<1x1x256xf32> to vector<1x256xf32>
    %473 = vector.broadcast %472 : vector<1x256xf32> to vector<2x256xf32>
    %474 = arith.mulf %470, %473 : vector<2x256xf32>
    %c0_253 = arith.constant 0 : index
    %c9 = arith.constant 9 : index
    %475 = memref.load %arg6[%c0_253, %c9] : memref<4x36xf32, #tpu.memory_space<smem>>
    %476 = vector.broadcast %475 : f32 to vector<2x256xf32>
    %477 = arith.mulf %476, %474 : vector<2x256xf32>
    %478 = arith.addf %457, %477 : vector<2x256xf32>
    %c1_254 = arith.constant 1 : index
    %c9_255 = arith.constant 9 : index
    %479 = memref.load %arg6[%c1_254, %c9_255] : memref<4x36xf32, #tpu.memory_space<smem>>
    %480 = vector.broadcast %479 : f32 to vector<2x256xf32>
    %481 = arith.mulf %480, %474 : vector<2x256xf32>
    %482 = arith.addf %461, %481 : vector<2x256xf32>
    %c2_256 = arith.constant 2 : index
    %c9_257 = arith.constant 9 : index
    %483 = memref.load %arg6[%c2_256, %c9_257] : memref<4x36xf32, #tpu.memory_space<smem>>
    %484 = vector.broadcast %483 : f32 to vector<2x256xf32>
    %485 = arith.mulf %484, %474 : vector<2x256xf32>
    %486 = arith.addf %465, %485 : vector<2x256xf32>
    %c3_258 = arith.constant 3 : index
    %c9_259 = arith.constant 9 : index
    %487 = memref.load %arg6[%c3_258, %c9_259] : memref<4x36xf32, #tpu.memory_space<smem>>
    %488 = vector.broadcast %487 : f32 to vector<2x256xf32>
    %489 = arith.mulf %488, %474 : vector<2x256xf32>
    %490 = arith.addf %469, %489 : vector<2x256xf32>
    %c14_i32_260 = arith.constant 14 : i32
    %491 = tpu.dynamic_rotate %283 by %c14_i32_260 dim 1 : vector<2x256xf32>, i32 -> vector<2x256xf32>
    %c1_261 = arith.constant 1 : index
    %c0_262 = arith.constant 0 : index
    %c0_263 = arith.constant 0 : index
    %492 = vector.load %arg9[%c1_261, %c0_262, %c0_263] : memref<9x1x256xf32, #tpu.memory_space<vmem>>, vector<1x1x256xf32>
    %493 = vector.shape_cast %492 : vector<1x1x256xf32> to vector<1x256xf32>
    %494 = vector.broadcast %493 : vector<1x256xf32> to vector<2x256xf32>
    %495 = arith.mulf %491, %494 : vector<2x256xf32>
    %c0_264 = arith.constant 0 : index
    %c10 = arith.constant 10 : index
    %496 = memref.load %arg6[%c0_264, %c10] : memref<4x36xf32, #tpu.memory_space<smem>>
    %497 = vector.broadcast %496 : f32 to vector<2x256xf32>
    %498 = arith.mulf %497, %495 : vector<2x256xf32>
    %499 = arith.addf %478, %498 : vector<2x256xf32>
    %c1_265 = arith.constant 1 : index
    %c10_266 = arith.constant 10 : index
    %500 = memref.load %arg6[%c1_265, %c10_266] : memref<4x36xf32, #tpu.memory_space<smem>>
    %501 = vector.broadcast %500 : f32 to vector<2x256xf32>
    %502 = arith.mulf %501, %495 : vector<2x256xf32>
    %503 = arith.addf %482, %502 : vector<2x256xf32>
    %c2_267 = arith.constant 2 : index
    %c10_268 = arith.constant 10 : index
    %504 = memref.load %arg6[%c2_267, %c10_268] : memref<4x36xf32, #tpu.memory_space<smem>>
    %505 = vector.broadcast %504 : f32 to vector<2x256xf32>
    %506 = arith.mulf %505, %495 : vector<2x256xf32>
    %507 = arith.addf %486, %506 : vector<2x256xf32>
    %c3_269 = arith.constant 3 : index
    %c10_270 = arith.constant 10 : index
    %508 = memref.load %arg6[%c3_269, %c10_270] : memref<4x36xf32, #tpu.memory_space<smem>>
    %509 = vector.broadcast %508 : f32 to vector<2x256xf32>
    %510 = arith.mulf %509, %495 : vector<2x256xf32>
    %511 = arith.addf %490, %510 : vector<2x256xf32>
    %c13_i32_271 = arith.constant 13 : i32
    %512 = tpu.dynamic_rotate %283 by %c13_i32_271 dim 1 : vector<2x256xf32>, i32 -> vector<2x256xf32>
    %c2_272 = arith.constant 2 : index
    %c0_273 = arith.constant 0 : index
    %c0_274 = arith.constant 0 : index
    %513 = vector.load %arg9[%c2_272, %c0_273, %c0_274] : memref<9x1x256xf32, #tpu.memory_space<vmem>>, vector<1x1x256xf32>
    %514 = vector.shape_cast %513 : vector<1x1x256xf32> to vector<1x256xf32>
    %515 = vector.broadcast %514 : vector<1x256xf32> to vector<2x256xf32>
    %516 = arith.mulf %512, %515 : vector<2x256xf32>
    %c0_275 = arith.constant 0 : index
    %c11 = arith.constant 11 : index
    %517 = memref.load %arg6[%c0_275, %c11] : memref<4x36xf32, #tpu.memory_space<smem>>
    %518 = vector.broadcast %517 : f32 to vector<2x256xf32>
    %519 = arith.mulf %518, %516 : vector<2x256xf32>
    %520 = arith.addf %499, %519 : vector<2x256xf32>
    %c1_276 = arith.constant 1 : index
    %c11_277 = arith.constant 11 : index
    %521 = memref.load %arg6[%c1_276, %c11_277] : memref<4x36xf32, #tpu.memory_space<smem>>
    %522 = vector.broadcast %521 : f32 to vector<2x256xf32>
    %523 = arith.mulf %522, %516 : vector<2x256xf32>
    %524 = arith.addf %503, %523 : vector<2x256xf32>
    %c2_278 = arith.constant 2 : index
    %c11_279 = arith.constant 11 : index
    %525 = memref.load %arg6[%c2_278, %c11_279] : memref<4x36xf32, #tpu.memory_space<smem>>
    %526 = vector.broadcast %525 : f32 to vector<2x256xf32>
    %527 = arith.mulf %526, %516 : vector<2x256xf32>
    %528 = arith.addf %507, %527 : vector<2x256xf32>
    %c3_280 = arith.constant 3 : index
    %c11_281 = arith.constant 11 : index
    %529 = memref.load %arg6[%c3_280, %c11_281] : memref<4x36xf32, #tpu.memory_space<smem>>
    %530 = vector.broadcast %529 : f32 to vector<2x256xf32>
    %531 = arith.mulf %530, %516 : vector<2x256xf32>
    %532 = arith.addf %511, %531 : vector<2x256xf32>
    %c1_i32_282 = arith.constant 1 : i32
    %533 = tpu.dynamic_rotate %283 by %c1_i32_282 dim 1 : vector<2x256xf32>, i32 -> vector<2x256xf32>
    %c3_283 = arith.constant 3 : index
    %c0_284 = arith.constant 0 : index
    %c0_285 = arith.constant 0 : index
    %534 = vector.load %arg9[%c3_283, %c0_284, %c0_285] : memref<9x1x256xf32, #tpu.memory_space<vmem>>, vector<1x1x256xf32>
    %535 = vector.shape_cast %534 : vector<1x1x256xf32> to vector<1x256xf32>
    %536 = vector.broadcast %535 : vector<1x256xf32> to vector<2x256xf32>
    %537 = arith.mulf %533, %536 : vector<2x256xf32>
    %c0_286 = arith.constant 0 : index
    %c12 = arith.constant 12 : index
    %538 = memref.load %arg6[%c0_286, %c12] : memref<4x36xf32, #tpu.memory_space<smem>>
    %539 = vector.broadcast %538 : f32 to vector<2x256xf32>
    %540 = arith.mulf %539, %537 : vector<2x256xf32>
    %541 = arith.addf %520, %540 : vector<2x256xf32>
    %c1_287 = arith.constant 1 : index
    %c12_288 = arith.constant 12 : index
    %542 = memref.load %arg6[%c1_287, %c12_288] : memref<4x36xf32, #tpu.memory_space<smem>>
    %543 = vector.broadcast %542 : f32 to vector<2x256xf32>
    %544 = arith.mulf %543, %537 : vector<2x256xf32>
    %545 = arith.addf %524, %544 : vector<2x256xf32>
    %c2_289 = arith.constant 2 : index
    %c12_290 = arith.constant 12 : index
    %546 = memref.load %arg6[%c2_289, %c12_290] : memref<4x36xf32, #tpu.memory_space<smem>>
    %547 = vector.broadcast %546 : f32 to vector<2x256xf32>
    %548 = arith.mulf %547, %537 : vector<2x256xf32>
    %549 = arith.addf %528, %548 : vector<2x256xf32>
    %c3_291 = arith.constant 3 : index
    %c12_292 = arith.constant 12 : index
    %550 = memref.load %arg6[%c3_291, %c12_292] : memref<4x36xf32, #tpu.memory_space<smem>>
    %551 = vector.broadcast %550 : f32 to vector<2x256xf32>
    %552 = arith.mulf %551, %537 : vector<2x256xf32>
    %553 = arith.addf %532, %552 : vector<2x256xf32>
    %c4_293 = arith.constant 4 : index
    %c0_294 = arith.constant 0 : index
    %c0_295 = arith.constant 0 : index
    %554 = vector.load %arg9[%c4_293, %c0_294, %c0_295] : memref<9x1x256xf32, #tpu.memory_space<vmem>>, vector<1x1x256xf32>
    %555 = vector.shape_cast %554 : vector<1x1x256xf32> to vector<1x256xf32>
    %556 = vector.broadcast %555 : vector<1x256xf32> to vector<2x256xf32>
    %557 = arith.mulf %283, %556 : vector<2x256xf32>
    %c0_296 = arith.constant 0 : index
    %c13 = arith.constant 13 : index
    %558 = memref.load %arg6[%c0_296, %c13] : memref<4x36xf32, #tpu.memory_space<smem>>
    %559 = vector.broadcast %558 : f32 to vector<2x256xf32>
    %560 = arith.mulf %559, %557 : vector<2x256xf32>
    %561 = arith.addf %541, %560 : vector<2x256xf32>
    %c1_297 = arith.constant 1 : index
    %c13_298 = arith.constant 13 : index
    %562 = memref.load %arg6[%c1_297, %c13_298] : memref<4x36xf32, #tpu.memory_space<smem>>
    %563 = vector.broadcast %562 : f32 to vector<2x256xf32>
    %564 = arith.mulf %563, %557 : vector<2x256xf32>
    %565 = arith.addf %545, %564 : vector<2x256xf32>
    %c2_299 = arith.constant 2 : index
    %c13_300 = arith.constant 13 : index
    %566 = memref.load %arg6[%c2_299, %c13_300] : memref<4x36xf32, #tpu.memory_space<smem>>
    %567 = vector.broadcast %566 : f32 to vector<2x256xf32>
    %568 = arith.mulf %567, %557 : vector<2x256xf32>
    %569 = arith.addf %549, %568 : vector<2x256xf32>
    %c3_301 = arith.constant 3 : index
    %c13_302 = arith.constant 13 : index
    %570 = memref.load %arg6[%c3_301, %c13_302] : memref<4x36xf32, #tpu.memory_space<smem>>
    %571 = vector.broadcast %570 : f32 to vector<2x256xf32>
    %572 = arith.mulf %571, %557 : vector<2x256xf32>
    %573 = arith.addf %553, %572 : vector<2x256xf32>
    %c255_i32_303 = arith.constant 255 : i32
    %574 = tpu.dynamic_rotate %283 by %c255_i32_303 dim 1 : vector<2x256xf32>, i32 -> vector<2x256xf32>
    %c5_304 = arith.constant 5 : index
    %c0_305 = arith.constant 0 : index
    %c0_306 = arith.constant 0 : index
    %575 = vector.load %arg9[%c5_304, %c0_305, %c0_306] : memref<9x1x256xf32, #tpu.memory_space<vmem>>, vector<1x1x256xf32>
    %576 = vector.shape_cast %575 : vector<1x1x256xf32> to vector<1x256xf32>
    %577 = vector.broadcast %576 : vector<1x256xf32> to vector<2x256xf32>
    %578 = arith.mulf %574, %577 : vector<2x256xf32>
    %c0_307 = arith.constant 0 : index
    %c14 = arith.constant 14 : index
    %579 = memref.load %arg6[%c0_307, %c14] : memref<4x36xf32, #tpu.memory_space<smem>>
    %580 = vector.broadcast %579 : f32 to vector<2x256xf32>
    %581 = arith.mulf %580, %578 : vector<2x256xf32>
    %582 = arith.addf %561, %581 : vector<2x256xf32>
    %c1_308 = arith.constant 1 : index
    %c14_309 = arith.constant 14 : index
    %583 = memref.load %arg6[%c1_308, %c14_309] : memref<4x36xf32, #tpu.memory_space<smem>>
    %584 = vector.broadcast %583 : f32 to vector<2x256xf32>
    %585 = arith.mulf %584, %578 : vector<2x256xf32>
    %586 = arith.addf %565, %585 : vector<2x256xf32>
    %c2_310 = arith.constant 2 : index
    %c14_311 = arith.constant 14 : index
    %587 = memref.load %arg6[%c2_310, %c14_311] : memref<4x36xf32, #tpu.memory_space<smem>>
    %588 = vector.broadcast %587 : f32 to vector<2x256xf32>
    %589 = arith.mulf %588, %578 : vector<2x256xf32>
    %590 = arith.addf %569, %589 : vector<2x256xf32>
    %c3_312 = arith.constant 3 : index
    %c14_313 = arith.constant 14 : index
    %591 = memref.load %arg6[%c3_312, %c14_313] : memref<4x36xf32, #tpu.memory_space<smem>>
    %592 = vector.broadcast %591 : f32 to vector<2x256xf32>
    %593 = arith.mulf %592, %578 : vector<2x256xf32>
    %594 = arith.addf %573, %593 : vector<2x256xf32>
    %c243_i32_314 = arith.constant 243 : i32
    %595 = tpu.dynamic_rotate %283 by %c243_i32_314 dim 1 : vector<2x256xf32>, i32 -> vector<2x256xf32>
    %c6_315 = arith.constant 6 : index
    %c0_316 = arith.constant 0 : index
    %c0_317 = arith.constant 0 : index
    %596 = vector.load %arg9[%c6_315, %c0_316, %c0_317] : memref<9x1x256xf32, #tpu.memory_space<vmem>>, vector<1x1x256xf32>
    %597 = vector.shape_cast %596 : vector<1x1x256xf32> to vector<1x256xf32>
    %598 = vector.broadcast %597 : vector<1x256xf32> to vector<2x256xf32>
    %599 = arith.mulf %595, %598 : vector<2x256xf32>
    %c0_318 = arith.constant 0 : index
    %c15 = arith.constant 15 : index
    %600 = memref.load %arg6[%c0_318, %c15] : memref<4x36xf32, #tpu.memory_space<smem>>
    %601 = vector.broadcast %600 : f32 to vector<2x256xf32>
    %602 = arith.mulf %601, %599 : vector<2x256xf32>
    %603 = arith.addf %582, %602 : vector<2x256xf32>
    %c1_319 = arith.constant 1 : index
    %c15_320 = arith.constant 15 : index
    %604 = memref.load %arg6[%c1_319, %c15_320] : memref<4x36xf32, #tpu.memory_space<smem>>
    %605 = vector.broadcast %604 : f32 to vector<2x256xf32>
    %606 = arith.mulf %605, %599 : vector<2x256xf32>
    %607 = arith.addf %586, %606 : vector<2x256xf32>
    %c2_321 = arith.constant 2 : index
    %c15_322 = arith.constant 15 : index
    %608 = memref.load %arg6[%c2_321, %c15_322] : memref<4x36xf32, #tpu.memory_space<smem>>
    %609 = vector.broadcast %608 : f32 to vector<2x256xf32>
    %610 = arith.mulf %609, %599 : vector<2x256xf32>
    %611 = arith.addf %590, %610 : vector<2x256xf32>
    %c3_323 = arith.constant 3 : index
    %c15_324 = arith.constant 15 : index
    %612 = memref.load %arg6[%c3_323, %c15_324] : memref<4x36xf32, #tpu.memory_space<smem>>
    %613 = vector.broadcast %612 : f32 to vector<2x256xf32>
    %614 = arith.mulf %613, %599 : vector<2x256xf32>
    %615 = arith.addf %594, %614 : vector<2x256xf32>
    %c242_i32_325 = arith.constant 242 : i32
    %616 = tpu.dynamic_rotate %283 by %c242_i32_325 dim 1 : vector<2x256xf32>, i32 -> vector<2x256xf32>
    %c7_326 = arith.constant 7 : index
    %c0_327 = arith.constant 0 : index
    %c0_328 = arith.constant 0 : index
    %617 = vector.load %arg9[%c7_326, %c0_327, %c0_328] : memref<9x1x256xf32, #tpu.memory_space<vmem>>, vector<1x1x256xf32>
    %618 = vector.shape_cast %617 : vector<1x1x256xf32> to vector<1x256xf32>
    %619 = vector.broadcast %618 : vector<1x256xf32> to vector<2x256xf32>
    %620 = arith.mulf %616, %619 : vector<2x256xf32>
    %c0_329 = arith.constant 0 : index
    %c16 = arith.constant 16 : index
    %621 = memref.load %arg6[%c0_329, %c16] : memref<4x36xf32, #tpu.memory_space<smem>>
    %622 = vector.broadcast %621 : f32 to vector<2x256xf32>
    %623 = arith.mulf %622, %620 : vector<2x256xf32>
    %624 = arith.addf %603, %623 : vector<2x256xf32>
    %c1_330 = arith.constant 1 : index
    %c16_331 = arith.constant 16 : index
    %625 = memref.load %arg6[%c1_330, %c16_331] : memref<4x36xf32, #tpu.memory_space<smem>>
    %626 = vector.broadcast %625 : f32 to vector<2x256xf32>
    %627 = arith.mulf %626, %620 : vector<2x256xf32>
    %628 = arith.addf %607, %627 : vector<2x256xf32>
    %c2_332 = arith.constant 2 : index
    %c16_333 = arith.constant 16 : index
    %629 = memref.load %arg6[%c2_332, %c16_333] : memref<4x36xf32, #tpu.memory_space<smem>>
    %630 = vector.broadcast %629 : f32 to vector<2x256xf32>
    %631 = arith.mulf %630, %620 : vector<2x256xf32>
    %632 = arith.addf %611, %631 : vector<2x256xf32>
    %c3_334 = arith.constant 3 : index
    %c16_335 = arith.constant 16 : index
    %633 = memref.load %arg6[%c3_334, %c16_335] : memref<4x36xf32, #tpu.memory_space<smem>>
    %634 = vector.broadcast %633 : f32 to vector<2x256xf32>
    %635 = arith.mulf %634, %620 : vector<2x256xf32>
    %636 = arith.addf %615, %635 : vector<2x256xf32>
    %c241_i32_336 = arith.constant 241 : i32
    %637 = tpu.dynamic_rotate %283 by %c241_i32_336 dim 1 : vector<2x256xf32>, i32 -> vector<2x256xf32>
    %c8_337 = arith.constant 8 : index
    %c0_338 = arith.constant 0 : index
    %c0_339 = arith.constant 0 : index
    %638 = vector.load %arg9[%c8_337, %c0_338, %c0_339] : memref<9x1x256xf32, #tpu.memory_space<vmem>>, vector<1x1x256xf32>
    %639 = vector.shape_cast %638 : vector<1x1x256xf32> to vector<1x256xf32>
    %640 = vector.broadcast %639 : vector<1x256xf32> to vector<2x256xf32>
    %641 = arith.mulf %637, %640 : vector<2x256xf32>
    %c0_340 = arith.constant 0 : index
    %c17 = arith.constant 17 : index
    %642 = memref.load %arg6[%c0_340, %c17] : memref<4x36xf32, #tpu.memory_space<smem>>
    %643 = vector.broadcast %642 : f32 to vector<2x256xf32>
    %644 = arith.mulf %643, %641 : vector<2x256xf32>
    %645 = arith.addf %624, %644 : vector<2x256xf32>
    %c1_341 = arith.constant 1 : index
    %c17_342 = arith.constant 17 : index
    %646 = memref.load %arg6[%c1_341, %c17_342] : memref<4x36xf32, #tpu.memory_space<smem>>
    %647 = vector.broadcast %646 : f32 to vector<2x256xf32>
    %648 = arith.mulf %647, %641 : vector<2x256xf32>
    %649 = arith.addf %628, %648 : vector<2x256xf32>
    %c2_343 = arith.constant 2 : index
    %c17_344 = arith.constant 17 : index
    %650 = memref.load %arg6[%c2_343, %c17_344] : memref<4x36xf32, #tpu.memory_space<smem>>
    %651 = vector.broadcast %650 : f32 to vector<2x256xf32>
    %652 = arith.mulf %651, %641 : vector<2x256xf32>
    %653 = arith.addf %632, %652 : vector<2x256xf32>
    %c3_345 = arith.constant 3 : index
    %c17_346 = arith.constant 17 : index
    %654 = memref.load %arg6[%c3_345, %c17_346] : memref<4x36xf32, #tpu.memory_space<smem>>
    %655 = vector.broadcast %654 : f32 to vector<2x256xf32>
    %656 = arith.mulf %655, %641 : vector<2x256xf32>
    %657 = arith.addf %636, %656 : vector<2x256xf32>
    %c15_i32_347 = arith.constant 15 : i32
    %658 = tpu.dynamic_rotate %284 by %c15_i32_347 dim 1 : vector<2x256xf32>, i32 -> vector<2x256xf32>
    %c0_348 = arith.constant 0 : index
    %c0_349 = arith.constant 0 : index
    %c0_350 = arith.constant 0 : index
    %659 = vector.load %arg9[%c0_348, %c0_349, %c0_350] : memref<9x1x256xf32, #tpu.memory_space<vmem>>, vector<1x1x256xf32>
    %660 = vector.shape_cast %659 : vector<1x1x256xf32> to vector<1x256xf32>
    %661 = vector.broadcast %660 : vector<1x256xf32> to vector<2x256xf32>
    %662 = arith.mulf %658, %661 : vector<2x256xf32>
    %c0_351 = arith.constant 0 : index
    %c18 = arith.constant 18 : index
    %663 = memref.load %arg6[%c0_351, %c18] : memref<4x36xf32, #tpu.memory_space<smem>>
    %664 = vector.broadcast %663 : f32 to vector<2x256xf32>
    %665 = arith.mulf %664, %662 : vector<2x256xf32>
    %666 = arith.addf %645, %665 : vector<2x256xf32>
    %c1_352 = arith.constant 1 : index
    %c18_353 = arith.constant 18 : index
    %667 = memref.load %arg6[%c1_352, %c18_353] : memref<4x36xf32, #tpu.memory_space<smem>>
    %668 = vector.broadcast %667 : f32 to vector<2x256xf32>
    %669 = arith.mulf %668, %662 : vector<2x256xf32>
    %670 = arith.addf %649, %669 : vector<2x256xf32>
    %c2_354 = arith.constant 2 : index
    %c18_355 = arith.constant 18 : index
    %671 = memref.load %arg6[%c2_354, %c18_355] : memref<4x36xf32, #tpu.memory_space<smem>>
    %672 = vector.broadcast %671 : f32 to vector<2x256xf32>
    %673 = arith.mulf %672, %662 : vector<2x256xf32>
    %674 = arith.addf %653, %673 : vector<2x256xf32>
    %c3_356 = arith.constant 3 : index
    %c18_357 = arith.constant 18 : index
    %675 = memref.load %arg6[%c3_356, %c18_357] : memref<4x36xf32, #tpu.memory_space<smem>>
    %676 = vector.broadcast %675 : f32 to vector<2x256xf32>
    %677 = arith.mulf %676, %662 : vector<2x256xf32>
    %678 = arith.addf %657, %677 : vector<2x256xf32>
    %c14_i32_358 = arith.constant 14 : i32
    %679 = tpu.dynamic_rotate %284 by %c14_i32_358 dim 1 : vector<2x256xf32>, i32 -> vector<2x256xf32>
    %c1_359 = arith.constant 1 : index
    %c0_360 = arith.constant 0 : index
    %c0_361 = arith.constant 0 : index
    %680 = vector.load %arg9[%c1_359, %c0_360, %c0_361] : memref<9x1x256xf32, #tpu.memory_space<vmem>>, vector<1x1x256xf32>
    %681 = vector.shape_cast %680 : vector<1x1x256xf32> to vector<1x256xf32>
    %682 = vector.broadcast %681 : vector<1x256xf32> to vector<2x256xf32>
    %683 = arith.mulf %679, %682 : vector<2x256xf32>
    %c0_362 = arith.constant 0 : index
    %c19 = arith.constant 19 : index
    %684 = memref.load %arg6[%c0_362, %c19] : memref<4x36xf32, #tpu.memory_space<smem>>
    %685 = vector.broadcast %684 : f32 to vector<2x256xf32>
    %686 = arith.mulf %685, %683 : vector<2x256xf32>
    %687 = arith.addf %666, %686 : vector<2x256xf32>
    %c1_363 = arith.constant 1 : index
    %c19_364 = arith.constant 19 : index
    %688 = memref.load %arg6[%c1_363, %c19_364] : memref<4x36xf32, #tpu.memory_space<smem>>
    %689 = vector.broadcast %688 : f32 to vector<2x256xf32>
    %690 = arith.mulf %689, %683 : vector<2x256xf32>
    %691 = arith.addf %670, %690 : vector<2x256xf32>
    %c2_365 = arith.constant 2 : index
    %c19_366 = arith.constant 19 : index
    %692 = memref.load %arg6[%c2_365, %c19_366] : memref<4x36xf32, #tpu.memory_space<smem>>
    %693 = vector.broadcast %692 : f32 to vector<2x256xf32>
    %694 = arith.mulf %693, %683 : vector<2x256xf32>
    %695 = arith.addf %674, %694 : vector<2x256xf32>
    %c3_367 = arith.constant 3 : index
    %c19_368 = arith.constant 19 : index
    %696 = memref.load %arg6[%c3_367, %c19_368] : memref<4x36xf32, #tpu.memory_space<smem>>
    %697 = vector.broadcast %696 : f32 to vector<2x256xf32>
    %698 = arith.mulf %697, %683 : vector<2x256xf32>
    %699 = arith.addf %678, %698 : vector<2x256xf32>
    %c13_i32_369 = arith.constant 13 : i32
    %700 = tpu.dynamic_rotate %284 by %c13_i32_369 dim 1 : vector<2x256xf32>, i32 -> vector<2x256xf32>
    %c2_370 = arith.constant 2 : index
    %c0_371 = arith.constant 0 : index
    %c0_372 = arith.constant 0 : index
    %701 = vector.load %arg9[%c2_370, %c0_371, %c0_372] : memref<9x1x256xf32, #tpu.memory_space<vmem>>, vector<1x1x256xf32>
    %702 = vector.shape_cast %701 : vector<1x1x256xf32> to vector<1x256xf32>
    %703 = vector.broadcast %702 : vector<1x256xf32> to vector<2x256xf32>
    %704 = arith.mulf %700, %703 : vector<2x256xf32>
    %c0_373 = arith.constant 0 : index
    %c20 = arith.constant 20 : index
    %705 = memref.load %arg6[%c0_373, %c20] : memref<4x36xf32, #tpu.memory_space<smem>>
    %706 = vector.broadcast %705 : f32 to vector<2x256xf32>
    %707 = arith.mulf %706, %704 : vector<2x256xf32>
    %708 = arith.addf %687, %707 : vector<2x256xf32>
    %c1_374 = arith.constant 1 : index
    %c20_375 = arith.constant 20 : index
    %709 = memref.load %arg6[%c1_374, %c20_375] : memref<4x36xf32, #tpu.memory_space<smem>>
    %710 = vector.broadcast %709 : f32 to vector<2x256xf32>
    %711 = arith.mulf %710, %704 : vector<2x256xf32>
    %712 = arith.addf %691, %711 : vector<2x256xf32>
    %c2_376 = arith.constant 2 : index
    %c20_377 = arith.constant 20 : index
    %713 = memref.load %arg6[%c2_376, %c20_377] : memref<4x36xf32, #tpu.memory_space<smem>>
    %714 = vector.broadcast %713 : f32 to vector<2x256xf32>
    %715 = arith.mulf %714, %704 : vector<2x256xf32>
    %716 = arith.addf %695, %715 : vector<2x256xf32>
    %c3_378 = arith.constant 3 : index
    %c20_379 = arith.constant 20 : index
    %717 = memref.load %arg6[%c3_378, %c20_379] : memref<4x36xf32, #tpu.memory_space<smem>>
    %718 = vector.broadcast %717 : f32 to vector<2x256xf32>
    %719 = arith.mulf %718, %704 : vector<2x256xf32>
    %720 = arith.addf %699, %719 : vector<2x256xf32>
    %c1_i32_380 = arith.constant 1 : i32
    %721 = tpu.dynamic_rotate %284 by %c1_i32_380 dim 1 : vector<2x256xf32>, i32 -> vector<2x256xf32>
    %c3_381 = arith.constant 3 : index
    %c0_382 = arith.constant 0 : index
    %c0_383 = arith.constant 0 : index
    %722 = vector.load %arg9[%c3_381, %c0_382, %c0_383] : memref<9x1x256xf32, #tpu.memory_space<vmem>>, vector<1x1x256xf32>
    %723 = vector.shape_cast %722 : vector<1x1x256xf32> to vector<1x256xf32>
    %724 = vector.broadcast %723 : vector<1x256xf32> to vector<2x256xf32>
    %725 = arith.mulf %721, %724 : vector<2x256xf32>
    %c0_384 = arith.constant 0 : index
    %c21 = arith.constant 21 : index
    %726 = memref.load %arg6[%c0_384, %c21] : memref<4x36xf32, #tpu.memory_space<smem>>
    %727 = vector.broadcast %726 : f32 to vector<2x256xf32>
    %728 = arith.mulf %727, %725 : vector<2x256xf32>
    %729 = arith.addf %708, %728 : vector<2x256xf32>
    %c1_385 = arith.constant 1 : index
    %c21_386 = arith.constant 21 : index
    %730 = memref.load %arg6[%c1_385, %c21_386] : memref<4x36xf32, #tpu.memory_space<smem>>
    %731 = vector.broadcast %730 : f32 to vector<2x256xf32>
    %732 = arith.mulf %731, %725 : vector<2x256xf32>
    %733 = arith.addf %712, %732 : vector<2x256xf32>
    %c2_387 = arith.constant 2 : index
    %c21_388 = arith.constant 21 : index
    %734 = memref.load %arg6[%c2_387, %c21_388] : memref<4x36xf32, #tpu.memory_space<smem>>
    %735 = vector.broadcast %734 : f32 to vector<2x256xf32>
    %736 = arith.mulf %735, %725 : vector<2x256xf32>
    %737 = arith.addf %716, %736 : vector<2x256xf32>
    %c3_389 = arith.constant 3 : index
    %c21_390 = arith.constant 21 : index
    %738 = memref.load %arg6[%c3_389, %c21_390] : memref<4x36xf32, #tpu.memory_space<smem>>
    %739 = vector.broadcast %738 : f32 to vector<2x256xf32>
    %740 = arith.mulf %739, %725 : vector<2x256xf32>
    %741 = arith.addf %720, %740 : vector<2x256xf32>
    %c4_391 = arith.constant 4 : index
    %c0_392 = arith.constant 0 : index
    %c0_393 = arith.constant 0 : index
    %742 = vector.load %arg9[%c4_391, %c0_392, %c0_393] : memref<9x1x256xf32, #tpu.memory_space<vmem>>, vector<1x1x256xf32>
    %743 = vector.shape_cast %742 : vector<1x1x256xf32> to vector<1x256xf32>
    %744 = vector.broadcast %743 : vector<1x256xf32> to vector<2x256xf32>
    %745 = arith.mulf %284, %744 : vector<2x256xf32>
    %c0_394 = arith.constant 0 : index
    %c22 = arith.constant 22 : index
    %746 = memref.load %arg6[%c0_394, %c22] : memref<4x36xf32, #tpu.memory_space<smem>>
    %747 = vector.broadcast %746 : f32 to vector<2x256xf32>
    %748 = arith.mulf %747, %745 : vector<2x256xf32>
    %749 = arith.addf %729, %748 : vector<2x256xf32>
    %c1_395 = arith.constant 1 : index
    %c22_396 = arith.constant 22 : index
    %750 = memref.load %arg6[%c1_395, %c22_396] : memref<4x36xf32, #tpu.memory_space<smem>>
    %751 = vector.broadcast %750 : f32 to vector<2x256xf32>
    %752 = arith.mulf %751, %745 : vector<2x256xf32>
    %753 = arith.addf %733, %752 : vector<2x256xf32>
    %c2_397 = arith.constant 2 : index
    %c22_398 = arith.constant 22 : index
    %754 = memref.load %arg6[%c2_397, %c22_398] : memref<4x36xf32, #tpu.memory_space<smem>>
    %755 = vector.broadcast %754 : f32 to vector<2x256xf32>
    %756 = arith.mulf %755, %745 : vector<2x256xf32>
    %757 = arith.addf %737, %756 : vector<2x256xf32>
    %c3_399 = arith.constant 3 : index
    %c22_400 = arith.constant 22 : index
    %758 = memref.load %arg6[%c3_399, %c22_400] : memref<4x36xf32, #tpu.memory_space<smem>>
    %759 = vector.broadcast %758 : f32 to vector<2x256xf32>
    %760 = arith.mulf %759, %745 : vector<2x256xf32>
    %761 = arith.addf %741, %760 : vector<2x256xf32>
    %c255_i32_401 = arith.constant 255 : i32
    %762 = tpu.dynamic_rotate %284 by %c255_i32_401 dim 1 : vector<2x256xf32>, i32 -> vector<2x256xf32>
    %c5_402 = arith.constant 5 : index
    %c0_403 = arith.constant 0 : index
    %c0_404 = arith.constant 0 : index
    %763 = vector.load %arg9[%c5_402, %c0_403, %c0_404] : memref<9x1x256xf32, #tpu.memory_space<vmem>>, vector<1x1x256xf32>
    %764 = vector.shape_cast %763 : vector<1x1x256xf32> to vector<1x256xf32>
    %765 = vector.broadcast %764 : vector<1x256xf32> to vector<2x256xf32>
    %766 = arith.mulf %762, %765 : vector<2x256xf32>
    %c0_405 = arith.constant 0 : index
    %c23 = arith.constant 23 : index
    %767 = memref.load %arg6[%c0_405, %c23] : memref<4x36xf32, #tpu.memory_space<smem>>
    %768 = vector.broadcast %767 : f32 to vector<2x256xf32>
    %769 = arith.mulf %768, %766 : vector<2x256xf32>
    %770 = arith.addf %749, %769 : vector<2x256xf32>
    %c1_406 = arith.constant 1 : index
    %c23_407 = arith.constant 23 : index
    %771 = memref.load %arg6[%c1_406, %c23_407] : memref<4x36xf32, #tpu.memory_space<smem>>
    %772 = vector.broadcast %771 : f32 to vector<2x256xf32>
    %773 = arith.mulf %772, %766 : vector<2x256xf32>
    %774 = arith.addf %753, %773 : vector<2x256xf32>
    %c2_408 = arith.constant 2 : index
    %c23_409 = arith.constant 23 : index
    %775 = memref.load %arg6[%c2_408, %c23_409] : memref<4x36xf32, #tpu.memory_space<smem>>
    %776 = vector.broadcast %775 : f32 to vector<2x256xf32>
    %777 = arith.mulf %776, %766 : vector<2x256xf32>
    %778 = arith.addf %757, %777 : vector<2x256xf32>
    %c3_410 = arith.constant 3 : index
    %c23_411 = arith.constant 23 : index
    %779 = memref.load %arg6[%c3_410, %c23_411] : memref<4x36xf32, #tpu.memory_space<smem>>
    %780 = vector.broadcast %779 : f32 to vector<2x256xf32>
    %781 = arith.mulf %780, %766 : vector<2x256xf32>
    %782 = arith.addf %761, %781 : vector<2x256xf32>
    %c243_i32_412 = arith.constant 243 : i32
    %783 = tpu.dynamic_rotate %284 by %c243_i32_412 dim 1 : vector<2x256xf32>, i32 -> vector<2x256xf32>
    %c6_413 = arith.constant 6 : index
    %c0_414 = arith.constant 0 : index
    %c0_415 = arith.constant 0 : index
    %784 = vector.load %arg9[%c6_413, %c0_414, %c0_415] : memref<9x1x256xf32, #tpu.memory_space<vmem>>, vector<1x1x256xf32>
    %785 = vector.shape_cast %784 : vector<1x1x256xf32> to vector<1x256xf32>
    %786 = vector.broadcast %785 : vector<1x256xf32> to vector<2x256xf32>
    %787 = arith.mulf %783, %786 : vector<2x256xf32>
    %c0_416 = arith.constant 0 : index
    %c24 = arith.constant 24 : index
    %788 = memref.load %arg6[%c0_416, %c24] : memref<4x36xf32, #tpu.memory_space<smem>>
    %789 = vector.broadcast %788 : f32 to vector<2x256xf32>
    %790 = arith.mulf %789, %787 : vector<2x256xf32>
    %791 = arith.addf %770, %790 : vector<2x256xf32>
    %c1_417 = arith.constant 1 : index
    %c24_418 = arith.constant 24 : index
    %792 = memref.load %arg6[%c1_417, %c24_418] : memref<4x36xf32, #tpu.memory_space<smem>>
    %793 = vector.broadcast %792 : f32 to vector<2x256xf32>
    %794 = arith.mulf %793, %787 : vector<2x256xf32>
    %795 = arith.addf %774, %794 : vector<2x256xf32>
    %c2_419 = arith.constant 2 : index
    %c24_420 = arith.constant 24 : index
    %796 = memref.load %arg6[%c2_419, %c24_420] : memref<4x36xf32, #tpu.memory_space<smem>>
    %797 = vector.broadcast %796 : f32 to vector<2x256xf32>
    %798 = arith.mulf %797, %787 : vector<2x256xf32>
    %799 = arith.addf %778, %798 : vector<2x256xf32>
    %c3_421 = arith.constant 3 : index
    %c24_422 = arith.constant 24 : index
    %800 = memref.load %arg6[%c3_421, %c24_422] : memref<4x36xf32, #tpu.memory_space<smem>>
    %801 = vector.broadcast %800 : f32 to vector<2x256xf32>
    %802 = arith.mulf %801, %787 : vector<2x256xf32>
    %803 = arith.addf %782, %802 : vector<2x256xf32>
    %c242_i32_423 = arith.constant 242 : i32
    %804 = tpu.dynamic_rotate %284 by %c242_i32_423 dim 1 : vector<2x256xf32>, i32 -> vector<2x256xf32>
    %c7_424 = arith.constant 7 : index
    %c0_425 = arith.constant 0 : index
    %c0_426 = arith.constant 0 : index
    %805 = vector.load %arg9[%c7_424, %c0_425, %c0_426] : memref<9x1x256xf32, #tpu.memory_space<vmem>>, vector<1x1x256xf32>
    %806 = vector.shape_cast %805 : vector<1x1x256xf32> to vector<1x256xf32>
    %807 = vector.broadcast %806 : vector<1x256xf32> to vector<2x256xf32>
    %808 = arith.mulf %804, %807 : vector<2x256xf32>
    %c0_427 = arith.constant 0 : index
    %c25 = arith.constant 25 : index
    %809 = memref.load %arg6[%c0_427, %c25] : memref<4x36xf32, #tpu.memory_space<smem>>
    %810 = vector.broadcast %809 : f32 to vector<2x256xf32>
    %811 = arith.mulf %810, %808 : vector<2x256xf32>
    %812 = arith.addf %791, %811 : vector<2x256xf32>
    %c1_428 = arith.constant 1 : index
    %c25_429 = arith.constant 25 : index
    %813 = memref.load %arg6[%c1_428, %c25_429] : memref<4x36xf32, #tpu.memory_space<smem>>
    %814 = vector.broadcast %813 : f32 to vector<2x256xf32>
    %815 = arith.mulf %814, %808 : vector<2x256xf32>
    %816 = arith.addf %795, %815 : vector<2x256xf32>
    %c2_430 = arith.constant 2 : index
    %c25_431 = arith.constant 25 : index
    %817 = memref.load %arg6[%c2_430, %c25_431] : memref<4x36xf32, #tpu.memory_space<smem>>
    %818 = vector.broadcast %817 : f32 to vector<2x256xf32>
    %819 = arith.mulf %818, %808 : vector<2x256xf32>
    %820 = arith.addf %799, %819 : vector<2x256xf32>
    %c3_432 = arith.constant 3 : index
    %c25_433 = arith.constant 25 : index
    %821 = memref.load %arg6[%c3_432, %c25_433] : memref<4x36xf32, #tpu.memory_space<smem>>
    %822 = vector.broadcast %821 : f32 to vector<2x256xf32>
    %823 = arith.mulf %822, %808 : vector<2x256xf32>
    %824 = arith.addf %803, %823 : vector<2x256xf32>
    %c241_i32_434 = arith.constant 241 : i32
    %825 = tpu.dynamic_rotate %284 by %c241_i32_434 dim 1 : vector<2x256xf32>, i32 -> vector<2x256xf32>
    %c8_435 = arith.constant 8 : index
    %c0_436 = arith.constant 0 : index
    %c0_437 = arith.constant 0 : index
    %826 = vector.load %arg9[%c8_435, %c0_436, %c0_437] : memref<9x1x256xf32, #tpu.memory_space<vmem>>, vector<1x1x256xf32>
    %827 = vector.shape_cast %826 : vector<1x1x256xf32> to vector<1x256xf32>
    %828 = vector.broadcast %827 : vector<1x256xf32> to vector<2x256xf32>
    %829 = arith.mulf %825, %828 : vector<2x256xf32>
    %c0_438 = arith.constant 0 : index
    %c26 = arith.constant 26 : index
    %830 = memref.load %arg6[%c0_438, %c26] : memref<4x36xf32, #tpu.memory_space<smem>>
    %831 = vector.broadcast %830 : f32 to vector<2x256xf32>
    %832 = arith.mulf %831, %829 : vector<2x256xf32>
    %833 = arith.addf %812, %832 : vector<2x256xf32>
    %c1_439 = arith.constant 1 : index
    %c26_440 = arith.constant 26 : index
    %834 = memref.load %arg6[%c1_439, %c26_440] : memref<4x36xf32, #tpu.memory_space<smem>>
    %835 = vector.broadcast %834 : f32 to vector<2x256xf32>
    %836 = arith.mulf %835, %829 : vector<2x256xf32>
    %837 = arith.addf %816, %836 : vector<2x256xf32>
    %c2_441 = arith.constant 2 : index
    %c26_442 = arith.constant 26 : index
    %838 = memref.load %arg6[%c2_441, %c26_442] : memref<4x36xf32, #tpu.memory_space<smem>>
    %839 = vector.broadcast %838 : f32 to vector<2x256xf32>
    %840 = arith.mulf %839, %829 : vector<2x256xf32>
    %841 = arith.addf %820, %840 : vector<2x256xf32>
    %c3_443 = arith.constant 3 : index
    %c26_444 = arith.constant 26 : index
    %842 = memref.load %arg6[%c3_443, %c26_444] : memref<4x36xf32, #tpu.memory_space<smem>>
    %843 = vector.broadcast %842 : f32 to vector<2x256xf32>
    %844 = arith.mulf %843, %829 : vector<2x256xf32>
    %845 = arith.addf %824, %844 : vector<2x256xf32>
    %c15_i32_445 = arith.constant 15 : i32
    %846 = tpu.dynamic_rotate %285 by %c15_i32_445 dim 1 : vector<2x256xf32>, i32 -> vector<2x256xf32>
    %c0_446 = arith.constant 0 : index
    %c0_447 = arith.constant 0 : index
    %c0_448 = arith.constant 0 : index
    %847 = vector.load %arg9[%c0_446, %c0_447, %c0_448] : memref<9x1x256xf32, #tpu.memory_space<vmem>>, vector<1x1x256xf32>
    %848 = vector.shape_cast %847 : vector<1x1x256xf32> to vector<1x256xf32>
    %849 = vector.broadcast %848 : vector<1x256xf32> to vector<2x256xf32>
    %850 = arith.mulf %846, %849 : vector<2x256xf32>
    %c0_449 = arith.constant 0 : index
    %c27 = arith.constant 27 : index
    %851 = memref.load %arg6[%c0_449, %c27] : memref<4x36xf32, #tpu.memory_space<smem>>
    %852 = vector.broadcast %851 : f32 to vector<2x256xf32>
    %853 = arith.mulf %852, %850 : vector<2x256xf32>
    %854 = arith.addf %833, %853 : vector<2x256xf32>
    %c1_450 = arith.constant 1 : index
    %c27_451 = arith.constant 27 : index
    %855 = memref.load %arg6[%c1_450, %c27_451] : memref<4x36xf32, #tpu.memory_space<smem>>
    %856 = vector.broadcast %855 : f32 to vector<2x256xf32>
    %857 = arith.mulf %856, %850 : vector<2x256xf32>
    %858 = arith.addf %837, %857 : vector<2x256xf32>
    %c2_452 = arith.constant 2 : index
    %c27_453 = arith.constant 27 : index
    %859 = memref.load %arg6[%c2_452, %c27_453] : memref<4x36xf32, #tpu.memory_space<smem>>
    %860 = vector.broadcast %859 : f32 to vector<2x256xf32>
    %861 = arith.mulf %860, %850 : vector<2x256xf32>
    %862 = arith.addf %841, %861 : vector<2x256xf32>
    %c3_454 = arith.constant 3 : index
    %c27_455 = arith.constant 27 : index
    %863 = memref.load %arg6[%c3_454, %c27_455] : memref<4x36xf32, #tpu.memory_space<smem>>
    %864 = vector.broadcast %863 : f32 to vector<2x256xf32>
    %865 = arith.mulf %864, %850 : vector<2x256xf32>
    %866 = arith.addf %845, %865 : vector<2x256xf32>
    %c14_i32_456 = arith.constant 14 : i32
    %867 = tpu.dynamic_rotate %285 by %c14_i32_456 dim 1 : vector<2x256xf32>, i32 -> vector<2x256xf32>
    %c1_457 = arith.constant 1 : index
    %c0_458 = arith.constant 0 : index
    %c0_459 = arith.constant 0 : index
    %868 = vector.load %arg9[%c1_457, %c0_458, %c0_459] : memref<9x1x256xf32, #tpu.memory_space<vmem>>, vector<1x1x256xf32>
    %869 = vector.shape_cast %868 : vector<1x1x256xf32> to vector<1x256xf32>
    %870 = vector.broadcast %869 : vector<1x256xf32> to vector<2x256xf32>
    %871 = arith.mulf %867, %870 : vector<2x256xf32>
    %c0_460 = arith.constant 0 : index
    %c28 = arith.constant 28 : index
    %872 = memref.load %arg6[%c0_460, %c28] : memref<4x36xf32, #tpu.memory_space<smem>>
    %873 = vector.broadcast %872 : f32 to vector<2x256xf32>
    %874 = arith.mulf %873, %871 : vector<2x256xf32>
    %875 = arith.addf %854, %874 : vector<2x256xf32>
    %c1_461 = arith.constant 1 : index
    %c28_462 = arith.constant 28 : index
    %876 = memref.load %arg6[%c1_461, %c28_462] : memref<4x36xf32, #tpu.memory_space<smem>>
    %877 = vector.broadcast %876 : f32 to vector<2x256xf32>
    %878 = arith.mulf %877, %871 : vector<2x256xf32>
    %879 = arith.addf %858, %878 : vector<2x256xf32>
    %c2_463 = arith.constant 2 : index
    %c28_464 = arith.constant 28 : index
    %880 = memref.load %arg6[%c2_463, %c28_464] : memref<4x36xf32, #tpu.memory_space<smem>>
    %881 = vector.broadcast %880 : f32 to vector<2x256xf32>
    %882 = arith.mulf %881, %871 : vector<2x256xf32>
    %883 = arith.addf %862, %882 : vector<2x256xf32>
    %c3_465 = arith.constant 3 : index
    %c28_466 = arith.constant 28 : index
    %884 = memref.load %arg6[%c3_465, %c28_466] : memref<4x36xf32, #tpu.memory_space<smem>>
    %885 = vector.broadcast %884 : f32 to vector<2x256xf32>
    %886 = arith.mulf %885, %871 : vector<2x256xf32>
    %887 = arith.addf %866, %886 : vector<2x256xf32>
    %c13_i32_467 = arith.constant 13 : i32
    %888 = tpu.dynamic_rotate %285 by %c13_i32_467 dim 1 : vector<2x256xf32>, i32 -> vector<2x256xf32>
    %c2_468 = arith.constant 2 : index
    %c0_469 = arith.constant 0 : index
    %c0_470 = arith.constant 0 : index
    %889 = vector.load %arg9[%c2_468, %c0_469, %c0_470] : memref<9x1x256xf32, #tpu.memory_space<vmem>>, vector<1x1x256xf32>
    %890 = vector.shape_cast %889 : vector<1x1x256xf32> to vector<1x256xf32>
    %891 = vector.broadcast %890 : vector<1x256xf32> to vector<2x256xf32>
    %892 = arith.mulf %888, %891 : vector<2x256xf32>
    %c0_471 = arith.constant 0 : index
    %c29 = arith.constant 29 : index
    %893 = memref.load %arg6[%c0_471, %c29] : memref<4x36xf32, #tpu.memory_space<smem>>
    %894 = vector.broadcast %893 : f32 to vector<2x256xf32>
    %895 = arith.mulf %894, %892 : vector<2x256xf32>
    %896 = arith.addf %875, %895 : vector<2x256xf32>
    %c1_472 = arith.constant 1 : index
    %c29_473 = arith.constant 29 : index
    %897 = memref.load %arg6[%c1_472, %c29_473] : memref<4x36xf32, #tpu.memory_space<smem>>
    %898 = vector.broadcast %897 : f32 to vector<2x256xf32>
    %899 = arith.mulf %898, %892 : vector<2x256xf32>
    %900 = arith.addf %879, %899 : vector<2x256xf32>
    %c2_474 = arith.constant 2 : index
    %c29_475 = arith.constant 29 : index
    %901 = memref.load %arg6[%c2_474, %c29_475] : memref<4x36xf32, #tpu.memory_space<smem>>
    %902 = vector.broadcast %901 : f32 to vector<2x256xf32>
    %903 = arith.mulf %902, %892 : vector<2x256xf32>
    %904 = arith.addf %883, %903 : vector<2x256xf32>
    %c3_476 = arith.constant 3 : index
    %c29_477 = arith.constant 29 : index
    %905 = memref.load %arg6[%c3_476, %c29_477] : memref<4x36xf32, #tpu.memory_space<smem>>
    %906 = vector.broadcast %905 : f32 to vector<2x256xf32>
    %907 = arith.mulf %906, %892 : vector<2x256xf32>
    %908 = arith.addf %887, %907 : vector<2x256xf32>
    %c1_i32_478 = arith.constant 1 : i32
    %909 = tpu.dynamic_rotate %285 by %c1_i32_478 dim 1 : vector<2x256xf32>, i32 -> vector<2x256xf32>
    %c3_479 = arith.constant 3 : index
    %c0_480 = arith.constant 0 : index
    %c0_481 = arith.constant 0 : index
    %910 = vector.load %arg9[%c3_479, %c0_480, %c0_481] : memref<9x1x256xf32, #tpu.memory_space<vmem>>, vector<1x1x256xf32>
    %911 = vector.shape_cast %910 : vector<1x1x256xf32> to vector<1x256xf32>
    %912 = vector.broadcast %911 : vector<1x256xf32> to vector<2x256xf32>
    %913 = arith.mulf %909, %912 : vector<2x256xf32>
    %c0_482 = arith.constant 0 : index
    %c30 = arith.constant 30 : index
    %914 = memref.load %arg6[%c0_482, %c30] : memref<4x36xf32, #tpu.memory_space<smem>>
    %915 = vector.broadcast %914 : f32 to vector<2x256xf32>
    %916 = arith.mulf %915, %913 : vector<2x256xf32>
    %917 = arith.addf %896, %916 : vector<2x256xf32>
    %c1_483 = arith.constant 1 : index
    %c30_484 = arith.constant 30 : index
    %918 = memref.load %arg6[%c1_483, %c30_484] : memref<4x36xf32, #tpu.memory_space<smem>>
    %919 = vector.broadcast %918 : f32 to vector<2x256xf32>
    %920 = arith.mulf %919, %913 : vector<2x256xf32>
    %921 = arith.addf %900, %920 : vector<2x256xf32>
    %c2_485 = arith.constant 2 : index
    %c30_486 = arith.constant 30 : index
    %922 = memref.load %arg6[%c2_485, %c30_486] : memref<4x36xf32, #tpu.memory_space<smem>>
    %923 = vector.broadcast %922 : f32 to vector<2x256xf32>
    %924 = arith.mulf %923, %913 : vector<2x256xf32>
    %925 = arith.addf %904, %924 : vector<2x256xf32>
    %c3_487 = arith.constant 3 : index
    %c30_488 = arith.constant 30 : index
    %926 = memref.load %arg6[%c3_487, %c30_488] : memref<4x36xf32, #tpu.memory_space<smem>>
    %927 = vector.broadcast %926 : f32 to vector<2x256xf32>
    %928 = arith.mulf %927, %913 : vector<2x256xf32>
    %929 = arith.addf %908, %928 : vector<2x256xf32>
    %c4_489 = arith.constant 4 : index
    %c0_490 = arith.constant 0 : index
    %c0_491 = arith.constant 0 : index
    %930 = vector.load %arg9[%c4_489, %c0_490, %c0_491] : memref<9x1x256xf32, #tpu.memory_space<vmem>>, vector<1x1x256xf32>
    %931 = vector.shape_cast %930 : vector<1x1x256xf32> to vector<1x256xf32>
    %932 = vector.broadcast %931 : vector<1x256xf32> to vector<2x256xf32>
    %933 = arith.mulf %285, %932 : vector<2x256xf32>
    %c0_492 = arith.constant 0 : index
    %c31 = arith.constant 31 : index
    %934 = memref.load %arg6[%c0_492, %c31] : memref<4x36xf32, #tpu.memory_space<smem>>
    %935 = vector.broadcast %934 : f32 to vector<2x256xf32>
    %936 = arith.mulf %935, %933 : vector<2x256xf32>
    %937 = arith.addf %917, %936 : vector<2x256xf32>
    %c1_493 = arith.constant 1 : index
    %c31_494 = arith.constant 31 : index
    %938 = memref.load %arg6[%c1_493, %c31_494] : memref<4x36xf32, #tpu.memory_space<smem>>
    %939 = vector.broadcast %938 : f32 to vector<2x256xf32>
    %940 = arith.mulf %939, %933 : vector<2x256xf32>
    %941 = arith.addf %921, %940 : vector<2x256xf32>
    %c2_495 = arith.constant 2 : index
    %c31_496 = arith.constant 31 : index
    %942 = memref.load %arg6[%c2_495, %c31_496] : memref<4x36xf32, #tpu.memory_space<smem>>
    %943 = vector.broadcast %942 : f32 to vector<2x256xf32>
    %944 = arith.mulf %943, %933 : vector<2x256xf32>
    %945 = arith.addf %925, %944 : vector<2x256xf32>
    %c3_497 = arith.constant 3 : index
    %c31_498 = arith.constant 31 : index
    %946 = memref.load %arg6[%c3_497, %c31_498] : memref<4x36xf32, #tpu.memory_space<smem>>
    %947 = vector.broadcast %946 : f32 to vector<2x256xf32>
    %948 = arith.mulf %947, %933 : vector<2x256xf32>
    %949 = arith.addf %929, %948 : vector<2x256xf32>
    %c255_i32_499 = arith.constant 255 : i32
    %950 = tpu.dynamic_rotate %285 by %c255_i32_499 dim 1 : vector<2x256xf32>, i32 -> vector<2x256xf32>
    %c5_500 = arith.constant 5 : index
    %c0_501 = arith.constant 0 : index
    %c0_502 = arith.constant 0 : index
    %951 = vector.load %arg9[%c5_500, %c0_501, %c0_502] : memref<9x1x256xf32, #tpu.memory_space<vmem>>, vector<1x1x256xf32>
    %952 = vector.shape_cast %951 : vector<1x1x256xf32> to vector<1x256xf32>
    %953 = vector.broadcast %952 : vector<1x256xf32> to vector<2x256xf32>
    %954 = arith.mulf %950, %953 : vector<2x256xf32>
    %c0_503 = arith.constant 0 : index
    %c32 = arith.constant 32 : index
    %955 = memref.load %arg6[%c0_503, %c32] : memref<4x36xf32, #tpu.memory_space<smem>>
    %956 = vector.broadcast %955 : f32 to vector<2x256xf32>
    %957 = arith.mulf %956, %954 : vector<2x256xf32>
    %958 = arith.addf %937, %957 : vector<2x256xf32>
    %c1_504 = arith.constant 1 : index
    %c32_505 = arith.constant 32 : index
    %959 = memref.load %arg6[%c1_504, %c32_505] : memref<4x36xf32, #tpu.memory_space<smem>>
    %960 = vector.broadcast %959 : f32 to vector<2x256xf32>
    %961 = arith.mulf %960, %954 : vector<2x256xf32>
    %962 = arith.addf %941, %961 : vector<2x256xf32>
    %c2_506 = arith.constant 2 : index
    %c32_507 = arith.constant 32 : index
    %963 = memref.load %arg6[%c2_506, %c32_507] : memref<4x36xf32, #tpu.memory_space<smem>>
    %964 = vector.broadcast %963 : f32 to vector<2x256xf32>
    %965 = arith.mulf %964, %954 : vector<2x256xf32>
    %966 = arith.addf %945, %965 : vector<2x256xf32>
    %c3_508 = arith.constant 3 : index
    %c32_509 = arith.constant 32 : index
    %967 = memref.load %arg6[%c3_508, %c32_509] : memref<4x36xf32, #tpu.memory_space<smem>>
    %968 = vector.broadcast %967 : f32 to vector<2x256xf32>
    %969 = arith.mulf %968, %954 : vector<2x256xf32>
    %970 = arith.addf %949, %969 : vector<2x256xf32>
    %c243_i32_510 = arith.constant 243 : i32
    %971 = tpu.dynamic_rotate %285 by %c243_i32_510 dim 1 : vector<2x256xf32>, i32 -> vector<2x256xf32>
    %c6_511 = arith.constant 6 : index
    %c0_512 = arith.constant 0 : index
    %c0_513 = arith.constant 0 : index
    %972 = vector.load %arg9[%c6_511, %c0_512, %c0_513] : memref<9x1x256xf32, #tpu.memory_space<vmem>>, vector<1x1x256xf32>
    %973 = vector.shape_cast %972 : vector<1x1x256xf32> to vector<1x256xf32>
    %974 = vector.broadcast %973 : vector<1x256xf32> to vector<2x256xf32>
    %975 = arith.mulf %971, %974 : vector<2x256xf32>
    %c0_514 = arith.constant 0 : index
    %c33 = arith.constant 33 : index
    %976 = memref.load %arg6[%c0_514, %c33] : memref<4x36xf32, #tpu.memory_space<smem>>
    %977 = vector.broadcast %976 : f32 to vector<2x256xf32>
    %978 = arith.mulf %977, %975 : vector<2x256xf32>
    %979 = arith.addf %958, %978 : vector<2x256xf32>
    %c1_515 = arith.constant 1 : index
    %c33_516 = arith.constant 33 : index
    %980 = memref.load %arg6[%c1_515, %c33_516] : memref<4x36xf32, #tpu.memory_space<smem>>
    %981 = vector.broadcast %980 : f32 to vector<2x256xf32>
    %982 = arith.mulf %981, %975 : vector<2x256xf32>
    %983 = arith.addf %962, %982 : vector<2x256xf32>
    %c2_517 = arith.constant 2 : index
    %c33_518 = arith.constant 33 : index
    %984 = memref.load %arg6[%c2_517, %c33_518] : memref<4x36xf32, #tpu.memory_space<smem>>
    %985 = vector.broadcast %984 : f32 to vector<2x256xf32>
    %986 = arith.mulf %985, %975 : vector<2x256xf32>
    %987 = arith.addf %966, %986 : vector<2x256xf32>
    %c3_519 = arith.constant 3 : index
    %c33_520 = arith.constant 33 : index
    %988 = memref.load %arg6[%c3_519, %c33_520] : memref<4x36xf32, #tpu.memory_space<smem>>
    %989 = vector.broadcast %988 : f32 to vector<2x256xf32>
    %990 = arith.mulf %989, %975 : vector<2x256xf32>
    %991 = arith.addf %970, %990 : vector<2x256xf32>
    %c242_i32_521 = arith.constant 242 : i32
    %992 = tpu.dynamic_rotate %285 by %c242_i32_521 dim 1 : vector<2x256xf32>, i32 -> vector<2x256xf32>
    %c7_522 = arith.constant 7 : index
    %c0_523 = arith.constant 0 : index
    %c0_524 = arith.constant 0 : index
    %993 = vector.load %arg9[%c7_522, %c0_523, %c0_524] : memref<9x1x256xf32, #tpu.memory_space<vmem>>, vector<1x1x256xf32>
    %994 = vector.shape_cast %993 : vector<1x1x256xf32> to vector<1x256xf32>
    %995 = vector.broadcast %994 : vector<1x256xf32> to vector<2x256xf32>
    %996 = arith.mulf %992, %995 : vector<2x256xf32>
    %c0_525 = arith.constant 0 : index
    %c34 = arith.constant 34 : index
    %997 = memref.load %arg6[%c0_525, %c34] : memref<4x36xf32, #tpu.memory_space<smem>>
    %998 = vector.broadcast %997 : f32 to vector<2x256xf32>
    %999 = arith.mulf %998, %996 : vector<2x256xf32>
    %1000 = arith.addf %979, %999 : vector<2x256xf32>
    %c1_526 = arith.constant 1 : index
    %c34_527 = arith.constant 34 : index
    %1001 = memref.load %arg6[%c1_526, %c34_527] : memref<4x36xf32, #tpu.memory_space<smem>>
    %1002 = vector.broadcast %1001 : f32 to vector<2x256xf32>
    %1003 = arith.mulf %1002, %996 : vector<2x256xf32>
    %1004 = arith.addf %983, %1003 : vector<2x256xf32>
    %c2_528 = arith.constant 2 : index
    %c34_529 = arith.constant 34 : index
    %1005 = memref.load %arg6[%c2_528, %c34_529] : memref<4x36xf32, #tpu.memory_space<smem>>
    %1006 = vector.broadcast %1005 : f32 to vector<2x256xf32>
    %1007 = arith.mulf %1006, %996 : vector<2x256xf32>
    %1008 = arith.addf %987, %1007 : vector<2x256xf32>
    %c3_530 = arith.constant 3 : index
    %c34_531 = arith.constant 34 : index
    %1009 = memref.load %arg6[%c3_530, %c34_531] : memref<4x36xf32, #tpu.memory_space<smem>>
    %1010 = vector.broadcast %1009 : f32 to vector<2x256xf32>
    %1011 = arith.mulf %1010, %996 : vector<2x256xf32>
    %1012 = arith.addf %991, %1011 : vector<2x256xf32>
    %c241_i32_532 = arith.constant 241 : i32
    %1013 = tpu.dynamic_rotate %285 by %c241_i32_532 dim 1 : vector<2x256xf32>, i32 -> vector<2x256xf32>
    %c8_533 = arith.constant 8 : index
    %c0_534 = arith.constant 0 : index
    %c0_535 = arith.constant 0 : index
    %1014 = vector.load %arg9[%c8_533, %c0_534, %c0_535] : memref<9x1x256xf32, #tpu.memory_space<vmem>>, vector<1x1x256xf32>
    %1015 = vector.shape_cast %1014 : vector<1x1x256xf32> to vector<1x256xf32>
    %1016 = vector.broadcast %1015 : vector<1x256xf32> to vector<2x256xf32>
    %1017 = arith.mulf %1013, %1016 : vector<2x256xf32>
    %c0_536 = arith.constant 0 : index
    %c35 = arith.constant 35 : index
    %1018 = memref.load %arg6[%c0_536, %c35] : memref<4x36xf32, #tpu.memory_space<smem>>
    %1019 = vector.broadcast %1018 : f32 to vector<2x256xf32>
    %1020 = arith.mulf %1019, %1017 : vector<2x256xf32>
    %1021 = arith.addf %1000, %1020 : vector<2x256xf32>
    %c1_537 = arith.constant 1 : index
    %c35_538 = arith.constant 35 : index
    %1022 = memref.load %arg6[%c1_537, %c35_538] : memref<4x36xf32, #tpu.memory_space<smem>>
    %1023 = vector.broadcast %1022 : f32 to vector<2x256xf32>
    %1024 = arith.mulf %1023, %1017 : vector<2x256xf32>
    %1025 = arith.addf %1004, %1024 : vector<2x256xf32>
    %c2_539 = arith.constant 2 : index
    %c35_540 = arith.constant 35 : index
    %1026 = memref.load %arg6[%c2_539, %c35_540] : memref<4x36xf32, #tpu.memory_space<smem>>
    %1027 = vector.broadcast %1026 : f32 to vector<2x256xf32>
    %1028 = arith.mulf %1027, %1017 : vector<2x256xf32>
    %1029 = arith.addf %1008, %1028 : vector<2x256xf32>
    %c3_541 = arith.constant 3 : index
    %c35_542 = arith.constant 35 : index
    %1030 = memref.load %arg6[%c3_541, %c35_542] : memref<4x36xf32, #tpu.memory_space<smem>>
    %1031 = vector.broadcast %1030 : f32 to vector<2x256xf32>
    %1032 = arith.mulf %1031, %1017 : vector<2x256xf32>
    %1033 = arith.addf %1012, %1032 : vector<2x256xf32>
    %c0_543 = arith.constant 0 : index
    %c0_544 = arith.constant 0 : index
    %1034 = memref.load %arg7[%c0_543, %c0_544] : memref<1x4xf32, #tpu.memory_space<smem>>
    %1035 = vector.broadcast %1034 : f32 to vector<2x256xf32>
    %1036 = arith.addf %1021, %1035 : vector<2x256xf32>
    %c0_545 = arith.constant 0 : index
    %c1_546 = arith.constant 1 : index
    %1037 = memref.load %arg7[%c0_545, %c1_546] : memref<1x4xf32, #tpu.memory_space<smem>>
    %1038 = vector.broadcast %1037 : f32 to vector<2x256xf32>
    %1039 = arith.addf %1025, %1038 : vector<2x256xf32>
    %c0_547 = arith.constant 0 : index
    %c2_548 = arith.constant 2 : index
    %1040 = memref.load %arg7[%c0_547, %c2_548] : memref<1x4xf32, #tpu.memory_space<smem>>
    %1041 = vector.broadcast %1040 : f32 to vector<2x256xf32>
    %1042 = arith.addf %1029, %1041 : vector<2x256xf32>
    %c0_549 = arith.constant 0 : index
    %c3_550 = arith.constant 3 : index
    %1043 = memref.load %arg7[%c0_549, %c3_550] : memref<1x4xf32, #tpu.memory_space<smem>>
    %1044 = vector.broadcast %1043 : f32 to vector<2x256xf32>
    %1045 = arith.addf %1033, %1044 : vector<2x256xf32>
    %c0_551 = arith.constant 0 : index
    %c0_552 = arith.constant 0 : index
    %c0_553 = arith.constant 0 : index
    %1046 = vector.load %arg17[%c0_551, %c0_552, %c0_553] : memref<4x2x256xf32, #tpu.memory_space<vmem>>, vector<1x2x256xf32>
    %1047 = vector.shape_cast %1046 : vector<1x2x256xf32> to vector<2x256xf32>
    %cst_554 = arith.constant 5.000000e-01 : f32
    %1048 = vector.broadcast %cst_554 : f32 to vector<2x256xf32>
    %1049 = arith.cmpf ogt, %1047, %1048 : vector<2x256xf32>
    %1050 = arith.extui %1049 : vector<2x256xi1> to vector<2x256xi32>
    %1051 = arith.sitofp %1050 : vector<2x256xi32> to vector<2x256xf32>
    %cst_555 = arith.constant 2.000000e-01 : f32
    %1052 = vector.broadcast %cst_555 : f32 to vector<2x256xf32>
    %1053 = arith.mulf %1047, %1052 : vector<2x256xf32>
    %cst_556 = arith.constant 1.000000e+00 : f32
    %1054 = vector.broadcast %cst_556 : f32 to vector<2x256xf32>
    %1055 = arith.subf %1054, %1051 : vector<2x256xf32>
    %1056 = arith.mulf %1053, %1055 : vector<2x256xf32>
    %1057 = arith.addf %1056, %1036 : vector<2x256xf32>
    %c0_557 = arith.constant 0 : index
    %c0_558 = arith.constant 0 : index
    %c0_559 = arith.constant 0 : index
    %1058 = vector.load %arg17[%c0_557, %c0_558, %c0_559] : memref<4x2x256xf32, #tpu.memory_space<vmem>>, vector<1x2x256xf32>
    %1059 = vector.shape_cast %1058 : vector<1x2x256xf32> to vector<2x256xf32>
    %1060 = vector.shape_cast %1057 : vector<2x256xf32> to vector<1x2x256xf32>
    tpu.vector_store %arg17[%c0_557, %c0_558, %c0_559], %1060 {strides = array<i32>} : memref<4x2x256xf32, #tpu.memory_space<vmem>>, vector<1x2x256xf32>,
    %cst_560 = arith.constant 5.000000e-01 : f32
    %1061 = vector.broadcast %cst_560 : f32 to vector<2x256xf32>
    %1062 = arith.cmpf ogt, %1057, %1061 : vector<2x256xf32>
    %1063 = arith.extui %1062 : vector<2x256xi1> to vector<2x256xi32>
    %1064 = arith.sitofp %1063 : vector<2x256xi32> to vector<2x256xf32>
    %c1_561 = arith.constant 1 : index
    %c0_562 = arith.constant 0 : index
    %c0_563 = arith.constant 0 : index
    %1065 = vector.load %arg17[%c1_561, %c0_562, %c0_563] : memref<4x2x256xf32, #tpu.memory_space<vmem>>, vector<1x2x256xf32>
    %1066 = vector.shape_cast %1065 : vector<1x2x256xf32> to vector<2x256xf32>
    %cst_564 = arith.constant 5.000000e-01 : f32
    %1067 = vector.broadcast %cst_564 : f32 to vector<2x256xf32>
    %1068 = arith.cmpf ogt, %1066, %1067 : vector<2x256xf32>
    %1069 = arith.extui %1068 : vector<2x256xi1> to vector<2x256xi32>
    %1070 = arith.sitofp %1069 : vector<2x256xi32> to vector<2x256xf32>
    %cst_565 = arith.constant 2.000000e-01 : f32
    %1071 = vector.broadcast %cst_565 : f32 to vector<2x256xf32>
    %1072 = arith.mulf %1066, %1071 : vector<2x256xf32>
    %cst_566 = arith.constant 1.000000e+00 : f32
    %1073 = vector.broadcast %cst_566 : f32 to vector<2x256xf32>
    %1074 = arith.subf %1073, %1070 : vector<2x256xf32>
    %1075 = arith.mulf %1072, %1074 : vector<2x256xf32>
    %1076 = arith.addf %1075, %1039 : vector<2x256xf32>
    %c1_567 = arith.constant 1 : index
    %c0_568 = arith.constant 0 : index
    %c0_569 = arith.constant 0 : index
    %1077 = vector.load %arg17[%c1_567, %c0_568, %c0_569] : memref<4x2x256xf32, #tpu.memory_space<vmem>>, vector<1x2x256xf32>
    %1078 = vector.shape_cast %1077 : vector<1x2x256xf32> to vector<2x256xf32>
    %1079 = vector.shape_cast %1076 : vector<2x256xf32> to vector<1x2x256xf32>
    tpu.vector_store %arg17[%c1_567, %c0_568, %c0_569], %1079 {strides = array<i32>} : memref<4x2x256xf32, #tpu.memory_space<vmem>>, vector<1x2x256xf32>,
    %cst_570 = arith.constant 5.000000e-01 : f32
    %1080 = vector.broadcast %cst_570 : f32 to vector<2x256xf32>
    %1081 = arith.cmpf ogt, %1076, %1080 : vector<2x256xf32>
    %1082 = arith.extui %1081 : vector<2x256xi1> to vector<2x256xi32>
    %1083 = arith.sitofp %1082 : vector<2x256xi32> to vector<2x256xf32>
    %c2_571 = arith.constant 2 : index
    %c0_572 = arith.constant 0 : index
    %c0_573 = arith.constant 0 : index
    %1084 = vector.load %arg17[%c2_571, %c0_572, %c0_573] : memref<4x2x256xf32, #tpu.memory_space<vmem>>, vector<1x2x256xf32>
    %1085 = vector.shape_cast %1084 : vector<1x2x256xf32> to vector<2x256xf32>
    %cst_574 = arith.constant 5.000000e-01 : f32
    %1086 = vector.broadcast %cst_574 : f32 to vector<2x256xf32>
    %1087 = arith.cmpf ogt, %1085, %1086 : vector<2x256xf32>
    %1088 = arith.extui %1087 : vector<2x256xi1> to vector<2x256xi32>
    %1089 = arith.sitofp %1088 : vector<2x256xi32> to vector<2x256xf32>
    %cst_575 = arith.constant 2.000000e-01 : f32
    %1090 = vector.broadcast %cst_575 : f32 to vector<2x256xf32>
    %1091 = arith.mulf %1085, %1090 : vector<2x256xf32>
    %cst_576 = arith.constant 1.000000e+00 : f32
    %1092 = vector.broadcast %cst_576 : f32 to vector<2x256xf32>
    %1093 = arith.subf %1092, %1089 : vector<2x256xf32>
    %1094 = arith.mulf %1091, %1093 : vector<2x256xf32>
    %1095 = arith.addf %1094, %1042 : vector<2x256xf32>
    %c2_577 = arith.constant 2 : index
    %c0_578 = arith.constant 0 : index
    %c0_579 = arith.constant 0 : index
    %1096 = vector.load %arg17[%c2_577, %c0_578, %c0_579] : memref<4x2x256xf32, #tpu.memory_space<vmem>>, vector<1x2x256xf32>
    %1097 = vector.shape_cast %1096 : vector<1x2x256xf32> to vector<2x256xf32>
    %1098 = vector.shape_cast %1095 : vector<2x256xf32> to vector<1x2x256xf32>
    tpu.vector_store %arg17[%c2_577, %c0_578, %c0_579], %1098 {strides = array<i32>} : memref<4x2x256xf32, #tpu.memory_space<vmem>>, vector<1x2x256xf32>,
    %cst_580 = arith.constant 5.000000e-01 : f32
    %1099 = vector.broadcast %cst_580 : f32 to vector<2x256xf32>
    %1100 = arith.cmpf ogt, %1095, %1099 : vector<2x256xf32>
    %1101 = arith.extui %1100 : vector<2x256xi1> to vector<2x256xi32>
    %1102 = arith.sitofp %1101 : vector<2x256xi32> to vector<2x256xf32>
    %c3_581 = arith.constant 3 : index
    %c0_582 = arith.constant 0 : index
    %c0_583 = arith.constant 0 : index
    %1103 = vector.load %arg17[%c3_581, %c0_582, %c0_583] : memref<4x2x256xf32, #tpu.memory_space<vmem>>, vector<1x2x256xf32>
    %1104 = vector.shape_cast %1103 : vector<1x2x256xf32> to vector<2x256xf32>
    %cst_584 = arith.constant 5.000000e-01 : f32
    %1105 = vector.broadcast %cst_584 : f32 to vector<2x256xf32>
    %1106 = arith.cmpf ogt, %1104, %1105 : vector<2x256xf32>
    %1107 = arith.extui %1106 : vector<2x256xi1> to vector<2x256xi32>
    %1108 = arith.sitofp %1107 : vector<2x256xi32> to vector<2x256xf32>
    %cst_585 = arith.constant 2.000000e-01 : f32
    %1109 = vector.broadcast %cst_585 : f32 to vector<2x256xf32>
    %1110 = arith.mulf %1104, %1109 : vector<2x256xf32>
    %cst_586 = arith.constant 1.000000e+00 : f32
    %1111 = vector.broadcast %cst_586 : f32 to vector<2x256xf32>
    %1112 = arith.subf %1111, %1108 : vector<2x256xf32>
    %1113 = arith.mulf %1110, %1112 : vector<2x256xf32>
    %1114 = arith.addf %1113, %1045 : vector<2x256xf32>
    %c3_587 = arith.constant 3 : index
    %c0_588 = arith.constant 0 : index
    %c0_589 = arith.constant 0 : index
    %1115 = vector.load %arg17[%c3_587, %c0_588, %c0_589] : memref<4x2x256xf32, #tpu.memory_space<vmem>>, vector<1x2x256xf32>
    %1116 = vector.shape_cast %1115 : vector<1x2x256xf32> to vector<2x256xf32>
    %1117 = vector.shape_cast %1114 : vector<2x256xf32> to vector<1x2x256xf32>
    tpu.vector_store %arg17[%c3_587, %c0_588, %c0_589], %1117 {strides = array<i32>} : memref<4x2x256xf32, #tpu.memory_space<vmem>>, vector<1x2x256xf32>,
    %cst_590 = arith.constant 5.000000e-01 : f32
    %1118 = vector.broadcast %cst_590 : f32 to vector<2x256xf32>
    %1119 = arith.cmpf ogt, %1114, %1118 : vector<2x256xf32>
    %1120 = arith.extui %1119 : vector<2x256xi1> to vector<2x256xi32>
    %1121 = arith.sitofp %1120 : vector<2x256xi32> to vector<2x256xf32>
    %1122 = tpu.concatenate %1064, %1083, %1102, %1121 in 1 : vector<2x256xf32>, vector<2x256xf32>, vector<2x256xf32>, vector<2x256xf32> -> vector<2x1024xf32>
    %c0_591 = arith.constant 0 : index
    %c0_592 = arith.constant 0 : index
    %1123 = vector.load %arg12[%c0_591, %c0_592] : memref<1x144xf32, #tpu.memory_space<vmem>>, vector<1x144xf32>
    %c0_593 = arith.constant 0 : index
    %c0_594 = arith.constant 0 : index
    %1124 = vector.load %arg11[%c0_593, %c0_594] : memref<1024x144xf32, #tpu.memory_space<vmem>>, vector<1024x144xf32>
    %cst_595 = arith.constant dense<0.000000e+00> : vector<2x144xf32>
    %1125 = tpu.matmul %1122, %1124, %cst_595 {dimension_numbers = #tpu.dot_dimension_numbers<[1], [0], [0], [1], [0, 0, 1, 1], [], []>} : vector<2x1024xf32>, vector<1024x144xf32>, vector<2x144xf32> -> vector<2x144xf32>
    %1126 = vector.broadcast %1123 : vector<1x144xf32> to vector<2x144xf32>
    %1127 = arith.addf %1126, %1125 : vector<2x144xf32>
    %c0_596 = arith.constant 0 : index
    %c0_597 = arith.constant 0 : index
    %1128 = vector.load %arg18[%c0_596, %c0_597] : memref<2x144xf32, #tpu.memory_space<vmem>>, vector<2x144xf32>
    %cst_598 = arith.constant 5.000000e-01 : f32
    %1129 = vector.broadcast %cst_598 : f32 to vector<2x144xf32>
    %1130 = arith.cmpf ogt, %1128, %1129 : vector<2x144xf32>
    %1131 = arith.extui %1130 : vector<2x144xi1> to vector<2x144xi32>
    %1132 = arith.sitofp %1131 : vector<2x144xi32> to vector<2x144xf32>
    %cst_599 = arith.constant 2.000000e-01 : f32
    %1133 = vector.broadcast %cst_599 : f32 to vector<2x144xf32>
    %1134 = arith.mulf %1128, %1133 : vector<2x144xf32>
    %cst_600 = arith.constant 1.000000e+00 : f32
    %1135 = vector.broadcast %cst_600 : f32 to vector<2x144xf32>
    %1136 = arith.subf %1135, %1132 : vector<2x144xf32>
    %1137 = arith.mulf %1134, %1136 : vector<2x144xf32>
    %1138 = arith.addf %1137, %1127 : vector<2x144xf32>
    %c0_601 = arith.constant 0 : index
    %c0_602 = arith.constant 0 : index
    %1139 = vector.load %arg18[%c0_601, %c0_602] : memref<2x144xf32, #tpu.memory_space<vmem>>, vector<2x144xf32>
    tpu.vector_store %arg18[%c0_601, %c0_602], %1138 {strides = array<i32>} : memref<2x144xf32, #tpu.memory_space<vmem>>, vector<2x144xf32>,
    %cst_603 = arith.constant 5.000000e-01 : f32
    %1140 = vector.broadcast %cst_603 : f32 to vector<2x144xf32>
    %1141 = arith.cmpf ogt, %1138, %1140 : vector<2x144xf32>
    %1142 = arith.extui %1141 : vector<2x144xi1> to vector<2x144xi32>
    %1143 = arith.sitofp %1142 : vector<2x144xi32> to vector<2x144xf32>
    %c0_604 = arith.constant 0 : index
    %c0_605 = arith.constant 0 : index
    %1144 = vector.load %arg14[%c0_604, %c0_605] : memref<1x10xf32, #tpu.memory_space<vmem>>, vector<1x10xf32>
    %c0_606 = arith.constant 0 : index
    %c0_607 = arith.constant 0 : index
    %1145 = vector.load %arg13[%c0_606, %c0_607] : memref<144x10xf32, #tpu.memory_space<vmem>>, vector<144x10xf32>
    %cst_608 = arith.constant dense<0.000000e+00> : vector<2x10xf32>
    %1146 = tpu.matmul %1143, %1145, %cst_608 {dimension_numbers = #tpu.dot_dimension_numbers<[1], [0], [0], [1], [0, 0, 1, 1], [], []>} : vector<2x144xf32>, vector<144x10xf32>, vector<2x10xf32> -> vector<2x10xf32>
    %1147 = vector.broadcast %1144 : vector<1x10xf32> to vector<2x10xf32>
    %1148 = arith.addf %1147, %1146 : vector<2x10xf32>
    %c0_609 = arith.constant 0 : index
    %c0_610 = arith.constant 0 : index
    %1149 = vector.load %arg19[%c0_609, %c0_610] : memref<2x10xf32, #tpu.memory_space<vmem>>, vector<2x10xf32>
    %cst_611 = arith.constant 5.000000e-01 : f32
    %1150 = vector.broadcast %cst_611 : f32 to vector<2x10xf32>
    %1151 = arith.cmpf ogt, %1149, %1150 : vector<2x10xf32>
    %1152 = arith.extui %1151 : vector<2x10xi1> to vector<2x10xi32>
    %1153 = arith.sitofp %1152 : vector<2x10xi32> to vector<2x10xf32>
    %cst_612 = arith.constant 2.000000e-01 : f32
    %1154 = vector.broadcast %cst_612 : f32 to vector<2x10xf32>
    %1155 = arith.mulf %1149, %1154 : vector<2x10xf32>
    %cst_613 = arith.constant 1.000000e+00 : f32
    %1156 = vector.broadcast %cst_613 : f32 to vector<2x10xf32>
    %1157 = arith.subf %1156, %1153 : vector<2x10xf32>
    %1158 = arith.mulf %1155, %1157 : vector<2x10xf32>
    %1159 = arith.addf %1158, %1148 : vector<2x10xf32>
    %c0_614 = arith.constant 0 : index
    %c0_615 = arith.constant 0 : index
    %1160 = vector.load %arg19[%c0_614, %c0_615] : memref<2x10xf32, #tpu.memory_space<vmem>>, vector<2x10xf32>
    tpu.vector_store %arg19[%c0_614, %c0_615], %1159 {strides = array<i32>} : memref<2x10xf32, #tpu.memory_space<vmem>>, vector<2x10xf32>,
    %cst_616 = arith.constant 5.000000e-01 : f32
    %1161 = vector.broadcast %cst_616 : f32 to vector<2x10xf32>
    %1162 = arith.cmpf ogt, %1159, %1161 : vector<2x10xf32>
    %1163 = arith.extui %1162 : vector<2x10xi1> to vector<2x10xi32>
    %1164 = arith.sitofp %1163 : vector<2x10xi32> to vector<2x10xf32>
    %c0_617 = arith.constant 0 : index
    %c0_618 = arith.constant 0 : index
    %1165 = vector.load %arg15[%c0_617, %c0_618] : memref<2x10xf32, #tpu.memory_space<vmem>>, vector<2x10xf32>
    %1166 = arith.addf %1165, %1164 : vector<2x10xf32>
    %c0_619 = arith.constant 0 : index
    %c0_620 = arith.constant 0 : index
    %1167 = vector.load %arg15[%c0_619, %c0_620] : memref<2x10xf32, #tpu.memory_space<vmem>>, vector<2x10xf32>
    tpu.vector_store %arg15[%c0_619, %c0_620], %1166 {strides = array<i32>} : memref<2x10xf32, #tpu.memory_space<vmem>>, vector<2x10xf32>,
    %c9_i32 = arith.constant 9 : i32
    %1168 = arith.cmpi eq, %arg1, %c9_i32 : i32
    %1169 = arith.extui %1168 : i1 to i32
    %c0_i32_621 = arith.constant 0 : i32
    %1170 = arith.cmpi ne, %1169, %c0_i32_621 : i32
    scf.if %1170 {
      %c0_622 = arith.constant 0 : index
      %c0_623 = arith.constant 0 : index
      %1171 = vector.load %arg15[%c0_622, %c0_623] : memref<2x10xf32, #tpu.memory_space<vmem>>, vector<2x10xf32>
      %cst_624 = arith.constant 1.000000e-01 : f32
      %1172 = vector.broadcast %cst_624 : f32 to vector<2x10xf32>
      %1173 = arith.mulf %1171, %1172 : vector<2x10xf32>
      %c0_625 = arith.constant 0 : index
      %c0_626 = arith.constant 0 : index
      %1174 = vector.load %arg15[%c0_625, %c0_626] : memref<2x10xf32, #tpu.memory_space<vmem>>, vector<2x10xf32>
      tpu.vector_store %arg15[%c0_625, %c0_626], %1173 {strides = array<i32>} : memref<2x10xf32, #tpu.memory_space<vmem>>, vector<2x10xf32>,
    } else {
    }
    return
  }
  func.func @transform_0(%arg0: i32, %arg1: i32) -> (i32, i32) {
    %c0_i32 = arith.constant 0 : i32
    %c0_i32_0 = arith.constant 0 : i32
    return %arg0, %c0_i32 : i32, i32
  }
  func.func @transform_1(%arg0: i32, %arg1: i32) -> (i32, i32, i32) {
    %c0_i32 = arith.constant 0 : i32
    %c0_i32_0 = arith.constant 0 : i32
    return %arg1, %arg0, %c0_i32 : i32, i32, i32
  }
  func.func @transform_2(%arg0: i32, %arg1: i32) -> (i32, i32) {
    %c0_i32 = arith.constant 0 : i32
    %c0_i32_0 = arith.constant 0 : i32
    %c0_i32_1 = arith.constant 0 : i32
    return %c0_i32, %c0_i32_0 : i32, i32
  }
  func.func @transform_3(%arg0: i32, %arg1: i32) -> (i32, i32) {
    %c0_i32 = arith.constant 0 : i32
    %c0_i32_0 = arith.constant 0 : i32
    %c0_i32_1 = arith.constant 0 : i32
    return %c0_i32, %c0_i32_0 : i32, i32
  }
  func.func @transform_4(%arg0: i32, %arg1: i32) -> (i32, i32) {
    %c0_i32 = arith.constant 0 : i32
    %c0_i32_0 = arith.constant 0 : i32
    %c0_i32_1 = arith.constant 0 : i32
    return %c0_i32, %c0_i32_0 : i32, i32
  }
  func.func @transform_5(%arg0: i32, %arg1: i32) -> (i32, i32) {
    %c0_i32 = arith.constant 0 : i32
    %c0_i32_0 = arith.constant 0 : i32
    %c0_i32_1 = arith.constant 0 : i32
    return %c0_i32, %c0_i32_0 : i32, i32
  }
  func.func @transform_6(%arg0: i32, %arg1: i32) -> (i32, i32, i32) {
    %c0_i32 = arith.constant 0 : i32
    %c0_i32_0 = arith.constant 0 : i32
    %c0_i32_1 = arith.constant 0 : i32
    %c0_i32_2 = arith.constant 0 : i32
    return %c0_i32, %c0_i32_0, %c0_i32_1 : i32, i32, i32
  }
  func.func @transform_7(%arg0: i32, %arg1: i32) -> (i32, i32, i32) {
    %c0_i32 = arith.constant 0 : i32
    %c0_i32_0 = arith.constant 0 : i32
    %c0_i32_1 = arith.constant 0 : i32
    %c0_i32_2 = arith.constant 0 : i32
    return %c0_i32, %c0_i32_0, %c0_i32_1 : i32, i32, i32
  }
  func.func @transform_8(%arg0: i32, %arg1: i32) -> (i32, i32) {
    %c0_i32 = arith.constant 0 : i32
    %c0_i32_0 = arith.constant 0 : i32
    %c0_i32_1 = arith.constant 0 : i32
    return %c0_i32, %c0_i32_0 : i32, i32
  }
  func.func @transform_9(%arg0: i32, %arg1: i32) -> (i32, i32) {
    %c0_i32 = arith.constant 0 : i32
    %c0_i32_0 = arith.constant 0 : i32
    %c0_i32_1 = arith.constant 0 : i32
    return %c0_i32, %c0_i32_0 : i32, i32
  }
  func.func @transform_10(%arg0: i32, %arg1: i32) -> (i32, i32) {
    %c0_i32 = arith.constant 0 : i32
    %c0_i32_0 = arith.constant 0 : i32
    %c0_i32_1 = arith.constant 0 : i32
    return %c0_i32, %c0_i32_0 : i32, i32
  }
  func.func @transform_11(%arg0: i32, %arg1: i32) -> (i32, i32) {
    %c0_i32 = arith.constant 0 : i32
    %c0_i32_0 = arith.constant 0 : i32
    %c0_i32_1 = arith.constant 0 : i32
    return %c0_i32, %c0_i32_0 : i32, i32
  }
  func.func @transform_12(%arg0: i32, %arg1: i32) -> (i32, i32) {
    %c0_i32 = arith.constant 0 : i32
    %c0_i32_0 = arith.constant 0 : i32
    %c0_i32_1 = arith.constant 0 : i32
    return %c0_i32, %c0_i32_0 : i32, i32
  }
  func.func @transform_13(%arg0: i32, %arg1: i32) -> (i32, i32) {
    %c0_i32 = arith.constant 0 : i32
    %c0_i32_0 = arith.constant 0 : i32
    return %arg0, %c0_i32 : i32, i32
  }
}

</mosaic_0001>

<bundles_post_ra>
// kernel: scnn_forward.1
= control target key start
LH: loop header
LB: loop body
LE: loop exit
PB: predicated region body
PF: predicated region fallthrough
CT: control target
= control target key end

     0   :  { %s13419_s0 = inlined_call_operand.vmem [shape: f32[2,896], index: 0, kind: input, shape index: {}]   ;;  %s13420_s1 = inlined_call_operand.vmem [shape: f32[10,2,896], index: 1, kind: input, shape index: {}]   ;;  %s13421_s2 = inlined_call_operand.vmem [shape: f32[4,9], index: 2, kind: input, shape index: {}]   ;;  %s13422_s3 = inlined_call_operand.vmem [shape: f32[1,4], index: 3, kind: input, shape index: {}]   ;;  %s13423_s4 = inlined_call_operand.vmem [shape: f32[4,36], index: 4, kind: input, shape index: {}]   ;;  %s13424_s5 = inlined_call_operand.vmem [shape: f32[1,4], index: 5, kind: input, shape index: {}]   ;;  %s13425_s6 = inlined_call_operand.vmem [shape: f32[9,1,896], index: 6, kind: input, shape index: {}]   ;;  %s13426_s7 = inlined_call_operand.vmem [shape: f32[9,1,256], index: 7, kind: input, shape index: {}]   ;;  %s13427_s8 = inlined_call_operand.vmem [shape: f32[896,256], index: 8, kind: input, shape index: {}]   ;;  %s13428_s9 = inlined_call_operand.vmem [shape: f32[1024,144], index: 9, kind: input, shape index: {}]   ;;  %s13429_s10 = inlined_call_operand.vmem [shape: f32[1,144], index: 10, kind: input, shape index: {}]   ;;  %s13430_s11 = inlined_call_operand.vmem [shape: f32[144,10], index: 11, kind: input, shape index: {}]   ;;  %s13431_s12 = inlined_call_operand.vmem [shape: f32[1,10], index: 12, kind: input, shape index: {}]   ;;  %s13432_s13 = inlined_call_operand.hbm [shape: f32[2,10], index: 13, kind: output, shape index: {}]  }
   0x1   :  { %13918 = sst [smem:[#allocation184_spill]] %s13419_s0 }
   0x2   :  { %13919 = sst [smem:[#allocation185_spill]] %s13420_s1 }
   0x3   :  { %13920 = sst [smem:[#allocation186_spill]] %s13421_s2 }
   0x4   :  { %13921 = sst [smem:[#allocation187_spill]] %s13422_s3 }
   0x5   :  { %13922 = sst [smem:[#allocation188_spill]] %s13423_s4 }
   0x6   :  { %13923 = sst [smem:[#allocation189_spill]] %s13424_s5 }
   0x7   :  { %13924 = sst [smem:[#allocation190_spill]] %s13425_s6 }
   0x8   :  { %13925 = sst [smem:[#allocation191_spill]] %s13426_s7 }
   0x9   :  { %13926 = sst [smem:[#allocation192_spill]] %s13427_s8 }
   0xa   :  { %13927 = sst [smem:[#allocation193_spill]] %s13428_s9 }
   0xb   :  { %13928 = sst [smem:[#allocation194_spill]] %s13429_s10 }
   0xc   :  { %13929 = sst [smem:[#allocation195_spill]] %s13430_s11 }
   0xd   :  { %13930 = sst [smem:[#allocation196_spill]] %s13431_s12 }
   0xe   :  { %13931 = sst [smem:[#allocation197_spill]] %s13432_s13 }
   0xf   :  { %18 = vsyncpa [#allocation8], 0 }
  0x10   :  { %19 = vsyncpa [#allocation10], 0 }
  0x11   :  { %20 = vsyncpa [#allocation13], 0 }
  0x12   :  { %21 = vsyncpa [#allocation7], 0  ;;  %s7783_s25 = smov 0   ;;  %s7785_s26 = smov 0  }
  0x13   :  { %s7787_s27 = smov 0  }
  0x14 LB: > { %13932 = sst [smem:[#allocation19_spill]] %s7680_s25  ;;  %s13935_s3 = sld [smem:[#allocation187_spill]]  ;;  %s7688_s27 = sphi %s7787_s27, %s27_s27   ;;  %s7684_s26 = sphi %s7785_s26, %s14788_s26   ;;  %s7680_s25 = sphi %s7783_s25, %s14787_s25  }
  0x15   : > { %13933 = sst [smem:[#allocation20_spill]] %s7684_s26  ;;  %s13436_s14 = sadd.s32 4294967295, %s7688_s27  }
  0x16   : > { %13934 = sst [smem:[#allocation21_spill]] %s7688_s27  ;;  %p5971_p0 = scmp.ge.s32.totalorder %s7688_s27, 1 }
  0x17   : > { %p355_p1 = scmp.lt.s32.totalorder %s7688_s27, 11  ;;  %p7806_p2 = scmp.eq.s32.totalorder %s13436_s14, 0 }
  0x18   : > { %s36_s17 = sadd.s32 1, %s7684_s26  ;;  %s13938_s2 = sld [smem:[#allocation186_spill]] }
  0x19   : > { %s13936_s15 = scalar_select %p7806_p2, 1, 0 }
  0x1a   : > { %s387_s30 = sshll.u32 %s13935_s3, 4  ;;  %p7810_p3 = pnand %p5971_p0, %p355_p1  ;;  %s388_s30 = int_to_ptr.vmem [resolvable:$true] %s387_s30 }
  0x1b   : > { %p7826_p6 = scmp.ge.s32.totalorder %s36_s17, 10  ;;  %s13941_s4 = sld [smem:[#allocation188_spill]] }
  0x1c   : > { %s13937_s16 = scalar_select %p7810_p3, 1, 0 }
  0x1d   : > { %p7452_p4 = pneg %p7810_p3  ;;  %s7564_s29 = scalar_lea.vmem %s388_s30, 16 }
  0x1e   : > { %s376_s20 = sshll.u32 %s13938_s2, 4  ;;  %p7565_p7 = scmp.ne.s32.totalorder %s388_s30, %s7564_s29  ;;  %s377_s20 = int_to_ptr.vmem [resolvable:$true] %s376_s20 }
  0x1f   : > { %p7822_p5 = pnand %p7806_p2, %p7452_p4  ;;  %p7572_p11 = scmp.lt.s32.totalorder %s388_s30, %s388_s30 }
  0x20   : > { %p7573_p12 = scmp.lt.s32.totalorder %s7564_s29, %s7564_s29 }
  0x21   : > { %s398_s28 = sshll.u32 %s13941_s4, 4  ;;  %p7566_p8 = pneg %p7822_p5  ;;  %s399_s28 = int_to_ptr.vmem [resolvable:$true] %s398_s28 }
  0x22   : > { %p7574_p13 = por %p7573_p12, %p7572_p11 }
  0x23   : > { %p7567_p9 = pnand %p7566_p8, %p7565_p7 }
  0x25   : > { %p7568_p10 = pneg %p7567_p9 }
  0x27   : > { %p7575_p0 = pnand %p7574_p13, %p7568_p10 }
  0x29   : > { %7578 = shalt.err (!%p7575_p0)
}
  0x2a   : > { %s7690_s18 = smov [#allocation9]   ;;  %s14790_s17 = smov (%p7826_p6, %s36_s17), 0 }
  0x2b   : > { %7458 = dma.vmem_to_smem (!%p7822_p5), %s388_s30, 16, %s7690_s18, [#allocation10]  }
  0x2c   : > { %13942 = sst [smem:[#allocation22_spill]] %s14790_s17  ;;  %s7579_s19 = scalar_lea.vmem %s377_s20, 64 }
  0x2d   : > { %p7580_p1 = scmp.ne.s32.totalorder %s377_s20, %s7579_s19  ;;  %p7587_p9 = scmp.lt.s32.totalorder %s377_s20, %s377_s20 }
  0x2e   : > { %p7588_p2 = scmp.lt.s32.totalorder %s7579_s19, %s7579_s19 }
  0x2f   : > { %p7582_p4 = pnand %p7580_p1, %p7566_p8 }
  0x30   : > { %p7589_p11 = por %p7588_p2, %p7587_p9 }
  0x31   : > { %p7583_p7 = pneg %p7582_p4 }
  0x33   : > { %p7590_p10 = pnand %p7589_p11, %p7583_p7 }
  0x35   : > { %7593 = shalt.err (!%p7590_p10)
}
  0x36   : > { %s7691_s23 = smov [#allocation6]   ;;  %s7594_s30 = scalar_lea.vmem %s399_s28, 64 }
  0x37   : > { %7455 = dma.vmem_to_smem (!%p7822_p5), %s377_s20, 64, %s7691_s23, [#allocation8]  }
  0x38   : > { %p7595_p6 = scmp.ne.s32.totalorder %s399_s28, %s7594_s30  ;;  %p7602_p0 = scmp.lt.s32.totalorder %s399_s28, %s399_s28 }
  0x39   : > { %p7603_p1 = scmp.lt.s32.totalorder %s7594_s30, %s7594_s30 }
  0x3a   : > { %p7597_p12 = pnand %p7595_p6, %p7566_p8 }
  0x3b   : > { %p7604_p4 = por %p7603_p1, %p7602_p0 }
  0x3c   : > { %p7598_p13 = pneg %p7597_p12 }
  0x3e   : > { %p7605_p3 = pnand %p7604_p4, %p7598_p13 }
  0x40   : > { %7608 = shalt.err (!%p7605_p3)
}
  0x41   : > { %s7692_s22 = smov [#allocation11]   ;;  %s13943_s5 = sld [smem:[#allocation189_spill]] }
  0x42   : > { %7461 = dma.vmem_to_smem (!%p7822_p5), %s399_s28, 64, %s7692_s22, [#allocation10]  }
  0x47   : > { %s409_s20 = sshll.u32 %s13943_s5, 4  ;;  %s410_s20 = int_to_ptr.vmem [resolvable:$true] %s409_s20 }
  0x48   : > { %s7609_s18 = scalar_lea.vmem %s410_s20, 16  ;;  %p7617_p11 = scmp.lt.s32.totalorder %s410_s20, %s410_s20 }
  0x49   : > { %p7610_p2 = scmp.ne.s32.totalorder %s410_s20, %s7609_s18  ;;  %p7618_p10 = scmp.lt.s32.totalorder %s7609_s18, %s7609_s18 }
  0x4b   : > { %p7612_p7 = pnand %p7610_p2, %p7566_p8  ;;  %p7619_p6 = por %p7618_p10, %p7617_p11 }
  0x4d   : > { %p7613_p9 = pneg %p7612_p7 }
  0x4f   : > { %p7620_p3 = pnand %p7619_p6, %p7613_p9 }
  0x51   : > { %7623 = shalt.err (!%p7620_p3)
}
  0x52   : > { %s7693_s19 = smov [#allocation12]   ;;  %p13944_p12 = scmp.ne.s32.totalorder %s13937_s16, 0 }
  0x53   : > { %7464 = dma.vmem_to_smem (!%p7822_p5), %s410_s20, 16, %s7693_s19, [#allocation13]  }
  0x54   : > { %455 = sbr.rel (%p13944_p12) target bundleno = 1975 (0x7b7), region = 72 }
  0x5b   : > { %p13945_p13 = scmp.ne.s32.totalorder %s13936_s15, 0 }
  0x5d   : > { %7663 = dma.done.wait (%p13945_p13), [#allocation8], 64  }
  0x5e   : > { %7665 = vsyncadd (%p13945_p13), [#allocation8], 4294967232 }
  0x5f   : > { %7667 = dma.done.wait (%p13945_p13), [#allocation10], 80  }
  0x60   : > { %7669 = vsyncadd (%p13945_p13), [#allocation10], 4294967216 }
  0x61   : > { %7671 = dma.done.wait (%p13945_p13), [#allocation13], 16  }
  0x62   : > { %7673 = vsyncadd (%p13945_p13), [#allocation13], 4294967280 }
  0x63   : > { %473 = sfence }
  0x64   : > { %p521_p5 = scmp.lt.s32.totalorder %s7680_s25, 9  ;;  %s13946_s1 = sld [smem:[#allocation185_spill]] }
  0x65   : > { %p5984_p8 = scmp.ne.s32.totalorder %s7680_s25, 0 }
  0x66   : > { %s522_s16 = scalar_select %p521_p5, %s7680_s25, 9 }
  0x67   : > { %533 = sbr.rel (%p5984_p8) target bundleno = 113 (0x71), region = 92  ;;  %vm546_vm0 = vcmask (!%p5984_p8), 1041408   ;;  %vm547_vm1 = vcmask (!%p5984_p8), 125954   ;;  %vm550_vm2 = vcmask (!%p5984_p8), 74752   ;;  %v7694_v0 = vmov (!%p5984_p8), 0.0  }
  0x68   : > { %s7431_s21 = smul.u32 14, %s522_s16  ;;  %534 = vst [vmem:[#allocation2] sm:$0xff] (!%p5984_p8), %v7694_v0  ;;  %535 = vst [vmem:[#allocation2 + $0x8] sm:$0x3f] (!%p5984_p8), %v7694_v0 }
  0x69   : > { %536 = vst [vmem:[#allocation2 + $0xe] sm:$0xff] (!%p5984_p8), %v7694_v0  ;;  %537 = vst [vmem:[#allocation2 + $0x16] sm:$0x3f] (!%p5984_p8), %v7694_v0 }
  0x6a   : > { %s529_s30 = scalar_lea.vmem %s13946_s1, %s7431_s21  ;;  %538 = vst [vmem:[#allocation2 + $0x1c] sm:$0xff] (!%p5984_p8), %v7694_v0  ;;  %539 = vst [vmem:[#allocation2 + $0x24] sm:$0x3f] (!%p5984_p8), %v7694_v0 }
  0x6b   : > { %540 = vst [vmem:[#allocation2 + $0x2a] sm:$0xff] (!%p5984_p8), %v7694_v0  ;;  %541 = vst [vmem:[#allocation2 + $0x32] sm:$0x3f] (!%p5984_p8), %v7694_v0 }
  0x6c   : > { %542 = vst [vmem:[#allocation3] sm:$0xf] (!%p5984_p8), %v7694_v0  ;;  %543 = vst [vmem:[#allocation3 + $0x4] sm:$0xf] (!%p5984_p8), %v7694_v0 }
  0x6d   : > { %544 = vst [vmem:[#allocation3 + $0x8] sm:$0xf] (!%p5984_p8), %v7694_v0  ;;  %545 = vst [vmem:[#allocation3 + $0xc] sm:$0xf] (!%p5984_p8), %v7694_v0 }
  0x6e   : > { %vm548_vm3 = vmor %vm547_vm1, %vm546_vm0  ;;  %551 = vst.msk [vmem:[#allocation5] sm:$0x3] %vm550_vm2, %v7694_v0 }
  0x6f   : > { %552 = vst.msk [vmem:[#allocation14] sm:$0x3] %vm550_vm2, %v7694_v0 }
  0x70   : > { %549 = vst.msk [vmem:[#allocation4] sm:$0xf] %vm548_vm3, %v7694_v0 }
  0x71 PF: > { %s13947_s0 = sld [smem:[#allocation184_spill]]  ;;  %v556_v2 = vld [vmem:[%s529_s30 + $0x8] sm:$0x3f]  ;;  %v13445_v3 = vlaneseq  ;;  %v555_v5 = vld [vmem:[%s529_s30] sm:$0xff]  ;;  %v13443_v6 = vmov 0.0   ;;  %s7697_s20 = smov 29  }
  0x72   : > { %v7696_v8 = vmov 1983009808   ;;  %s7698_s18 = smov 28   ;;  %s13949_s8 = sld [smem:[#allocation192_spill]] }
  0x73   : > { %v567_v9 = vunpack.c.l.s4 %v7696_v8  ;;  %v7896_v10 = vshrl.u32 %v13445_v3, 7  ;;  %s7699_s23 = smov 27   ;;  %s13454_s19 = smov 1  }
  0x74   : > { %s13437_s21 = smov 127   ;;  %s13439_s28 = smov 101  }
  0x75   : > { %v568_v12 = vunpack.c.0.s8 %v567_v9  ;;  %s13991_s6 = sld [smem:[#allocation190_spill]]  ;;  %s14000_s16 = smov 127  }
  0x76   : > { %s8437_s29 = sld [smem:[#allocation6]]  ;;  %s8466_s30 = sld [smem:[#allocation6 + $0x81]] }
  0x77   : > { %v554_v1 = vld [vmem:[%s13947_s0 + $0x8] sm:$0x3f]  ;;  %v553_v4 = vld [vmem:[%s13947_s0] sm:$0xff]  ;;  %v7906_v15 = vsub.s32 %v568_v12, %v7896_v10  ;;  %s8451_s24 = sld [smem:[#allocation6 + $0x80]]  ;;  %s8479_s0 = sld [smem:[#allocation6 + $0x2]] }
  0x78   : > { %vm558_vm4 = vcmp.gt.f32.partialorder %v554_v1, %v556_v2  ;;  %vm557_vm5 = vcmp.gt.f32.partialorder %v553_v4, %v555_v5  ;;  %v2210_v22 = vld [vmem:[%s13949_s8 + $0x8] sm:$0xff]  ;;  %v2212_v23 = vld [vmem:[%s13949_s8 + $0x18] sm:$0xff]  ;;  %v2209_v25 = vld [vmem:[%s13949_s8] sm:$0xff]  ;;  %s8460_s14 = sld [smem:[#allocation6 + $0x180]]  ;;  %s8499_s3 = sld [smem:[#allocation6 + $0x82]] }
  0x79   : > { %v7893_v7 = vsel %vm558_vm4, 1.0, %v13443_v6  ;;  %v7899_v11 = vsel %vm557_vm5, 1.0, %v13443_v6  ;;  %13948 = vst [vmem:[#allocation23_spill] sm:$0xff] %v7906_v15  ;;  %v7940_v24 = vpack.c.bf16 %v2212_v23, %v2210_v22  ;;  %v2211_v26 = vld [vmem:[%s13949_s8 + $0x10] sm:$0xff]  ;;  %v2274_v28 = vld [vmem:[%s13949_s8 + $0x208] sm:$0xff]  ;;  %v2276_v29 = vld [vmem:[%s13949_s8 + $0x218] sm:$0xff] }
  0x7a   : > { %v582_v13 = vcombine.high %v7893_v7, %v7893_v7  ;;  %v565_v14 = vcombine.high %v7899_v11, %v7899_v11  ;;  %v572_v17 = vrot.slane %v7899_v11, %v7906_v15  ;;  %v7950_v27 = vpack.c.bf16 %v2211_v26, %v2209_v25  ;;  %v2273_v30 = vld [vmem:[%s13949_s8 + $0x200] sm:$0xff]  ;;  %v2275_v32 = vld [vmem:[%s13949_s8 + $0x210] sm:$0xff]  ;;  %v2214_v33 = vld [vmem:[%s13949_s8 + $0x28] sm:$0xff]  ;;  %s8501_s4 = sld [smem:[#allocation6 + $0x4]]  ;;  %s8533_s26 = sld [smem:[#allocation6 + $0x102]] }
  0x7b   : > { %13950 = vst [vmem:[#allocation24_spill] sm:$0xff] %v7940_v24  ;;  %6223 = vmatprep.subr.bf16.mxu1 %v7940_v24  ;;  %v7965_v31 = vpack.c.bf16 %v2276_v29, %v2274_v28  ;;  %v2216_v34 = vld [vmem:[%s13949_s8 + $0x38] sm:$0xff]  ;;  %v7976_v35 = vpack.c.bf16 %v2275_v32, %v2273_v30  ;;  %v2213_v37 = vld [vmem:[%s13949_s8 + $0x20] sm:$0xff]  ;;  %v2215_v38 = vld [vmem:[%s13949_s8 + $0x30] sm:$0xff]  ;;  %v8099_v12 = vrot.slane %v7893_v7, %v7906_v15  ;;  %s8510_s15 = sld [smem:[#allocation6 + $0x84]]  ;;  %s8551_s13 = sld [smem:[#allocation6 + $0x182]] }
  0x7c   : > { %v7909_v16 = vrot.slane %v582_v13, %v7906_v15  ;;  %v579_v18 = vrot.slane %v565_v14, %v7906_v15  ;;  %v7924_v21 = vcombine.high %v572_v17, %v572_v17  ;;  %13951 = vst [vmem:[#allocation25_spill] sm:$0xff] %v7950_v27  ;;  %6225 = vmatpush1.bf16.msra.mxu1 %v7950_v27  ;;  %v2278_v40 = vld [vmem:[%s13949_s8 + $0x228] sm:$0xff]  ;;  %v2280_v41 = vld [vmem:[%s13949_s8 + $0x238] sm:$0xff]  ;;  %v2277_v43 = vld [vmem:[%s13949_s8 + $0x220] sm:$0xff]  ;;  %s8520_s22 = sld [smem:[#allocation6 + $0x184]]  ;;  %s8662_s1 = sld [smem:[#allocation6 + $0x183]] }
  0x7d   : > { %13952 = vst [vmem:[#allocation26_spill] sm:$0xff] %v7965_v31  ;;  %13953 = vst [vmem:[#allocation27_spill] sm:$0xff] %v7976_v35  ;;  %v7978_v36 = vpack.c.bf16 %v2216_v34, %v2214_v33  ;;  %6287 = vmatprep.subr.bf16.mxu0 %v7965_v31  ;;  %v7989_v39 = vpack.c.bf16 %v2215_v38, %v2213_v37  ;;  %v7999_v42 = vpack.c.bf16 %v2280_v41, %v2278_v40  ;;  %v2279_v44 = vld [vmem:[%s13949_s8 + $0x230] sm:$0xff]  ;;  %v2218_v46 = vld [vmem:[%s13949_s8 + $0x48] sm:$0xff]  ;;  %s8717_s17 = sld [smem:[#allocation6 + $0x5]]  ;;  %s14434_s27 = smov 1  }
  0x7e   : > { %617 = vrot.lane.b32.xlu1 %v7909_v16, %s7697_s20  ;;  %v7916_v19 = vpack.i.bf16 %v579_v18, %v572_v17  ;;  %v7918_v20 = vcombine.high %v579_v18, %v579_v18  ;;  %6289 = vmatpush1.bf16.msra.mxu0 %v7976_v35  ;;  %v8013_v45 = vpack.c.bf16 %v2279_v44, %v2277_v43  ;;  %v2220_v47 = vld [vmem:[%s13949_s8 + $0x58] sm:$0xff]  ;;  %v2217_v49 = vld [vmem:[%s13949_s8 + $0x40] sm:$0xff]  ;;  %v2219_v50 = vld [vmem:[%s13949_s8 + $0x50] sm:$0xff]  ;;  %s8719_s2 = sld [smem:[#allocation6 + $0x85]]  ;;  %s14483_s7 = sld [smem:[#allocation191_spill]] }
  0x7f   : > { %13954 = vst [vmem:[#allocation28_spill] sm:$0xff] %v7978_v36  ;;  %13955 = vst [vmem:[#allocation29_spill] sm:$0xff] %v7989_v39  ;;  %6227 = vmatprep.subr.bf16.mxu1 %v7978_v36  ;;  %6291 = vmatprep.subr.bf16.mxu0 %v7999_v42  ;;  %v8021_v48 = vpack.c.bf16 %v2220_v47, %v2218_v46  ;;  %v2282_v51 = vld [vmem:[%s13949_s8 + $0x248] sm:$0xff]  ;;  %v2284_v52 = vld [vmem:[%s13949_s8 + $0x258] sm:$0xff]  ;;  %v8044_v54 = vpack.c.bf16 %v2219_v50, %v2217_v49  ;;  %s8731_s5 = sld [smem:[#allocation6 + $0x105]]  ;;  %s11084_s25 = sld [smem:[#allocation11 + $0x186]] }
  0x80   : > { %7523 = vrot.lane.b32.xlu0 %v7916_v19, %s7697_s20  ;;  %13956 = vst [vmem:[#allocation30_spill] sm:$0xff] %v7999_v42  ;;  %6229 = vmatpush1.bf16.msra.mxu1 %v7989_v39  ;;  %13957 = vst [vmem:[#allocation31_spill] sm:$0xff] %v8013_v45  ;;  %v2281_v53 = vld [vmem:[%s13949_s8 + $0x240] sm:$0xff]  ;;  %v2283_v55 = vld [vmem:[%s13949_s8 + $0x250] sm:$0xff]  ;;  %v8052_v57 = vpack.c.bf16 %v2284_v52, %v2282_v51  ;;  %s11099_s11 = sld [smem:[#allocation11 + $0x7]]  ;;  %s11125_s10 = sld [smem:[#allocation11 + $0x8]] }
  0x81   : > { %13958 = vst [vmem:[#allocation32_spill] sm:$0xff] %v8021_v48  ;;  %6231 = vmatprep.subr.bf16.mxu1 %v8021_v48  ;;  %13959 = vst [vmem:[#allocation33_spill] sm:$0xff] %v8044_v54  ;;  %v2222_v56 = vld [vmem:[%s13949_s8 + $0x68] sm:$0xff]  ;;  %v8054_v58 = vpack.c.bf16 %v2283_v55, %v2281_v53  ;;  %v2224_v59 = vld [vmem:[%s13949_s8 + $0x78] sm:$0xff]  ;;  %v8674_v42 = vstv %s8551_s13  ;;  %v14032_v31 = vstv %s8510_s15  ;;  %s8892_s13 = sld [smem:[#allocation9 + $0x2]]  ;;  %s11116_s9 = sld [smem:[#allocation11 + $0x107]] }
  0x82   : > { %611 = vrot.lane.b32.xlu1 %v7918_v20, %s7697_s20  ;;  %6293 = vmatpush1.bf16.msra.mxu0 %v8013_v45  ;;  %13960 = vst [vmem:[#allocation34_spill] sm:$0xff] %v8052_v57  ;;  %v8062_v60 = vpack.c.bf16 %v2224_v59, %v2222_v56  ;;  %v2221_v61 = vld [vmem:[%s13949_s8 + $0x60] sm:$0xff]  ;;  %v2223_v62 = vld [vmem:[%s13949_s8 + $0x70] sm:$0xff]  ;;  %v2286_v0 = vld [vmem:[%s13949_s8 + $0x268] sm:$0xff]  ;;  %s11127_s12 = sld [smem:[#allocation11 + $0x88]] }
  0x83   : > { %13961 = vst [vmem:[#allocation35_spill] sm:$0xff] %v8054_v58  ;;  %6295 = vmatprep.subr.bf16.mxu0 %v8052_v57  ;;  %v8071_v63 = vpack.c.bf16 %v2223_v62, %v2221_v61  ;;  %v2288_v1 = vld [vmem:[%s13949_s8 + $0x278] sm:$0xff]  ;;  %v2285_v4 = vld [vmem:[%s13949_s8 + $0x260] sm:$0xff]  ;;  %v2287_v5 = vld [vmem:[%s13949_s8 + $0x270] sm:$0xff]  ;;  %v8653_v57 = vstv %s8533_s26  ;;  %s8765_s26 = sld [smem:[#allocation6 + $0x106]] }
  0x84   : > { %7528 = vrot.lane.b32.xlu0 %v7916_v19, %s7698_s18  ;;  %6233 = vmatpush1.bf16.msra.mxu1 %v8044_v54  ;;  %13962 = vst [vmem:[#allocation36_spill] sm:$0xff] %v8062_v60  ;;  %v8082_v2 = vpack.c.bf16 %v2288_v1, %v2286_v0  ;;  %v2226_v8 = vld [vmem:[%s13949_s8 + $0x88] sm:$0xff]  ;;  %v2228_v9 = vld [vmem:[%s13949_s8 + $0x98] sm:$0xff]  ;;  %v8104_v13 = vpack.c.bf16 %v2287_v5, %v2285_v4  ;;  %v2225_v17 = vld [vmem:[%s13949_s8 + $0x80] sm:$0xff] }
  0x85   : > { %13963 = vst [vmem:[#allocation37_spill] sm:$0xff] %v8071_v63  ;;  %6235 = vmatprep.subr.bf16.mxu1 %v8062_v60  ;;  %v8106_v14 = vpack.c.bf16 %v2228_v9, %v2226_v8  ;;  %v2227_v18 = vld [vmem:[%s13949_s8 + $0x90] sm:$0xff]  ;;  %v2290_v23 = vld [vmem:[%s13949_s8 + $0x288] sm:$0xff]  ;;  %v2292_v25 = vld [vmem:[%s13949_s8 + $0x298] sm:$0xff] }
  0x86   : > { %711 = vrot.lane.b32.xlu1 %v7924_v21, %s7698_s18  ;;  %6297 = vmatpush1.bf16.msra.mxu0 %v8054_v58  ;;  %13964 = vst [vmem:[#allocation38_spill] sm:$0xff] %v8082_v2  ;;  %13965 = vst [vmem:[#allocation39_spill] sm:$0xff] %v8104_v13  ;;  %v8129_v22 = vpack.c.bf16 %v2227_v18, %v2225_v17  ;;  %v8139_v26 = vpack.c.bf16 %v2292_v25, %v2290_v23  ;;  %v2289_v28 = vld [vmem:[%s13949_s8 + $0x280] sm:$0xff]  ;;  %v2291_v29 = vld [vmem:[%s13949_s8 + $0x290] sm:$0xff] }
  0x87   : > { %13966 = vst [vmem:[#allocation40_spill] sm:$0xff] %v8106_v14  ;;  %6299 = vmatprep.subr.bf16.mxu0 %v8082_v2  ;;  %v8148_v30 = vpack.c.bf16 %v2291_v29, %v2289_v28  ;;  %v2230_v32 = vld [vmem:[%s13949_s8 + $0xa8] sm:$0xff]  ;;  %v2232_v33 = vld [vmem:[%s13949_s8 + $0xb8] sm:$0xff]  ;;  %v2229_v37 = vld [vmem:[%s13949_s8 + $0xa0] sm:$0xff]  ;;  %v8625_v2 = vsub.s32 5, %v7896_v10 }
  0x88   : > { %607 = vrot.lane.b32.xlu0 %v7924_v21, %s7697_s20  ;;  %6237 = vmatpush1.bf16.msra.mxu1 %v8071_v63  ;;  %13967 = vst [vmem:[#allocation41_spill] sm:$0xff] %v8129_v22  ;;  %13968 = vst [vmem:[#allocation42_spill] sm:$0xff] %v8139_v26  ;;  %v8159_v34 = vpack.c.bf16 %v2232_v33, %v2230_v32  ;;  %v2231_v38 = vld [vmem:[%s13949_s8 + $0xb0] sm:$0xff]  ;;  %v2294_v41 = vld [vmem:[%s13949_s8 + $0x2a8] sm:$0xff] }
  0x89   : > { %6239 = vmatprep.subr.bf16.mxu1 %v8106_v14  ;;  %13969 = vst [vmem:[#allocation43_spill] sm:$0xff] %v8148_v30  ;;  %v8168_v40 = vpack.c.bf16 %v2231_v38, %v2229_v37  ;;  %v2296_v43 = vld [vmem:[%s13949_s8 + $0x2b8] sm:$0xff]  ;;  %v2293_v46 = vld [vmem:[%s13949_s8 + $0x2a0] sm:$0xff]  ;;  %v2295_v47 = vld [vmem:[%s13949_s8 + $0x2b0] sm:$0xff] }
  0x8a   : > { %721 = vrot.lane.b32.xlu1 %v7909_v16, %s7698_s18  ;;  %6301 = vmatpush1.bf16.msra.mxu0 %v8104_v13  ;;  %13970 = vst [vmem:[#allocation44_spill] sm:$0xff] %v8159_v34  ;;  %v8179_v44 = vpack.c.bf16 %v2296_v43, %v2294_v41  ;;  %v8188_v49 = vpack.c.bf16 %v2295_v47, %v2293_v46  ;;  %v2234_v50 = vld [vmem:[%s13949_s8 + $0xc8] sm:$0xff]  ;;  %v2236_v51 = vld [vmem:[%s13949_s8 + $0xd8] sm:$0xff]  ;;  %v2233_v53 = vld [vmem:[%s13949_s8 + $0xc0] sm:$0xff] }
  0x8b   : > { %6303 = vmatprep.subr.bf16.mxu0 %v8139_v26  ;;  %13971 = vst [vmem:[#allocation45_spill] sm:$0xff] %v8168_v40  ;;  %v8199_v52 = vpack.c.bf16 %v2236_v51, %v2234_v50  ;;  %v2235_v55 = vld [vmem:[%s13949_s8 + $0xd0] sm:$0xff]  ;;  %v2298_v59 = vld [vmem:[%s13949_s8 + $0x2c8] sm:$0xff]  ;;  %v2300_v61 = vld [vmem:[%s13949_s8 + $0x2d8] sm:$0xff] }
  0x8c   : > { %715 = vrot.lane.b32.xlu0 %v7918_v20, %s7698_s18  ;;  %6241 = vmatpush1.bf16.msra.mxu1 %v8129_v22  ;;  %13972 = vst [vmem:[#allocation46_spill] sm:$0xff] %v8179_v44  ;;  %13973 = vst [vmem:[#allocation47_spill] sm:$0xff] %v8188_v49  ;;  %v8208_v56 = vpack.c.bf16 %v2235_v55, %v2233_v53  ;;  %v2297_v62 = vld [vmem:[%s13949_s8 + $0x2c0] sm:$0xff]  ;;  %v8223_v0 = vpack.c.bf16 %v2300_v61, %v2298_v59  ;;  %v2299_v1 = vld [vmem:[%s13949_s8 + $0x2d0] sm:$0xff] }
  0x8d   : > { %6243 = vmatprep.subr.bf16.mxu1 %v8159_v34  ;;  %13974 = vst [vmem:[#allocation48_spill] sm:$0xff] %v8199_v52  ;;  %v2238_v4 = vld [vmem:[%s13949_s8 + $0xe8] sm:$0xff]  ;;  %v2240_v5 = vld [vmem:[%s13949_s8 + $0xf8] sm:$0xff]  ;;  %v8236_v8 = vpack.c.bf16 %v2299_v1, %v2297_v62  ;;  %v2237_v17 = vld [vmem:[%s13949_s8 + $0xe0] sm:$0xff] }
  0x8e   : > { %842 = vrot.lane.b32.xlu1 %v7924_v21, %s7699_s23  ;;  %6305 = vmatpush1.bf16.msra.mxu0 %v8148_v30  ;;  %13975 = vst [vmem:[#allocation49_spill] sm:$0xff] %v8208_v56  ;;  %13976 = vst [vmem:[#allocation50_spill] sm:$0xff] %v8223_v0  ;;  %v8238_v9 = vpack.c.bf16 %v2240_v5, %v2238_v4  ;;  %v2239_v18 = vld [vmem:[%s13949_s8 + $0xf0] sm:$0xff]  ;;  %v2304_v25 = vld [vmem:[%s13949_s8 + $0x2f8] sm:$0xff] }
  0x8f   : > { %6307 = vmatprep.subr.bf16.mxu0 %v8179_v44  ;;  %13977 = vst [vmem:[#allocation51_spill] sm:$0xff] %v8236_v8  ;;  %v8247_v23 = vpack.c.bf16 %v2239_v18, %v2237_v17  ;;  %v2301_v29 = vld [vmem:[%s13949_s8 + $0x2e0] sm:$0xff]  ;;  %v2303_v32 = vld [vmem:[%s13949_s8 + $0x2f0] sm:$0xff]  ;;  %v2242_v33 = vld [vmem:[%s13949_s8 + $0x108] sm:$0xff] }
  0x90   : > { %7533 = vrot.lane.b32.xlu0 %v7916_v19, %s7699_s23  ;;  %6245 = vmatpush1.bf16.msra.mxu1 %v8168_v40  ;;  %13978 = vst [vmem:[#allocation52_spill] sm:$0xff] %v8238_v9  ;;  %v8277_v37 = vpack.c.bf16 %v2303_v32, %v2301_v29  ;;  %v2244_v38 = vld [vmem:[%s13949_s8 + $0x118] sm:$0xff]  ;;  %v2241_v41 = vld [vmem:[%s13949_s8 + $0x100] sm:$0xff]  ;;  %v2243_v43 = vld [vmem:[%s13949_s8 + $0x110] sm:$0xff] }
  0x91   : > { %6247 = vmatprep.subr.bf16.mxu1 %v8199_v52  ;;  %13979 = vst [vmem:[#allocation53_spill] sm:$0xff] %v8247_v23  ;;  %v8289_v46 = vpack.c.bf16 %v2244_v38, %v2242_v33  ;;  %v8291_v47 = vpack.c.bf16 %v2243_v43, %v2241_v41  ;;  %v2306_v50 = vld [vmem:[%s13949_s8 + $0x308] sm:$0xff]  ;;  %v2308_v51 = vld [vmem:[%s13949_s8 + $0x318] sm:$0xff]  ;;  %v2305_v55 = vld [vmem:[%s13949_s8 + $0x300] sm:$0xff]  ;;  %v8890_v40 = vstv %s8765_s26  ;;  %s8909_s26 = sld [smem:[#allocation9 + $0x3]] }
  0x92   : > { %852 = vrot.lane.b32.xlu1 %v7909_v16, %s7699_s23  ;;  %6309 = vmatpush1.bf16.msra.mxu0 %v8188_v49  ;;  %13981 = vst [vmem:[#allocation55_spill] sm:$0xff] %v8277_v37  ;;  %v8302_v53 = vpack.c.bf16 %v2308_v51, %v2306_v50  ;;  %v2307_v59 = vld [vmem:[%s13949_s8 + $0x310] sm:$0xff]  ;;  %v2248_v62 = vld [vmem:[%s13949_s8 + $0x138] sm:$0xff]  ;;  %v2245_v4 = vld [vmem:[%s13949_s8 + $0x120] sm:$0xff]  ;;  %v8374_v51 = vsub.s32 0, %v7896_v10 }
  0x93   : > { %6311 = vmatprep.subr.bf16.mxu0 %v8223_v0  ;;  %13982 = vst [vmem:[#allocation56_spill] sm:$0xff] %v8289_v46  ;;  %13983 = vst [vmem:[#allocation57_spill] sm:$0xff] %v8291_v47  ;;  %v8311_v61 = vpack.c.bf16 %v2307_v59, %v2305_v55  ;;  %v2247_v5 = vld [vmem:[%s13949_s8 + $0x130] sm:$0xff]  ;;  %v2310_v18 = vld [vmem:[%s13949_s8 + $0x328] sm:$0xff]  ;;  %v8377_v55 = vsub.s32 3, %v7896_v10  ;;  %v8380_v59 = vsub.s32 1, %v7896_v10  ;;  %v8593_v0 = vstv %s8466_s30 }
  0x94   : > { %846 = vrot.lane.b32.xlu0 %v7918_v20, %s7699_s23  ;;  %6249 = vmatpush1.bf16.msra.mxu1 %v8208_v56  ;;  %13984 = vst [vmem:[#allocation58_spill] sm:$0xff] %v8302_v53  ;;  %v8334_v17 = vpack.c.bf16 %v2247_v5, %v2245_v4  ;;  %v2309_v29 = vld [vmem:[%s13949_s8 + $0x320] sm:$0xff]  ;;  %v2311_v32 = vld [vmem:[%s13949_s8 + $0x330] sm:$0xff]  ;;  %v2250_v38 = vld [vmem:[%s13949_s8 + $0x148] sm:$0xff]  ;;  %s8641_s30 = sld [smem:[#allocation6 + $0x83]] }
  0x95   : > { %6251 = vmatprep.subr.bf16.mxu1 %v8238_v9  ;;  %13985 = vst [vmem:[#allocation59_spill] sm:$0xff] %v8311_v61  ;;  %v8354_v33 = vpack.c.bf16 %v2311_v32, %v2309_v29  ;;  %v2252_v41 = vld [vmem:[%s13949_s8 + $0x158] sm:$0xff]  ;;  %13992 = vst [vmem:[#allocation65_spill] sm:$0xff] %v8374_v51  ;;  %v2251_v4 = vld [vmem:[%s13949_s8 + $0x150] sm:$0xff] }
  0x96   : > { %973 = vrot.lane.b32.xlu1 %v7924_v21, %s13454_s19  ;;  %6313 = vmatpush1.bf16.msra.mxu0 %v8236_v8  ;;  %13987 = vst [vmem:[#allocation61_spill] sm:$0xff] %v8334_v17  ;;  %v8363_v43 = vpack.c.bf16 %v2252_v41, %v2250_v38  ;;  %v8370_v50 = vld [vmem:[%s13991_s6 + $0x1c] sm:$0xff]  ;;  %13993 = vst [vmem:[#allocation66_spill] sm:$0xff] %v8380_v59  ;;  %v2315_v6 = vld [vmem:[%s13949_s8 + $0x350] sm:$0xff] }
  0x97   : > { %13989 = vst [vmem:[#allocation63_spill] sm:$0xff] %v8354_v33  ;;  %v1112_v29 = vrot.slane %v8370_v50, %v8380_v59  ;;  %v1120_v38 = vrot.slane %v8370_v50, %v8377_v55  ;;  %v2316_v41 = vld [vmem:[%s13949_s8 + $0x358] sm:$0xff]  ;;  %14017 = vst [vmem:[#allocation86_spill] sm:$0xff] %v8593_v0  ;;  %v8604_v30 = vld [vmem:[%s13991_s6 + $0xe] sm:$0xff] }
  0x98   : > { %7538 = vrot.lane.b32.xlu0 %v7916_v19, %s13454_s19  ;;  %6253 = vmatpush1.bf16.msra.mxu1 %v8247_v23  ;;  %13990 = vst [vmem:[#allocation64_spill] sm:$0xff] %v8363_v43  ;;  %14020 = vst [vmem:[#allocation89_spill] sm:$0xff] %v8604_v30  ;;  %v2263_v13 = vld [vmem:[%s13949_s8 + $0x1b0] sm:$0xff]  ;;  %v8835_v23 = vstv %s8717_s17  ;;  %s8861_s17 = sld [smem:[#allocation6 + $0x108]]  ;;  %v2269_v34 = vld [vmem:[%s13949_s8 + $0x1e0] sm:$0xff] }
  0x99   : > { %6255 = vmatprep.subr.bf16.mxu1 %v8289_v46  ;;  %14023 = vst [vmem:[#allocation92_spill] sm:$0xff] %v8625_v2  ;;  %14026 = vst [vmem:[#allocation94_spill] sm:$0xff] %v8653_v57  ;;  %v8773_v46 = vstv %s8662_s1  ;;  %s8806_s1 = sld [smem:[#allocation6 + $0x87]]  ;;  %v2334_v60 = vld [vmem:[%s13949_s8 + $0x3e8] sm:$0xff]  ;;  %v2336_v54 = vld [vmem:[%s13949_s8 + $0x3f8] sm:$0xff] }
  0x9a   : > { %983 = vrot.lane.b32.xlu1 %v7909_v16, %s13454_s19  ;;  %14031 = vst [vmem:[#allocation98_spill] sm:$0xff] %v8674_v42  ;;  %14046 = vst [vmem:[#allocation110_spill] sm:$0xff] %v8773_v46 }
  0x9b   : > { %14053 = vst [vmem:[#allocation117_spill] sm:$0xff] %v8835_v23  ;;  %14062 = vst [vmem:[#allocation126_spill] sm:$0xff] %v8890_v40 }
  0x9c   : > { %977 = vrot.lane.b32.xlu0 %v7918_v20, %s13454_s19  ;;  %6257 = vmatpush1.bf16.msra.mxu1 %v8291_v47 }
  0x9e   : > { %1384 = vrot.lane.b32.xlu1 %v7924_v21, %s13437_s21  ;;  %v8979_v24 = vstv %s8861_s17  ;;  %s10970_s17 = sld [smem:[#allocation11]] }
  0x9f   : > { %14075 = vst [vmem:[#allocation139_spill] sm:$0xff] %v8979_v24 }
  0xa0   : > { %7543 = vrot.lane.b32.xlu0 %v7916_v19, %s13437_s21 }
  0xa2   : > { %1390 = vrot.lane.b32.xlu1 %v8099_v12, %s13437_s21 }
  0xa4   : > { %1388 = vrot.lane.b32.xlu0 %v7918_v20, %s13437_s21  ;;  %s8462_s21 = sld [smem:[#allocation6 + $0x1]] }
  0xa6   : > { %1515 = vrot.lane.b32.xlu1 %v7924_v21, %s13439_s28 }
  0xa8   : > { %7548 = vrot.lane.b32.xlu0 %v7916_v19, %s13439_s28 }
  0xaa   : > { %1521 = vrot.lane.b32.xlu1 %v8099_v12, %s13439_s28 }
  0xac   : > { %1519 = vrot.lane.b32.xlu0 %v7918_v20, %s13439_s28  ;;  %s13441_s28 = smov 100  }
  0xae   : > { %1646 = vrot.lane.b32.xlu1 %v7924_v21, %s13441_s28 }
  0xb0   : > { %7553 = vrot.lane.b32.xlu0 %v7916_v19, %s13441_s28 }
  0xb2   : > { %1652 = vrot.lane.b32.xlu1 %v8099_v12, %s13441_s28 }
  0xb4   : > { %1650 = vrot.lane.b32.xlu0 %v7918_v20, %s13441_s28  ;;  %s13456_s28 = smov 99  }
  0xb6   : > { %1777 = vrot.lane.b32.xlu1 %v7924_v21, %s13456_s28  ;;  %v2302_v21 = vld [vmem:[%s13949_s8 + $0x2e8] sm:$0xff] }
  0xb7   : > { %v8258_v28 = vpack.c.bf16 %v2304_v25, %v2302_v21  ;;  %v2312_v21 = vld [vmem:[%s13949_s8 + $0x338] sm:$0xff] }
  0xb8   : > { %7558 = vrot.lane.b32.xlu0 %v7916_v19, %s13456_s28  ;;  %v8274_v19 = vcombine.high %v8099_v12, %v8099_v12  ;;  %v8343_v25 = vpack.c.bf16 %v2312_v21, %v2310_v18  ;;  %v2314_v18 = vld [vmem:[%s13949_s8 + $0x348] sm:$0xff]  ;;  %v1108_v21 = vrot.slane %v8370_v50, %v8374_v51 }
  0xb9   : > { %13980 = vst [vmem:[#allocation54_spill] sm:$0xff] %v8258_v28  ;;  %6315 = vmatprep.subr.bf16.mxu0 %v8258_v28  ;;  %v2264_v28 = vld [vmem:[%s13949_s8 + $0x1b8] sm:$0xff] }
  0xba   : > { %1783 = vrot.lane.b32.xlu1 %v8099_v12, %s13456_s28  ;;  %6317 = vmatpush1.bf16.msra.mxu0 %v8277_v37  ;;  %13988 = vst [vmem:[#allocation62_spill] sm:$0xff] %v8343_v25  ;;  %v2324_v37 = vld [vmem:[%s13949_s8 + $0x398] sm:$0xff] }
  0xbb   : > { %6319 = vmatprep.subr.bf16.mxu0 %v8302_v53  ;;  %v2322_v53 = vld [vmem:[%s13949_s8 + $0x388] sm:$0xff] }
  0xbc   : > { %1781 = vrot.lane.b32.xlu0 %v7918_v20, %s13456_s28  ;;  %v2246_v20 = vld [vmem:[%s13949_s8 + $0x128] sm:$0xff]  ;;  %s8477_s28 = sld [smem:[#allocation6 + $0x181]] }
  0xbd   : > { %v8322_v1 = vpack.c.bf16 %v2248_v62, %v2246_v20  ;;  %v8383_v20 = vsub.s32 2, %v7896_v10  ;;  %v2249_v62 = vld [vmem:[%s13949_s8 + $0x140] sm:$0xff] }
  0xbe   : > { %615 = vrot.lane.b32.xlu1 %v8274_v19, %s7697_s20  ;;  %6321 = vmatpush1.bf16.msra.mxu0 %v8311_v61  ;;  %v8394_v5 = vpack.c.bf16 %v2251_v4, %v2249_v62  ;;  %v8413_v62 = vpack.c.bf16 %v2316_v41, %v2314_v18  ;;  %v2313_v4 = vld [vmem:[%s13949_s8 + $0x340] sm:$0xff]  ;;  %v1133_v41 = vcombine.low %v1108_v21, %v1112_v29  ;;  %v2255_v61 = vld [vmem:[%s13949_s8 + $0x170] sm:$0xff] }
  0xbf   : > { %13986 = vst [vmem:[#allocation60_spill] sm:$0xff] %v8322_v1  ;;  %6259 = vmatprep.subr.bf16.mxu1 %v8322_v1  ;;  %6323 = vmatprep.subr.bf16.mxu0 %v8343_v25  ;;  %v1116_v32 = vrot.slane %v8370_v50, %v8383_v20  ;;  %v8421_v3 = vpack.c.bf16 %v2315_v6, %v2313_v4  ;;  %v2256_v25 = vld [vmem:[%s13949_s8 + $0x178] sm:$0xff]  ;;  %v2253_v6 = vld [vmem:[%s13949_s8 + $0x160] sm:$0xff]  ;;  %v8758_v1 = vstv %s8641_s30  ;;  %s8785_s30 = sld [smem:[#allocation6 + $0x186]] }
  0xc0   : > { %613 = vrot.lane.b32.xlu0 %v8099_v12, %s7697_s20  ;;  %6261 = vmatpush1.bf16.msra.mxu1 %v8334_v17  ;;  %13994 = vst [vmem:[#allocation67_spill] sm:$0xff] %v8394_v5  ;;  %13995 = vst [vmem:[#allocation68_spill] sm:$0xff] %v8413_v62  ;;  %v1141_v29 = vrot.slane %v1133_v41, %v7906_v15  ;;  %v8497_v41 = vld [vmem:[%s13991_s6] sm:$0xff]  ;;  %s8512_s20 = sld [smem:[#allocation6 + $0x104]] }
  0xc1   : > { %6263 = vmatprep.subr.bf16.mxu1 %v8363_v43  ;;  %13996 = vst [vmem:[#allocation69_spill] sm:$0xff] %v8421_v3  ;;  %v1134_v4 = vcombine.low %v1116_v32, %v1120_v38  ;;  %14002 = vst [vmem:[#allocation74_spill] sm:$0xff] %v8497_v41 }
  0xc2   : > { %719 = vrot.lane.b32.xlu1 %v8274_v19, %s7698_s18  ;;  %6325 = vmatpush1.bf16.msra.mxu0 %v8354_v33  ;;  %v2254_v33 = vld [vmem:[%s13949_s8 + $0x168] sm:$0xff]  ;;  %v8599_v44 = vstv %s8477_s28  ;;  %14043 = vst [vmem:[#allocation107_spill] sm:$0xff] %v8758_v1  ;;  %s8849_s28 = sld [smem:[#allocation6 + $0x8]] }
  0xc3   : > { %6327 = vmatprep.subr.bf16.mxu0 %v8413_v62  ;;  %v8432_v18 = vpack.c.bf16 %v2256_v25, %v2254_v33  ;;  %v2318_v62 = vld [vmem:[%s13949_s8 + $0x368] sm:$0xff]  ;;  %v2320_v25 = vld [vmem:[%s13949_s8 + $0x378] sm:$0xff]  ;;  %v8456_v33 = vpack.c.bf16 %v2255_v61, %v2253_v6  ;;  %v2319_v61 = vld [vmem:[%s13949_s8 + $0x370] sm:$0xff]  ;;  %v1148_v32 = vrot.slane %v1134_v4, %v7906_v15  ;;  %14019 = vst [vmem:[#allocation88_spill] sm:$0xff] %v8599_v44 }
  0xc4   : > { %717 = vrot.lane.b32.xlu0 %v8099_v12, %s7698_s18  ;;  %6265 = vmatpush1.bf16.msra.mxu1 %v8394_v5  ;;  %v8458_v21 = vpack.c.bf16 %v2320_v25, %v2318_v62  ;;  %s8468_s18 = sld [smem:[#allocation6 + $0x101]]  ;;  %v2258_v62 = vld [vmem:[%s13949_s8 + $0x188] sm:$0xff]  ;;  %v2260_v6 = vld [vmem:[%s13949_s8 + $0x198] sm:$0xff] }
  0xc5   : > { %13997 = vst [vmem:[#allocation70_spill] sm:$0xff] %v8432_v18  ;;  %6267 = vmatprep.subr.bf16.mxu1 %v8432_v18  ;;  %13998 = vst [vmem:[#allocation71_spill] sm:$0xff] %v8456_v33  ;;  %v8503_v4 = vpack.c.bf16 %v2260_v6, %v2258_v62  ;;  %v8508_v25 = vld [vmem:[%s13991_s6 + $0x7] sm:$0xff]  ;;  %v2259_v6 = vld [vmem:[%s13949_s8 + $0x190] sm:$0xff]  ;;  %v8898_v22 = vstv %s8785_s30  ;;  %s13816_s30 = smov 15  }
  0xc6   : > { %850 = vrot.lane.b32.xlu1 %v8274_v19, %s7699_s23  ;;  %6329 = vmatpush1.bf16.msra.mxu0 %v8421_v3  ;;  %13999 = vst [vmem:[#allocation72_spill] sm:$0xff] %v8458_v21  ;;  %14004 = vst [vmem:[#allocation76_spill] sm:$0xff] %v8508_v25  ;;  %v2257_v62 = vld [vmem:[%s13949_s8 + $0x180] sm:$0xff] }
  0xc7   : > { %6331 = vmatprep.subr.bf16.mxu0 %v8458_v21  ;;  %14003 = vst [vmem:[#allocation75_spill] sm:$0xff] %v8503_v4  ;;  %v1149_v21 = vcombine.low %v1141_v29, %v1148_v32  ;;  %v8535_v3 = vpack.c.bf16 %v2259_v6, %v2257_v62  ;;  %v8553_v62 = vpack.c.bf16 %v2324_v37, %v2322_v53  ;;  %v2321_v6 = vld [vmem:[%s13949_s8 + $0x380] sm:$0xff]  ;;  %v8562_v29 = vstv %s8437_s29  ;;  %v2262_v53 = vld [vmem:[%s13949_s8 + $0x1a8] sm:$0xff]  ;;  %s14013_s29 = smov 100  }
  0xc8   : > { %848 = vrot.lane.b32.xlu0 %v8099_v12, %s7699_s23  ;;  %s8453_s23 = sld [smem:[#allocation6 + $0x100]]  ;;  %6269 = vmatpush1.bf16.msra.mxu1 %v8456_v33  ;;  %14010 = vst [vmem:[#allocation80_spill] sm:$0xff] %v8562_v29  ;;  %v8584_v32 = vstv %s8460_s14  ;;  %s14024_s14 = smov 99   ;;  %14063 = vst [vmem:[#allocation127_spill] sm:$0xff] %v8898_v22  ;;  %v14082_v22 = vstv %s8512_s20 }
  0xc9   : > { %6271 = vmatprep.subr.bf16.mxu1 %v8503_v4  ;;  %14008 = vst [vmem:[#allocation78_spill] sm:$0xff] %v8535_v3  ;;  %14009 = vst [vmem:[#allocation79_spill] sm:$0xff] %v8553_v62  ;;  %v1168_v26 = vmul.f32 %v7899_v11, %v1149_v21  ;;  %v2328_v11 = vld [vmem:[%s13949_s8 + $0x3b8] sm:$0xff]  ;;  %v8667_v21 = vsub.s32 4, %v7896_v10 }
  0xca   : > { %981 = vrot.lane.b32.xlu1 %v8274_v19, %s13454_s19  ;;  %v8596_v49 = vstv %s8468_s18  ;;  %s8822_s18 = sld [smem:[#allocation6 + $0x107]] }
  0xcb   : > { %14018 = vst [vmem:[#allocation87_spill] sm:$0xff] %v8596_v49  ;;  %14029 = vst [vmem:[#allocation96_spill] sm:$0xff] %v8667_v21  ;;  %v1124_v35 = vrot.slane %v8370_v50, %v8667_v21 }
  0xcc   : > { %979 = vrot.lane.b32.xlu0 %v8099_v12, %s13454_s19  ;;  %v2317_v12 = vld [vmem:[%s13949_s8 + $0x360] sm:$0xff]  ;;  %s14005_s19 = smov 101   ;;  %6273 = vmatpush1.bf16.msra.mxu1 %v8535_v3  ;;  %v14033_v3 = vstv %s8512_s20  ;;  %s10960_s20 = sld [smem:[#allocation11 + $0x4]] }
  0xcd   : > { %v8484_v38 = vpack.c.bf16 %v2319_v61, %v2317_v12  ;;  %v14006_v12 = vlaneseq  ;;  %v1278_v4 = vmul.f32 %v14033_v3, %v1168_v26  ;;  %v2266_v3 = vld [vmem:[%s13949_s8 + $0x1c8] sm:$0xff] }
  0xce   : > { %1394 = vrot.lane.b32.xlu1 %v7909_v16, %s14000_s16  ;;  %v8581_v8 = vstv %s8453_s23  ;;  %s8851_s23 = sld [smem:[#allocation6 + $0x88]] }
  0xcf   : > { %14001 = vst [vmem:[#allocation73_spill] sm:$0xff] %v8484_v38  ;;  %6333 = vmatpush1.bf16.msra.mxu0 %v8484_v38  ;;  %v8518_v61 = vand.u32 127, %v14006_v12  ;;  %v2323_v38 = vld [vmem:[%s13949_s8 + $0x390] sm:$0xff]  ;;  %v8565_v12 = vstv %s8451_s24  ;;  %14014 = vst [vmem:[#allocation83_spill] sm:$0xff] %v8581_v8  ;;  %s8660_s24 = sld [smem:[#allocation6 + $0x103]] }
  0xd0   : > { %1392 = vrot.lane.b32.xlu0 %v8274_v19, %s14000_s16  ;;  %14011 = vst [vmem:[#allocation81_spill] sm:$0xff] %v8565_v12  ;;  %v8570_v37 = vpack.c.bf16 %v2323_v38, %v2321_v6  ;;  %v8587_v38 = vstv %s8462_s21  ;;  %6335 = vmatprep.subr.bf16.mxu0 %v8553_v62  ;;  %v8590_v6 = vpack.c.bf16 %v2264_v28, %v2262_v53  ;;  %v8613_v53 = vstv %s8479_s0  ;;  %v2261_v28 = vld [vmem:[%s13949_s8 + $0x1a0] sm:$0xff]  ;;  %s8639_s21 = sld [smem:[#allocation6 + $0x3]]  ;;  %s8742_s0 = sld [smem:[#allocation6 + $0x6]] }
  0xd1   : > { %14007 = vst [vmem:[#allocation77_spill] sm:$0xff] %v8518_v61  ;;  %14015 = vst [vmem:[#allocation84_spill] sm:$0xff] %v8587_v38  ;;  %v8616_v62 = vstv %s8499_s3  ;;  %v8644_v58 = vpack.c.bf16 %v2263_v13, %v2261_v28  ;;  %v14028_v13 = vstv %s8501_s4  ;;  %vm621_vm6 = vcmp.lt.s32.totalorder %v8518_v61, 29  ;;  %s10985_s3 = sld [smem:[#allocation11 + $0x81]] }
  0xd2   : > { %1525 = vrot.lane.b32.xlu1 %v7909_v16, %s14005_s19  ;;  %14012 = vst [vmem:[#allocation82_spill] sm:$0xff] %v8570_v37  ;;  %14016 = vst [vmem:[#allocation85_spill] sm:$0xff] %v8590_v6  ;;  %6275 = vmatprep.subr.bf16.mxu1 %v8590_v6  ;;  %v1172_v28 = vmul.f32 %v14028_v13, %v1168_v26  ;;  %v1225_v6 = vmul.f32 %v14032_v31, %v1168_v26  ;;  %v2325_v13 = vld [vmem:[%s13949_s8 + $0x3a0] sm:$0xff]  ;;  %v2268_v31 = vld [vmem:[%s13949_s8 + $0x1d8] sm:$0xff]  ;;  %vm723_vm7 = vcmp.lt.s32.totalorder %v8518_v61, 28 }
  0xd3   : > { %6337 = vmatpush1.bf16.msra.mxu0 %v8570_v37  ;;  %14021 = vst [vmem:[#allocation90_spill] sm:$0xff] %v8613_v53  ;;  %14022 = vst [vmem:[#allocation91_spill] sm:$0xff] %v8616_v62  ;;  %v8658_v37 = vld [vmem:[%s13991_s6 + $0x15] sm:$0xff]  ;;  %6277 = vmatpush1.bf16.msra.mxu1 %v8644_v58  ;;  %vm854_vm8 = vcmp.lt.s32.totalorder %v8518_v61, 27  ;;  %vm985_vm10 = vcmp.lt.s32.totalorder %v8518_v61, 1  ;;  %vm1396_vm11 = vcmp.lt.s32.totalorder %v8518_v61, 127 }
  0xd4   : > { %1523 = vrot.lane.b32.xlu0 %v8274_v19, %s14005_s19  ;;  %14025 = vst [vmem:[#allocation93_spill] sm:$0xff] %v8644_v58  ;;  %14027 = vst [vmem:[#allocation95_spill] sm:$0xff] %v8658_v37  ;;  %v1128_v58 = vrot.slane %v8370_v50, %v8625_v2  ;;  %v8715_v18 = vrot.slane %v1172_v28, %v7906_v15  ;;  %v1176_v5 = vcombine.high %v1172_v28, %v1172_v28  ;;  %s8733_s19 = sld [smem:[#allocation6 + $0x185]]  ;;  %v2267_v28 = vld [vmem:[%s13949_s8 + $0x1d0] sm:$0xff] }
  0xd5   : > { %v8965_v36 = vstv %s8851_s23  ;;  %vm1527_vm12 = vcmp.lt.s32.totalorder %v8518_v61, 101  ;;  %vm1658_vm13 = vcmp.lt.s32.totalorder %v8518_v61, 100  ;;  %vm1789_vm14 = vcmp.lt.s32.totalorder %v8518_v61, 99  ;;  %s10966_s23 = sld [smem:[#allocation11 + $0x184]] }
  0xd6   : > { %1656 = vrot.lane.b32.xlu1 %v7909_v16, %s14013_s29  ;;  %14037 = vst [vmem:[#allocation101_spill] sm:$0xff] %v8715_v18  ;;  %v1150_v43 = vcombine.low %v1124_v35, %v1128_v58  ;;  %v8755_v17 = vstv %s8639_s21  ;;  %v8780_v58 = vld [vmem:[%s13991_s6 + $0x23] sm:$0xff]  ;;  %s8824_s21 = sld [smem:[#allocation6 + $0x187]]  ;;  %v8884_v52 = vstv %s8742_s0  ;;  %14072 = vst [vmem:[#allocation136_spill] sm:$0xff] %v8965_v36  ;;  %s11025_s0 = sld [smem:[#allocation11 + $0x103]] }
  0xd7   : > { %14042 = vst [vmem:[#allocation106_spill] sm:$0xff] %v8755_v17  ;;  %14047 = vst [vmem:[#allocation111_spill] sm:$0xff] %v8780_v58 }
  0xd8   : > { %1654 = vrot.lane.b32.xlu0 %v8274_v19, %s14013_s29  ;;  %s8763_s29 = sld [smem:[#allocation6 + $0x86]]  ;;  %14060 = vst [vmem:[#allocation124_spill] sm:$0xff] %v8884_v52 }
  0xda   : > { %1787 = vrot.lane.b32.xlu1 %v7909_v16, %s14024_s14  ;;  %v2326_v16 = vld [vmem:[%s13949_s8 + $0x3a8] sm:$0xff]  ;;  %v8857_v56 = vstv %s8733_s19  ;;  %s8879_s19 = sld [smem:[#allocation9 + $0x1]] }
  0xdb   : > { %v8669_v45 = vpack.c.bf16 %v2328_v11, %v2326_v16  ;;  %v2327_v11 = vld [vmem:[%s13949_s8 + $0x3b0] sm:$0xff]  ;;  %14057 = vst [vmem:[#allocation121_spill] sm:$0xff] %v8857_v56 }
  0xdc   : > { %1785 = vrot.lane.b32.xlu0 %v8274_v19, %s14024_s14  ;;  %v14034_v19 = vstv %s8520_s22  ;;  %v8692_v33 = vpack.c.bf16 %v2327_v11, %v2325_v13  ;;  %v8726_v11 = vrot.slane %v1225_v6, %v7906_v15  ;;  %v8945_v48 = vstv %s8824_s21  ;;  %s13824_s21 = smov 13   ;;  %s10993_s14 = sld [smem:[#allocation11 + $0x2]] }
  0xdd   : > { %14030 = vst [vmem:[#allocation97_spill] sm:$0xff] %v8669_v45  ;;  %v1331_v16 = vmul.f32 %v14034_v19, %v1168_v26  ;;  %6339 = vmatprep.subr.bf16.mxu0 %v8669_v45  ;;  %v8710_v19 = vpack.c.bf16 %v2268_v31, %v2266_v3  ;;  %v8722_v26 = vsub.s32 6, %v7896_v10  ;;  %v8729_v3 = vrot.slane %v1278_v4, %v7906_v15  ;;  %v2265_v10 = vld [vmem:[%s13949_s8 + $0x1c0] sm:$0xff] }
  0xde   : > { %14035 = vst [vmem:[#allocation99_spill] sm:$0xff] %v8692_v33  ;;  %6341 = vmatpush1.bf16.msra.mxu0 %v8692_v33  ;;  %14039 = vst [vmem:[#allocation103_spill] sm:$0xff] %v8726_v11  ;;  %v1229_v31 = vcombine.high %v1225_v6, %v1225_v6  ;;  %v1282_v45 = vcombine.high %v1278_v4, %v1278_v4  ;;  %v8744_v33 = vpack.c.bf16 %v2267_v28, %v2265_v10  ;;  %v2330_v4 = vld [vmem:[%s13949_s8 + $0x3c8] sm:$0xff]  ;;  %v2332_v6 = vld [vmem:[%s13949_s8 + $0x3d8] sm:$0xff] }
  0xdf   : > { %14036 = vst [vmem:[#allocation100_spill] sm:$0xff] %v8710_v19  ;;  %14038 = vst [vmem:[#allocation102_spill] sm:$0xff] %v8722_v26  ;;  %6279 = vmatprep.subr.bf16.mxu1 %v8710_v19  ;;  %v1335_v13 = vcombine.high %v1331_v16, %v1331_v16  ;;  %v1132_v19 = vrot.slane %v8370_v50, %v8722_v26  ;;  %v8761_v47 = vrot.slane %v1331_v16, %v7906_v15 }
  0xe0   : > { %14040 = vst [vmem:[#allocation104_spill] sm:$0xff] %v8729_v3  ;;  %14041 = vst [vmem:[#allocation105_spill] sm:$0xff] %v8744_v33  ;;  %v8767_v10 = vpack.c.bf16 %v2332_v6, %v2330_v4  ;;  %v8770_v28 = vstv %s8660_s24  ;;  %v8783_v50 = vrot.slane %v1176_v5, %v7906_v15  ;;  %6281 = vmatpush1.bf16.msra.mxu1 %v8744_v33  ;;  %s8804_s24 = sld [smem:[#allocation6 + $0x7]]  ;;  %v8838_v16 = vstv %s8719_s2  ;;  %s13822_s2 = smov 115  }
  0xe1   : > { %14044 = vst [vmem:[#allocation108_spill] sm:$0xff] %v8761_v47  ;;  %v8795_v35 = vrot.slane %v1229_v31, %v7906_v15  ;;  %v8799_v5 = vrot.slane %v1282_v45, %v7906_v15  ;;  %v8802_v33 = vrot.slane %v1335_v13, %v7906_v15  ;;  %v1157_v4 = vrot.slane %v1150_v43, %v7906_v15  ;;  %v2329_v31 = vld [vmem:[%s13949_s8 + $0x3c0] sm:$0xff]  ;;  %v2331_v45 = vld [vmem:[%s13949_s8 + $0x3d0] sm:$0xff]  ;;  %v2272_v13 = vld [vmem:[%s13949_s8 + $0x1f8] sm:$0xff] }
  0xe2   : > { %14045 = vst [vmem:[#allocation109_spill] sm:$0xff] %v8767_v10  ;;  %14048 = vst [vmem:[#allocation112_spill] sm:$0xff] %v8783_v50  ;;  %6343 = vmatprep.subr.bf16.mxu0 %v8767_v10  ;;  %v1164_v6 = vrot.slane %v1132_v19, %v7906_v15  ;;  %v8826_v19 = vpack.c.bf16 %v2331_v45, %v2329_v31  ;;  %v2270_v10 = vld [vmem:[%s13949_s8 + $0x1e8] sm:$0xff]  ;;  %v8854_v45 = vstv %s8731_s5  ;;  %v8875_v43 = vld [vmem:[%s13991_s6 + $0x31] sm:$0xff]  ;;  %s8877_s5 = sld [smem:[#allocation6 + $0x188]]  ;;  %v8991_v36 = vstv %s8879_s19  ;;  %14484 = sst [smem:[#allocation164_spill]] %s10993_s14 }
  0xe3   : > { %14049 = vst [vmem:[#allocation113_spill] sm:$0xff] %v8795_v35  ;;  %14050 = vst [vmem:[#allocation114_spill] sm:$0xff] %v8799_v5  ;;  %v8847_v31 = vld [vmem:[%s13991_s6 + $0x2a] sm:$0xff]  ;;  %v8864_v9 = vpack.c.bf16 %v2272_v13, %v2270_v10  ;;  %v8907_v13 = vld [vmem:[%s13991_s6 + $0x38] sm:$0xff]  ;;  %v14107_v3 = vmov 0.0   ;;  %s10976_s19 = sld [smem:[#allocation11 + $0x100]] }
  0xe4   : > { %14051 = vst [vmem:[#allocation115_spill] sm:$0xff] %v8802_v33  ;;  %14052 = vst [vmem:[#allocation116_spill] sm:$0xff] %v8826_v19  ;;  %6345 = vmatpush1.bf16.msra.mxu0 %v8826_v19  ;;  %v1165_v10 = vcombine.low %v1157_v4, %v1164_v6  ;;  %v8887_v19 = vstv %s8763_s29  ;;  %v2271_v4 = vld [vmem:[%s13949_s8 + $0x1f0] sm:$0xff]  ;;  %s10983_s29 = sld [smem:[#allocation11 + $0x1]]  ;;  %s14502_s14 = smov 115  }
  0xe5   : > { %14054 = vst [vmem:[#allocation118_spill] sm:$0xff] %v8838_v16  ;;  %14055 = vst [vmem:[#allocation119_spill] sm:$0xff] %v8847_v31  ;;  %6283 = vmatprep.subr.bf16.mxu1 %v8864_v9  ;;  %v8923_v63 = vpack.c.bf16 %v2271_v4, %v2269_v34  ;;  %v8939_v34 = vpack.c.bf16 %v2336_v54, %v2334_v60  ;;  %v8942_v4 = vstv %s8822_s18  ;;  %v2335_v54 = vld [vmem:[%s13949_s8 + $0x3f0] sm:$0xff]  ;;  %v2404_v60 = vld [vmem:[%s13949_s8 + $0x618] sm:$0xff]  ;;  %s13814_s18 = smov 14  }
  0xe6   : > { %14056 = vst [vmem:[#allocation120_spill] sm:$0xff] %v8854_v45  ;;  %14058 = vst [vmem:[#allocation122_spill] sm:$0xff] %v8864_v9  ;;  %v8933_v6 = vstv %s8804_s24  ;;  %v8936_v9 = vstv %s8806_s1  ;;  %v1169_v14 = vmul.f32 %v7893_v7, %v1165_v10  ;;  %v2333_v7 = vld [vmem:[%s13949_s8 + $0x3e0] sm:$0xff]  ;;  %v8962_v10 = vstv %s8849_s28  ;;  %s10964_s28 = sld [smem:[#allocation11 + $0x104]]  ;;  %s10987_s24 = sld [smem:[#allocation11 + $0x101]] }
  0xe7   : > { %14059 = vst [vmem:[#allocation123_spill] sm:$0xff] %v8875_v43  ;;  %14061 = vst [vmem:[#allocation125_spill] sm:$0xff] %v8887_v19  ;;  %6285 = vmatpush1.bf16.msra.mxu1 %v8923_v63  ;;  %6347 = vmatprep.subr.bf16.mxu0 %v8939_v34  ;;  %v8968_v39 = vpack.c.bf16 %v2335_v54, %v2333_v7  ;;  %v14104_v45 = vrot.slane %v8508_v25, %v8374_v51  ;;  %s10989_s1 = sld [smem:[#allocation11 + $0x181]] }
  0xe8   : > { %14064 = vst [vmem:[#allocation128_spill] sm:$0xff] %v8907_v13  ;;  %14065 = vst [vmem:[#allocation129_spill] sm:$0xff] %v8923_v63  ;;  %v2402_v63 = vld [vmem:[%s13949_s8 + $0x608] sm:$0xff]  ;;  %v1279_v7 = vmul.f32 %v14082_v22, %v1169_v14 }
  0xe9   : > { %14066 = vst [vmem:[#allocation130_spill] sm:$0xff] %v8933_v6  ;;  %14067 = vst [vmem:[#allocation131_spill] sm:$0xff] %v8936_v9  ;;  %v8985_v54 = vpack.c.bf16 %v2404_v60, %v2402_v63  ;;  %6349 = vmatpush1.bf16.msra.mxu0 %v8968_v39  ;;  %v8999_v6 = vstv %s8892_s13  ;;  %v14083_v63 = vstv %s8520_s22  ;;  %s10962_s22 = sld [smem:[#allocation11 + $0x84]]  ;;  %s10978_s13 = sld [smem:[#allocation11 + $0x180]] }
  0xea   : > { %14068 = vst [vmem:[#allocation132_spill] sm:$0xff] %v8939_v34  ;;  %14069 = vst [vmem:[#allocation133_spill] sm:$0xff] %v8942_v4  ;;  %v14079_v4 = vstv %s8501_s4  ;;  %v14081_v34 = vstv %s8510_s15  ;;  %v1332_v60 = vmul.f32 %v14083_v63, %v1169_v14  ;;  %v1299_v13 = vcombine.high %v1279_v7, %v1279_v7  ;;  %s9062_s4 = sld [smem:[#allocation9]]  ;;  %s13818_s15 = smov 113  }
  0xeb   : > { %14070 = vst [vmem:[#allocation134_spill] sm:$0xff] %v8945_v48  ;;  %14071 = vst [vmem:[#allocation135_spill] sm:$0xff] %v8962_v10  ;;  %v8988_v10 = vstv %s8877_s5  ;;  %v1173_v9 = vmul.f32 %v14079_v4, %v1169_v14  ;;  %v1226_v43 = vmul.f32 %v14081_v34, %v1169_v14  ;;  %6415 = vmatprep.subr.bf16.mxu1 %v8985_v54  ;;  %s10972_s5 = sld [smem:[#allocation11 + $0x80]] }
  0xec   : > { %14073 = vst [vmem:[#allocation137_spill] sm:$0xff] %v8968_v39  ;;  %14076 = vst [vmem:[#allocation140_spill] sm:$0xff] %v8985_v54  ;;  %v1352_v40 = vcombine.high %v1332_v60, %v1332_v60  ;;  %v9049_v33 = vrot.slane %v1279_v7, %v7906_v15 }
  0xed   : > { %14077 = vst [vmem:[#allocation141_spill] sm:$0xff] %v8988_v10  ;;  %14078 = vst [vmem:[#allocation142_spill] sm:$0xff] %v8991_v36  ;;  %v9009_v10 = vstv %s8909_s26  ;;  %v1193_v39 = vcombine.high %v1173_v9, %v1173_v9  ;;  %v1246_v22 = vcombine.high %v1226_v43, %v1226_v43  ;;  %v9046_v52 = vrot.slane %v1226_v43, %v7906_v15  ;;  %s11021_s26 = sld [smem:[#allocation11 + $0x83]] }
  0xee   : > { %14080 = vst [vmem:[#allocation143_spill] sm:$0xff] %v8999_v6  ;;  %14084 = vst [vmem:[#allocation144_spill] sm:$0xff] %v9009_v10  ;;  %v9043_v10 = vrot.slane %v1173_v9, %v7906_v15 }
  0xef   : > { %14087 = vst [vmem:[#allocation147_spill] sm:$0xff] %v9046_v52  ;;  %14088 = vst [vmem:[#allocation148_spill] sm:$0xff] %v9049_v33  ;;  %v9055_v48 = vrot.slane %v1193_v39, %v7906_v15  ;;  %v9067_v7 = vrot.slane %v1246_v22, %v7906_v15  ;;  %v9073_v39 = vrot.slane %v1352_v40, %v7906_v15  ;;  %v1942_v52 = vld [vmem:[#allocation2] sm:$0xff]  ;;  %14482 = sst [smem:[#allocation163_spill]] %s10978_s13 }
  0xf0   : > { %v8976_v27 = vpop.permute.xlu1 %617  ;;  %14086 = vst [vmem:[#allocation146_spill] sm:$0xff] %v9043_v10  ;;  %v9140_v2 = vstv %s9062_s4  ;;  %vm1944_vm9 = vcmp.gt.f32.partialorder %v1942_v52, 0.5  ;;  %v1950_v46 = vmul.f32 0.2, %v1942_v52  ;;  %s13820_s4 = smov 114  }
  0xf1   : > { %14074 = vst [vmem:[#allocation138_spill] sm:$0xff] %v8976_v27  ;;  %14089 = vst [vmem:[#allocation149_spill] sm:$0xff] %v9055_v48  ;;  %v6033_v11 = vsel %vm1944_vm9, 1.0, %v14107_v3 }
  0xf2   : > { %v7524_v24 = vpop.permute.xlu0 %7523  ;;  %14091 = vst [vmem:[#allocation151_spill] sm:$0xff] %v9067_v7  ;;  %14093 = vst [vmem:[#allocation153_spill] sm:$0xff] %v9073_v39 }
  0xf3   : > { %v7526_v6 = vunpack.i.h.bf16 %v7524_v24  ;;  %v7525_v63 = vunpack.i.l.bf16 %v7524_v24  ;;  %v14094_v24 = vrot.slane %v8497_v41, %v8377_v55  ;;  %14102 = vst [vmem:[#allocation156_spill] sm:$0xff] %v9140_v2  ;;  %14492 = sst [smem:[#allocation168_spill]] %s11021_s26  ;;  %s11154_s26 = sld [smem:[#allocation11 + $0xd]] }
  0xf4   : > { %v9017_v36 = vpop.permute.xlu1 %611 }
  0xf5   : > { %14085 = vst [vmem:[#allocation145_spill] sm:$0xff] %v9017_v36  ;;  %v625_v4 = vsel %vm621_vm6, %v7526_v6, %v9017_v36  ;;  %v9060_v36 = vrot.slane %v1332_v60, %v7906_v15 }
  0xf6   : > { %v9029_v54 = vpop.permute.xlu0 %7528  ;;  %v669_v60 = vmul.f32 %v14094_v24, %v625_v4  ;;  %v14097_v24 = vrot.slane %v8508_v25, %v8380_v59  ;;  %v14098_v4 = vrot.slane %v8508_v25, %v8383_v20 }
  0xf7   : > { %v7531_v14 = vunpack.i.h.bf16 %v9029_v54  ;;  %v7530_v34 = vunpack.i.l.bf16 %v9029_v54  ;;  %v628_v54 = vsel %vm621_vm6, %v8976_v27, %v7525_v63  ;;  %14090 = vst [vmem:[#allocation150_spill] sm:$0xff] %v9060_v36  ;;  %v9070_v27 = vrot.slane %v1299_v13, %v7906_v15 }
  0xf8   : > { %v712_v19 = vpop.permute.xlu1 %711  ;;  %v14095_v13 = vrot.slane %v8497_v41, %v8374_v51 }
  0xf9   : > { %v729_v9 = vsel %vm723_vm7, %v7530_v34, %v712_v19  ;;  %14092 = vst [vmem:[#allocation152_spill] sm:$0xff] %v9070_v27  ;;  %v728_v48 = vsel %vm723_vm7, %v712_v19, %v7531_v14 }
  0xfa   : > { %v608_v43 = vpop.permute.xlu0 %607  ;;  %v666_v27 = vmul.f32 %v14095_v13, %v628_v54  ;;  %v770_v5 = vmul.f32 %v14097_v24, %v729_v9  ;;  %v771_v40 = vmul.f32 %v14098_v4, %v728_v48  ;;  %v9120_v24 = vmul.f32 %v8565_v12, %v669_v60 }
  0xfb   : > { %v626_v22 = vsel %vm621_vm6, %v608_v43, %v7526_v6  ;;  %v627_v54 = vsel %vm621_vm6, %v7525_v63, %v608_v43  ;;  %v9117_v43 = vmul.f32 %v8562_v29, %v669_v60  ;;  %v9123_v48 = vmul.f32 %v8581_v8, %v669_v60 }
  0xfc   : > { %v9087_v7 = vpop.permute.xlu1 %721  ;;  %v9126_v4 = vmul.f32 %v8584_v32, %v669_v60  ;;  %v14100_v9 = vrot.slane %v8497_v41, %v8380_v59  ;;  %v14101_v6 = vrot.slane %v8497_v41, %v8383_v20  ;;  %v675_v15 = vmul.f32 %v8562_v29, %v666_v27 }
  0xfd   : > { %14096 = vst [vmem:[#allocation154_spill] sm:$0xff] %v9087_v7  ;;  %v684_v36 = vmul.f32 %v8565_v12, %v666_v27  ;;  %v779_v10 = vmul.f32 %v8587_v38, %v770_v5  ;;  %v693_v39 = vmul.f32 %v8581_v8, %v666_v27  ;;  %v702_v60 = vmul.f32 %v8584_v32, %v666_v27 }
  0xfe   : > { %v9108_v19 = vpop.permute.xlu0 %715  ;;  %v667_v13 = vmul.f32 %v14100_v9, %v627_v54  ;;  %v668_v63 = vmul.f32 %v14101_v6, %v626_v22  ;;  %v780_v54 = vmul.f32 %v8587_v38, %v771_v40  ;;  %v795_v9 = vmul.f32 %v8593_v0, %v770_v5 }
  0xff   : > { %14099 = vst [vmem:[#allocation155_spill] sm:$0xff] %v9108_v19  ;;  %v796_v22 = vmul.f32 %v8593_v0, %v771_v40  ;;  %v730_v6 = vsel %vm723_vm7, %v9087_v7, %v7530_v34  ;;  %v811_v26 = vmul.f32 %v8596_v49, %v770_v5  ;;  %v812_v41 = vmul.f32 %v8596_v49, %v771_v40 }
 0x100   : > { %v843_v33 = vpop.permute.xlu1 %842  ;;  %v727_v27 = vsel %vm723_vm7, %v7531_v14, %v9108_v19  ;;  %v827_v2 = vmul.f32 %v8599_v44, %v770_v5  ;;  %v676_v31 = vmul.f32 %v8562_v29, %v667_v13  ;;  %v677_v56 = vmul.f32 %v8562_v29, %v668_v63 }
 0x101   : > { %v685_v35 = vmul.f32 %v8565_v12, %v667_v13  ;;  %v686_v34 = vmul.f32 %v8565_v12, %v668_v63  ;;  %v694_v7 = vmul.f32 %v8581_v8, %v667_v13  ;;  %v769_v16 = vmul.f32 %v14104_v45, %v730_v6 }
 0x102   : > { %v7534_v21 = vpop.permute.xlu0 %7533  ;;  %v828_v19 = vmul.f32 %v8599_v44, %v771_v40  ;;  %v14105_v5 = vrot.slane %v8508_v25, %v8377_v55  ;;  %v695_v12 = vmul.f32 %v8581_v8, %v668_v63  ;;  %v703_v18 = vmul.f32 %v8584_v32, %v667_v13 }
 0x103   : > { %v7535_v14 = vunpack.i.l.bf16 %v7534_v21  ;;  %v7536_v29 = vunpack.i.h.bf16 %v7534_v21  ;;  %v704_v58 = vmul.f32 %v8584_v32, %v668_v63  ;;  %v786_v45 = vadd.f32 %v779_v10, %v676_v31 }
 0x104   : > { %v9157_v50 = vpop.permute.xlu1 %852  ;;  %v772_v23 = vmul.f32 %v14105_v5, %v727_v27  ;;  %v9174_v6 = vadd.f32 %v780_v54, %v677_v56  ;;  %v802_v40 = vadd.f32 %v795_v9, %v685_v35  ;;  %v9178_v21 = vadd.f32 %v796_v22, %v686_v34 }
 0x105   : > { %14103 = vst [vmem:[#allocation157_spill] sm:$0xff] %v9157_v50  ;;  %v860_v25 = vsel %vm854_vm8, %v7535_v14, %v843_v33  ;;  %v818_v5 = vadd.f32 %v811_v26, %v694_v7  ;;  %v778_v3 = vmul.f32 %v8587_v38, %v769_v16  ;;  %v794_v8 = vmul.f32 %v8593_v0, %v769_v16 }
 0x106   : > { %v9168_v47 = vpop.permute.xlu0 %846  ;;  %v810_v13 = vmul.f32 %v8596_v49, %v769_v16  ;;  %v826_v52 = vmul.f32 %v8599_v44, %v769_v16  ;;  %v781_v56 = vmul.f32 %v8587_v38, %v772_v23  ;;  %v859_v35 = vsel %vm854_vm8, %v843_v33, %v7536_v29 }
 0x107   : > { %14106 = vst [vmem:[#allocation158_spill] sm:$0xff] %v9168_v47  ;;  %v9188_v10 = vadd.f32 %v812_v41, %v695_v12  ;;  %v797_v26 = vmul.f32 %v8593_v0, %v772_v23  ;;  %v813_v7 = vmul.f32 %v8596_v49, %v772_v23  ;;  %v14108_v63 = vrot.slane %v8604_v30, %v8380_v59 }
 0x108   : > { %v974_v27 = vpop.permute.xlu1 %973  ;;  %v834_v9 = vadd.f32 %v827_v2, %v703_v18  ;;  %v9195_v22 = vadd.f32 %v828_v19, %v704_v58  ;;  %v829_v16 = vmul.f32 %v8599_v44, %v772_v23  ;;  %v861_v33 = vsel %vm854_vm8, %v9157_v50, %v7535_v14  ;;  %v14122_v50 = vld [vmem:[#allocation111_spill] sm:$0xff] }
 0x109   : > { %v901_v54 = vmul.f32 %v14108_v63, %v860_v25  ;;  %v785_v41 = vadd.f32 %v778_v3, %v675_v15  ;;  %v14110_v12 = vrot.slane %v8604_v30, %v8383_v20  ;;  %v858_v25 = vsel %vm854_vm8, %v7536_v29, %v9168_v47 }
 0x10a   : > { %v7539_v31 = vpop.permute.xlu0 %7538  ;;  %v1952_v2 = vsub.f32 1.0, %v6033_v11  ;;  %v801_v18 = vadd.f32 %v794_v8, %v684_v36  ;;  %v817_v58 = vadd.f32 %v810_v13, %v693_v39  ;;  %v833_v19 = vadd.f32 %v826_v52, %v702_v60 }
 0x10b   : > { %v902_v49 = vmul.f32 %v14110_v12, %v859_v35  ;;  %v788_v23 = vadd.f32 %v781_v56, %v9117_v43  ;;  %v804_v14 = vadd.f32 %v797_v26, %v9120_v24  ;;  %v820_v15 = vadd.f32 %v813_v7, %v9123_v48 }
 0x10c   : > { %v9201_v34 = vpop.permute.xlu1 %983  ;;  %v910_v3 = vmul.f32 %v8613_v53, %v901_v54  ;;  %v14112_v35 = vrot.slane %v8604_v30, %v8374_v51  ;;  %v836_v29 = vadd.f32 %v829_v16, %v9126_v4  ;;  %v14113_v36 = vrot.slane %v8604_v30, %v8377_v55 }
 0x10d   : > { %14109 = vst [vmem:[#allocation159_spill] sm:$0xff] %v9201_v34  ;;  %v7541_v11 = vunpack.i.h.bf16 %v7539_v31  ;;  %v7540_v39 = vunpack.i.l.bf16 %v7539_v31  ;;  %v9223_v43 = vmul.f32 %v8613_v53, %v902_v49  ;;  %v926_v24 = vmul.f32 %v8616_v62, %v901_v54 }
 0x10e   : > { %v9210_v63 = vpop.permute.xlu0 %977  ;;  %v900_v12 = vmul.f32 %v14112_v35, %v861_v33  ;;  %v903_v8 = vmul.f32 %v14113_v36, %v858_v25  ;;  %v942_v48 = vmul.f32 %v8653_v57, %v901_v54  ;;  %v9227_v60 = vmul.f32 %v1952_v2, %v1950_v46 }
 0x10f   : > { %14111 = vst [vmem:[#allocation160_spill] sm:$0xff] %v9210_v63  ;;  %v9230_v13 = vmul.f32 %v8616_v62, %v902_v49  ;;  %v9233_v4 = vmul.f32 %v8653_v57, %v902_v49  ;;  %v958_v52 = vmul.f32 %v8674_v42, %v901_v54  ;;  %v9237_v56 = vmul.f32 %v8674_v42, %v902_v49 }
 0x110   : > { %14114 = vst [vmem:[#allocation161_spill] sm:$0xff] %v9227_v60  ;;  %v1385_v31 = vpop.permute.xlu1 %1384  ;;  %v917_v7 = vadd.f32 %v910_v3, %v786_v45  ;;  %v909_v46 = vmul.f32 %v8613_v53, %v900_v12  ;;  %v925_v16 = vmul.f32 %v8616_v62, %v900_v12  ;;  %v941_v33 = vmul.f32 %v8653_v57, %v900_v12 }
 0x111   : > { %v957_v25 = vmul.f32 %v8674_v42, %v900_v12  ;;  %v912_v2 = vmul.f32 %v8613_v53, %v903_v8  ;;  %v991_v49 = vsel %vm985_vm10, %v7540_v39, %v974_v27  ;;  %v992_v54 = vsel %vm985_vm10, %v9201_v34, %v7540_v39 }
 0x112   : > { %v9240_v26 = vpop.permute.xlu0 %7543  ;;  %v933_v35 = vadd.f32 %v926_v24, %v802_v40  ;;  %v949_v36 = vadd.f32 %v942_v48, %v818_v5  ;;  %v928_v45 = vmul.f32 %v8616_v62, %v903_v8  ;;  %v990_v3 = vsel %vm985_vm10, %v974_v27, %v7541_v11 }
 0x113   : > { %14115 = vst [vmem:[#allocation162_spill] sm:$0xff] %v9240_v26  ;;  %v965_v60 = vadd.f32 %v958_v52, %v834_v9  ;;  %v944_v47 = vmul.f32 %v8653_v57, %v903_v8  ;;  %v960_v12 = vmul.f32 %v8674_v42, %v903_v8  ;;  %v989_v53 = vsel %vm985_vm10, %v7541_v11, %v9210_v63 }
 0x114   : > { %v916_v44 = vadd.f32 %v909_v46, %v785_v41  ;;  %v932_v39 = vadd.f32 %v925_v16, %v801_v18  ;;  %v14116_v40 = vrot.slane %v8658_v37, %v8380_v59  ;;  %v14117_v27 = vrot.slane %v8658_v37, %v8374_v51  ;;  %v9271_v11 = vpop.permute.xlu1 %1390 }
 0x115   : > { %v948_v24 = vadd.f32 %v941_v33, %v817_v58  ;;  %v964_v48 = vadd.f32 %v957_v25, %v833_v19  ;;  %v919_v52 = vadd.f32 %v912_v2, %v788_v23  ;;  %v14118_v8 = vrot.slane %v8658_v37, %v8383_v20  ;;  %v14120_v25 = vld [vmem:[#allocation110_spill] sm:$0xff] }
 0x116   : > { %v9260_v30 = vpop.permute.xlu0 %1388  ;;  %v1032_v5 = vmul.f32 %v14116_v40, %v991_v49  ;;  %v1031_v9 = vmul.f32 %v14117_v27, %v992_v54  ;;  %v935_v63 = vadd.f32 %v928_v45, %v804_v14  ;;  %v14119_v41 = vrot.slane %v8658_v37, %v8377_v55 }
 0x117   : > { %v1033_v42 = vmul.f32 %v14118_v8, %v990_v3  ;;  %v7546_v46 = vunpack.i.h.bf16 %v9240_v26  ;;  %v13687_v16 = vunpack.i.l.bf16 %v9240_v26  ;;  %v951_v49 = vadd.f32 %v944_v47, %v820_v15 }
 0x118   : > { %v1034_v18 = vmul.f32 %v14119_v41, %v989_v53  ;;  %v967_v54 = vadd.f32 %v960_v12, %v836_v29  ;;  %v1040_v58 = vmul.f32 %v8755_v17, %v1031_v9  ;;  %v1056_v19 = vmul.f32 %v8758_v1, %v1031_v9  ;;  %v9300_v37 = vpop.permute.xlu1 %1515 }
 0x119   : > { %v1041_v23 = vmul.f32 %v8755_v17, %v1032_v5  ;;  %v1057_v33 = vmul.f32 %v8758_v1, %v1032_v5  ;;  %v1072_v14 = vmul.f32 %v8770_v28, %v1031_v9  ;;  %v1088_v2 = vmul.f32 %v14120_v25, %v1031_v9 }
 0x11a   : > { %v1042_v53 = vmul.f32 %v8755_v17, %v1033_v42  ;;  %v1058_v45 = vmul.f32 %v8758_v1, %v1033_v42  ;;  %v1073_v3 = vmul.f32 %v8770_v28, %v1032_v5  ;;  %v1089_v47 = vmul.f32 %v14120_v25, %v1032_v5  ;;  %v9288_v15 = vpop.permute.xlu0 %7548 }
 0x11b   : > { %14121 = vst [vmem:[#allocation110_spill] sm:$0xff] %v9288_v15  ;;  %v1043_v29 = vmul.f32 %v8755_v17, %v1034_v18  ;;  %v1059_v12 = vmul.f32 %v8758_v1, %v1034_v18  ;;  %v1401_v40 = vsel %vm1396_vm11, %v1385_v31, %v7546_v46  ;;  %v1402_v27 = vsel %vm1396_vm11, %v13687_v16, %v1385_v31  ;;  %v14147_v16 = vld [vmem:[#allocation115_spill] sm:$0xff] }
 0x11c   : > { %v1047_v9 = vadd.f32 %v1040_v58, %v916_v44  ;;  %v1063_v8 = vadd.f32 %v1056_v19, %v932_v39  ;;  %v1075_v41 = vmul.f32 %v8770_v28, %v1034_v18  ;;  %v1091_v5 = vmul.f32 %v14120_v25, %v1034_v18 }
 0x11d   : > { %v1048_v34 = vadd.f32 %v1041_v23, %v917_v7  ;;  %v1064_v17 = vadd.f32 %v1057_v33, %v933_v35  ;;  %v1079_v57 = vadd.f32 %v1072_v14, %v948_v24  ;;  %v1095_v1 = vadd.f32 %v1088_v2, %v964_v48  ;;  %v14125_v7 = vld [vmem:[#allocation101_spill] sm:$0xff]  ;;  %v14126_v24 = vld [vmem:[#allocation103_spill] sm:$0xff]  ;;  %v14127_v33 = vld [vmem:[#allocation104_spill] sm:$0xff] }
 0x11e   : > { %v1080_v62 = vadd.f32 %v1073_v3, %v949_v36  ;;  %v1096_v0 = vadd.f32 %v1089_v47, %v965_v60  ;;  %v14123_v26 = vrot.slane %v14122_v50, %v8374_v51  ;;  %v14124_v44 = vrot.slane %v14122_v50, %v8380_v59  ;;  %v9312_v23 = vpop.permute.xlu0 %1519  ;;  %v14128_v14 = vld [vmem:[#allocation108_spill] sm:$0xff] }
 0x11f   : > { %v1074_v39 = vmul.f32 %v8770_v28, %v1033_v42  ;;  %v1090_v18 = vmul.f32 %v14120_v25, %v1033_v42  ;;  %v1050_v58 = vadd.f32 %v1043_v29, %v919_v52  ;;  %v1066_v19 = vadd.f32 %v1059_v12, %v935_v63  ;;  %v14133_v29 = vld [vmem:[#allocation117_spill] sm:$0xff] }
 0x120   : > { %v1442_v38 = vmul.f32 %v14123_v26, %v1402_v27  ;;  %v1443_v31 = vmul.f32 %v14124_v44, %v1401_v40  ;;  %v1216_v35 = vadd.f32 %v14125_v7, %v1047_v9  ;;  %v1269_v48 = vadd.f32 %v14126_v24, %v1063_v8  ;;  %v9331_v40 = vpop.permute.xlu1 %1521  ;;  %v14135_v9 = vld [vmem:[#allocation118_spill] sm:$0xff] }
 0x121   : > { %v1082_v36 = vadd.f32 %v1075_v41, %v951_v49  ;;  %v1098_v60 = vadd.f32 %v1091_v5, %v967_v54  ;;  %v1322_v26 = vadd.f32 %v14127_v33, %v1079_v57  ;;  %v1375_v2 = vadd.f32 %v14128_v14, %v1095_v1  ;;  %14134 = vst [vmem:[#allocation111_spill] sm:$0xff] %v9331_v40 }
 0x122   : > { %v14129_v3 = vcombine.high %v14125_v7, %v14125_v7  ;;  %v14130_v42 = vcombine.high %v14126_v24, %v14126_v24  ;;  %v14131_v52 = vcombine.high %v14127_v33, %v14127_v33  ;;  %v14132_v54 = vcombine.high %v14128_v14, %v14128_v14  ;;  %v14141_v33 = vld [vmem:[#allocation121_spill] sm:$0xff] }
 0x123   : > { %v1451_v1 = vmul.f32 %v14133_v29, %v1442_v38  ;;  %v1452_v12 = vmul.f32 %v14133_v29, %v1443_v31  ;;  %v950_v27 = vadd.f32 %v9233_v4, %v9188_v10  ;;  %v1468_v8 = vmul.f32 %v14135_v9, %v1443_v31 }
 0x124   : > { %v1217_v47 = vadd.f32 %v14129_v3, %v1048_v34  ;;  %v1270_v63 = vadd.f32 %v14130_v42, %v1064_v17  ;;  %v1323_v49 = vadd.f32 %v14131_v52, %v1080_v62  ;;  %v1376_v57 = vadd.f32 %v14132_v54, %v1096_v0 }
 0x125   : > { %v918_v34 = vadd.f32 %v9223_v43, %v9174_v6  ;;  %v934_v17 = vadd.f32 %v9230_v13, %v9178_v21  ;;  %v966_v62 = vadd.f32 %v9237_v56, %v9195_v22  ;;  %v1467_v0 = vmul.f32 %v14135_v9, %v1442_v38  ;;  %v14136_v21 = vld [vmem:[#allocation120_spill] sm:$0xff]  ;;  %v14139_v56 = vld [vmem:[#allocation113_spill] sm:$0xff] }
 0x126   : > { %v1399_v41 = vsel %vm1396_vm11, %v9260_v30, %v9271_v11  ;;  %v1400_v6 = vsel %vm1396_vm11, %v7546_v46, %v9260_v30  ;;  %v1483_v43 = vmul.f32 %v14136_v21, %v1442_v38  ;;  %v1484_v10 = vmul.f32 %v14136_v21, %v1443_v31  ;;  %v14137_v13 = vld [vmem:[#allocation112_spill] sm:$0xff]  ;;  %v9365_v46 = vpop.permute.xlu0 %7553 }
 0x127   : > { %v14138_v22 = vcombine.high %v14137_v13, %v14137_v13  ;;  %v14140_v5 = vcombine.high %v14139_v56, %v14139_v56  ;;  %v9358_v7 = vadd.f32 %v1451_v1, %v1216_v35  ;;  %v9360_v24 = vadd.f32 %v1452_v12, %v1217_v47  ;;  %14142 = vst [vmem:[#allocation101_spill] sm:$0xff] %v9365_v46  ;;  %v1647_v1 = vpop.permute.xlu1 %1646 }
 0x128   : > { %v1499_v14 = vmul.f32 %v14141_v33, %v1442_v38  ;;  %v1500_v30 = vmul.f32 %v14141_v33, %v1443_v31  ;;  %v1049_v3 = vadd.f32 %v1042_v53, %v918_v34  ;;  %v1065_v42 = vadd.f32 %v1058_v45, %v934_v17 }
 0x129   : > { %v1219_v4 = vadd.f32 %v14138_v22, %v1050_v58  ;;  %v1272_v44 = vadd.f32 %v14140_v5, %v1066_v19  ;;  %v14143_v58 = vrot.slane %v14122_v50, %v8383_v20  ;;  %v14144_v19 = vrot.slane %v14122_v50, %v8377_v55  ;;  %v14145_v5 = vld [vmem:[#allocation114_spill] sm:$0xff] }
 0x12a   : > { %v1474_v47 = vadd.f32 %v1467_v0, %v1269_v48  ;;  %v9373_v54 = vadd.f32 %v1468_v8, %v1270_v63  ;;  %v7551_v38 = vunpack.i.h.bf16 %v9288_v15  ;;  %v13688_v31 = vunpack.i.l.bf16 %v9288_v15 }
 0x12b   : > { %v1444_v52 = vmul.f32 %v14143_v58, %v1400_v6  ;;  %v1445_v35 = vmul.f32 %v14144_v19, %v1399_v41  ;;  %v1490_v12 = vadd.f32 %v1483_v43, %v1322_v26  ;;  %v1491_v22 = vadd.f32 %v1484_v10, %v1323_v49  ;;  %v14149_v10 = vld [vmem:[#allocation119_spill] sm:$0xff] }
 0x12c   : > { %v1081_v53 = vadd.f32 %v1074_v39, %v950_v27  ;;  %v1097_v45 = vadd.f32 %v1090_v18, %v966_v62  ;;  %v1506_v34 = vadd.f32 %v1499_v14, %v1375_v2  ;;  %v1507_v17 = vadd.f32 %v1500_v30, %v1376_v57  ;;  %v1651_v2 = vpop.permute.xlu0 %1650 }
 0x12d   : > { %v14146_v6 = vcombine.high %v14145_v5, %v14145_v5  ;;  %v14148_v48 = vcombine.high %v14147_v16, %v14147_v16  ;;  %v1218_v0 = vadd.f32 %v14137_v13, %v1049_v3  ;;  %v1271_v8 = vadd.f32 %v14139_v56, %v1065_v42 }
 0x12e   : > { %v1453_v41 = vmul.f32 %v14133_v29, %v1444_v52  ;;  %v1454_v26 = vmul.f32 %v14133_v29, %v1445_v35  ;;  %v1469_v39 = vmul.f32 %v14135_v9, %v1444_v52  ;;  %v1470_v18 = vmul.f32 %v14135_v9, %v1445_v35 }
 0x12f   : > { %v1325_v58 = vadd.f32 %v14146_v6, %v1082_v36  ;;  %v1378_v63 = vadd.f32 %v14148_v48, %v1098_v60  ;;  %v1532_v36 = vsel %vm1527_vm12, %v9300_v37, %v7551_v38  ;;  %v1533_v60 = vsel %vm1527_vm12, %v13688_v31, %v9300_v37  ;;  %v14154_v31 = vld [vmem:[#allocation124_spill] sm:$0xff] }
 0x130   : > { %v1324_v49 = vadd.f32 %v14145_v5, %v1081_v53  ;;  %v1377_v57 = vadd.f32 %v14147_v16, %v1097_v45  ;;  %v1485_v27 = vmul.f32 %v14136_v21, %v1444_v52  ;;  %v1486_v62 = vmul.f32 %v14136_v21, %v1445_v35  ;;  %v9412_v16 = vpop.permute.xlu1 %1652 }
 0x131   : > { %v1501_v43 = vmul.f32 %v14141_v33, %v1444_v52  ;;  %v14150_v13 = vrot.slane %v14149_v10, %v8374_v51  ;;  %v14151_v14 = vrot.slane %v14149_v10, %v8380_v59  ;;  %v1530_v37 = vsel %vm1527_vm12, %v9312_v23, %v9331_v40  ;;  %14152 = vst [vmem:[#allocation103_spill] sm:$0xff] %v9412_v16 }
 0x132   : > { %v1502_v3 = vmul.f32 %v14141_v33, %v1445_v35  ;;  %v7556_v42 = vunpack.i.h.bf16 %v9365_v46  ;;  %v1661_v19 = vsel %vm1658_vm13, %v1651_v2, %v9412_v16  ;;  %v1460_v53 = vadd.f32 %v1453_v41, %v1218_v0  ;;  %v14155_v16 = vld [vmem:[#allocation125_spill] sm:$0xff] }
 0x133   : > { %v1573_v56 = vmul.f32 %v14150_v13, %v1533_v60  ;;  %v1574_v30 = vmul.f32 %v14151_v14, %v1532_v36  ;;  %v1461_v45 = vadd.f32 %v1454_v26, %v1219_v4  ;;  %v1476_v5 = vadd.f32 %v1469_v39, %v1271_v8  ;;  %v14156_v8 = vld [vmem:[#allocation126_spill] sm:$0xff]  ;;  %v14157_v26 = vld [vmem:[#allocation127_spill] sm:$0xff] }
 0x134   : > { %v1477_v6 = vadd.f32 %v1470_v18, %v1272_v44  ;;  %v1492_v48 = vadd.f32 %v1485_v27, %v1324_v49  ;;  %v1493_v36 = vadd.f32 %v1486_v62, %v1325_v58  ;;  %v1531_v60 = vsel %vm1527_vm12, %v7551_v38, %v9312_v23 }
 0x135   : > { %v14153_v35 = vrot.slane %v14149_v10, %v8377_v55  ;;  %v1508_v14 = vadd.f32 %v1501_v43, %v1377_v57  ;;  %v1582_v52 = vmul.f32 %v14154_v31, %v1573_v56  ;;  %v1583_v40 = vmul.f32 %v14154_v31, %v1574_v30 }
 0x136   : > { %v1598_v0 = vmul.f32 %v14155_v16, %v1573_v56  ;;  %v1509_v4 = vadd.f32 %v1502_v3, %v1378_v63  ;;  %v1599_v44 = vmul.f32 %v14155_v16, %v1574_v30  ;;  %v1614_v58 = vmul.f32 %v14156_v8, %v1573_v56 }
 0x137   : > { %v1576_v13 = vmul.f32 %v14153_v35, %v1530_v37  ;;  %v1615_v41 = vmul.f32 %v14156_v8, %v1574_v30  ;;  %v1630_v23 = vmul.f32 %v14157_v26, %v1573_v56  ;;  %v1631_v38 = vmul.f32 %v14157_v26, %v1574_v30  ;;  %v1778_v56 = vpop.permute.xlu1 %1777  ;;  %v9450_v35 = vpop.permute.xlu0 %7558 }
 0x138   : > { %v14158_v39 = vrot.slane %v14149_v10, %v8383_v20  ;;  %v1663_v49 = vsel %vm1658_vm13, %v1647_v1, %v7556_v42  ;;  %v14159_v62 = vunpack.i.l.bf16 %v9365_v46  ;;  %v1589_v30 = vadd.f32 %v1582_v52, %v9358_v7  ;;  %14160 = vst [vmem:[#allocation104_spill] sm:$0xff] %v9450_v35  ;;  %v14161_v46 = vld [vmem:[#allocation123_spill] sm:$0xff] }
 0x139   : > { %v1585_v57 = vmul.f32 %v14154_v31, %v1576_v13  ;;  %v1601_v63 = vmul.f32 %v14155_v16, %v1576_v13  ;;  %v1617_v27 = vmul.f32 %v14156_v8, %v1576_v13  ;;  %v1590_v37 = vadd.f32 %v1583_v40, %v9360_v24 }
 0x13a   : > { %v1575_v18 = vmul.f32 %v14158_v39, %v1531_v60  ;;  %v1664_v43 = vsel %vm1658_vm13, %v14159_v62, %v1647_v1  ;;  %v1605_v3 = vadd.f32 %v1598_v0, %v1474_v47  ;;  %v1633_v60 = vmul.f32 %v14157_v26, %v1576_v13 }
 0x13b   : > { %v1606_v39 = vadd.f32 %v1599_v44, %v9373_v54  ;;  %v1621_v10 = vadd.f32 %v1614_v58, %v1490_v12  ;;  %v1622_v33 = vadd.f32 %v1615_v41, %v1491_v22  ;;  %v14162_v15 = vrot.slane %v14161_v46, %v8380_v59  ;;  %v14165_v44 = vld [vmem:[#allocation131_spill] sm:$0xff]  ;;  %v14166_v41 = vld [vmem:[#allocation133_spill] sm:$0xff] }
 0x13c   : > { %v1637_v62 = vadd.f32 %v1630_v23, %v1506_v34  ;;  %v1638_v21 = vadd.f32 %v1631_v38, %v1507_v17  ;;  %v1584_v7 = vmul.f32 %v14154_v31, %v1575_v18  ;;  %v14163_v40 = vrot.slane %v14161_v46, %v8374_v51  ;;  %v14164_v34 = vld [vmem:[#allocation130_spill] sm:$0xff] }
 0x13d   : > { %v1705_v1 = vmul.f32 %v14162_v15, %v1663_v49  ;;  %v1592_v47 = vadd.f32 %v1585_v57, %v1461_v45  ;;  %v1600_v52 = vmul.f32 %v14155_v16, %v1575_v18  ;;  %v1608_v13 = vadd.f32 %v1601_v63, %v1477_v6  ;;  %v14167_v38 = vld [vmem:[#allocation134_spill] sm:$0xff]  ;;  %v9469_v49 = vpop.permute.xlu1 %1783 }
 0x13e   : > { %v1704_v24 = vmul.f32 %v14163_v40, %v1664_v43  ;;  %v1616_v54 = vmul.f32 %v14156_v8, %v1575_v18  ;;  %v1624_v12 = vadd.f32 %v1617_v27, %v1493_v36  ;;  %v1632_v22 = vmul.f32 %v14157_v26, %v1575_v18  ;;  %14168 = vst [vmem:[#allocation108_spill] sm:$0xff] %v9469_v49  ;;  %v1782_v18 = vpop.permute.xlu0 %1781 }
 0x13f   : > { %v1640_v0 = vadd.f32 %v1633_v60, %v1509_v4  ;;  %v1662_v15 = vsel %vm1658_vm13, %v7556_v42, %v1651_v2  ;;  %v1714_v17 = vmul.f32 %v14164_v34, %v1705_v1  ;;  %v1730_v58 = vmul.f32 %v14165_v44, %v1705_v1 }
 0x140   : > { %v1746_v23 = vmul.f32 %v14166_v41, %v1705_v1  ;;  %v1762_v45 = vmul.f32 %v14167_v38, %v1705_v1  ;;  %v1591_v6 = vadd.f32 %v1584_v7, %v1460_v53  ;;  %v1713_v57 = vmul.f32 %v14164_v34, %v1704_v24 }
 0x141   : > { %v1729_v36 = vmul.f32 %v14165_v44, %v1704_v24  ;;  %v1745_v4 = vmul.f32 %v14166_v41, %v1704_v24  ;;  %v14169_v2 = vrot.slane %v14161_v46, %v8383_v20  ;;  %v14170_v63 = vrot.slane %v14161_v46, %v8377_v55 }
 0x142   : > { %v7561_v43 = vunpack.i.h.bf16 %v9450_v35  ;;  %v13701_v60 = vunpack.i.l.bf16 %v9450_v35  ;;  %v1607_v53 = vadd.f32 %v1600_v52, %v1476_v5  ;;  %v1623_v1 = vadd.f32 %v1616_v54, %v1492_v48  ;;  %v14171_v52 = vld [vmem:[#allocation128_spill] sm:$0xff] }
 0x143   : > { %v1706_v42 = vmul.f32 %v14169_v2, %v1662_v15  ;;  %v1707_v27 = vmul.f32 %v14170_v63, %v1661_v19  ;;  %v1639_v7 = vadd.f32 %v1632_v22, %v1508_v14  ;;  %v1761_v40 = vmul.f32 %v14167_v38, %v1704_v24 }
 0x144   : > { %v9483_v26 = vadd.f32 %v1714_v17, %v1590_v37  ;;  %v1737_v8 = vadd.f32 %v1730_v58, %v1606_v39  ;;  %v1753_v16 = vadd.f32 %v1746_v23, %v1622_v33  ;;  %v1769_v31 = vadd.f32 %v1762_v45, %v1638_v21  ;;  %v616_v33 = vpop.permute.xlu1 %615 }
 0x145   : > { %v9485_v9 = vadd.f32 %v1713_v57, %v1589_v30  ;;  %v1736_v15 = vadd.f32 %v1729_v36, %v1605_v3  ;;  %v1752_v2 = vadd.f32 %v1745_v4, %v1621_v10  ;;  %v1792_v46 = vsel %vm1789_vm14, %v1782_v18, %v9469_v49  ;;  %v614_v3 = vpop.permute.xlu0 %613  ;;  %v14175_v36 = vld [vmem:[#allocation138_spill] sm:$0xff] }
 0x146   : > { %v1715_v19 = vmul.f32 %v14164_v34, %v1706_v42  ;;  %v1716_v5 = vmul.f32 %v14164_v34, %v1707_v27  ;;  %v1794_v48 = vsel %vm1789_vm14, %v1778_v56, %v7561_v43  ;;  %v1795_v21 = vsel %vm1789_vm14, %v13701_v60, %v1778_v56 }
 0x147   : > { %v1731_v14 = vmul.f32 %v14165_v44, %v1706_v42  ;;  %v1732_v10 = vmul.f32 %v14165_v44, %v1707_v27  ;;  %v1747_v30 = vmul.f32 %v14166_v41, %v1706_v42  ;;  %v1748_v37 = vmul.f32 %v14166_v41, %v1707_v27 }
 0x148   : > { %v1763_v39 = vmul.f32 %v14167_v38, %v1706_v42  ;;  %v1764_v24 = vmul.f32 %v14167_v38, %v1707_v27  ;;  %v14172_v54 = vrot.slane %v14171_v52, %v8374_v51  ;;  %v1793_v56 = vsel %vm1789_vm14, %v7561_v43, %v1782_v18 }
 0x149   : > { %v1768_v17 = vadd.f32 %v1761_v40, %v1637_v62  ;;  %v14173_v58 = vrot.slane %v14171_v52, %v8380_v59  ;;  %v14174_v45 = vrot.slane %v14171_v52, %v8377_v55  ;;  %v622_v4 = vsel %vm621_vm6, %v616_v33, %v14175_v36 }
 0x14a   : > { %v1835_v22 = vmul.f32 %v14172_v54, %v1795_v21  ;;  %v1722_v42 = vadd.f32 %v1715_v19, %v1591_v6  ;;  %v1723_v63 = vadd.f32 %v1716_v5, %v1592_v47  ;;  %v623_v27 = vsel %vm621_vm6, %v614_v3, %v616_v33  ;;  %v14176_v21 = vld [vmem:[#allocation145_spill] sm:$0xff]  ;;  %v14179_v19 = vld [vmem:[#allocation139_spill] sm:$0xff] }
 0x14b   : > { %v1836_v23 = vmul.f32 %v14173_v58, %v1794_v48  ;;  %v1838_v57 = vmul.f32 %v14174_v45, %v1792_v46  ;;  %v624_v62 = vsel %vm621_vm6, %v14176_v21, %v614_v3  ;;  %v1738_v18 = vadd.f32 %v1731_v14, %v1607_v53  ;;  %v14178_v45 = vld [vmem:[#allocation136_spill] sm:$0xff]  ;;  %v14180_v33 = vld [vmem:[#allocation135_spill] sm:$0xff]  ;;  %v14182_v14 = vld [vmem:[#allocation74_spill] sm:$0xff] }
 0x14c   : > { %v1739_v43 = vadd.f32 %v1732_v10, %v1608_v13  ;;  %v1754_v40 = vadd.f32 %v1747_v30, %v1623_v1  ;;  %v14177_v55 = vrot.slane %v14171_v52, %v8383_v20  ;;  %v1755_v48 = vadd.f32 %v1748_v37, %v1624_v12  ;;  %v14181_v1 = vld [vmem:[#allocation141_spill] sm:$0xff]  ;;  %v14183_v12 = vld [vmem:[#allocation102_spill] sm:$0xff] }
 0x14d   : > { %v1770_v54 = vadd.f32 %v1763_v39, %v1639_v7  ;;  %v1771_v58 = vadd.f32 %v1764_v24, %v1640_v0  ;;  %v1860_v6 = vmul.f32 %v14178_v45, %v1835_v22  ;;  %v1861_v47 = vmul.f32 %v14178_v45, %v1836_v23  ;;  %v720_v24 = vpop.permute.xlu1 %719 }
 0x14e   : > { %v1837_v46 = vmul.f32 %v14177_v55, %v1793_v56  ;;  %v1876_v5 = vmul.f32 %v14179_v19, %v1835_v22  ;;  %v1847_v36 = vmul.f32 %v14180_v33, %v1838_v57  ;;  %v1863_v3 = vmul.f32 %v14178_v45, %v1838_v57 }
 0x14f   : > { %v1877_v13 = vmul.f32 %v14179_v19, %v1836_v23  ;;  %v1879_v53 = vmul.f32 %v14179_v19, %v1838_v57  ;;  %v1895_v20 = vmul.f32 %v14181_v1, %v1838_v57  ;;  %v14184_v7 = vrot.slane %v14182_v14, %v14183_v12 }
 0x150   : > { %v9538_v10 = vmul.f32 %v14180_v33, %v1835_v22  ;;  %v1892_v30 = vmul.f32 %v14181_v1, %v1835_v22  ;;  %v1893_v37 = vmul.f32 %v14181_v1, %v1836_v23  ;;  %v1862_v39 = vmul.f32 %v14178_v45, %v1837_v46 }
 0x151   : > { %v672_v0 = vmul.f32 %v14184_v7, %v622_v4  ;;  %v9544_v52 = vmul.f32 %v14180_v33, %v1836_v23  ;;  %v9546_v56 = vadd.f32 %v1860_v6, %v1736_v15  ;;  %v1846_v57 = vmul.f32 %v14180_v33, %v1837_v46  ;;  %v14189_v23 = vld [vmem:[#allocation154_spill] sm:$0xff]  ;;  %v718_v6 = vpop.permute.xlu0 %717 }
 0x152   : > { %v1878_v21 = vmul.f32 %v14179_v19, %v1837_v46  ;;  %v9550_v4 = vadd.f32 %v1861_v47, %v1737_v8  ;;  %v9552_v55 = vadd.f32 %v1876_v5, %v1752_v2  ;;  %v9554_v7 = vadd.f32 %v1847_v36, %v1723_v63  ;;  %v14195_v36 = vld [vmem:[#allocation142_spill] sm:$0xff] }
 0x153   : > { %14185 = vst [vmem:[#allocation117_spill] sm:$0xff] %v9546_v56  ;;  %v1870_v22 = vadd.f32 %v1863_v3, %v1739_v43  ;;  %v9556_v60 = vadd.f32 %v1877_v13, %v1753_v16  ;;  %v1886_v59 = vadd.f32 %v1879_v53, %v1755_v48  ;;  %v1894_v51 = vmul.f32 %v14181_v1, %v1837_v46  ;;  %v14192_v43 = vld [vmem:[#allocation80_spill] sm:$0xff]  ;;  %v14220_v33 = vld [vmem:[#allocation90_spill] sm:$0xff] }
 0x154   : > { %14186 = vst [vmem:[#allocation112_spill] sm:$0xff] %v9550_v4  ;;  %14187 = vst [vmem:[#allocation113_spill] sm:$0xff] %v9552_v55  ;;  %v724_v15 = vsel %vm723_vm7, %v720_v24, %v14189_v23  ;;  %v9562_v56 = vadd.f32 %v1892_v30, %v1768_v17  ;;  %v9564_v19 = vadd.f32 %v1893_v37, %v1769_v31  ;;  %v14193_v48 = vld [vmem:[#allocation96_spill] sm:$0xff] }
 0x155   : > { %14188 = vst [vmem:[#allocation114_spill] sm:$0xff] %v9556_v60  ;;  %v1869_v8 = vadd.f32 %v1862_v39, %v1738_v18  ;;  %v1902_v2 = vadd.f32 %v1895_v20, %v1771_v58  ;;  %v9566_v47 = vadd.f32 %v1846_v57, %v1722_v42  ;;  %v1885_v63 = vadd.f32 %v1878_v21, %v1754_v40  ;;  %v14197_v13 = vld [vmem:[#allocation76_spill] sm:$0xff]  ;;  %v14199_v18 = vld [vmem:[#allocation155_spill] sm:$0xff]  ;;  %v851_v21 = vpop.permute.xlu1 %850 }
 0x156   : > { %14190 = vst [vmem:[#allocation115_spill] sm:$0xff] %v9562_v56  ;;  %14191 = vst [vmem:[#allocation123_spill] sm:$0xff] %v9564_v19  ;;  %v681_v16 = vmul.f32 %v14192_v43, %v672_v0  ;;  %v14194_v5 = vrot.slane %v14182_v14, %v14193_v48  ;;  %v9573_v3 = vadd.f32 %v14195_v36, %v1870_v22  ;;  %v14200_v58 = vld [vmem:[#allocation143_spill] sm:$0xff]  ;;  %v14203_v37 = vld [vmem:[#allocation92_spill] sm:$0xff] }
 0x157   : > { %v14198_v17 = vrot.slane %v14197_v13, %v14183_v12  ;;  %v725_v31 = vsel %vm723_vm7, %v718_v6, %v720_v24  ;;  %v726_v42 = vsel %vm723_vm7, %v14199_v18, %v718_v6  ;;  %v9583_v40 = vadd.f32 %v1894_v51, %v1770_v54  ;;  %v14206_v24 = vld [vmem:[#allocation144_spill] sm:$0xff]  ;;  %v14214_v19 = vld [vmem:[#allocation86_spill] sm:$0xff] }
 0x158   : > { %v670_v46 = vmul.f32 %v14194_v5, %v624_v62  ;;  %14196 = vst [vmem:[#allocation130_spill] sm:$0xff] %v9573_v3  ;;  %v9586_v20 = vadd.f32 %v14200_v58, %v1886_v59  ;;  %v14202_v62 = vld [vmem:[#allocation81_spill] sm:$0xff]  ;;  %v14204_v39 = vrot.slane %v14182_v14, %v14203_v37  ;;  %v9593_v22 = vadd.f32 %v14195_v36, %v1869_v8  ;;  %v14212_v18 = vld [vmem:[#allocation84_spill] sm:$0xff]  ;;  %v14219_v36 = vld [vmem:[#allocation158_spill] sm:$0xff] }
 0x159   : > { %v775_v53 = vmul.f32 %v14198_v17, %v724_v15  ;;  %v690_v30 = vmul.f32 %v14202_v62, %v672_v0  ;;  %v9596_v23 = vadd.f32 %v14206_v24, %v1902_v2  ;;  %v14208_v15 = vld [vmem:[#allocation83_spill] sm:$0xff]  ;;  %v14209_v51 = vrot.slane %v14197_v13, %v14193_v48  ;;  %v14217_v3 = vld [vmem:[#allocation89_spill] sm:$0xff]  ;;  %v982_v1 = vpop.permute.xlu1 %981 }
 0x15a   : > { %14201 = vst [vmem:[#allocation131_spill] sm:$0xff] %v9586_v20  ;;  %v671_v57 = vmul.f32 %v14204_v39, %v623_v27  ;;  %14205 = vst [vmem:[#allocation133_spill] sm:$0xff] %v9593_v22  ;;  %v699_v6 = vmul.f32 %v14208_v15, %v672_v0  ;;  %v9603_v54 = vadd.f32 %v14200_v58, %v1885_v63  ;;  %v849_v63 = vpop.permute.xlu0 %848  ;;  %v14216_v20 = vld [vmem:[#allocation88_spill] sm:$0xff] }
 0x15b   : > { %14207 = vst [vmem:[#allocation128_spill] sm:$0xff] %v9596_v23  ;;  %v773_v59 = vmul.f32 %v14209_v51, %v726_v42  ;;  %v708_v5 = vmul.f32 %v8584_v32, %v672_v0  ;;  %v679_v27 = vmul.f32 %v14192_v43, %v670_v46  ;;  %v14211_v14 = vrot.slane %v14197_v13, %v14203_v37  ;;  %v14213_v23 = vld [vmem:[#allocation157_spill] sm:$0xff] }
 0x15c   : > { %14210 = vst [vmem:[#allocation138_spill] sm:$0xff] %v9603_v54  ;;  %v688_v2 = vmul.f32 %v14202_v62, %v670_v46  ;;  %v697_v17 = vmul.f32 %v14208_v15, %v670_v46  ;;  %v784_v39 = vmul.f32 %v14212_v18, %v775_v53  ;;  %v855_v42 = vsel %vm854_vm8, %v851_v21, %v14213_v23  ;;  %v14215_v54 = vld [vmem:[#allocation87_spill] sm:$0xff] }
 0x15d   : > { %v774_v8 = vmul.f32 %v14211_v14, %v725_v31  ;;  %v680_v51 = vmul.f32 %v14192_v43, %v671_v57  ;;  %v706_v0 = vmul.f32 %v8584_v32, %v670_v46  ;;  %v800_v56 = vmul.f32 %v14214_v19, %v775_v53 }
 0x15e   : > { %v816_v13 = vmul.f32 %v14215_v54, %v775_v53  ;;  %v689_v31 = vmul.f32 %v14202_v62, %v671_v57  ;;  %v698_v14 = vmul.f32 %v14208_v15, %v671_v57  ;;  %v832_v60 = vmul.f32 %v14216_v20, %v775_v53 }
 0x15f   : > { %v782_v55 = vmul.f32 %v14212_v18, %v773_v59  ;;  %v707_v22 = vmul.f32 %v8584_v32, %v671_v57  ;;  %v783_v23 = vmul.f32 %v14212_v18, %v774_v8  ;;  %v14218_v43 = vrot.slane %v14217_v3, %v14183_v12 }
 0x160   : > { %v856_v4 = vsel %vm854_vm8, %v849_v63, %v851_v21  ;;  %v791_v58 = vadd.f32 %v784_v39, %v681_v16  ;;  %v798_v62 = vmul.f32 %v14214_v19, %v773_v59  ;;  %v799_v15 = vmul.f32 %v14214_v19, %v774_v8 }
 0x161   : > { %v906_v46 = vmul.f32 %v14218_v43, %v855_v42  ;;  %v857_v53 = vsel %vm854_vm8, %v14219_v36, %v849_v63  ;;  %v807_v32 = vadd.f32 %v800_v56, %v690_v30  ;;  %v823_v57 = vadd.f32 %v816_v13, %v699_v6  ;;  %v980_v6 = vpop.permute.xlu0 %979  ;;  %v14226_v13 = vld [vmem:[#allocation98_spill] sm:$0xff] }
 0x162   : > { %v814_v18 = vmul.f32 %v14215_v54, %v773_v59  ;;  %v815_v45 = vmul.f32 %v14215_v54, %v774_v8  ;;  %v839_v42 = vadd.f32 %v832_v60, %v708_v5  ;;  %v789_v43 = vadd.f32 %v782_v55, %v679_v27  ;;  %v14223_v54 = vld [vmem:[#allocation91_spill] sm:$0xff]  ;;  %v14224_v55 = vld [vmem:[#allocation94_spill] sm:$0xff] }
 0x163   : > { %v830_v21 = vmul.f32 %v14216_v20, %v773_v59  ;;  %v831_v16 = vmul.f32 %v14216_v20, %v774_v8  ;;  %v790_v39 = vadd.f32 %v783_v23, %v680_v51  ;;  %v915_v19 = vmul.f32 %v14220_v33, %v906_v46  ;;  %v14225_v59 = vld [vmem:[#allocation159_spill] sm:$0xff] }
 0x164   : > { %v14221_v49 = vrot.slane %v14217_v3, %v14193_v48  ;;  %v14222_v56 = vrot.slane %v14217_v3, %v14203_v37  ;;  %v805_v63 = vadd.f32 %v798_v62, %v688_v2  ;;  %v931_v60 = vmul.f32 %v14223_v54, %v906_v46  ;;  %v14227_v3 = vld [vmem:[#allocation160_spill] sm:$0xff]  ;;  %v1395_v62 = vpop.permute.xlu1 %1394 }
 0x165   : > { %v947_v5 = vmul.f32 %v14224_v55, %v906_v46  ;;  %v986_v20 = vsel %vm985_vm10, %v982_v1, %v14225_v59  ;;  %v806_v27 = vadd.f32 %v799_v15, %v689_v31  ;;  %v821_v8 = vadd.f32 %v814_v18, %v697_v17  ;;  %v14228_v31 = vld [vmem:[#allocation95_spill] sm:$0xff] }
 0x166   : > { %v904_v36 = vmul.f32 %v14221_v49, %v857_v53  ;;  %v905_v30 = vmul.f32 %v14222_v56, %v856_v4  ;;  %v822_v51 = vadd.f32 %v815_v45, %v698_v14  ;;  %v963_v23 = vmul.f32 %v14226_v13, %v906_v46 }
 0x167   : > { %v837_v49 = vadd.f32 %v830_v21, %v706_v0  ;;  %v838_v53 = vadd.f32 %v831_v16, %v707_v22  ;;  %v987_v4 = vsel %vm985_vm10, %v980_v6, %v982_v1  ;;  %v988_v2 = vsel %vm985_vm10, %v14227_v3, %v980_v6 }
 0x168   : > { %v922_v56 = vadd.f32 %v915_v19, %v791_v58  ;;  %v913_v35 = vmul.f32 %v14220_v33, %v904_v36  ;;  %v914_v59 = vmul.f32 %v14220_v33, %v905_v30  ;;  %v14229_v45 = vrot.slane %v14228_v31, %v14183_v12  ;;  %v14232_v33 = vld [vmem:[#allocation162_spill] sm:$0xff] }
 0x169   : > { %v938_v14 = vadd.f32 %v931_v60, %v807_v32  ;;  %v954_v0 = vadd.f32 %v947_v5, %v823_v57  ;;  %v929_v22 = vmul.f32 %v14223_v54, %v904_v36  ;;  %v930_v1 = vmul.f32 %v14223_v54, %v905_v30  ;;  %v14234_v5 = vld [vmem:[#allocation106_spill] sm:$0xff] }
 0x16a   : > { %v1037_v17 = vmul.f32 %v14229_v45, %v986_v20  ;;  %v970_v46 = vadd.f32 %v963_v23, %v839_v42  ;;  %v14230_v15 = vrot.slane %v14228_v31, %v14193_v48  ;;  %v14231_v58 = vrot.slane %v14228_v31, %v14203_v37  ;;  %v14235_v23 = vld [vmem:[#allocation107_spill] sm:$0xff] }
 0x16b   : > { %v14233_v16 = vunpack.i.l.bf16 %v14232_v33  ;;  %v945_v32 = vmul.f32 %v14224_v55, %v904_v36  ;;  %v946_v57 = vmul.f32 %v14224_v55, %v905_v30  ;;  %v961_v6 = vmul.f32 %v14226_v13, %v904_v36 }
 0x16c   : > { %v1035_v18 = vmul.f32 %v14230_v15, %v988_v2  ;;  %v1036_v21 = vmul.f32 %v14231_v58, %v987_v4  ;;  %v962_v42 = vmul.f32 %v14226_v13, %v905_v30  ;;  %v920_v54 = vadd.f32 %v913_v35, %v789_v43 }
 0x16d   : > { %v1403_v19 = vsel %vm1396_vm11, %v1395_v62, %v14233_v16  ;;  %v921_v60 = vadd.f32 %v914_v59, %v790_v39  ;;  %v1046_v20 = vmul.f32 %v14234_v5, %v1037_v17  ;;  %v1062_v3 = vmul.f32 %v14235_v23, %v1037_v17 }
 0x16e   : > { %v936_v4 = vadd.f32 %v929_v22, %v805_v63  ;;  %v937_v2 = vadd.f32 %v930_v1, %v806_v27  ;;  %v1078_v31 = vmul.f32 %v8770_v28, %v1037_v17  ;;  %v1094_v45 = vmul.f32 %v14120_v25, %v1037_v17  ;;  %v1393_v1 = vpop.permute.xlu0 %1392 }
 0x16f   : > { %v1044_v15 = vmul.f32 %v14234_v5, %v1035_v18  ;;  %v1045_v55 = vmul.f32 %v14234_v5, %v1036_v21  ;;  %v1060_v36 = vmul.f32 %v14235_v23, %v1035_v18  ;;  %v1061_v30 = vmul.f32 %v14235_v23, %v1036_v21 }
 0x170   : > { %v952_v35 = vadd.f32 %v945_v32, %v821_v8  ;;  %v953_v43 = vadd.f32 %v946_v57, %v822_v51  ;;  %v968_v39 = vadd.f32 %v961_v6, %v837_v49  ;;  %v1076_v13 = vmul.f32 %v8770_v28, %v1035_v18  ;;  %v14239_v6 = vld [vmem:[#allocation152_spill] sm:$0xff] }
 0x171   : > { %v969_v59 = vadd.f32 %v962_v42, %v838_v53  ;;  %v1053_v63 = vadd.f32 %v1046_v20, %v922_v56  ;;  %v1069_v27 = vadd.f32 %v1062_v3, %v938_v14  ;;  %v1077_v22 = vmul.f32 %v8770_v28, %v1036_v21  ;;  %v14240_v42 = vld [vmem:[#allocation153_spill] sm:$0xff] }
 0x172   : > { %v1085_v17 = vadd.f32 %v1078_v31, %v954_v0  ;;  %v1101_v58 = vadd.f32 %v1094_v45, %v970_v46  ;;  %v1092_v33 = vmul.f32 %v14120_v25, %v1035_v18  ;;  %v1093_v16 = vmul.f32 %v14120_v25, %v1036_v21  ;;  %v14237_v0 = vld [vmem:[#allocation149_spill] sm:$0xff]  ;;  %v14238_v18 = vld [vmem:[#allocation151_spill] sm:$0xff]  ;;  %v1524_v45 = vpop.permute.xlu0 %1523 }
 0x173   : > { %v1051_v5 = vadd.f32 %v1044_v15, %v920_v54  ;;  %v1052_v38 = vadd.f32 %v1045_v55, %v921_v60  ;;  %v1067_v23 = vadd.f32 %v1060_v36, %v936_v4  ;;  %v1068_v8 = vadd.f32 %v1061_v30, %v937_v2  ;;  %v14241_v60 = vld [vmem:[#allocation146_spill] sm:$0xff]  ;;  %v14245_v55 = vld [vmem:[#allocation147_spill] sm:$0xff] }
 0x174   : > { %v1083_v51 = vadd.f32 %v1076_v13, %v952_v35  ;;  %v14236_v49 = vrot.slane %v14122_v50, %v14183_v12  ;;  %v1397_v56 = vsel %vm1396_vm11, %v1393_v1, %v1395_v62  ;;  %v1398_v28 = vsel %vm1396_vm11, %v9271_v11, %v1393_v1  ;;  %v1526_v62 = vpop.permute.xlu1 %1525 }
 0x175   : > { %v9701_v14 = vadd.f32 %v14206_v24, %v9583_v40  ;;  %v1084_v25 = vadd.f32 %v1077_v22, %v953_v43  ;;  %v1222_v46 = vadd.f32 %v14237_v0, %v1053_v63  ;;  %v1275_v21 = vadd.f32 %v14238_v18, %v1069_v27  ;;  %v14247_v43 = vld [vmem:[#allocation148_spill] sm:$0xff]  ;;  %v14251_v22 = vld [vmem:[#allocation110_spill] sm:$0xff] }
 0x176   : > { %v1448_v53 = vmul.f32 %v14236_v49, %v1403_v19  ;;  %v1099_v32 = vadd.f32 %v1092_v33, %v968_v39  ;;  %v1100_v57 = vadd.f32 %v1093_v16, %v969_v59  ;;  %v1328_v19 = vadd.f32 %v14239_v6, %v1085_v17  ;;  %v14249_v59 = vld [vmem:[#allocation120_spill] sm:$0xff]  ;;  %v14254_v16 = vld [vmem:[#allocation150_spill] sm:$0xff] }
 0x177   : > { %v1381_v54 = vadd.f32 %v14240_v42, %v1101_v58  ;;  %v1220_v20 = vadd.f32 %v14241_v60, %v1051_v5  ;;  %v14242_v11 = vcombine.high %v14241_v60, %v14241_v60  ;;  %v14243_v40 = vrot.slane %v14122_v50, %v14193_v48  ;;  %v14253_v58 = vld [vmem:[#allocation121_spill] sm:$0xff] }
 0x178   : > { %v14244_v2 = vrot.slane %v14122_v50, %v14203_v37  ;;  %v1457_v15 = vmul.f32 %v14133_v29, %v1448_v53  ;;  %v1273_v36 = vadd.f32 %v14245_v55, %v1067_v23  ;;  %v14246_v30 = vcombine.high %v14245_v55, %v14245_v55 }
 0x179   : > { %v1221_v3 = vadd.f32 %v14242_v11, %v1052_v38  ;;  %v1446_v4 = vmul.f32 %v14243_v40, %v1398_v28  ;;  %v1326_v39 = vadd.f32 %v14247_v43, %v1083_v51  ;;  %v14248_v38 = vld [vmem:[#allocation118_spill] sm:$0xff]  ;;  %v1489_v63 = vmul.f32 %v14249_v59, %v1448_v53 }
 0x17a   : > { %v1447_v31 = vmul.f32 %v14244_v2, %v1397_v56  ;;  %v1274_v35 = vadd.f32 %v14246_v30, %v1068_v8  ;;  %v1473_v13 = vmul.f32 %v14248_v38, %v1448_v53  ;;  %v14250_v27 = vcombine.high %v14247_v43, %v14247_v43  ;;  %v14258_v2 = vld [vmem:[#allocation111_spill] sm:$0xff] }
 0x17b   : > { %v14252_v1 = vunpack.i.l.bf16 %v14251_v22  ;;  %v1505_v33 = vmul.f32 %v14253_v58, %v1448_v53  ;;  %v1379_v5 = vadd.f32 %v14254_v16, %v1099_v32  ;;  %v14255_v23 = vcombine.high %v14254_v16, %v14254_v16  ;;  %v14256_v32 = vld [vmem:[#allocation119_spill] sm:$0xff] }
 0x17c   : > { %v1327_v50 = vadd.f32 %v14250_v27, %v1084_v25  ;;  %v1528_v51 = vsel %vm1527_vm12, %v1524_v45, %v1526_v62  ;;  %v1455_v49 = vmul.f32 %v14133_v29, %v1446_v4  ;;  %v1456_v56 = vmul.f32 %v14133_v29, %v1447_v31  ;;  %v14264_v27 = vld [vmem:[#allocation127_spill] sm:$0xff] }
 0x17d   : > { %v1534_v17 = vsel %vm1527_vm12, %v1526_v62, %v14252_v1  ;;  %v1380_v8 = vadd.f32 %v14255_v23, %v1100_v57  ;;  %v1471_v28 = vmul.f32 %v14248_v38, %v1446_v4  ;;  %v1472_v25 = vmul.f32 %v14248_v38, %v1447_v31 }
 0x17e   : > { %v1464_v0 = vadd.f32 %v1457_v15, %v1222_v46  ;;  %v1487_v53 = vmul.f32 %v14249_v59, %v1446_v4  ;;  %v1488_v18 = vmul.f32 %v14249_v59, %v1447_v31  ;;  %v14257_v6 = vrot.slane %v14256_v32, %v14183_v12 }
 0x17f   : > { %v1480_v42 = vadd.f32 %v1473_v13, %v1275_v21  ;;  %v1496_v60 = vadd.f32 %v1489_v63, %v1328_v19  ;;  %v1503_v62 = vmul.f32 %v14253_v58, %v1446_v4  ;;  %v1851_v29 = vadd.f32 %v9538_v10, %v9485_v9  ;;  %v14260_v13 = vld [vmem:[#allocation124_spill] sm:$0xff]  ;;  %v14261_v9 = vld [vmem:[#allocation125_spill] sm:$0xff]  ;;  %v14262_v63 = vld [vmem:[#allocation126_spill] sm:$0xff] }
 0x180   : > { %v1579_v57 = vmul.f32 %v14257_v6, %v1534_v17  ;;  %v1512_v11 = vadd.f32 %v1505_v33, %v1381_v54  ;;  %v1504_v40 = vmul.f32 %v14253_v58, %v1447_v31  ;;  %v1529_v46 = vsel %vm1527_vm12, %v14258_v2, %v1524_v45  ;;  %v2338_v54 = vld [vmem:[%s13949_s8 + $0x408] sm:$0xff]  ;;  %v2340_v31 = vld [vmem:[%s13949_s8 + $0x418] sm:$0xff] }
 0x181   : > { %v14259_v15 = vrot.slane %v14256_v32, %v14203_v37  ;;  %v1462_v30 = vadd.f32 %v1455_v49, %v1220_v20  ;;  %v1463_v43 = vadd.f32 %v1456_v56, %v1221_v3  ;;  %v1478_v21 = vadd.f32 %v1471_v28, %v1273_v36  ;;  %v14263_v36 = vld [vmem:[#allocation156_spill] sm:$0xff] }
 0x182   : > { %v1479_v19 = vadd.f32 %v1472_v25, %v1274_v35  ;;  %v1494_v38 = vadd.f32 %v1487_v53, %v1326_v39  ;;  %v1495_v4 = vadd.f32 %v1488_v18, %v1327_v50  ;;  %v1588_v59 = vmul.f32 %v14260_v13, %v1579_v57  ;;  %v1655_v25 = vpop.permute.xlu0 %1654 }
 0x183   : > { %v1578_v55 = vmul.f32 %v14259_v15, %v1528_v51  ;;  %v1604_v10 = vmul.f32 %v14261_v9, %v1579_v57  ;;  %v1510_v45 = vadd.f32 %v1503_v62, %v1379_v5  ;;  %v1620_v20 = vmul.f32 %v14262_v63, %v1579_v57  ;;  %v2401_v15 = vld [vmem:[%s13949_s8 + $0x600] sm:$0xff] }
 0x184   : > { %v1852_v3 = vadd.f32 %v9544_v52, %v9483_v26  ;;  %v1908_v35 = vadd.f32 %v14263_v36, %v1851_v29  ;;  %v1511_v39 = vadd.f32 %v1504_v40, %v1380_v8  ;;  %v1636_v50 = vmul.f32 %v14264_v27, %v1579_v57  ;;  %v1657_v52 = vpop.permute.xlu1 %1656 }
 0x185   : > { %v14265_v22 = vrot.slane %v14256_v32, %v14193_v48  ;;  %v1910_v17 = vadd.f32 %v14263_v36, %v9566_v47  ;;  %v1587_v58 = vmul.f32 %v14260_v13, %v1578_v55  ;;  %v1911_v16 = vadd.f32 %v14263_v36, %v9554_v7  ;;  %v7562_v7 = vld [vmem:[%s13991_s6 + $0x31] sm:$0xff]  ;;  %v14266_v32 = vld [vmem:[#allocation101_spill] sm:$0xff] }
 0x186   : > { %v1909_v33 = vadd.f32 %v14263_v36, %v1852_v3  ;;  %v9780_v26 = vpack.c.bf16 %v2340_v31, %v2338_v54  ;;  %v9782_v5 = vadd.f32 %v1588_v59, %v1464_v0  ;;  %v9784_v23 = vadd.f32 %v1604_v10, %v1480_v42  ;;  %v2406_v3 = vld [vmem:[%s13949_s8 + $0x628] sm:$0xff] }
 0x187   : > { %v1577_v1 = vmul.f32 %v14265_v22, %v1529_v46  ;;  %v1603_v8 = vmul.f32 %v14261_v9, %v1578_v55  ;;  %v1619_v51 = vmul.f32 %v14262_v63, %v1578_v55  ;;  %v9788_v49 = vadd.f32 %v1620_v20, %v1496_v60  ;;  %v14268_v60 = vld [vmem:[#allocation23_spill] sm:$0xff]  ;;  %v2408_v22 = vld [vmem:[%s13949_s8 + $0x638] sm:$0xff] }
 0x188   : > { %v1963_v47 = vcombine.low %v1908_v35, %v1909_v33  ;;  %v1964_v56 = vcombine.low %v1910_v17, %v1911_v16  ;;  %6351 = vmatprep.subr.bf16.mxu0 %v9780_v26  ;;  %v1696_v28 = vrot.slane %v7562_v7, %v14183_v12  ;;  %v14267_v6 = vunpack.i.l.bf16 %v14266_v32  ;;  %v2407_v17 = vld [vmem:[%s13949_s8 + $0x630] sm:$0xff] }
 0x189   : > { %v1586_v0 = vmul.f32 %v14260_v13, %v1577_v1  ;;  %v1602_v53 = vmul.f32 %v14261_v9, %v1577_v1  ;;  %v1618_v18 = vmul.f32 %v14262_v63, %v1577_v1  ;;  %v1634_v42 = vmul.f32 %v14264_v27, %v1577_v1  ;;  %v2403_v13 = vld [vmem:[%s13949_s8 + $0x610] sm:$0xff]  ;;  %v2405_v1 = vld [vmem:[%s13949_s8 + $0x620] sm:$0xff] }
 0x18a   : > { %v1665_v57 = vsel %vm1658_vm13, %v1657_v52, %v14267_v6  ;;  %v1971_v62 = vrot.slane %v1963_v47, %v14268_v60  ;;  %v1978_v29 = vrot.slane %v1964_v56, %v14268_v60  ;;  %v1688_v40 = vrot.slane %v7562_v7, %v14193_v48  ;;  %v14269_v9 = vld [vmem:[#allocation103_spill] sm:$0xff] }
 0x18b   : > { %v1643_v2 = vadd.f32 %v1636_v50, %v1512_v11  ;;  %v1635_v46 = vmul.f32 %v14264_v27, %v1578_v55  ;;  %v1692_v59 = vrot.slane %v7562_v7, %v14203_v37  ;;  %v1660_v10 = vsel %vm1658_vm13, %v14269_v9, %v1655_v25  ;;  %v2337_v55 = vld [vmem:[%s13949_s8 + $0x400] sm:$0xff]  ;;  %v2339_v63 = vld [vmem:[%s13949_s8 + $0x410] sm:$0xff] }
 0x18c   : > { %v9817_v54 = vadd.f32 %v1587_v58, %v1463_v43  ;;  %v1979_v31 = vcombine.low %v1971_v62, %v1978_v29  ;;  %v1710_v11 = vmul.f32 %v1696_v28, %v1665_v57  ;;  %v1659_v20 = vsel %vm1658_vm13, %v1655_v25, %v1657_v52  ;;  %v14275_v25 = vld [vmem:[#allocation134_spill] sm:$0xff]  ;;  %v7563_v57 = vld [vmem:[%s13991_s6 + $0x38] sm:$0xff]  ;;  %s11027_s6 = sld [smem:[#allocation11 + $0x183]] }
 0x18d   : > { %v9830_v35 = vadd.f32 %v1586_v0, %v1462_v30  ;;  %v9832_v43 = vadd.f32 %v1602_v53, %v1478_v21  ;;  %v9834_v27 = vadd.f32 %v1603_v8, %v1479_v19  ;;  %v9836_v50 = vadd.f32 %v1619_v51, %v1495_v4  ;;  %v14270_v19 = vld [vmem:[#allocation161_spill] sm:$0xff]  ;;  %v1786_v53 = vpop.permute.xlu0 %1785  ;;  %v14276_v29 = vld [vmem:[#allocation104_spill] sm:$0xff] }
 0x18e   : > { %v9847_v30 = vadd.f32 %v1618_v18, %v1494_v38  ;;  %v9849_v21 = vadd.f32 %v1634_v42, %v1510_v45  ;;  %v1998_v58 = vadd.f32 %v1979_v31, %v14270_v19  ;;  %v1708_v4 = vmul.f32 %v1688_v40, %v1660_v10  ;;  %v1788_v45 = vpop.permute.xlu1 %1787  ;;  %v2342_v10 = vld [vmem:[%s13949_s8 + $0x428] sm:$0xff] }
 0x18f   : > { %v9852_v33 = vadd.f32 %v1635_v46, %v1511_v39  ;;  %v9854_v16 = vpack.c.bf16 %v2403_v13, %v2401_v15  ;;  %v9856_v52 = vpack.c.bf16 %v2339_v63, %v2337_v55  ;;  %v1709_v8 = vmul.f32 %v1692_v59, %v1659_v20  ;;  %v14278_v55 = vld [vmem:[#allocation108_spill] sm:$0xff] }
 0x190   : > { %2000 = vst [vmem:[#allocation2] sm:$0xff] %v1998_v58  ;;  %vm2002_vm15 = vcmp.gt.f32.partialorder %v1998_v58, 0.5  ;;  %v1719_v51 = vmul.f32 %v14164_v34, %v1710_v11  ;;  %v9859_v47 = vpack.c.bf16 %v2408_v22, %v2406_v3  ;;  %v9861_v38 = vpack.c.bf16 %v2407_v17, %v2405_v1 }
 0x191   : > { %14271 = vst [vmem:[#allocation145_spill] sm:$0xff] %v9854_v16  ;;  %v14274_v56 = vmov 0.0   ;;  %v1735_v28 = vmul.f32 %v14165_v44, %v1710_v11  ;;  %v1751_v39 = vmul.f32 %v14166_v41, %v1710_v11  ;;  %v1767_v0 = vmul.f32 %v14275_v25, %v1710_v11 }
 0x192   : > { %14272 = vst [vmem:[#allocation74_spill] sm:$0xff] %v9859_v47  ;;  %14273 = vst [vmem:[#allocation102_spill] sm:$0xff] %v9861_v38  ;;  %v6035_v7 = vsel %vm2002_vm15, 1.0, %v14274_v56  ;;  %v1717_v6 = vmul.f32 %v14164_v34, %v1708_v4  ;;  %v1827_v42 = vrot.slane %v7563_v57, %v14183_v12  ;;  %v1718_v62 = vmul.f32 %v14164_v34, %v1709_v8  ;;  %v2344_v34 = vld [vmem:[%s13949_s8 + $0x438] sm:$0xff]  ;;  %14494 = sst [smem:[#allocation169_spill]] %s11027_s6  ;;  %s14503_s6 = smov 114  }
 0x193   : > { %v2442_v18 = vrot.slane %v6035_v7, %v14268_v60  ;;  %v2435_v32 = vcombine.high %v6035_v7, %v6035_v7  ;;  %v14277_v40 = vunpack.i.l.bf16 %v14276_v29  ;;  %v1819_v15 = vrot.slane %v7563_v57, %v14193_v48  ;;  %v14279_v7 = vld [vmem:[#allocation135_spill] sm:$0xff]  ;;  %v2346_v29 = vld [vmem:[%s13949_s8 + $0x448] sm:$0xff] }
 0x194   : > { %v1823_v13 = vrot.slane %v7563_v57, %v14203_v37  ;;  %v1790_v31 = vsel %vm1789_vm14, %v1786_v53, %v1788_v45  ;;  %v1726_v48 = vadd.f32 %v1719_v51, %v9782_v5  ;;  %v1742_v37 = vadd.f32 %v1735_v28, %v9784_v23  ;;  %v2410_v5 = vld [vmem:[%s13949_s8 + $0x648] sm:$0xff]  ;;  %v2412_v23 = vld [vmem:[%s13949_s8 + $0x658] sm:$0xff] }
 0x195   : > { %v1796_v46 = vsel %vm1789_vm14, %v1788_v45, %v14277_v40  ;;  %v2450_v59 = vcombine.high %v2442_v18, %v2442_v18  ;;  %v2449_v9 = vrot.slane %v2435_v32, %v14268_v60  ;;  %v1733_v11 = vmul.f32 %v14165_v44, %v1708_v4  ;;  %v2409_v32 = vld [vmem:[%s13949_s8 + $0x640] sm:$0xff] }
 0x196   : > { %v9887_v12 = vmul.f32 %v1827_v42, %v1796_v46  ;;  %v1791_v63 = vsel %vm1789_vm14, %v14278_v55, %v1786_v53  ;;  %v1758_v3 = vadd.f32 %v1751_v39, %v9788_v49  ;;  %v9898_v22 = vadd.f32 %v1767_v0, %v1643_v2  ;;  %v2341_v49 = vld [vmem:[%s13949_s8 + $0x420] sm:$0xff]  ;;  %v2343_v2 = vld [vmem:[%s13949_s8 + $0x430] sm:$0xff]  ;;  %v14280_v0 = vld [vmem:[#allocation136_spill] sm:$0xff] }
 0x197   : > { %2539 = vmatprep.mubr.f32.mxu1 %v2450_v59  ;;  %v2451_v20 = vcombine.high %v2449_v9, %v2449_v9  ;;  %v9900_v1 = vmul.f32 %v1823_v13, %v1790_v31  ;;  %v1734_v17 = vmul.f32 %v14165_v44, %v1709_v8  ;;  %v1749_v19 = vmul.f32 %v14166_v41, %v1708_v4  ;;  %v2348_v59 = vld [vmem:[%s13949_s8 + $0x458] sm:$0xff]  ;;  %v2415_v55 = vld [vmem:[%s13949_s8 + $0x670] sm:$0xff] }
 0x198   : > { %2540 = vmatmul.mubr.f32.vlgmr.msra.gmra.mrb[0].mxu1 %v2442_v18  ;;  %v9910_v58 = vpack.c.bf16 %v2344_v34, %v2342_v10  ;;  %v9918_v51 = vmul.f32 %v1819_v15, %v1791_v63  ;;  %v1750_v45 = vmul.f32 %v14166_v41, %v1709_v8  ;;  %v1765_v44 = vmul.f32 %v14275_v25, %v1708_v4  ;;  %v2411_v41 = vld [vmem:[%s13949_s8 + $0x650] sm:$0xff]  ;;  %v9964_v10 = vld [vmem:[#allocation2 + $0x8] sm:$0x3f] }
 0x199   : > { %6417 = vmatpush1.bf16.msra.mxu1 %v9854_v16  ;;  %2610 = vmatprep.mubr.f32.mxu0 %v2451_v20  ;;  %v1850_v28 = vmul.f32 %v14279_v7, %v9887_v12  ;;  %v1766_v39 = vmul.f32 %v14275_v25, %v1709_v8  ;;  %v1866_v53 = vmul.f32 %v14280_v0, %v9887_v12  ;;  %v14282_v4 = vld [vmem:[#allocation139_spill] sm:$0xff]  ;;  %v2352_v20 = vld [vmem:[%s13949_s8 + $0x478] sm:$0xff]  ;;  %vm1945_vm0 = vcmp.gt.f32.partialorder %v9964_v10, 0.5  ;;  %v14356_v16 = vld [vmem:[#allocation70_spill] sm:$0xff] }
 0x19a   : > { %2611 = vmatmul.mubr.f32.vlgmr.msra.gmra.mrb[0].mxu0 %v2449_v9  ;;  %6419 = vmatprep.subr.bf16.mxu1 %v9859_v47  ;;  %v9929_v18 = vpack.c.bf16 %v2412_v23, %v2410_v5  ;;  %v1882_v8 = vmul.f32 %v14282_v4, %v9887_v12  ;;  %v9940_v25 = vpack.c.bf16 %v2343_v2, %v2341_v49  ;;  %v2345_v9 = vld [vmem:[%s13949_s8 + $0x440] sm:$0xff]  ;;  %v2418_v5 = vld [vmem:[%s13949_s8 + $0x688] sm:$0xff]  ;;  %v2420_v23 = vld [vmem:[%s13949_s8 + $0x698] sm:$0xff] }
 0x19b   : > { %6353 = vmatpush1.bf16.msra.mxu0 %v9856_v52  ;;  %v1848_v57 = vmul.f32 %v14279_v7, %v9918_v51  ;;  %v1849_v42 = vmul.f32 %v14279_v7, %v9900_v1  ;;  %v1724_v40 = vadd.f32 %v1717_v6, %v9830_v35  ;;  %v1725_v46 = vadd.f32 %v1718_v62, %v9817_v54  ;;  %v2347_v6 = vld [vmem:[%s13949_s8 + $0x450] sm:$0xff]  ;;  %v2414_v62 = vld [vmem:[%s13949_s8 + $0x668] sm:$0xff]  ;;  %v2349_v2 = vld [vmem:[%s13949_s8 + $0x460] sm:$0xff] }
 0x19c   : > { %14281 = vst [vmem:[#allocation154_spill] sm:$0xff] %v9929_v18  ;;  %v9952_v15 = vadd.f32 %v1733_v11, %v9832_v43  ;;  %v9955_v13 = vadd.f32 %v1734_v17, %v9834_v27  ;;  %6355 = vmatprep.subr.bf16.mxu0 %v9910_v58  ;;  %v9967_v54 = vadd.f32 %v1749_v19, %v9847_v30  ;;  %v2416_v30 = vld [vmem:[%s13949_s8 + $0x678] sm:$0xff]  ;;  %v2413_v11 = vld [vmem:[%s13949_s8 + $0x660] sm:$0xff] }
 0x19d   : > { %v9970_v35 = vadd.f32 %v1750_v45, %v9836_v50  ;;  %6421 = vmatpush1.bf16.msra.mxu1 %v9861_v38  ;;  %v1857_v43 = vadd.f32 %v1850_v28, %v1726_v48  ;;  %v9973_v27 = vpack.c.bf16 %v2411_v41, %v2409_v32  ;;  %v9985_v50 = vadd.f32 %v1765_v44, %v9849_v21  ;;  %v2350_v21 = vld [vmem:[%s13949_s8 + $0x468] sm:$0xff]  ;;  %v2351_v45 = vld [vmem:[%s13949_s8 + $0x470] sm:$0xff]  ;;  %v2417_v44 = vld [vmem:[%s13949_s8 + $0x680] sm:$0xff] }
 0x19e   : > { %v9988_v34 = vadd.f32 %v1766_v39, %v9852_v33  ;;  %v1873_v31 = vadd.f32 %v1866_v53, %v1742_v37  ;;  %v1865_v48 = vmul.f32 %v14280_v0, %v9900_v1  ;;  %6423 = vmatprep.subr.bf16.mxu1 %v9929_v18  ;;  %v1889_v33 = vadd.f32 %v1882_v8, %v1758_v3  ;;  %v14285_v7 = vld [vmem:[#allocation141_spill] sm:$0xff]  ;;  %v2419_v32 = vld [vmem:[%s13949_s8 + $0x690] sm:$0xff]  ;;  %v2354_v41 = vld [vmem:[%s13949_s8 + $0x488] sm:$0xff] }
 0x19f   : > { %14283 = vst [vmem:[#allocation80_spill] sm:$0xff] %v9973_v27  ;;  %6357 = vmatpush1.bf16.msra.mxu0 %v9940_v25  ;;  %v1855_v37 = vadd.f32 %v1848_v57, %v1724_v40  ;;  %v1856_v63 = vadd.f32 %v1849_v42, %v1725_v46  ;;  %v1864_v3 = vmul.f32 %v14280_v0, %v9918_v51  ;;  %v14287_v8 = vld [vmem:[#allocation142_spill] sm:$0xff]  ;;  %v2353_v40 = vld [vmem:[%s13949_s8 + $0x480] sm:$0xff]  ;;  %v2355_v46 = vld [vmem:[%s13949_s8 + $0x490] sm:$0xff] }
 0x1a0   : > { %v10015_v17 = vpack.c.bf16 %v2348_v59, %v2346_v29  ;;  %v10017_v19 = vpack.c.bf16 %v2347_v6, %v2345_v9  ;;  %v10019_v49 = vpack.c.bf16 %v2416_v30, %v2414_v62  ;;  %2752 = vmatprep.mubr.f32.mxu1 %v14274_v56  ;;  %v10033_v28 = vmul.f32 %v14285_v7, %v9887_v12  ;;  %v2356_v12 = vld [vmem:[%s13949_s8 + $0x498] sm:$0xff]  ;;  %v2422_v59 = vld [vmem:[%s13949_s8 + $0x6a8] sm:$0xff]  ;;  %v14351_v18 = vld [vmem:[#allocation57_spill] sm:$0xff] }
 0x1a1   : > { %v10036_v39 = vadd.f32 %v14263_v36, %v1857_v43  ;;  %v1880_v0 = vmul.f32 %v14282_v4, %v9918_v51  ;;  %6425 = vmatpush1.bf16.msra.mxu1 %v9973_v27  ;;  %v10041_v53 = vpack.c.bf16 %v2415_v55, %v2413_v11  ;;  %v10053_v57 = vadd.f32 %v14287_v8, %v1873_v31  ;;  %v14289_v43 = vld [vmem:[#allocation143_spill] sm:$0xff]  ;;  %v2424_v11 = vld [vmem:[%s13949_s8 + $0x6b8] sm:$0xff]  ;;  %v2421_v55 = vld [vmem:[%s13949_s8 + $0x6a0] sm:$0xff] }
 0x1a2   : > { %14284 = vst [vmem:[#allocation96_spill] sm:$0xff] %v10019_v49  ;;  %6359 = vmatprep.subr.bf16.mxu0 %v10015_v17  ;;  %6427 = vmatprep.subr.bf16.mxu1 %v10019_v49  ;;  %v10057_v42 = vpack.c.bf16 %v2352_v20, %v2350_v21  ;;  %v10059_v29 = vpack.c.bf16 %v2420_v23, %v2418_v5  ;;  %v6034_v9 = vsel %vm1945_vm0, 1.0, %v14274_v56  ;;  %v2423_v21 = vld [vmem:[%s13949_s8 + $0x6b0] sm:$0xff]  ;;  %v2358_v20 = vld [vmem:[%s13949_s8 + $0x4a8] sm:$0xff]  ;;  %v2360_v5 = vld [vmem:[%s13949_s8 + $0x4b8] sm:$0xff] }
 0x1a3   : > { %14286 = vst [vmem:[#allocation76_spill] sm:$0xff] %v10041_v53  ;;  %v10074_v6 = vadd.f32 %v14289_v43, %v1889_v33  ;;  %v1912_v62 = vadd.f32 %v14263_v36, %v1855_v37  ;;  %v1913_v30 = vadd.f32 %v14263_v36, %v1856_v63  ;;  %6361 = vmatpush1.bf16.msra.mxu0 %v10017_v19  ;;  %v14353_v38 = vld [vmem:[#allocation61_spill] sm:$0xff]  ;;  %v14354_v47 = vld [vmem:[#allocation64_spill] sm:$0xff] }
 0x1a4   : > { %14288 = vst [vmem:[#allocation155_spill] sm:$0xff] %v10059_v29  ;;  %v10079_v31 = vpack.c.bf16 %v2351_v45, %v2349_v2  ;;  %v1871_v33 = vadd.f32 %v1864_v3, %v9952_v15  ;;  %v1872_v36 = vadd.f32 %v1865_v48, %v9955_v13  ;;  %v1881_v37 = vmul.f32 %v14282_v4, %v9900_v1  ;;  %v2009_v48 = vld [vmem:[#allocation2 + $0xe] sm:$0xff] }
 0x1a5   : > { %6363 = vmatprep.subr.bf16.mxu0 %v10057_v42  ;;  %v10095_v63 = vpack.c.bf16 %v2356_v12, %v2354_v41  ;;  %v1887_v23 = vadd.f32 %v1880_v0, %v9967_v54  ;;  %v10106_v15 = vmul.f32 %v14285_v7, %v9918_v51  ;;  %6429 = vmatpush1.bf16.msra.mxu1 %v10041_v53  ;;  %v1951_v13 = vmul.f32 0.2, %v9964_v10  ;;  %v2426_v10 = vld [vmem:[%s13949_s8 + $0x6c8] sm:$0xff]  ;;  %v2428_v0 = vld [vmem:[%s13949_s8 + $0x6d8] sm:$0xff]  ;;  %v14297_v41 = vld [vmem:[#allocation117_spill] sm:$0xff] }
 0x1a6   : > { %14290 = vst [vmem:[#allocation81_spill] sm:$0xff] %v10079_v31  ;;  %v10109_v4 = vpack.c.bf16 %v2419_v32, %v2417_v44  ;;  %6431 = vmatprep.subr.bf16.mxu1 %v10059_v29  ;;  %v10113_v3 = vpack.c.bf16 %v2355_v46, %v2353_v40  ;;  %v10115_v2 = vpack.c.bf16 %v2424_v11, %v2422_v59  ;;  %v1953_v54 = vsub.f32 1.0, %v6034_v9  ;;  %v2357_v44 = vld [vmem:[%s13949_s8 + $0x4a0] sm:$0xff]  ;;  %v14298_v40 = vld [vmem:[#allocation112_spill] sm:$0xff]  ;;  %v2359_v59 = vld [vmem:[%s13949_s8 + $0x4b0] sm:$0xff] }
 0x1a7   : > { %14291 = vst [vmem:[#allocation92_spill] sm:$0xff] %v10095_v63  ;;  %v10117_v45 = vpack.c.bf16 %v2423_v21, %v2421_v55  ;;  %6365 = vmatpush1.bf16.msra.mxu0 %v10079_v31  ;;  %v10120_v51 = vpack.c.bf16 %v2360_v5, %v2358_v20  ;;  %v1980_v32 = vcombine.low %v1912_v62, %v1913_v30  ;;  %v2425_v9 = vld [vmem:[%s13949_s8 + $0x6c0] sm:$0xff]  ;;  %v2427_v62 = vld [vmem:[%s13949_s8 + $0x6d0] sm:$0xff]  ;;  %vm2011_vm1 = vcmp.gt.f32.partialorder %v2009_v48, 0.5  ;;  %v14299_v55 = vld [vmem:[#allocation130_spill] sm:$0xff] }
 0x1a8   : > { %14292 = vst [vmem:[#allocation144_spill] sm:$0xff] %v10109_v4  ;;  %14293 = vst [vmem:[#allocation83_spill] sm:$0xff] %v10113_v3  ;;  %v1917_v12 = vadd.f32 %v14287_v8, %v14297_v41  ;;  %v1918_v46 = vadd.f32 %v14287_v8, %v14298_v40  ;;  %6367 = vmatprep.subr.bf16.mxu0 %v10095_v63  ;;  %v1994_v30 = vrot.slane %v10036_v39, %v14268_v60  ;;  %v14300_v21 = vld [vmem:[#allocation133_spill] sm:$0xff]  ;;  %v2362_v5 = vld [vmem:[%s13949_s8 + $0x4c8] sm:$0xff] }
 0x1a9   : > { %14294 = vst [vmem:[#allocation84_spill] sm:$0xff] %v10115_v2  ;;  %14295 = vst [vmem:[#allocation157_spill] sm:$0xff] %v10117_v45  ;;  %v2017_v11 = vmul.f32 0.2, %v2009_v48  ;;  %v2031_v20 = vcombine.low %v14300_v21, %v14299_v55  ;;  %6433 = vmatpush1.bf16.msra.mxu1 %v10109_v4  ;;  %v2364_v41 = vld [vmem:[%s13949_s8 + $0x4d8] sm:$0xff]  ;;  %v2361_v40 = vld [vmem:[%s13949_s8 + $0x4c0] sm:$0xff]  ;;  %v1955_v39 = vmul.f32 %v1953_v54, %v1951_v13 }
 0x1aa   : > { %14296 = vst [vmem:[#allocation86_spill] sm:$0xff] %v10120_v51  ;;  %v1987_v48 = vrot.slane %v1980_v32, %v14268_v60  ;;  %v6037_v61 = vsel %vm2011_vm1, 1.0, %v14274_v56  ;;  %v2030_v55 = vcombine.low %v1917_v12, %v1918_v46  ;;  %v1888_v21 = vadd.f32 %v1881_v37, %v9970_v35  ;;  %6435 = vmatprep.subr.bf16.mxu1 %v10115_v2  ;;  %v2363_v29 = vld [vmem:[%s13949_s8 + $0x4d0] sm:$0xff]  ;;  %v2430_v53 = vld [vmem:[%s13949_s8 + $0x6e8] sm:$0xff]  ;;  %v2432_v13 = vld [vmem:[%s13949_s8 + $0x6f8] sm:$0xff] }
 0x1ab   : > { %v10163_v4 = vpack.c.bf16 %v2428_v0, %v2426_v10  ;;  %v2019_v54 = vsub.f32 1.0, %v6037_v61  ;;  %v2045_v32 = vrot.slane %v2031_v20, %v14268_v60  ;;  %v10177_v35 = vmul.f32 %v14285_v7, %v9900_v1  ;;  %6369 = vmatpush1.bf16.msra.mxu0 %v10113_v3  ;;  %v2429_v10 = vld [vmem:[%s13949_s8 + $0x6e0] sm:$0xff]  ;;  %v2431_v0 = vld [vmem:[%s13949_s8 + $0x6f0] sm:$0xff]  ;;  %v2366_v61 = vld [vmem:[%s13949_s8 + $0x4e8] sm:$0xff] }
 0x1ac   : > { %v10180_v37 = vpack.c.bf16 %v2359_v59, %v2357_v44  ;;  %v1995_v12 = vcombine.low %v1987_v48, %v1994_v30  ;;  %v2038_v1 = vrot.slane %v2030_v55, %v14268_v60  ;;  %v10193_v7 = vadd.f32 %v14287_v8, %v1871_v33  ;;  %6371 = vmatprep.subr.bf16.mxu0 %v10120_v51  ;;  %v2368_v59 = vld [vmem:[%s13949_s8 + $0x4f8] sm:$0xff]  ;;  %v2365_v30 = vld [vmem:[%s13949_s8 + $0x4e0] sm:$0xff]  ;;  %v2367_v33 = vld [vmem:[%s13949_s8 + $0x4f0] sm:$0xff] }
 0x1ad   : > { %14301 = vst [vmem:[#allocation87_spill] sm:$0xff] %v10163_v4  ;;  %v10196_v44 = vadd.f32 %v14287_v8, %v1872_v36  ;;  %v10199_v46 = vpack.c.bf16 %v2364_v41, %v2362_v5  ;;  %v2021_v20 = vmul.f32 %v2019_v54, %v2017_v11  ;;  %v10211_v8 = vadd.f32 %v14289_v43, %v1887_v23  ;;  %v2076_v48 = vld [vmem:[#allocation2 + $0x1c] sm:$0xff] }
 0x1ae   : > { %14302 = vst [vmem:[#allocation88_spill] sm:$0xff] %v10180_v37  ;;  %6437 = vmatpush1.bf16.msra.mxu1 %v10117_v45  ;;  %v10214_v36 = vpack.c.bf16 %v2427_v62, %v2425_v9  ;;  %v1999_v5 = vadd.f32 %v1995_v12, %v1955_v39  ;;  %v2046_v41 = vcombine.low %v2038_v1, %v2045_v32  ;;  %vm2078_vm3 = vcmp.gt.f32.partialorder %v2076_v48, 0.5 }
 0x1af   : > { %14303 = vst [vmem:[#allocation89_spill] sm:$0xff] %v10199_v46  ;;  %v10217_v55 = vadd.f32 %v14289_v43, %v1888_v21  ;;  %6439 = vmatprep.subr.bf16.mxu1 %v10163_v4  ;;  %v10220_v2 = vpack.c.bf16 %v2363_v29, %v2361_v40  ;;  %v10222_v49 = vpack.c.bf16 %v2432_v13, %v2430_v53  ;;  %v2370_v53 = vld [vmem:[%s13949_s8 + $0x508] sm:$0xff]  ;;  %v2372_v29 = vld [vmem:[%s13949_s8 + $0x518] sm:$0xff]  ;;  %v14310_v40 = vld [vmem:[#allocation113_spill] sm:$0xff]  ;;  %v6041_v12 = vsel %vm2078_vm3, 1.0, %v14274_v56 }
 0x1b0   : > { %14304 = vst [vmem:[#allocation158_spill] sm:$0xff] %v10214_v36  ;;  %v10224_v11 = vpack.c.bf16 %v2431_v0, %v2429_v10  ;;  %6373 = vmatpush1.bf16.msra.mxu0 %v10180_v37  ;;  %v10227_v23 = vpack.c.bf16 %v2368_v59, %v2366_v61  ;;  %v10229_v9 = vpack.c.bf16 %v2367_v33, %v2365_v30  ;;  %2001 = vst [vmem:[#allocation2 + $0x8] sm:$0x3f] %v1999_v5  ;;  %v14311_v13 = vld [vmem:[#allocation114_spill] sm:$0xff]  ;;  %v2369_v0 = vld [vmem:[%s13949_s8 + $0x500] sm:$0xff] }
 0x1b1   : > { %14305 = vst [vmem:[#allocation90_spill] sm:$0xff] %v10220_v2  ;;  %14306 = vst [vmem:[#allocation91_spill] sm:$0xff] %v10222_v49  ;;  %vm2003_vm2 = vcmp.gt.f32.partialorder %v1999_v5, 0.5  ;;  %v2065_v62 = vadd.f32 %v2046_v41, %v2021_v20  ;;  %6375 = vmatprep.subr.bf16.mxu0 %v10199_v46  ;;  %v1926_v21 = vadd.f32 %v14289_v43, %v14310_v40  ;;  %v2371_v61 = vld [vmem:[%s13949_s8 + $0x510] sm:$0xff]  ;;  %v2084_v59 = vmul.f32 0.2, %v2076_v48 }
 0x1b2   : > { %14307 = vst [vmem:[#allocation94_spill] sm:$0xff] %v10224_v11  ;;  %14308 = vst [vmem:[#allocation159_spill] sm:$0xff] %v10227_v23  ;;  %v6036_v39 = vsel %vm2003_vm2, 1.0, %v14274_v56  ;;  %v1927_v54 = vadd.f32 %v14289_v43, %v14311_v13  ;;  %6441 = vmatpush1.bf16.msra.mxu1 %v10214_v36  ;;  %v2010_v43 = vld [vmem:[#allocation2 + $0x16] sm:$0x3f]  ;;  %v2086_v30 = vsub.f32 1.0, %v6041_v12  ;;  %v10265_v41 = vpack.c.bf16 %v2372_v29, %v2370_v53 }
 0x1b3   : > { %14309 = vst [vmem:[#allocation98_spill] sm:$0xff] %v10229_v9  ;;  %v2452_v32 = vcombine.high %v6036_v39, %v6036_v39  ;;  %v10245_v10 = vrot.slane %v6036_v39, %v14268_v60  ;;  %2067 = vst [vmem:[#allocation2 + $0xe] sm:$0xff] %v2065_v62  ;;  %vm2069_vm4 = vcmp.gt.f32.partialorder %v2065_v62, 0.5  ;;  %6443 = vmatprep.subr.bf16.mxu1 %v10222_v49  ;;  %v2374_v62 = vld [vmem:[%s13949_s8 + $0x528] sm:$0xff]  ;;  %v2376_v48 = vld [vmem:[%s13949_s8 + $0x538] sm:$0xff]  ;;  %vm2012_vm5 = vcmp.gt.f32.partialorder %v2010_v43, 0.5 }
 0x1b4   : > { %v10256_v1 = vsel %vm2069_vm4, 1.0, %v14274_v56  ;;  %v2097_v33 = vcombine.low %v1926_v21, %v1927_v54  ;;  %6377 = vmatpush1.bf16.msra.mxu0 %v10220_v2  ;;  %14312 = vst [vmem:[#allocation160_spill] sm:$0xff] %v10265_v41  ;;  %v14313_v39 = vld [vmem:[#allocation131_spill] sm:$0xff]  ;;  %v14314_v40 = vld [vmem:[#allocation138_spill] sm:$0xff]  ;;  %v10277_v54 = vpack.c.bf16 %v2371_v61, %v2369_v0  ;;  %v2088_v12 = vmul.f32 %v2086_v30, %v2084_v59 }
 0x1b5   : > { %v2467_v20 = vcombine.high %v10245_v10, %v10245_v10  ;;  %v10263_v5 = vrot.slane %v10256_v1, %v14268_v60  ;;  %v2098_v21 = vcombine.low %v14314_v40, %v14313_v39  ;;  %6379 = vmatprep.subr.bf16.mxu0 %v10227_v23  ;;  %v2466_v13 = vrot.slane %v2452_v32, %v14268_v60  ;;  %v2077_v53 = vld [vmem:[#allocation2 + $0x24] sm:$0x3f]  ;;  %v14316_v39 = vld [vmem:[#allocation24_spill] sm:$0xff] }
 0x1b6   : > { %14315 = vst [vmem:[#allocation95_spill] sm:$0xff] %v10277_v54  ;;  %6445 = vmatpush1.bf16.msra.mxu1 %v10224_v11  ;;  %v2105_v29 = vrot.slane %v2097_v33, %v14268_v60  ;;  %v6038_v36 = vsel %vm2012_vm5, 1.0, %v14274_v56  ;;  %v2018_v4 = vmul.f32 0.2, %v2010_v43  ;;  %v10286_v0 = vpack.c.bf16 %v2376_v48, %v2374_v62  ;;  %v2143_v43 = vld [vmem:[#allocation2 + $0x2a] sm:$0xff]  ;;  %v2373_v62 = vld [vmem:[%s13949_s8 + $0x520] sm:$0xff] }
 0x1b7   : > { %2681 = vmatprep.mubr.f32.mxu0 %v2467_v20  ;;  %v2112_v49 = vrot.slane %v2098_v21, %v14268_v60  ;;  %6447 = vmatprep.subr.bf16.mxu1 %v14316_v39  ;;  %v2776_v32 = vcombine.high %v10263_v5, %v10263_v5  ;;  %v2020_v61 = vsub.f32 1.0, %v6038_v36  ;;  %v2047_v59 = vcombine.low %v10193_v7, %v10196_v44  ;;  %v2375_v7 = vld [vmem:[%s13949_s8 + $0x530] sm:$0xff]  ;;  %v2378_v48 = vld [vmem:[%s13949_s8 + $0x548] sm:$0xff]  ;;  %v2380_v40 = vld [vmem:[%s13949_s8 + $0x558] sm:$0xff] }
 0x1b8   : > { %14317 = vst [vmem:[#allocation162_spill] sm:$0xff] %v10286_v0  ;;  %6381 = vmatpush1.bf16.msra.mxu0 %v10229_v9  ;;  %vm2079_vm6 = vcmp.gt.f32.partialorder %v2077_v53, 0.5  ;;  %v2085_v33 = vmul.f32 0.2, %v2077_v53  ;;  %v2114_v20 = vcombine.low %v10211_v8, %v10217_v55  ;;  %v2061_v36 = vrot.slane %v10053_v57, %v14268_v60  ;;  %v14318_v55 = vld [vmem:[#allocation25_spill] sm:$0xff]  ;;  %v14319_v53 = vld [vmem:[#allocation28_spill] sm:$0xff] }
 0x1b9   : > { %v2113_v30 = vcombine.low %v2105_v29, %v2112_v49  ;;  %2753 = vmatmul.mubr.f32.vlgmr.msra.gmra.mrb[2].mxu1 %v2466_v13  ;;  %6383 = vmatprep.subr.bf16.mxu0 %v10265_v41  ;;  %v2022_v44 = vmul.f32 %v2020_v61, %v2018_v4  ;;  %v2054_v49 = vrot.slane %v2047_v59, %v14268_v60  ;;  %v6042_v8 = vsel %vm2079_vm6, 1.0, %v14274_v56  ;;  %v14321_v59 = vld [vmem:[#allocation123_spill] sm:$0xff] }
 0x1ba   : > { %6449 = vmatpush1.bf16.msra.mxu1 %v14318_v55  ;;  %2865 = vmatprep.mubr.f32.mxu1 %v2776_v32  ;;  %v2087_v4 = vsub.f32 1.0, %v6042_v8  ;;  %v2121_v13 = vrot.slane %v2114_v20, %v14268_v60  ;;  %v2128_v57 = vrot.slane %v10074_v6, %v14268_v60  ;;  %v14320_v32 = vld [vmem:[#allocation115_spill] sm:$0xff]  ;;  %v1936_v11 = vadd.f32 %v14206_v24, %v14321_v59 }
 0x1bb   : > { %v10311_v21 = vadd.f32 %v2113_v30, %v2088_v12  ;;  %6451 = vmatprep.subr.bf16.mxu1 %v14319_v53  ;;  %v2062_v29 = vcombine.low %v2054_v49, %v2061_v36  ;;  %v1935_v61 = vadd.f32 %v14206_v24, %v14320_v32  ;;  %vm2145_vm7 = vcmp.gt.f32.partialorder %v2143_v43, 0.5 }
 0x1bc   : > { %6385 = vmatpush1.bf16.msra.mxu0 %v10277_v54  ;;  %v10322_v12 = vpack.c.bf16 %v2375_v7, %v2373_v62  ;;  %v2089_v30 = vmul.f32 %v2087_v4, %v2085_v33  ;;  %v2129_v20 = vcombine.low %v2121_v13, %v2128_v57  ;;  %v6045_v6 = vsel %vm2145_vm7, 1.0, %v14274_v56  ;;  %v2377_v62 = vld [vmem:[%s13949_s8 + $0x540] sm:$0xff]  ;;  %v2379_v33 = vld [vmem:[%s13949_s8 + $0x550] sm:$0xff]  ;;  %v14325_v57 = vld [vmem:[#allocation32_spill] sm:$0xff] }
 0x1bd   : > { %2134 = vst [vmem:[#allocation2 + $0x1c] sm:$0xff] %v10311_v21  ;;  %v1903_v49 = vadd.f32 %v10106_v15, %v9985_v50  ;;  %v1904_v36 = vadd.f32 %v10177_v35, %v9988_v34  ;;  %6387 = vmatprep.subr.bf16.mxu0 %v10286_v0  ;;  %v10331_v8 = vpack.c.bf16 %v2380_v40, %v2378_v48  ;;  %v2144_v4 = vld [vmem:[#allocation2 + $0x32] sm:$0x3f]  ;;  %v14324_v13 = vld [vmem:[#allocation29_spill] sm:$0xff]  ;;  %v2382_v50 = vld [vmem:[%s13949_s8 + $0x568] sm:$0xff]  ;;  %v2153_v48 = vsub.f32 1.0, %v6045_v6 }
 0x1be   : > { %14322 = vst [vmem:[#allocation106_spill] sm:$0xff] %v10322_v12  ;;  %v10339_v7 = vadd.f32 %v2062_v29, %v2022_v44  ;;  %6453 = vmatpush1.bf16.msra.mxu1 %v14324_v13  ;;  %v2384_v34 = vld [vmem:[%s13949_s8 + $0x578] sm:$0xff]  ;;  %v10348_v15 = vadd.f32 %v2129_v20, %v2089_v30  ;;  %v2151_v35 = vmul.f32 0.2, %v2143_v43  ;;  %v2164_v40 = vcombine.low %v1935_v61, %v1936_v11  ;;  %v14329_v61 = vld [vmem:[#allocation33_spill] sm:$0xff]  ;;  %v2386_v30 = vld [vmem:[%s13949_s8 + $0x588] sm:$0xff] }
 0x1bf   : > { %14323 = vst [vmem:[#allocation107_spill] sm:$0xff] %v10331_v8  ;;  %v1905_v44 = vadd.f32 %v10033_v28, %v9898_v22  ;;  %6455 = vmatprep.subr.bf16.mxu1 %v14325_v57  ;;  %v14326_v29 = vld [vmem:[#allocation128_spill] sm:$0xff]  ;;  %v10357_v59 = vpack.c.bf16 %v2379_v33, %v2377_v62  ;;  %vm2146_vm8 = vcmp.gt.f32.partialorder %v2144_v4, 0.5  ;;  %v1939_v43 = vadd.f32 %v14206_v24, %v1903_v49  ;;  %v2381_v28 = vld [vmem:[%s13949_s8 + $0x560] sm:$0xff] }
 0x1c0   : > { %2068 = vst [vmem:[#allocation2 + $0x16] sm:$0x3f] %v10339_v7  ;;  %v2165_v32 = vcombine.low %v9701_v14, %v14326_v29  ;;  %6389 = vmatpush1.bf16.msra.mxu0 %v10322_v12  ;;  %2135 = vst [vmem:[#allocation2 + $0x24] sm:$0x3f] %v10348_v15  ;;  %v1940_v11 = vadd.f32 %v14206_v24, %v1904_v36  ;;  %v10363_v22 = vpack.c.bf16 %v2384_v34, %v2382_v50  ;;  %v2383_v14 = vld [vmem:[%s13949_s8 + $0x570] sm:$0xff]  ;;  %v2388_v20 = vld [vmem:[%s13949_s8 + $0x598] sm:$0xff] }
 0x1c1   : > { %14327 = vst [vmem:[#allocation149_spill] sm:$0xff] %v10357_v59  ;;  %6391 = vmatprep.subr.bf16.mxu0 %v10331_v8  ;;  %v2155_v6 = vmul.f32 %v2153_v48, %v2151_v35  ;;  %v2172_v49 = vrot.slane %v2164_v40, %v14268_v60  ;;  %v1941_v62 = vadd.f32 %v14206_v24, %v1905_v44  ;;  %v14330_v33 = vld [vmem:[#allocation36_spill] sm:$0xff]  ;;  %v6046_v50 = vsel %vm2146_vm8, 1.0, %v14274_v56  ;;  %v2385_v48 = vld [vmem:[%s13949_s8 + $0x580] sm:$0xff]  ;;  %v2387_v24 = vld [vmem:[%s13949_s8 + $0x590] sm:$0xff] }
 0x1c2   : > { %14328 = vst [vmem:[#allocation151_spill] sm:$0xff] %v10363_v22  ;;  %6457 = vmatpush1.bf16.msra.mxu1 %v14329_v61  ;;  %v2179_v36 = vrot.slane %v2165_v32, %v14268_v60  ;;  %v2152_v34 = vmul.f32 0.2, %v2144_v4  ;;  %v10384_v29 = vpack.c.bf16 %v2383_v14, %v2381_v28  ;;  %v2154_v27 = vsub.f32 1.0, %v6046_v50  ;;  %v14333_v4 = vld [vmem:[#allocation37_spill] sm:$0xff]  ;;  %v2390_v44 = vld [vmem:[%s13949_s8 + $0x5a8] sm:$0xff] }
 0x1c3   : > { %6459 = vmatprep.subr.bf16.mxu1 %v14330_v33  ;;  %v10387_v35 = vpack.c.bf16 %v2388_v20, %v2386_v30  ;;  %v2181_v40 = vcombine.low %v1939_v43, %v1940_v11  ;;  %v2392_v32 = vld [vmem:[%s13949_s8 + $0x5b8] sm:$0xff]  ;;  %v10408_v43 = vpack.c.bf16 %v2387_v24, %v2385_v48  ;;  %vm2136_vm9 = vcmp.gt.f32.partialorder %v10311_v21, 0.5 }
 0x1c4   : > { %6393 = vmatpush1.bf16.msra.mxu0 %v10357_v59  ;;  %14331 = vst [vmem:[#allocation152_spill] sm:$0xff] %v10384_v29  ;;  %v2180_v45 = vcombine.low %v2172_v49, %v2179_v36  ;;  %v14335_v14 = vld [vmem:[#allocation40_spill] sm:$0xff]  ;;  %v2156_v30 = vmul.f32 %v2154_v27, %v2152_v34  ;;  %v2195_v49 = vrot.slane %v1941_v62, %v14268_v60  ;;  %v2391_v27 = vld [vmem:[%s13949_s8 + $0x5b0] sm:$0xff]  ;;  %v14338_v36 = vld [vmem:[#allocation41_spill] sm:$0xff]  ;;  %vm2070_vm12 = vcmp.gt.f32.partialorder %v10339_v7, 0.5 }
 0x1c5   : > { %6395 = vmatprep.subr.bf16.mxu0 %v10363_v22  ;;  %14332 = vst [vmem:[#allocation153_spill] sm:$0xff] %v10387_v35  ;;  %v2188_v20 = vrot.slane %v2181_v40, %v14268_v60  ;;  %14336 = vst [vmem:[#allocation147_spill] sm:$0xff] %v10408_v43  ;;  %v10412_v11 = vpack.c.bf16 %v2392_v32, %v2390_v44  ;;  %v2394_v62 = vld [vmem:[%s13949_s8 + $0x5c8] sm:$0xff]  ;;  %v2396_v50 = vld [vmem:[%s13949_s8 + $0x5d8] sm:$0xff]  ;;  %vm2137_vm13 = vcmp.gt.f32.partialorder %v10348_v15, 0.5 }
 0x1c6   : > { %6461 = vmatpush1.bf16.msra.mxu1 %v14333_v4  ;;  %v10402_v28 = vadd.f32 %v2180_v45, %v2155_v6  ;;  %v2389_v45 = vld [vmem:[%s13949_s8 + $0x5a0] sm:$0xff]  ;;  %v14339_v34 = vld [vmem:[#allocation44_spill] sm:$0xff]  ;;  %v10434_v40 = vpack.c.bf16 %v2396_v50, %v2394_v62  ;;  %v2395_v32 = vld [vmem:[%s13949_s8 + $0x5d0] sm:$0xff] }
 0x1c7   : > { %6463 = vmatprep.subr.bf16.mxu1 %v14335_v14  ;;  %14337 = vst [vmem:[#allocation148_spill] sm:$0xff] %v10412_v11  ;;  %v2196_v6 = vcombine.low %v2188_v20, %v2195_v49  ;;  %v10431_v24 = vpack.c.bf16 %v2391_v27, %v2389_v45  ;;  %v2393_v44 = vld [vmem:[%s13949_s8 + $0x5c0] sm:$0xff]  ;;  %v2398_v20 = vld [vmem:[%s13949_s8 + $0x5e8] sm:$0xff]  ;;  %v2400_v49 = vld [vmem:[%s13949_s8 + $0x5f8] sm:$0xff] }
 0x1c8   : > { %14334 = vst [vmem:[#allocation146_spill] sm:$0xff] %v10402_v28  ;;  %6397 = vmatpush1.bf16.msra.mxu0 %v10384_v29  ;;  %2201 = vst [vmem:[#allocation2 + $0x2a] sm:$0xff] %v10402_v28  ;;  %v14344_v45 = vld [vmem:[#allocation48_spill] sm:$0xff]  ;;  %v10452_v27 = vpack.c.bf16 %v2395_v32, %v2393_v44  ;;  %v2397_v62 = vld [vmem:[%s13949_s8 + $0x5e0] sm:$0xff]  ;;  %v10467_v44 = vsel %vm2136_vm9, 1.0, %v14274_v56 }
 0x1c9   : > { %6399 = vmatprep.subr.bf16.mxu0 %v10387_v35  ;;  %v10428_v48 = vadd.f32 %v2196_v6, %v2156_v30  ;;  %14341 = vst [vmem:[#allocation120_spill] sm:$0xff] %v10431_v24  ;;  %14342 = vst [vmem:[#allocation110_spill] sm:$0xff] %v10434_v40  ;;  %v14343_v30 = vld [vmem:[#allocation45_spill] sm:$0xff]  ;;  %v10456_v6 = vpack.c.bf16 %v2400_v49, %v2398_v20  ;;  %v2399_v50 = vld [vmem:[%s13949_s8 + $0x5f0] sm:$0xff]  ;;  %v10476_v20 = vrot.slane %v10467_v44, %v14268_v60  ;;  %s11082_s8 = sld [smem:[#allocation11 + $0x106]] }
 0x1ca   : > { %6465 = vmatpush1.bf16.msra.mxu1 %v14338_v36  ;;  %14345 = vst [vmem:[#allocation121_spill] sm:$0xff] %v10452_v27  ;;  %v14348_v28 = vld [vmem:[#allocation52_spill] sm:$0xff]  ;;  %v10470_v21 = vpack.c.bf16 %v2399_v50, %v2397_v62  ;;  %v14349_v32 = vld [vmem:[#allocation53_spill] sm:$0xff] }
 0x1cb   : > { %6467 = vmatprep.subr.bf16.mxu1 %v14339_v34  ;;  %14340 = vst [vmem:[#allocation118_spill] sm:$0xff] %v10428_v48  ;;  %2202 = vst [vmem:[#allocation2 + $0x32] sm:$0x3f] %v10428_v48  ;;  %v14347_v48 = vld [vmem:[#allocation49_spill] sm:$0xff]  ;;  %v14350_v49 = vld [vmem:[#allocation56_spill] sm:$0xff]  ;;  %v3102_v62 = vcombine.high %v10476_v20, %v10476_v20 }
 0x1cc   : > { %6401 = vmatpush1.bf16.msra.mxu0 %v10408_v43  ;;  %14346 = vst [vmem:[#allocation150_spill] sm:$0xff] %v10456_v6  ;;  %v14352_v50 = vld [vmem:[#allocation60_spill] sm:$0xff]  ;;  %v14397_v7 = vld [vmem:[#allocation137_spill] sm:$0xff] }
 0x1cd   : > { %6403 = vmatprep.subr.bf16.mxu0 %v10412_v11 }
 0x1ce   : > { %6469 = vmatpush1.bf16.msra.mxu1 %v14343_v30 }
 0x1cf   : > { %6471 = vmatprep.subr.bf16.mxu1 %v14344_v45 }
 0x1d0   : > { %6405 = vmatpush1.bf16.msra.mxu0 %v10431_v24 }
 0x1d1   : > { %6407 = vmatprep.subr.bf16.mxu0 %v10434_v40 }
 0x1d2   : > { %6473 = vmatpush1.bf16.msra.mxu1 %v14347_v48 }
 0x1d3   : > { %6475 = vmatprep.subr.bf16.mxu1 %v14348_v28 }
 0x1d4   : > { %6409 = vmatpush1.bf16.msra.mxu0 %v10452_v27 }
 0x1d5   : > { %6411 = vmatprep.subr.bf16.mxu0 %v10456_v6 }
 0x1d6   : > { %6477 = vmatpush1.bf16.msra.mxu1 %v14349_v32 }
 0x1d7   : > { %6479 = vmatprep.subr.bf16.mxu1 %v14350_v49 }
 0x1d8   : > { %6413 = vmatpush1.bf16.msra.mxu0 %v10470_v21 }
 0x1d9   : > { %6671 = vmatprep.subr.bf16.mxu0 %v14316_v39  ;;  %v14355_v39 = vld [vmem:[#allocation67_spill] sm:$0xff] }
 0x1da   : > { %6481 = vmatpush1.bf16.msra.mxu1 %v14351_v18 }
 0x1db   : > { %2682 = vmatmul.mubr.f32.vlgmr.msra.gmra.mrb[0].mxu0 %v10245_v10  ;;  %6483 = vmatprep.subr.bf16.mxu1 %v14352_v50  ;;  %v14357_v10 = vld [vmem:[#allocation71_spill] sm:$0xff] }
 0x1dc   : > { %6673 = vmatpush1.bf16.msra.mxu0 %v14318_v55  ;;  %3191 = vmatprep.mubr.f32.mxu0 %v3102_v62  ;;  %v14358_v62 = vld [vmem:[#allocation75_spill] sm:$0xff]  ;;  %v14366_v55 = vld [vmem:[#allocation26_spill] sm:$0xff] }
 0x1dd   : > { %6675 = vmatprep.subr.bf16.mxu0 %v14319_v53  ;;  %v14359_v53 = vld [vmem:[#allocation78_spill] sm:$0xff] }
 0x1de   : > { %6485 = vmatpush1.bf16.msra.mxu1 %v14353_v38 }
 0x1df   : > { %6487 = vmatprep.subr.bf16.mxu1 %v14354_v47 }
 0x1e0   : > { %6677 = vmatpush1.bf16.msra.mxu0 %v14324_v13  ;;  %v14360_v13 = vld [vmem:[#allocation85_spill] sm:$0xff] }
 0x1e1   : > { %6679 = vmatprep.subr.bf16.mxu0 %v14325_v57  ;;  %v14361_v57 = vld [vmem:[#allocation93_spill] sm:$0xff] }
 0x1e2   : > { %6489 = vmatpush1.bf16.msra.mxu1 %v14355_v39 }
 0x1e3   : > { %6491 = vmatprep.subr.bf16.mxu1 %v14356_v16 }
 0x1e4   : > { %6681 = vmatpush1.bf16.msra.mxu0 %v14329_v61  ;;  %v14362_v61 = vld [vmem:[#allocation100_spill] sm:$0xff] }
 0x1e5   : > { %6683 = vmatprep.subr.bf16.mxu0 %v14330_v33  ;;  %v2761_v33 = vcombine.high %v10256_v1, %v10256_v1 }
 0x1e6   : > { %6493 = vmatpush1.bf16.msra.mxu1 %v14357_v10 }
 0x1e7   : > { %6495 = vmatprep.subr.bf16.mxu1 %v14358_v62 }
 0x1e8   : > { %6685 = vmatpush1.bf16.msra.mxu0 %v14333_v4  ;;  %v14364_v4 = vld [vmem:[#allocation122_spill] sm:$0xff] }
 0x1e9   : > { %6687 = vmatprep.subr.bf16.mxu0 %v14335_v14  ;;  %v14363_v14 = vld [vmem:[#allocation105_spill] sm:$0xff] }
 0x1ea   : > { %6497 = vmatpush1.bf16.msra.mxu1 %v14359_v53 }
 0x1eb   : > { %6499 = vmatprep.subr.bf16.mxu1 %v14360_v13 }
 0x1ec   : > { %6689 = vmatpush1.bf16.msra.mxu0 %v14338_v36  ;;  %v10514_v36 = vrot.slane %v2761_v33, %v14268_v60  ;;  %v14368_v33 = vld [vmem:[#allocation30_spill] sm:$0xff] }
 0x1ed   : > { %6691 = vmatprep.subr.bf16.mxu0 %v14339_v34  ;;  %v14365_v34 = vld [vmem:[#allocation129_spill] sm:$0xff] }
 0x1ee   : > { %6501 = vmatpush1.bf16.msra.mxu1 %v14361_v57  ;;  %v2777_v1 = vcombine.high %v10514_v36, %v10514_v36 }
 0x1ef   : > { %6503 = vmatprep.subr.bf16.mxu1 %v14362_v61 }
 0x1f0   : > { %6693 = vmatpush1.bf16.msra.mxu0 %v14343_v30 }
 0x1f1   : > { %6695 = vmatprep.subr.bf16.mxu0 %v14344_v45  ;;  %v14367_v45 = vld [vmem:[#allocation27_spill] sm:$0xff] }
 0x1f2   : > { %6505 = vmatpush1.bf16.msra.mxu1 %v14363_v14 }
 0x1f3   : > { %6507 = vmatprep.subr.bf16.mxu1 %v14364_v4 }
 0x1f4   : > { %6697 = vmatpush1.bf16.msra.mxu0 %v14347_v48  ;;  %v14370_v48 = vld [vmem:[#allocation34_spill] sm:$0xff] }
 0x1f5   : > { %6699 = vmatprep.subr.bf16.mxu0 %v14348_v28  ;;  %v14369_v28 = vld [vmem:[#allocation31_spill] sm:$0xff] }
 0x1f6   : > { %6509 = vmatpush1.bf16.msra.mxu1 %v14365_v34 }
 0x1f7   : > { %6511 = vmatprep.subr.bf16.mxu1 %v14366_v55 }
 0x1f8   : > { %6701 = vmatpush1.bf16.msra.mxu0 %v14349_v32  ;;  %v14382_v32 = vld [vmem:[#allocation58_spill] sm:$0xff] }
 0x1f9   : > { %2866 = vmatmul.mubr.f32.vlgmr.msra.gmra.mrb[4].mxu1 %v10263_v5  ;;  %6703 = vmatprep.subr.bf16.mxu0 %v14350_v49  ;;  %v14371_v5 = vld [vmem:[#allocation35_spill] sm:$0xff]  ;;  %v14372_v49 = vld [vmem:[#allocation38_spill] sm:$0xff] }
 0x1fa   : > { %6513 = vmatpush1.bf16.msra.mxu1 %v14367_v45  ;;  %2936 = vmatprep.mubr.f32.mxu1 %v2777_v1  ;;  %v14373_v1 = vld [vmem:[#allocation39_spill] sm:$0xff] }
 0x1fb   : > { %6515 = vmatprep.subr.bf16.mxu1 %v14368_v33 }
 0x1fc   : > { %6705 = vmatpush1.bf16.msra.mxu0 %v14351_v18  ;;  %v14374_v18 = vld [vmem:[#allocation42_spill] sm:$0xff] }
 0x1fd   : > { %6707 = vmatprep.subr.bf16.mxu0 %v14352_v50  ;;  %v14375_v50 = vld [vmem:[#allocation43_spill] sm:$0xff] }
 0x1fe   : > { %6517 = vmatpush1.bf16.msra.mxu1 %v14369_v28 }
 0x1ff   : > { %6519 = vmatprep.subr.bf16.mxu1 %v14370_v48 }
 0x200   : > { %6709 = vmatpush1.bf16.msra.mxu0 %v14353_v38  ;;  %v14376_v38 = vld [vmem:[#allocation46_spill] sm:$0xff] }
 0x201   : > { %6711 = vmatprep.subr.bf16.mxu0 %v14354_v47  ;;  %v14377_v47 = vld [vmem:[#allocation47_spill] sm:$0xff] }
 0x202   : > { %6521 = vmatpush1.bf16.msra.mxu1 %v14371_v5 }
 0x203   : > { %6523 = vmatprep.subr.bf16.mxu1 %v14372_v49 }
 0x204   : > { %6713 = vmatpush1.bf16.msra.mxu0 %v14355_v39  ;;  %v14378_v39 = vld [vmem:[#allocation50_spill] sm:$0xff] }
 0x205   : > { %6715 = vmatprep.subr.bf16.mxu0 %v14356_v16  ;;  %v14379_v16 = vld [vmem:[#allocation51_spill] sm:$0xff] }
 0x206   : > { %6525 = vmatpush1.bf16.msra.mxu1 %v14373_v1 }
 0x207   : > { %6527 = vmatprep.subr.bf16.mxu1 %v14374_v18 }
 0x208   : > { %6717 = vmatpush1.bf16.msra.mxu0 %v14357_v10  ;;  %v14380_v10 = vld [vmem:[#allocation54_spill] sm:$0xff] }
 0x209   : > { %6719 = vmatprep.subr.bf16.mxu0 %v14358_v62  ;;  %v3087_v62 = vcombine.high %v10467_v44, %v10467_v44 }
 0x20a   : > { %6529 = vmatpush1.bf16.msra.mxu1 %v14375_v50 }
 0x20b   : > { %6531 = vmatprep.subr.bf16.mxu1 %v14376_v38 }
 0x20c   : > { %6721 = vmatpush1.bf16.msra.mxu0 %v14359_v53  ;;  %v10556_v53 = vrot.slane %v3087_v62, %v14268_v60  ;;  %v14385_v62 = vld [vmem:[#allocation63_spill] sm:$0xff] }
 0x20d   : > { %6723 = vmatprep.subr.bf16.mxu0 %v14360_v13  ;;  %v14381_v13 = vld [vmem:[#allocation55_spill] sm:$0xff] }
 0x20e   : > { %6533 = vmatpush1.bf16.msra.mxu1 %v14377_v47  ;;  %v3103_v44 = vcombine.high %v10556_v53, %v10556_v53 }
 0x20f   : > { %6535 = vmatprep.subr.bf16.mxu1 %v14378_v39 }
 0x210   : > { %6725 = vmatpush1.bf16.msra.mxu0 %v14361_v57 }
 0x211   : > { %6727 = vmatprep.subr.bf16.mxu0 %v14362_v61  ;;  %v14383_v61 = vld [vmem:[#allocation59_spill] sm:$0xff] }
 0x212   : > { %6537 = vmatpush1.bf16.msra.mxu1 %v14379_v16 }
 0x213   : > { %6539 = vmatprep.subr.bf16.mxu1 %v14380_v10 }
 0x214   : > { %6729 = vmatpush1.bf16.msra.mxu0 %v14363_v14  ;;  %v14384_v14 = vld [vmem:[#allocation62_spill] sm:$0xff] }
 0x215   : > { %6731 = vmatprep.subr.bf16.mxu0 %v14364_v4  ;;  %v14386_v4 = vld [vmem:[#allocation68_spill] sm:$0xff] }
 0x216   : > { %6541 = vmatpush1.bf16.msra.mxu1 %v14381_v13 }
 0x217   : > { %6543 = vmatprep.subr.bf16.mxu1 %v14382_v32 }
 0x218   : > { %6733 = vmatpush1.bf16.msra.mxu0 %v14365_v34  ;;  %v14388_v34 = vld [vmem:[#allocation72_spill] sm:$0xff] }
 0x219   : > { %6735 = vmatprep.subr.bf16.mxu0 %v14366_v55  ;;  %v14387_v55 = vld [vmem:[#allocation69_spill] sm:$0xff] }
 0x21a   : > { %6545 = vmatpush1.bf16.msra.mxu1 %v14383_v61 }
 0x21b   : > { %3192 = vmatmul.mubr.f32.vlgmr.msra.gmra.mrb[2].mxu0 %v10476_v20  ;;  %6547 = vmatprep.subr.bf16.mxu1 %v14384_v14  ;;  %v14389_v20 = vld [vmem:[#allocation73_spill] sm:$0xff] }
 0x21c   : > { %6737 = vmatpush1.bf16.msra.mxu0 %v14367_v45  ;;  %3262 = vmatprep.mubr.f32.mxu0 %v3103_v44  ;;  %v14390_v44 = vld [vmem:[#allocation79_spill] sm:$0xff] }
 0x21d   : > { %6739 = vmatprep.subr.bf16.mxu0 %v14368_v33  ;;  %v14391_v33 = vld [vmem:[#allocation82_spill] sm:$0xff] }
 0x21e   : > { %6549 = vmatpush1.bf16.msra.mxu1 %v14385_v62 }
 0x21f   : > { %6551 = vmatprep.subr.bf16.mxu1 %v14386_v4 }
 0x220   : > { %6741 = vmatpush1.bf16.msra.mxu0 %v14369_v28  ;;  %v14392_v28 = vld [vmem:[#allocation97_spill] sm:$0xff] }
 0x221   : > { %6743 = vmatprep.subr.bf16.mxu0 %v14370_v48  ;;  %v14393_v48 = vld [vmem:[#allocation99_spill] sm:$0xff] }
 0x222   : > { %6553 = vmatpush1.bf16.msra.mxu1 %v14387_v55 }
 0x223   : > { %6555 = vmatprep.subr.bf16.mxu1 %v14388_v34 }
 0x224   : > { %6745 = vmatpush1.bf16.msra.mxu0 %v14371_v5  ;;  %v14396_v5 = vld [vmem:[#allocation132_spill] sm:$0xff] }
 0x225   : > { %6747 = vmatprep.subr.bf16.mxu0 %v14372_v49  ;;  %v14394_v49 = vld [vmem:[#allocation109_spill] sm:$0xff] }
 0x226   : > { %6557 = vmatpush1.bf16.msra.mxu1 %v14389_v20 }
 0x227   : > { %6559 = vmatprep.subr.bf16.mxu1 %v14390_v44 }
 0x228   : > { %6749 = vmatpush1.bf16.msra.mxu0 %v14373_v1  ;;  %v14395_v1 = vld [vmem:[#allocation116_spill] sm:$0xff] }
 0x229   : > { %6751 = vmatprep.subr.bf16.mxu0 %v14374_v18  ;;  %v10590_v18 = vsel %vm2070_vm12, 1.0, %v14274_v56 }
 0x22a   : > { %6561 = vmatpush1.bf16.msra.mxu1 %v14391_v33 }
 0x22b   : > { %6563 = vmatprep.subr.bf16.mxu1 %v14392_v28 }
 0x22c   : > { %6753 = vmatpush1.bf16.msra.mxu0 %v14375_v50 }
 0x22d   : > { %6755 = vmatprep.subr.bf16.mxu0 %v14376_v38  ;;  %v10597_v38 = vrot.slane %v10590_v18, %v14268_v60 }
 0x22e   : > { %6565 = vmatpush1.bf16.msra.mxu1 %v14393_v48 }
 0x22f   : > { %6567 = vmatprep.subr.bf16.mxu1 %v14394_v49 }
 0x230   : > { %6757 = vmatpush1.bf16.msra.mxu0 %v14377_v47 }
 0x231   : > { %6759 = vmatprep.subr.bf16.mxu0 %v14378_v39  ;;  %v2793_v39 = vcombine.high %v10597_v38, %v10597_v38 }
 0x232   : > { %6569 = vmatpush1.bf16.msra.mxu1 %v14395_v1 }
 0x233   : > { %6571 = vmatprep.subr.bf16.mxu1 %v14396_v5 }
 0x234   : > { %6761 = vmatpush1.bf16.msra.mxu0 %v14379_v16 }
 0x235   : > { %6763 = vmatprep.subr.bf16.mxu0 %v14380_v10 }
 0x236   : > { %6573 = vmatpush1.bf16.msra.mxu1 %v14397_v7 }
 0x237   : > { %6575 = vmatprep.subr.bf16.mxu1 %v9780_v26 }
 0x238   : > { %6765 = vmatpush1.bf16.msra.mxu0 %v14381_v13 }
 0x239   : > { %2937 = vmatmul.mubr.f32.vlgmr.msra.gmra.mrb[4].mxu1 %v10514_v36  ;;  %6767 = vmatprep.subr.bf16.mxu0 %v14382_v32 }
 0x23a   : > { %6577 = vmatpush1.bf16.msra.mxu1 %v9856_v52  ;;  %3007 = vmatprep.mubr.f32.mxu1 %v2793_v39  ;;  %v10635_v39 = vsel %vm2137_vm13, 1.0, %v14274_v56 }
 0x23b   : > { %6579 = vmatprep.subr.bf16.mxu1 %v9910_v58  ;;  %v10642_v36 = vrot.slane %v10635_v39, %v14268_v60 }
 0x23c   : > { %6769 = vmatpush1.bf16.msra.mxu0 %v14383_v61 }
 0x23d   : > { %6771 = vmatprep.subr.bf16.mxu0 %v14384_v14  ;;  %v3119_v15 = vcombine.high %v10642_v36, %v10642_v36 }
 0x23e   : > { %6581 = vmatpush1.bf16.msra.mxu1 %v9940_v25 }
 0x23f   : > { %6583 = vmatprep.subr.bf16.mxu1 %v10015_v17 }
 0x240   : > { %6773 = vmatpush1.bf16.msra.mxu0 %v14385_v62 }
 0x241   : > { %6775 = vmatprep.subr.bf16.mxu0 %v14386_v4 }
 0x242   : > { %6585 = vmatpush1.bf16.msra.mxu1 %v10017_v19 }
 0x243   : > { %6587 = vmatprep.subr.bf16.mxu1 %v10057_v42 }
 0x244   : > { %6777 = vmatpush1.bf16.msra.mxu0 %v14387_v55 }
 0x245   : > { %6779 = vmatprep.subr.bf16.mxu0 %v14388_v34 }
 0x246   : > { %6589 = vmatpush1.bf16.msra.mxu1 %v10079_v31 }
 0x247   : > { %6591 = vmatprep.subr.bf16.mxu1 %v10095_v63 }
 0x248   : > { %6781 = vmatpush1.bf16.msra.mxu0 %v14389_v20 }
 0x249   : > { %6783 = vmatprep.subr.bf16.mxu0 %v14390_v44 }
 0x24a   : > { %6593 = vmatpush1.bf16.msra.mxu1 %v10113_v3 }
 0x24b   : > { %6595 = vmatprep.subr.bf16.mxu1 %v10120_v51 }
 0x24c   : > { %6785 = vmatpush1.bf16.msra.mxu0 %v14391_v33 }
 0x24d   : > { %6787 = vmatprep.subr.bf16.mxu0 %v14392_v28 }
 0x24e   : > { %6597 = vmatpush1.bf16.msra.mxu1 %v10180_v37 }
 0x24f   : > { %6599 = vmatprep.subr.bf16.mxu1 %v10199_v46 }
 0x250   : > { %6789 = vmatpush1.bf16.msra.mxu0 %v14393_v48 }
 0x251   : > { %6791 = vmatprep.subr.bf16.mxu0 %v14394_v49 }
 0x252   : > { %6601 = vmatpush1.bf16.msra.mxu1 %v10220_v2 }
 0x253   : > { %6603 = vmatprep.subr.bf16.mxu1 %v10227_v23 }
 0x254   : > { %6793 = vmatpush1.bf16.msra.mxu0 %v14395_v1 }
 0x255   : > { %6795 = vmatprep.subr.bf16.mxu0 %v14396_v5 }
 0x256   : > { %6605 = vmatpush1.bf16.msra.mxu1 %v10229_v9 }
 0x257   : > { %6607 = vmatprep.subr.bf16.mxu1 %v10265_v41 }
 0x258   : > { %6797 = vmatpush1.bf16.msra.mxu0 %v14397_v7 }
 0x259   : > { %6799 = vmatprep.subr.bf16.mxu0 %v9780_v26 }
 0x25a   : > { %6609 = vmatpush1.bf16.msra.mxu1 %v10277_v54 }
 0x25b   : > { %3263 = vmatmul.mubr.f32.vlgmr.msra.gmra.mrb[2].mxu0 %v10556_v53  ;;  %6611 = vmatprep.subr.bf16.mxu1 %v10286_v0 }
 0x25c   : > { %6801 = vmatpush1.bf16.msra.mxu0 %v9856_v52  ;;  %3333 = vmatprep.mubr.f32.mxu0 %v3119_v15 }
 0x25d   : > { %6803 = vmatprep.subr.bf16.mxu0 %v9910_v58 }
 0x25e   : > { %6613 = vmatpush1.bf16.msra.mxu1 %v10322_v12 }
 0x25f   : > { %6615 = vmatprep.subr.bf16.mxu1 %v10331_v8 }
 0x260   : > { %6805 = vmatpush1.bf16.msra.mxu0 %v9940_v25 }
 0x261   : > { %6807 = vmatprep.subr.bf16.mxu0 %v10015_v17 }
 0x262   : > { %6617 = vmatpush1.bf16.msra.mxu1 %v10357_v59 }
 0x263   : > { %6619 = vmatprep.subr.bf16.mxu1 %v10363_v22 }
 0x264   : > { %6809 = vmatpush1.bf16.msra.mxu0 %v10017_v19 }
 0x265   : > { %6811 = vmatprep.subr.bf16.mxu0 %v10057_v42 }
 0x266   : > { %6621 = vmatpush1.bf16.msra.mxu1 %v10384_v29 }
 0x267   : > { %6623 = vmatprep.subr.bf16.mxu1 %v10387_v35 }
 0x268   : > { %6813 = vmatpush1.bf16.msra.mxu0 %v10079_v31  ;;  %v14413_v31 = vld [vmem:[#allocation91_spill] sm:$0xff] }
 0x269   : > { %6815 = vmatprep.subr.bf16.mxu0 %v10095_v63  ;;  %v14411_v63 = vld [vmem:[#allocation87_spill] sm:$0xff] }
 0x26a   : > { %6625 = vmatpush1.bf16.msra.mxu1 %v10408_v43 }
 0x26b   : > { %6627 = vmatprep.subr.bf16.mxu1 %v10412_v11  ;;  %v10669_v53 = vpop.f32.mrb[0].mxu1 }
 0x26c   : > { %6817 = vmatpush1.bf16.msra.mxu0 %v10113_v3  ;;  %v10671_v15 = vpop.f32.mrb[1].mxu1  ;;  %v14398_v3 = vld [vmem:[#allocation140_spill] sm:$0xff] }
 0x26d   : > { %6819 = vmatprep.subr.bf16.mxu0 %v10120_v51 }
 0x26e   : > { %6629 = vmatpush1.bf16.msra.mxu1 %v10431_v24 }
 0x26f   : > { %6631 = vmatprep.subr.bf16.mxu1 %v10434_v40 }
 0x270   : > { %6821 = vmatpush1.bf16.msra.mxu0 %v10180_v37  ;;  %v14399_v37 = vld [vmem:[#allocation145_spill] sm:$0xff] }
 0x271   : > { %6823 = vmatprep.subr.bf16.mxu0 %v10199_v46  ;;  %v14400_v46 = vld [vmem:[#allocation74_spill] sm:$0xff] }
 0x272   : > { %6633 = vmatpush1.bf16.msra.mxu1 %v10452_v27 }
 0x273   : > { %6635 = vmatprep.subr.bf16.mxu1 %v10456_v6 }
 0x274   : > { %6825 = vmatpush1.bf16.msra.mxu0 %v10220_v2  ;;  %v14402_v2 = vld [vmem:[#allocation154_spill] sm:$0xff] }
 0x275   : > { %6827 = vmatprep.subr.bf16.mxu0 %v10227_v23  ;;  %v14401_v23 = vld [vmem:[#allocation102_spill] sm:$0xff] }
 0x276   : > { %6637 = vmatpush1.bf16.msra.mxu1 %v10470_v21 }
 0x277   : > { %6639 = vmatprep.subr.bf16.mxu1 %v14398_v3 }
 0x278   : > { %6829 = vmatpush1.bf16.msra.mxu0 %v10229_v9  ;;  %v14405_v9 = vld [vmem:[#allocation76_spill] sm:$0xff] }
 0x279   : > { %3008 = vmatmul.mubr.f32.vlgmr.msra.gmra.mrb[4].mxu1 %v10597_v38  ;;  %6831 = vmatprep.subr.bf16.mxu0 %v10265_v41  ;;  %v14403_v38 = vld [vmem:[#allocation80_spill] sm:$0xff] }
 0x27a   : > { %6641 = vmatpush1.bf16.msra.mxu1 %v14399_v37  ;;  %3078 = vmatprep.mubr.f32.mxu1 %v14274_v56  ;;  %v14404_v41 = vld [vmem:[#allocation96_spill] sm:$0xff] }
 0x27b   : > { %6643 = vmatprep.subr.bf16.mxu1 %v14400_v46 }
 0x27c   : > { %6833 = vmatpush1.bf16.msra.mxu0 %v10277_v54  ;;  %v14406_v54 = vld [vmem:[#allocation155_spill] sm:$0xff] }
 0x27d   : > { %6835 = vmatprep.subr.bf16.mxu0 %v10286_v0  ;;  %v14407_v0 = vld [vmem:[#allocation144_spill] sm:$0xff] }
 0x27e   : > { %6645 = vmatpush1.bf16.msra.mxu1 %v14401_v23 }
 0x27f   : > { %6647 = vmatprep.subr.bf16.mxu1 %v14402_v2 }
 0x280   : > { %6837 = vmatpush1.bf16.msra.mxu0 %v10322_v12  ;;  %v14408_v12 = vld [vmem:[#allocation84_spill] sm:$0xff] }
 0x281   : > { %6839 = vmatprep.subr.bf16.mxu0 %v10331_v8 }
 0x282   : > { %6649 = vmatpush1.bf16.msra.mxu1 %v14403_v38 }
 0x283   : > { %6651 = vmatprep.subr.bf16.mxu1 %v14404_v41 }
 0x284   : > { %6841 = vmatpush1.bf16.msra.mxu0 %v10357_v59  ;;  %v14409_v59 = vld [vmem:[#allocation157_spill] sm:$0xff] }
 0x285   : > { %6843 = vmatprep.subr.bf16.mxu0 %v10363_v22  ;;  %v14410_v22 = vld [vmem:[#allocation146_spill] sm:$0xff] }
 0x286   : > { %6653 = vmatpush1.bf16.msra.mxu1 %v14405_v9  ;;  %vm2203_vm14 = vcmp.gt.f32.partialorder %v14410_v22, 0.5 }
 0x287   : > { %6655 = vmatprep.subr.bf16.mxu1 %v14406_v54 }
 0x288   : > { %6845 = vmatpush1.bf16.msra.mxu0 %v10384_v29  ;;  %v14412_v29 = vld [vmem:[#allocation158_spill] sm:$0xff] }
 0x289   : > { %6847 = vmatprep.subr.bf16.mxu0 %v10387_v35  ;;  %v10714_v35 = vsel %vm2203_vm14, 1.0, %v14274_v56 }
 0x28a   : > { %6657 = vmatpush1.bf16.msra.mxu1 %v14407_v0  ;;  %v10723_v22 = vrot.slane %v10714_v35, %v14268_v60 }
 0x28b   : > { %6659 = vmatprep.subr.bf16.mxu1 %v14408_v12 }
 0x28c   : > { %v2754_v8 = vpop.f32.mrb[2].mxu1  ;;  %6849 = vmatpush1.bf16.msra.mxu0 %v10408_v43  ;;  %v2778_v43 = vcombine.high %v10590_v18, %v10590_v18  ;;  %v3428_v18 = vcombine.high %v10723_v22, %v10723_v22 }
 0x28d   : > { %v2756_v51 = vpop.f32.mrb[3].mxu1  ;;  %6851 = vmatprep.subr.bf16.mxu0 %v10412_v11  ;;  %v14415_v11 = vld [vmem:[#allocation24_spill] sm:$0xff] }
 0x28e   : > { %6661 = vmatpush1.bf16.msra.mxu1 %v14409_v59 }
 0x28f   : > { %6663 = vmatprep.subr.bf16.mxu1 %v14411_v63 }
 0x290   : > { %6853 = vmatpush1.bf16.msra.mxu0 %v10431_v24  ;;  %v14414_v24 = vld [vmem:[#allocation94_spill] sm:$0xff] }
 0x291   : > { %6855 = vmatprep.subr.bf16.mxu0 %v10434_v40  ;;  %v2792_v40 = vrot.slane %v2778_v43, %v14268_v60  ;;  %v14418_v43 = vld [vmem:[#allocation29_spill] sm:$0xff] }
 0x292   : > { %6665 = vmatpush1.bf16.msra.mxu1 %v14412_v29 }
 0x293   : > { %6667 = vmatprep.subr.bf16.mxu1 %v14413_v31 }
 0x294   : > { %6857 = vmatpush1.bf16.msra.mxu0 %v10452_v27  ;;  %v14416_v27 = vld [vmem:[#allocation25_spill] sm:$0xff] }
 0x295   : > { %6859 = vmatprep.subr.bf16.mxu0 %v10456_v6  ;;  %v14417_v6 = vld [vmem:[#allocation28_spill] sm:$0xff] }
 0x296   : > { %6669 = vmatpush1.bf16.msra.mxu1 %v14414_v24 }
 0x297   : > { %6895 = vmatprep.subr.bf16.mxu1 %v14415_v11  ;;  %v14419_v11 = vld [vmem:[#allocation32_spill] sm:$0xff] }
 0x298   : > { %6861 = vmatpush1.bf16.msra.mxu0 %v10470_v21 }
 0x299   : > { %3079 = vmatmul.mubr.f32.vlgmr.msra.gmra.mrb[4].mxu1 %v2792_v40  ;;  %6863 = vmatprep.subr.bf16.mxu0 %v14398_v3  ;;  %v14420_v40 = vld [vmem:[#allocation33_spill] sm:$0xff] }
 0x29a   : > { %6897 = vmatpush1.bf16.msra.mxu1 %v14416_v27  ;;  %3517 = vmatprep.mubr.f32.mxu1 %v3428_v18  ;;  %v14421_v27 = vld [vmem:[#allocation36_spill] sm:$0xff]  ;;  %v14424_v18 = vld [vmem:[#allocation41_spill] sm:$0xff] }
 0x29b   : > { %3334 = vmatmul.mubr.f32.vlgmr.msra.gmra.mrb[2].mxu0 %v10642_v36  ;;  %6899 = vmatprep.subr.bf16.mxu1 %v14417_v6  ;;  %v14422_v6 = vld [vmem:[#allocation37_spill] sm:$0xff]  ;;  %v14423_v36 = vld [vmem:[#allocation40_spill] sm:$0xff] }
 0x29c   : > { %6865 = vmatpush1.bf16.msra.mxu0 %v14399_v37  ;;  %3404 = vmatprep.mubr.f32.mxu0 %v14274_v56 }
 0x29d   : > { %6867 = vmatprep.subr.bf16.mxu0 %v14400_v46 }
 0x29e   : > { %6901 = vmatpush1.bf16.msra.mxu1 %v14418_v43  ;;  %v14425_v43 = vld [vmem:[#allocation44_spill] sm:$0xff] }
 0x29f   : > { %6903 = vmatprep.subr.bf16.mxu1 %v14419_v11 }
 0x2a0   : > { %6869 = vmatpush1.bf16.msra.mxu0 %v14401_v23 }
 0x2a1   : > { %6871 = vmatprep.subr.bf16.mxu0 %v14402_v2 }
 0x2a2   : > { %6905 = vmatpush1.bf16.msra.mxu1 %v14420_v40 }
 0x2a3   : > { %6907 = vmatprep.subr.bf16.mxu1 %v14421_v27 }
 0x2a4   : > { %6873 = vmatpush1.bf16.msra.mxu0 %v14403_v38 }
 0x2a5   : > { %6875 = vmatprep.subr.bf16.mxu0 %v14404_v41 }
 0x2a6   : > { %6909 = vmatpush1.bf16.msra.mxu1 %v14422_v6  ;;  %v14426_v6 = vld [vmem:[#allocation48_spill] sm:$0xff] }
 0x2a7   : > { %6911 = vmatprep.subr.bf16.mxu1 %v14423_v36 }
 0x2a8   : > { %6877 = vmatpush1.bf16.msra.mxu0 %v14405_v9 }
 0x2a9   : > { %6879 = vmatprep.subr.bf16.mxu0 %v14406_v54 }
 0x2aa   : > { %6913 = vmatpush1.bf16.msra.mxu1 %v14424_v18 }
 0x2ab   : > { %6915 = vmatprep.subr.bf16.mxu1 %v14425_v43  ;;  %v14427_v43 = vld [vmem:[#allocation49_spill] sm:$0xff] }
 0x2ac   : > { %6881 = vmatpush1.bf16.msra.mxu0 %v14407_v0 }
 0x2ad   : > { %6883 = vmatprep.subr.bf16.mxu0 %v14408_v12 }
 0x2ae   : > { %v2683_v11 = vpop.f32.mrb[0].mxu0  ;;  %6917 = vmatpush1.bf16.msra.mxu1 %v14343_v30  ;;  %v14428_v30 = vld [vmem:[#allocation52_spill] sm:$0xff] }
 0x2af   : > { %v7401_v40 = vadd.f32 %v2683_v11, %v10669_v53  ;;  %v2685_v27 = vpop.f32.mrb[1].mxu0  ;;  %6919 = vmatprep.subr.bf16.mxu1 %v14426_v6  ;;  %v14430_v53 = vld [vmem:[#allocation56_spill] sm:$0xff]  ;;  %v14431_v11 = vld [vmem:[#allocation57_spill] sm:$0xff]  ;;  %v14436_v6 = vld [vmem:[#allocation67_spill] sm:$0xff] }
 0x2b0   : > { %v7403_v36 = vadd.f32 %v2685_v27, %v10671_v15  ;;  %6885 = vmatpush1.bf16.msra.mxu0 %v14409_v59  ;;  %v14435_v27 = vld [vmem:[#allocation64_spill] sm:$0xff] }
 0x2b1   : > { %v10760_v54 = vadd.f32 %v7401_v40, %v2754_v8  ;;  %6887 = vmatprep.subr.bf16.mxu0 %v14411_v63  ;;  %v3104_v8 = vcombine.high %v10635_v39, %v10635_v39  ;;  %v14432_v39 = vld [vmem:[#allocation60_spill] sm:$0xff]  ;;  %v14433_v40 = vld [vmem:[#allocation61_spill] sm:$0xff] }
 0x2b2   : > { %v10763_v18 = vadd.f32 %v7403_v36, %v2756_v51  ;;  %6921 = vmatpush1.bf16.msra.mxu1 %v14427_v43  ;;  %v14429_v51 = vld [vmem:[#allocation53_spill] sm:$0xff]  ;;  %v14437_v36 = vld [vmem:[#allocation70_spill] sm:$0xff]  ;;  %v14438_v43 = vld [vmem:[#allocation71_spill] sm:$0xff] }
 0x2b3   : > { %3737 = vrot.lane.b32.xlu0 %v10760_v54, %s13816_s30  ;;  %6923 = vmatprep.subr.bf16.mxu1 %v14428_v30  ;;  %v3118_v15 = vrot.slane %v3104_v8, %v14268_v60  ;;  %v14439_v30 = vld [vmem:[#allocation75_spill] sm:$0xff]  ;;  %v14440_v8 = vld [vmem:[#allocation78_spill] sm:$0xff] }
 0x2b4   : > { %6889 = vmatpush1.bf16.msra.mxu0 %v14412_v29  ;;  %3739 = vrot.lane.b32.xlu1 %v10763_v18, %s13816_s30 }
 0x2b5   : > { %6891 = vmatprep.subr.bf16.mxu0 %v14413_v31 }
 0x2b6   : > { %6925 = vmatpush1.bf16.msra.mxu1 %v14429_v51  ;;  %v14441_v51 = vld [vmem:[#allocation85_spill] sm:$0xff] }
 0x2b7   : > { %3774 = vrot.lane.b32.xlu0 %v10760_v54, %s13814_s18  ;;  %6927 = vmatprep.subr.bf16.mxu1 %v14430_v53  ;;  %v14442_v53 = vld [vmem:[#allocation100_spill] sm:$0xff] }
 0x2b8   : > { %6893 = vmatpush1.bf16.msra.mxu0 %v14414_v24  ;;  %3776 = vrot.lane.b32.xlu1 %v10763_v18, %s13814_s18 }
 0x2ba   : > { %6929 = vmatpush1.bf16.msra.mxu1 %v14431_v11  ;;  %v14443_v11 = vld [vmem:[#allocation105_spill] sm:$0xff] }
 0x2bb   : > { %3405 = vmatmul.mubr.f32.vlgmr.msra.gmra.mrb[2].mxu0 %v3118_v15  ;;  %3820 = vrot.lane.b32.xlu0 %v10760_v54, %s13824_s21  ;;  %v3413_v15 = vcombine.high %v10714_v35, %v10714_v35  ;;  %v14449_v35 = vld [vmem:[#allocation34_spill] sm:$0xff] }
 0x2bc   : > { %3822 = vrot.lane.b32.xlu1 %v10763_v18, %s13824_s21  ;;  %6931 = vmatprep.subr.bf16.mxu1 %v14432_v39  ;;  %v14444_v39 = vld [vmem:[#allocation122_spill] sm:$0xff] }
 0x2be   : > { %6933 = vmatpush1.bf16.msra.mxu1 %v14433_v40  ;;  %v3427_v40 = vrot.slane %v3413_v15, %v14268_v60  ;;  %v3927_v15 = vstv %s10960_s20  ;;  %s11045_s20 = sld [smem:[#allocation11 + $0x5]] }
 0x2bf   : > { %3866 = vrot.lane.b32.xlu0 %v10760_v54, %s14434_s27  ;;  %6935 = vmatprep.subr.bf16.mxu1 %v14435_v27  ;;  %v14445_v27 = vld [vmem:[#allocation129_spill] sm:$0xff] }
 0x2c0   : > { %3868 = vrot.lane.b32.xlu1 %v10763_v18, %s14434_s27 }
 0x2c2   : > { %6937 = vmatpush1.bf16.msra.mxu1 %v14436_v6  ;;  %v3429_v6 = vcombine.high %v3427_v40, %v3427_v40 }
 0x2c3   : > { %3950 = vrot.lane.b32.xlu0 %v10760_v54, %s14000_s16  ;;  %6939 = vmatprep.subr.bf16.mxu1 %v14437_v36  ;;  %v14447_v36 = vld [vmem:[#allocation30_spill] sm:$0xff] }
 0x2c4   : > { %3952 = vrot.lane.b32.xlu1 %v10763_v18, %s14000_s16 }
 0x2c6   : > { %6941 = vmatpush1.bf16.msra.mxu1 %v14438_v43  ;;  %v14448_v43 = vld [vmem:[#allocation31_spill] sm:$0xff] }
 0x2c7   : > { %3995 = vrot.lane.b32.xlu0 %v10760_v54, %s13822_s2  ;;  %6943 = vmatprep.subr.bf16.mxu1 %v14439_v30  ;;  %v14450_v30 = vld [vmem:[#allocation35_spill] sm:$0xff] }
 0x2c8   : > { %3997 = vrot.lane.b32.xlu1 %v10763_v18, %s13822_s2 }
 0x2ca   : > { %6945 = vmatpush1.bf16.msra.mxu1 %v14440_v8  ;;  %v14451_v8 = vld [vmem:[#allocation38_spill] sm:$0xff] }
 0x2cb   : > { %4041 = vrot.lane.b32.xlu0 %v10760_v54, %s13820_s4  ;;  %6947 = vmatprep.subr.bf16.mxu1 %v14441_v51  ;;  %v14452_v51 = vld [vmem:[#allocation39_spill] sm:$0xff] }
 0x2cc   : > { %4043 = vrot.lane.b32.xlu1 %v10763_v18, %s13820_s4 }
 0x2ce   : > { %6949 = vmatpush1.bf16.msra.mxu1 %v14361_v57  ;;  %v14446_v57 = vld [vmem:[#allocation26_spill] sm:$0xff] }
 0x2cf   : > { %4087 = vrot.lane.b32.xlu0 %v10760_v54, %s13818_s15  ;;  %6951 = vmatprep.subr.bf16.mxu1 %v14442_v53  ;;  %v14453_v53 = vld [vmem:[#allocation42_spill] sm:$0xff] }
 0x2d0   : > { %4089 = vrot.lane.b32.xlu1 %v10763_v18, %s13818_s15 }
 0x2d2   : > { %6953 = vmatpush1.bf16.msra.mxu1 %v14443_v11  ;;  %v14493_v11 = vld [vmem:[#allocation77_spill] sm:$0xff] }
 0x2d3   : > { %6955 = vmatprep.subr.bf16.mxu1 %v14444_v39  ;;  %vm3741_vm0 = vcmp.lt.s32.totalorder %v14493_v11, 15  ;;  %v3933_v39 = vstv %s10962_s22  ;;  %vm3778_vm1 = vcmp.lt.s32.totalorder %v14493_v11, 14  ;;  %s11047_s22 = sld [smem:[#allocation11 + $0x85]]  ;;  %vm3824_vm2 = vcmp.lt.s32.totalorder %v14493_v11, 13 }
 0x2d4   : > { %vm3999_vm3 = vcmp.lt.s32.totalorder %v14493_v11, 115  ;;  %vm4045_vm4 = vcmp.lt.s32.totalorder %v14493_v11, 114  ;;  %vm4091_vm5 = vcmp.lt.s32.totalorder %v14493_v11, 113 }
 0x2d6   : > { %6957 = vmatpush1.bf16.msra.mxu1 %v14445_v27  ;;  %v3945_v27 = vstv %s10966_s23  ;;  %s11062_s23 = sld [smem:[#allocation11 + $0x185]] }
 0x2d7   : > { %6959 = vmatprep.subr.bf16.mxu1 %v14446_v57 }
 0x2d9   : > { %3518 = vmatmul.mubr.f32.vlgmr.msra.gmra.mrb[6].mxu1 %v10723_v22  ;;  %v14454_v22 = vld [vmem:[#allocation46_spill] sm:$0xff] }
 0x2da   : > { %6961 = vmatpush1.bf16.msra.mxu1 %v14367_v45  ;;  %3588 = vmatprep.mubr.f32.mxu1 %v3429_v6  ;;  %v14455_v45 = vld [vmem:[#allocation50_spill] sm:$0xff] }
 0x2db   : > { %6963 = vmatprep.subr.bf16.mxu1 %v14447_v36  ;;  %v3759_v36 = vstv %s10970_s17  ;;  %s14506_s17 = sld [smem:[#allocation164_spill]] }
 0x2de   : > { %6965 = vmatpush1.bf16.msra.mxu1 %v14448_v43  ;;  %v6057_v43 = vld [vmem:[%s14483_s7 + $0x4] sm:$0x3] }
 0x2df   : > { %6967 = vmatprep.subr.bf16.mxu1 %v14449_v35 }
 0x2e2   : > { %6969 = vmatpush1.bf16.msra.mxu1 %v14450_v30  ;;  %v3763_v30 = vstv %s10972_s5 }
 0x2e3   : > { %6971 = vmatprep.subr.bf16.mxu1 %v14451_v8 }
 0x2e6   : > { %6973 = vmatpush1.bf16.msra.mxu1 %v14452_v51 }
 0x2e7   : > { %6975 = vmatprep.subr.bf16.mxu1 %v14453_v53 }
 0x2ea   : > { %6977 = vmatpush1.bf16.msra.mxu1 %v14375_v50  ;;  %v14472_v50 = vld [vmem:[#allocation151_spill] sm:$0xff] }
 0x2eb   : > { %6979 = vmatprep.subr.bf16.mxu1 %v14454_v22  ;;  %v3767_v22 = vstv %s10976_s19 }
 0x2ee   : > { %6981 = vmatpush1.bf16.msra.mxu1 %v14377_v47 }
 0x2ef   : > { %6983 = vmatprep.subr.bf16.mxu1 %v14455_v45  ;;  %v3771_v45 = vstv %s10978_s13  ;;  %s11118_s13 = sld [smem:[#allocation11 + $0x187]] }
 0x2f2   : > { %6985 = vmatpush1.bf16.msra.mxu1 %v14379_v16  ;;  %v14456_v16 = vld [vmem:[#allocation118_spill] sm:$0xff] }
 0x2f3   : > { %6987 = vmatprep.subr.bf16.mxu1 %v14380_v10  ;;  %vm2204_vm15 = vcmp.gt.f32.partialorder %v14456_v16, 0.5  ;;  %v14473_v10 = vld [vmem:[#allocation152_spill] sm:$0xff]  ;;  %v3803_v16 = vstv %s10985_s3  ;;  %s14512_s3 = sld [smem:[#allocation168_spill]] }
 0x2f4   : > { %v10857_v47 = vsel %vm2204_vm15, 1.0, %v14274_v56  ;;  %vm5707_vm15 = vcmask 1041408  }
 0x2f6   : > { %6989 = vmatpush1.bf16.msra.mxu1 %v14381_v13 }
 0x2f7   : > { %6991 = vmatprep.subr.bf16.mxu1 %v14382_v32  ;;  %v14470_v32 = vld [vmem:[#allocation107_spill] sm:$0xff] }
 0x2fa   : > { %6993 = vmatpush1.bf16.msra.mxu1 %v14383_v61  ;;  %v14457_v61 = vld [vmem:[#allocation81_spill] sm:$0xff] }
 0x2fb   : > { %6995 = vmatprep.subr.bf16.mxu1 %v14384_v14  ;;  %v14462_v14 = vld [vmem:[#allocation89_spill] sm:$0xff] }
 0x2fe   : > { %6997 = vmatpush1.bf16.msra.mxu1 %v14385_v62  ;;  %v14477_v62 = vld [vmem:[#allocation120_spill] sm:$0xff] }
 0x2ff   : > { %6999 = vmatprep.subr.bf16.mxu1 %v14386_v4  ;;  %v14458_v4 = vld [vmem:[#allocation92_spill] sm:$0xff] }
 0x302   : > { %7001 = vmatpush1.bf16.msra.mxu1 %v14387_v55  ;;  %v3437_v55 = vrot.slane %v10857_v47, %v14268_v60 }
 0x303   : > { %7003 = vmatprep.subr.bf16.mxu1 %v14388_v34  ;;  %v14468_v34 = vld [vmem:[#allocation162_spill] sm:$0xff] }
 0x304   : > { %v3445_v13 = vcombine.high %v3437_v55, %v3437_v55 }
 0x306   : > { %7005 = vmatpush1.bf16.msra.mxu1 %v14389_v20  ;;  %v14478_v20 = vld [vmem:[#allocation110_spill] sm:$0xff] }
 0x307   : > { %7007 = vmatprep.subr.bf16.mxu1 %v14390_v44  ;;  %v14479_v44 = vld [vmem:[#allocation121_spill] sm:$0xff] }
 0x30a   : > { %7009 = vmatpush1.bf16.msra.mxu1 %v14391_v33  ;;  %v14474_v33 = vld [vmem:[#allocation153_spill] sm:$0xff] }
 0x30b   : > { %7011 = vmatprep.subr.bf16.mxu1 %v14392_v28  ;;  %v14460_v28 = vld [vmem:[#allocation86_spill] sm:$0xff] }
 0x30e   : > { %7013 = vmatpush1.bf16.msra.mxu1 %v14393_v48  ;;  %v14469_v48 = vld [vmem:[#allocation106_spill] sm:$0xff] }
 0x30f   : > { %7015 = vmatprep.subr.bf16.mxu1 %v14394_v49  ;;  %v14471_v49 = vld [vmem:[#allocation149_spill] sm:$0xff] }
 0x312   : > { %7017 = vmatpush1.bf16.msra.mxu1 %v14395_v1  ;;  %v14476_v1 = vld [vmem:[#allocation148_spill] sm:$0xff] }
 0x313   : > { %7019 = vmatprep.subr.bf16.mxu1 %v14396_v5  ;;  %v14475_v5 = vld [vmem:[#allocation147_spill] sm:$0xff] }
 0x316   : > { %7021 = vmatpush1.bf16.msra.mxu1 %v14397_v7  ;;  %v14480_v7 = vld [vmem:[#allocation150_spill] sm:$0xff] }
 0x317   : > { %7023 = vmatprep.subr.bf16.mxu1 %v9780_v26  ;;  %v14459_v26 = vld [vmem:[#allocation83_spill] sm:$0xff] }
 0x319   : > { %3589 = vmatmul.mubr.f32.vlgmr.msra.gmra.mrb[6].mxu1 %v3427_v40  ;;  %v3939_v40 = vstv %s10964_s28  ;;  %s11060_s28 = sld [smem:[#allocation11 + $0x105]] }
 0x31a   : > { %7025 = vmatpush1.bf16.msra.mxu1 %v9856_v52  ;;  %3659 = vmatprep.mubr.f32.mxu1 %v3445_v13  ;;  %v14461_v52 = vld [vmem:[#allocation88_spill] sm:$0xff] }
 0x31b   : > { %7027 = vmatprep.subr.bf16.mxu1 %v9910_v58  ;;  %v14463_v58 = vld [vmem:[#allocation90_spill] sm:$0xff] }
 0x31e   : > { %7029 = vmatpush1.bf16.msra.mxu1 %v9940_v25  ;;  %v14464_v25 = vld [vmem:[#allocation159_spill] sm:$0xff] }
 0x31f   : > { %7031 = vmatprep.subr.bf16.mxu1 %v10015_v17  ;;  %v14465_v17 = vld [vmem:[#allocation98_spill] sm:$0xff] }
 0x322   : > { %7033 = vmatpush1.bf16.msra.mxu1 %v10017_v19  ;;  %v14466_v19 = vld [vmem:[#allocation160_spill] sm:$0xff] }
 0x323   : > { %7035 = vmatprep.subr.bf16.mxu1 %v10057_v42  ;;  %v14467_v42 = vld [vmem:[#allocation95_spill] sm:$0xff] }
 0x326   : > { %7037 = vmatpush1.bf16.msra.mxu1 %v14457_v61 }
 0x327   : > { %7039 = vmatprep.subr.bf16.mxu1 %v14458_v4 }
 0x32a   : > { %7041 = vmatpush1.bf16.msra.mxu1 %v14459_v26  ;;  %v6062_v26 = vld [vmem:[%s14483_s7 + $0x6] sm:$0x3] }
 0x32b   : > { %7043 = vmatprep.subr.bf16.mxu1 %v14460_v28 }
 0x32e   : > { %7045 = vmatpush1.bf16.msra.mxu1 %v14461_v52 }
 0x32f   : > { %7047 = vmatprep.subr.bf16.mxu1 %v14462_v14 }
 0x332   : > { %7049 = vmatpush1.bf16.msra.mxu1 %v14463_v58 }
 0x333   : > { %7051 = vmatprep.subr.bf16.mxu1 %v14464_v25  ;;  %v6072_v25 = vld [vmem:[%s14483_s7 + $0xa] sm:$0x3] }
 0x336   : > { %7053 = vmatpush1.bf16.msra.mxu1 %v14465_v17 }
 0x337   : > { %7055 = vmatprep.subr.bf16.mxu1 %v14466_v19 }
 0x33a   : > { %7057 = vmatpush1.bf16.msra.mxu1 %v14467_v42 }
 0x33b   : > { %7059 = vmatprep.subr.bf16.mxu1 %v14468_v34 }
 0x33e   : > { %7061 = vmatpush1.bf16.msra.mxu1 %v14469_v48 }
 0x33f   : > { %7063 = vmatprep.subr.bf16.mxu1 %v14470_v32 }
 0x342   : > { %7065 = vmatpush1.bf16.msra.mxu1 %v14471_v49 }
 0x343   : > { %7067 = vmatprep.subr.bf16.mxu1 %v14472_v50 }
 0x346   : > { %7069 = vmatpush1.bf16.msra.mxu1 %v14473_v10 }
 0x347   : > { %7071 = vmatprep.subr.bf16.mxu1 %v14474_v33 }
 0x34a   : > { %7073 = vmatpush1.bf16.msra.mxu1 %v14475_v5 }
 0x34b   : > { %7075 = vmatprep.subr.bf16.mxu1 %v14476_v1 }
 0x34e   : > { %7077 = vmatpush1.bf16.msra.mxu1 %v14477_v62  ;;  %v6077_v62 = vld [vmem:[%s14483_s7 + $0xc] sm:$0x3] }
 0x34f   : > { %7079 = vmatprep.subr.bf16.mxu1 %v14478_v20 }
 0x352   : > { %7081 = vmatpush1.bf16.msra.mxu1 %v14479_v44 }
 0x353   : > { %7083 = vmatprep.subr.bf16.mxu1 %v14480_v7 }
 0x356   : > { %7085 = vmatpush1.bf16.msra.mxu1 %v10470_v21  ;;  %v14481_v21 = vld [vmem:[#allocation155_spill] sm:$0xff] }
 0x357   : > { %7087 = vmatprep.subr.bf16.mxu1 %v14398_v3 }
 0x359   : > { %3660 = vmatmul.mubr.f32.vlgmr.msra.gmra.mrb[6].mxu1 %v3437_v55  ;;  %v3815_v55 = vstv %s10989_s1  ;;  %s11281_s1 = sld [smem:[#allocation11 + $0x18d]] }
 0x35a   : > { %7089 = vmatpush1.bf16.msra.mxu1 %v14399_v37  ;;  %3730 = vmatprep.mubr.f32.mxu1 %v14274_v56 }
 0x35b   : > { %7091 = vmatprep.subr.bf16.mxu1 %v14400_v46 }
 0x35e   : > { %7093 = vmatpush1.bf16.msra.mxu1 %v14401_v23  ;;  %v6067_v23 = vld [vmem:[%s14483_s7 + $0x8] sm:$0x3] }
 0x35f   : > { %7095 = vmatprep.subr.bf16.mxu1 %v14402_v2  ;;  %v3430_v2 = vcombine.high %v10857_v47, %v10857_v47  ;;  %v3809_v47 = vstv %s10987_s24  ;;  %s11279_s24 = sld [smem:[#allocation11 + $0x10d]] }
 0x362   : > { %7097 = vmatpush1.bf16.msra.mxu1 %v14403_v38  ;;  %v6052_v38 = vld [vmem:[%s14483_s7 + $0x2] sm:$0x3] }
 0x363   : > { %7099 = vmatprep.subr.bf16.mxu1 %v14404_v41 }
 0x366   : > { %7101 = vmatpush1.bf16.msra.mxu1 %v14405_v9  ;;  %v14486_v9 = vld [vmem:[#allocation65_spill] sm:$0xff] }
 0x367   : > { %7103 = vmatprep.subr.bf16.mxu1 %v14481_v21  ;;  %v10998_v41 = vrot.slane %v6067_v23, %v14486_v9  ;;  %v11055_v8 = vrot.slane %v6052_v38, %v14486_v9  ;;  %v11077_v13 = vrot.slane %v6057_v43, %v14486_v9  ;;  %v11130_v10 = vrot.slane %v6062_v26, %v14486_v9 }
 0x368   : > { %v11149_v7 = vrot.slane %v6072_v25, %v14486_v9 }
 0x369   : > { %14487 = vst [vmem:[#allocation119_spill] sm:$0xff] %v10998_v41  ;;  %v3924_v35 = vmul.f32 %v10760_v54, %v10998_v41  ;;  %14496 = vst [vmem:[#allocation125_spill] sm:$0xff] %v11055_v8  ;;  %v3797_v54 = vstv %s10983_s29 }
 0x36a   : > { %7105 = vmatpush1.bf16.msra.mxu1 %v14407_v0  ;;  %v3744_v0 = vld [vmem:[%s14483_s7] sm:$0x3]  ;;  %14498 = vst [vmem:[#allocation156_spill] sm:$0xff] %v11077_v13  ;;  %14500 = vst [vmem:[#allocation101_spill] sm:$0xff] %v11130_v10 }
 0x36b   : > { %7107 = vmatprep.subr.bf16.mxu1 %v14408_v12  ;;  %v14490_v12 = vld [vmem:[#allocation66_spill] sm:$0xff]  ;;  %v11035_v57 = vrot.slane %v3744_v0, %v14486_v9  ;;  %v11091_v28 = vmul.f32 %v3927_v15, %v3924_v35  ;;  %v11093_v52 = vmul.f32 %v3933_v39, %v3924_v35  ;;  %v11095_v14 = vmul.f32 %v3939_v40, %v3924_v35 }
 0x36c   : > { %v10908_v3 = vpop.f32.mrb[4].mxu1  ;;  %v11038_v6 = vrot.slane %v3744_v0, %v14490_v12  ;;  %v11058_v51 = vrot.slane %v6052_v38, %v14490_v12  ;;  %v11080_v61 = vrot.slane %v6057_v43, %v14490_v12  ;;  %v11097_v58 = vmul.f32 %v3945_v27, %v3924_v35  ;;  %v6082_v38 = vld [vmem:[%s14483_s7 + $0xe] sm:$0x3] }
 0x36d   : > { %v10910_v37 = vpop.f32.mrb[5].mxu1  ;;  %4133 = vrot.lane.b32.xlu0 %v10908_v3, %s13816_s30  ;;  %v11133_v33 = vrot.slane %v6062_v26, %v14490_v12  ;;  %v11176_v43 = vrot.slane %v6077_v62, %v14486_v9  ;;  %v11179_v35 = vrot.slane %v6077_v62, %v14490_v12  ;;  %v11192_v62 = vrot.slane %v6082_v38, %v14486_v9 }
 0x36e   : > { %7109 = vmatpush1.bf16.msra.mxu1 %v14409_v59  ;;  %4135 = vrot.lane.b32.xlu1 %v10910_v37, %s13816_s30  ;;  %v11010_v59 = vrot.slane %v6067_v23, %v14490_v12  ;;  %14495 = vst [vmem:[#allocation124_spill] sm:$0xff] %v11038_v6  ;;  %14497 = vst [vmem:[#allocation126_spill] sm:$0xff] %v11058_v51  ;;  %v11195_v23 = vrot.slane %v6082_v38, %v14490_v12 }
 0x36f   : > { %7111 = vmatprep.subr.bf16.mxu1 %v14411_v63  ;;  %v3444_v63 = vrot.slane %v3430_v2, %v14268_v60  ;;  %14499 = vst [vmem:[#allocation127_spill] sm:$0xff] %v11080_v61  ;;  %14501 = vst [vmem:[#allocation103_spill] sm:$0xff] %v11133_v33  ;;  %v11159_v2 = vrot.slane %v6072_v25, %v14490_v12 }
 0x370   : > { %14491 = vst [vmem:[#allocation111_spill] sm:$0xff] %v11010_v59  ;;  %v3925_v53 = vmul.f32 %v10763_v18, %v11010_v59 }
 0x371   : > { %4165 = vrot.lane.b32.xlu0 %v10908_v3, %s13814_s18 }
 0x372   : > { %7113 = vmatpush1.bf16.msra.mxu1 %v14412_v29  ;;  %4167 = vrot.lane.b32.xlu1 %v10910_v37, %s13814_s18  ;;  %v11012_v29 = vpop.permute.xlu0 %3737  ;;  %v11108_v17 = vmul.f32 %v3927_v15, %v3925_v53  ;;  %v11110_v19 = vmul.f32 %v3933_v39, %v3925_v53  ;;  %v11112_v42 = vmul.f32 %v3939_v40, %v3925_v53 }
 0x373   : > { %7115 = vmatprep.subr.bf16.mxu1 %v14413_v31  ;;  %v11114_v34 = vmul.f32 %v3945_v27, %v3925_v53 }
 0x375   : > { %4197 = vrot.lane.b32.xlu0 %v10908_v3, %s13824_s21 }
 0x376   : > { %7117 = vmatpush1.bf16.msra.mxu1 %v14414_v24  ;;  %4199 = vrot.lane.b32.xlu1 %v10910_v37, %s13824_s21  ;;  %v11014_v24 = vpop.permute.xlu1 %3739  ;;  %v3775_v18 = vpop.permute.xlu0 %3774 }
 0x377   : > { %v3742_v15 = vsel %vm3741_vm0, %v11012_v29, %v11014_v24  ;;  %v3743_v39 = vsel %vm3741_vm0, %v11014_v24, %v11012_v29 }
 0x378   : > { %v3757_v24 = vmul.f32 %v11038_v6, %v3742_v15 }
 0x379   : > { %3731 = vmatmul.mubr.f32.vlgmr.msra.gmra.mrb[6].mxu1 %v3444_v63  ;;  %4229 = vrot.lane.b32.xlu0 %v10908_v3, %s14434_s27 }
 0x37a   : > { %4231 = vrot.lane.b32.xlu1 %v10910_v37, %s14434_s27  ;;  %v3777_v4 = vpop.permute.xlu1 %3776  ;;  %v3821_v40 = vpop.permute.xlu0 %3820  ;;  %v3761_v29 = vmul.f32 %v3759_v36, %v3757_v24  ;;  %v3765_v20 = vmul.f32 %v3763_v30, %v3757_v24  ;;  %v3769_v5 = vmul.f32 %v3767_v22, %v3757_v24 }
 0x37b   : > { %v3779_v53 = vsel %vm3778_vm1, %v3775_v18, %v3777_v4  ;;  %v3780_v26 = vsel %vm3778_vm1, %v3777_v4, %v3775_v18  ;;  %v6087_v18 = vld [vmem:[%s14483_s7 + $0x10] sm:$0x3]  ;;  %v3756_v4 = vmul.f32 %v11035_v57, %v3743_v39  ;;  %s11455_s7 = sld [smem:[#allocation11 + $0x18e]] }
 0x37c   : > { %v3794_v25 = vmul.f32 %v11055_v8, %v3780_v26  ;;  %v3795_v38 = vmul.f32 %v11058_v51, %v3779_v53  ;;  %v11211_v44 = vrot.slane %v6087_v18, %v14486_v9  ;;  %v11219_v21 = vrot.slane %v6087_v18, %v14490_v12 }
 0x37d   : > { %4287 = vrot.lane.b32.xlu0 %v10908_v3, %s14000_s16  ;;  %v3760_v15 = vmul.f32 %v3759_v36, %v3756_v4  ;;  %v3764_v63 = vmul.f32 %v3763_v30, %v3756_v4  ;;  %v3768_v36 = vmul.f32 %v3767_v22, %v3756_v4 }
 0x37e   : > { %4289 = vrot.lane.b32.xlu1 %v10910_v37, %s14000_s16  ;;  %v3823_v27 = vpop.permute.xlu1 %3822  ;;  %v3867_v26 = vpop.permute.xlu0 %3866  ;;  %v3798_v39 = vmul.f32 %v3797_v54, %v3794_v25  ;;  %v3799_v1 = vmul.f32 %v3797_v54, %v3795_v38  ;;  %v3804_v50 = vmul.f32 %v3803_v16, %v3794_v25  ;;  %v3805_v49 = vmul.f32 %v3803_v16, %v3795_v38 }
 0x37f   : > { %v3825_v0 = vsel %vm3824_vm2, %v3821_v40, %v3823_v27  ;;  %v3826_v18 = vsel %vm3824_vm2, %v3823_v27, %v3821_v40  ;;  %v3810_v54 = vmul.f32 %v3809_v47, %v3794_v25  ;;  %v3811_v22 = vmul.f32 %v3809_v47, %v3795_v38 }
 0x380   : > { %v3840_v40 = vmul.f32 %v11077_v13, %v3826_v18  ;;  %v3841_v27 = vmul.f32 %v11080_v61, %v3825_v0  ;;  %v3816_v48 = vmul.f32 %v3815_v55, %v3794_v25  ;;  %v3817_v16 = vmul.f32 %v3815_v55, %v3795_v38 }
 0x381   : > { %4319 = vrot.lane.b32.xlu0 %v10908_v3, %s13822_s2  ;;  %v3772_v0 = vmul.f32 %v3771_v45, %v3756_v4  ;;  %v3773_v18 = vmul.f32 %v3771_v45, %v3757_v24  ;;  %v3800_v12 = vadd.f32 %v3798_v39, %v3760_v15  ;;  %v3801_v9 = vadd.f32 %v3799_v1, %v3761_v29  ;;  %14576 = sst [smem:[#allocation179_spill]] %s11455_s7 }
 0x382   : > { %4321 = vrot.lane.b32.xlu1 %v10910_v37, %s13822_s2  ;;  %s11070_s2 = sld [smem:[#allocation11 + $0x6]]  ;;  %v3869_v53 = vpop.permute.xlu1 %3868  ;;  %v3951_v60 = vpop.permute.xlu0 %3950  ;;  %v3807_v56 = vadd.f32 %v3805_v49, %v3765_v20  ;;  %v14510_v55 = vstv %s14506_s17  ;;  %v3812_v20 = vadd.f32 %v3810_v54, %v3768_v36  ;;  %v3813_v4 = vadd.f32 %v3811_v22, %v3769_v5  ;;  %s11397_s17 = sld [smem:[#allocation11 + $0x10a]] }
 0x383   : > { %v3870_v30 = vsel %vm985_vm10, %v3867_v26, %v3869_v53  ;;  %v3871_v32 = vsel %vm985_vm10, %v3869_v53, %v3867_v26  ;;  %v3806_v53 = vadd.f32 %v3804_v50, %v3764_v63  ;;  %v3844_v45 = vmul.f32 %v14510_v55, %v3840_v40  ;;  %s11583_s7 = sld [smem:[#allocation11 + $0x94]] }
 0x384   : > { %v3885_v47 = vmul.f32 %v11130_v10, %v3871_v32  ;;  %v3886_v25 = vmul.f32 %v11133_v33, %v3870_v30  ;;  %v14511_v24 = vmov %v14510_v55  ;;  %v3818_v32 = vadd.f32 %v3816_v48, %v3772_v0 }
 0x385   : > { %4351 = vrot.lane.b32.xlu0 %v10908_v3, %s13820_s4  ;;  %v3845_v1 = vmul.f32 %v14511_v24, %v3841_v27  ;;  %v3819_v38 = vadd.f32 %v3817_v16, %v3773_v18  ;;  %v14521_v48 = vstv %s14512_s3  ;;  %v3846_v0 = vadd.f32 %v3844_v45, %v3800_v12  ;;  %s11433_s3 = sld [smem:[#allocation11 + $0xc]] }
 0x386   : > { %4353 = vrot.lane.b32.xlu1 %v10910_v37, %s13820_s4  ;;  %s11072_s4 = sld [smem:[#allocation11 + $0x86]]  ;;  %v3953_v26 = vpop.permute.xlu1 %3952  ;;  %v3895_v54 = vmul.f32 %v14521_v48, %v3885_v47  ;;  %v14523_v22 = vmov %v14521_v48  ;;  %v3996_v13 = vpop.permute.xlu0 %3995 }
 0x387   : > { %v3896_v16 = vmul.f32 %v14523_v22, %v3886_v25  ;;  %v3847_v18 = vadd.f32 %v3845_v1, %v3801_v9  ;;  %v3955_v48 = vsel %vm1396_vm11, %v3953_v26, %v3951_v60 }
 0x388   : > { %v3970_v6 = vmul.f32 %v11159_v2, %v3955_v48 }
 0x389   : > { %4383 = vrot.lane.b32.xlu0 %v10908_v3, %s13818_s15 }
 0x38a   : > { %4385 = vrot.lane.b32.xlu1 %v10910_v37, %s13818_s15  ;;  %s11007_s15 = sld [smem:[#allocation11 + $0x182]] }
 0x38b   : > { %14565 = sst [smem:[#allocation172_spill]] %s11433_s3  ;;  %s11564_s3 = sld [smem:[#allocation11 + $0x13]] }
 0x38e   : > { %v10952_v31 = vpop.f32.mrb[2].mxu0 }
 0x38f   : > { %v10954_v46 = vpop.f32.mrb[3].mxu0  ;;  %4415 = vrot.lane.b32.xlu0 %v10952_v31, %s13816_s30 }
 0x390   : > { %4417 = vrot.lane.b32.xlu1 %v10954_v46, %s13816_s30  ;;  %s11005_s30 = sld [smem:[#allocation11 + $0x102]]  ;;  %14489 = sst [smem:[#allocation167_spill]] %s11007_s15 }
 0x391   : > { %s11140_s15 = sld [smem:[#allocation11 + $0x108]] }
 0x392   : > { %s14509_s29 = sld [smem:[#allocation167_spill]] }
 0x393   : > { %4447 = vrot.lane.b32.xlu0 %v10952_v31, %s13814_s18 }
 0x394   : > { %4449 = vrot.lane.b32.xlu1 %v10954_v46, %s13814_s18  ;;  %s10995_s18 = sld [smem:[#allocation11 + $0x82]] }
 0x396   : > { %14488 = sst [smem:[#allocation166_spill]] %s11005_s30  ;;  %s11142_s30 = sld [smem:[#allocation11 + $0x188]] }
 0x397   : > { %4479 = vrot.lane.b32.xlu0 %v10952_v31, %s13824_s21  ;;  %s14508_s19 = sld [smem:[#allocation166_spill]] }
 0x398   : > { %4481 = vrot.lane.b32.xlu1 %v10954_v46, %s13824_s21  ;;  %s11019_s21 = sld [smem:[#allocation11 + $0x3]]  ;;  %v14517_v24 = vstv %s14509_s29 }
 0x399   : > { %v3862_v33 = vmul.f32 %v14517_v24, %v3840_v40  ;;  %v14518_v10 = vmov %v14517_v24  ;;  %v14524_v24 = vstv %s11025_s0  ;;  %s11353_s0 = sld [smem:[#allocation11 + $0x96]]  ;;  %s11410_s29 = sld [smem:[#allocation11 + $0x8b]] }
 0x39a   : > { %14485 = sst [smem:[#allocation165_spill]] %s10995_s18  ;;  %s14522_s18 = sld [smem:[#allocation169_spill]] }
 0x39b   : > { %4511 = vrot.lane.b32.xlu0 %v10952_v31, %s14434_s27  ;;  %s14507_s5 = sld [smem:[#allocation165_spill]]  ;;  %14551 = sst [smem:[#allocation169_spill]] %s11397_s17 }
 0x39c   : > { %4513 = vrot.lane.b32.xlu1 %v10954_v46, %s14434_s27  ;;  %s11101_s27 = sld [smem:[#allocation11 + $0x87]] }
 0x39d   : > { %v14515_v39 = vstv %s14508_s19  ;;  %s11408_s19 = sld [smem:[#allocation11 + $0xb]] }
 0x39e   : > { %v3856_v15 = vmul.f32 %v14515_v39, %v3840_v40  ;;  %v14516_v30 = vmov %v14515_v39  ;;  %v14519_v61 = vstv %s11019_s21  ;;  %s11351_s21 = sld [smem:[#allocation11 + $0x16]] }
 0x39f   : > { %4569 = vrot.lane.b32.xlu0 %v10952_v31, %s14000_s16  ;;  %v3857_v55 = vmul.f32 %v14516_v30, %v3841_v27  ;;  %v14520_v36 = vmov %v14519_v61  ;;  %14537 = sst [smem:[#allocation164_spill]] %s11353_s0 }
 0x3a0   : > { %4571 = vrot.lane.b32.xlu1 %v10954_v46, %s14000_s16  ;;  %s11156_s16 = sld [smem:[#allocation11 + $0x8d]]  ;;  %v3890_v5 = vmul.f32 %v14520_v36, %v3886_v25  ;;  %v3954_v36 = vsel %vm1396_vm11, %v3951_v60, %v3953_v26  ;;  %v3858_v22 = vadd.f32 %v3856_v15, %v3812_v20  ;;  %v14526_v12 = vstv %s14522_s18  ;;  %s11445_s18 = sld [smem:[#allocation11 + $0x18c]] }
 0x3a1   : > { %v14513_v29 = vstv %s14507_s5  ;;  %v3859_v51 = vadd.f32 %v3857_v55, %v3813_v4  ;;  %v3907_v9 = vmul.f32 %v14526_v12, %v3885_v47  ;;  %v3969_v8 = vmul.f32 %v11149_v7, %v3954_v36  ;;  %s11399_s5 = sld [smem:[#allocation11 + $0x18a]] }
 0x3a2   : > { %v3850_v50 = vmul.f32 %v14513_v29, %v3840_v40  ;;  %v14514_v63 = vmov %v14513_v29  ;;  %v3863_v29 = vmul.f32 %v14518_v10, %v3841_v27  ;;  %v3998_v40 = vpop.permute.xlu1 %3997  ;;  %v3901_v10 = vmul.f32 %v14524_v24, %v3885_v47 }
 0x3a3   : > { %4601 = vrot.lane.b32.xlu0 %v10952_v31, %s14502_s14  ;;  %v3851_v49 = vmul.f32 %v14514_v63, %v3841_v27  ;;  %v3889_v63 = vmul.f32 %v14519_v61, %v3885_v47  ;;  %v14525_v27 = vmov %v14524_v24  ;;  %v3892_v1 = vadd.f32 %v3890_v5, %v3847_v18  ;;  %14556 = sst [smem:[#allocation171_spill]] %s11408_s19  ;;  %s11557_s19 = sld [smem:[#allocation11 + $0x192]] }
 0x3a4   : > { %4603 = vrot.lane.b32.xlu1 %v10954_v46, %s14502_s14  ;;  %s14504_s14 = smov 113   ;;  %v3852_v39 = vadd.f32 %v3850_v50, %v3806_v53  ;;  %v3902_v61 = vmul.f32 %v14525_v27, %v3886_v25  ;;  %v14527_v53 = vmov %v14526_v12  ;;  %v3864_v24 = vadd.f32 %v3862_v33, %v3818_v32  ;;  %14536 = sst [smem:[#allocation163_spill]] %s11351_s21 }
 0x3a5   : > { %v3853_v30 = vadd.f32 %v3851_v49, %v3807_v56  ;;  %v3908_v56 = vmul.f32 %v14527_v53, %v3886_v25  ;;  %v3891_v45 = vadd.f32 %v3889_v63, %v3846_v0  ;;  %v3865_v27 = vadd.f32 %v3863_v29, %v3819_v38  ;;  %v4042_v38 = vpop.permute.xlu0 %4041 }
 0x3a6   : > { %v3897_v50 = vadd.f32 %v3895_v54, %v3852_v39  ;;  %v3903_v60 = vadd.f32 %v3901_v10, %v3858_v22  ;;  %v3904_v26 = vadd.f32 %v3902_v61, %v3859_v51  ;;  %v4276_v47 = vstv %s11279_s24  ;;  %v4044_v15 = vpop.permute.xlu1 %4043  ;;  %14571 = sst [smem:[#allocation175_spill]] %s11445_s18  ;;  %s11573_s18 = sld [smem:[#allocation11 + $0x113]] }
 0x3a7   : > { %4633 = vrot.lane.b32.xlu0 %v10952_v31, %s14503_s6  ;;  %v3898_v49 = vadd.f32 %v3896_v16, %v3853_v30  ;;  %v4282_v25 = vstv %s11281_s1  ;;  %v3909_v20 = vadd.f32 %v3907_v9, %v3864_v24  ;;  %v3910_v4 = vadd.f32 %v3908_v56, %v3865_v27  ;;  %14552 = sst [smem:[#allocation170_spill]] %s11399_s5  ;;  %s11591_s24 = sld [smem:[#allocation11 + $0x194]] }
 0x3a8   : > { %4635 = vrot.lane.b32.xlu1 %v10954_v46, %s14503_s6  ;;  %v4000_v33 = vsel %vm3999_vm3, %v3996_v13, %v3998_v40  ;;  %v4001_v32 = vsel %vm3999_vm3, %v3998_v40, %v3996_v13  ;;  %v3930_v55 = vadd.f32 %v11091_v28, %v3891_v45  ;;  %v3931_v29 = vadd.f32 %v11108_v17, %v3892_v1  ;;  %s11477_s6 = sld [smem:[#allocation11 + $0x10f]] }
 0x3a9   : > { %v3936_v51 = vadd.f32 %v11093_v52, %v3897_v50  ;;  %v3937_v63 = vadd.f32 %v11110_v19, %v3898_v49  ;;  %v14528_v5 = vstv %s11045_s20  ;;  %v14530_v18 = vstv %s11047_s22  ;;  %v4088_v50 = vpop.permute.xlu0 %4087  ;;  %s11376_s20 = sld [smem:[#allocation11 + $0x116]] }
 0x3aa   : > { %v3973_v54 = vmul.f32 %v14528_v5, %v3969_v8  ;;  %v14529_v16 = vmov %v14528_v5  ;;  %v3979_v13 = vmul.f32 %v14530_v18, %v3969_v8  ;;  %v14531_v39 = vmov %v14530_v18  ;;  %v4090_v49 = vpop.permute.xlu1 %4089  ;;  %s11378_s22 = sld [smem:[#allocation11 + $0x196]] }
 0x3ab   : > { %4665 = vrot.lane.b32.xlu0 %v10952_v31, %s14504_s14  ;;  %v3974_v0 = vmul.f32 %v14529_v16, %v3970_v6  ;;  %v3980_v30 = vmul.f32 %v14531_v39, %v3970_v6  ;;  %v3942_v40 = vadd.f32 %v11095_v14, %v3903_v60  ;;  %v3943_v28 = vadd.f32 %v11112_v42, %v3904_v26 }
 0x3ac   : > { %4667 = vrot.lane.b32.xlu1 %v10954_v46, %s14504_s14  ;;  %v4015_v17 = vmul.f32 %v11176_v43, %v4000_v33  ;;  %v4016_v10 = vmul.f32 %v11179_v35, %v4001_v32  ;;  %v3948_v52 = vadd.f32 %v11097_v58, %v3909_v20  ;;  %v3949_v19 = vadd.f32 %v11114_v34, %v3910_v4  ;;  %s11467_s14 = sld [smem:[#allocation11 + $0x8f]] }
 0x3ad   : > { %v14532_v61 = vstv %s11060_s28  ;;  %v4046_v48 = vsel %vm4045_vm4, %v4042_v38, %v4044_v15  ;;  %v14534_v42 = vstv %s11062_s23  ;;  %v4047_v58 = vsel %vm4045_vm4, %v4044_v15, %v4042_v38  ;;  %s11385_s28 = sld [smem:[#allocation11 + $0x109]] }
 0x3ae   : > { %v3985_v36 = vmul.f32 %v14532_v61, %v3969_v8  ;;  %v14533_v22 = vmov %v14532_v61  ;;  %v3991_v12 = vmul.f32 %v14534_v42, %v3969_v8  ;;  %v14535_v9 = vmov %v14534_v42  ;;  %s11387_s23 = sld [smem:[#allocation11 + $0x189]]  ;;  %14578 = sst [smem:[#allocation181_spill]] %s11477_s6 }
 0x3af   : > { %v3986_v14 = vmul.f32 %v14533_v22, %v3970_v6  ;;  %v3992_v53 = vmul.f32 %v14535_v9, %v3970_v6  ;;  %v3975_v34 = vadd.f32 %v3973_v54, %v3930_v55  ;;  %v3976_v56 = vadd.f32 %v3974_v0, %v3931_v29  ;;  %s11497_s6 = sld [smem:[#allocation11 + $0x190]] }
 0x3b0   : > { %v3981_v45 = vadd.f32 %v3979_v13, %v3936_v51  ;;  %v3982_v1 = vadd.f32 %v3980_v30, %v3937_v63  ;;  %v14538_v8 = vstv %s11070_s2  ;;  %v14540_v60 = vstv %s11072_s4  ;;  %s11391_s2 = sld [smem:[#allocation11 + $0xa]] }
 0x3b1   : > { %v4019_v24 = vmul.f32 %v14538_v8, %v4015_v17  ;;  %v14539_v27 = vmov %v14538_v8  ;;  %v4025_v26 = vmul.f32 %v14540_v60, %v4015_v17  ;;  %v14541_v20 = vmov %v14540_v60  ;;  %s11393_s4 = sld [smem:[#allocation11 + $0x8a]] }
 0x3b2   : > { %v4020_v6 = vmul.f32 %v14539_v27, %v4016_v10  ;;  %v4026_v4 = vmul.f32 %v14541_v20, %v4016_v10  ;;  %v3987_v33 = vadd.f32 %v3985_v36, %v3942_v40  ;;  %v14542_v32 = vstv %s11082_s8  ;;  %s11381_s8 = sld [smem:[#allocation11 + $0x9]]  ;;  %14577 = sst [smem:[#allocation180_spill]] %s11467_s14 }
 0x3b3   : > { %v4031_v38 = vmul.f32 %v14542_v32, %v4015_v17  ;;  %v14543_v15 = vmov %v14542_v32  ;;  %v14544_v29 = vstv %s11084_s25  ;;  %v4061_v54 = vmul.f32 %v11192_v62, %v4046_v48  ;;  %s11383_s25 = sld [smem:[#allocation11 + $0x89]]  ;;  %14547 = sst [smem:[#allocation166_spill]] %s11385_s28 }
 0x3b4   : > { %v4032_v55 = vmul.f32 %v14543_v15, %v4016_v10  ;;  %v4037_v51 = vmul.f32 %v14544_v29, %v4015_v17  ;;  %v14545_v63 = vmov %v14544_v29  ;;  %v4092_v16 = vsel %vm4091_vm5, %v4088_v50, %v4090_v49  ;;  %s11487_s14 = sld [smem:[#allocation11 + $0x90]] }
 0x3b5   : > { %v4038_v5 = vmul.f32 %v14545_v63, %v4016_v10  ;;  %v4093_v0 = vsel %vm4091_vm5, %v4090_v49, %v4088_v50  ;;  %v3988_v18 = vadd.f32 %v3986_v14, %v3943_v28  ;;  %v3993_v13 = vadd.f32 %v3991_v12, %v3948_v52 }
 0x3b6   : > { %v3994_v39 = vadd.f32 %v3992_v53, %v3949_v19  ;;  %v4062_v30 = vmul.f32 %v11195_v23, %v4047_v58  ;;  %v4021_v40 = vadd.f32 %v4019_v24, %v3975_v34  ;;  %v4022_v17 = vadd.f32 %v4020_v6, %v3976_v56  ;;  %14548 = sst [smem:[#allocation167_spill]] %s11391_s2 }
 0x3b7   : > { %v4027_v10 = vadd.f32 %v4025_v26, %v3981_v45  ;;  %v4028_v61 = vadd.f32 %v4026_v4, %v3982_v1  ;;  %v4033_v28 = vadd.f32 %v4031_v38, %v3987_v33  ;;  %v4034_v52 = vadd.f32 %v4032_v55, %v3988_v18  ;;  %14549 = sst [smem:[#allocation168_spill]] %s11393_s4 }
 0x3b8   : > { %14546 = sst [smem:[#allocation165_spill]] %s11381_s8  ;;  %v4107_v19 = vmul.f32 %v11211_v44, %v4092_v16  ;;  %v4108_v36 = vmul.f32 %v11219_v21, %v4093_v0  ;;  %v4039_v48 = vadd.f32 %v4037_v51, %v3993_v13  ;;  %v4040_v22 = vadd.f32 %v4038_v5, %v3994_v39 }
 0x3b9   : > { %v14550_v14 = vstv %s11099_s11  ;;  %v4546_v12 = vstv %s11351_s21  ;;  %v14554_v58 = vstv %s11101_s27  ;;  %v4552_v1 = vstv %s11353_s0  ;;  %s11421_s11 = sld [smem:[#allocation11 + $0x10b]]  ;;  %s11479_s0 = sld [smem:[#allocation11 + $0x18f]] }
 0x3ba   : > { %v4065_v42 = vmul.f32 %v14550_v14, %v4061_v54  ;;  %v14553_v9 = vmov %v14550_v14  ;;  %v4071_v34 = vmul.f32 %v14554_v58, %v4061_v54  ;;  %v14555_v56 = vmov %v14554_v58  ;;  %s11423_s27 = sld [smem:[#allocation11 + $0x18b]]  ;;  %s11485_s21 = sld [smem:[#allocation11 + $0x10]] }
 0x3bb   : > { %v4066_v53 = vmul.f32 %v14553_v9, %v4062_v30  ;;  %v4072_v45 = vmul.f32 %v14555_v56, %v4062_v30  ;;  %v14557_v50 = vstv %s11116_s9  ;;  %v14559_v27 = vstv %s11118_s13  ;;  %s11435_s9 = sld [smem:[#allocation11 + $0x8c]] }
 0x3bc   : > { %v4077_v49 = vmul.f32 %v14557_v50, %v4061_v54  ;;  %v14558_v8 = vmov %v14557_v50  ;;  %v4083_v6 = vmul.f32 %v14559_v27, %v4061_v54  ;;  %v14560_v60 = vmov %v14559_v27  ;;  %s11443_s13 = sld [smem:[#allocation11 + $0x10c]] }
 0x3bd   : > { %v4078_v24 = vmul.f32 %v14558_v8, %v4062_v30  ;;  %v4084_v26 = vmul.f32 %v14560_v60, %v4062_v30  ;;  %v14561_v20 = vstv %s11125_s10  ;;  %v14563_v38 = vstv %s11127_s12  ;;  %s11449_s10 = sld [smem:[#allocation11 + $0xe]] }
 0x3be   : > { %v4111_v4 = vmul.f32 %v14561_v20, %v4107_v19  ;;  %v14562_v33 = vmov %v14561_v20  ;;  %v4117_v15 = vmul.f32 %v14563_v38, %v4107_v19  ;;  %v14564_v55 = vmov %v14563_v38  ;;  %s11451_s12 = sld [smem:[#allocation11 + $0x8e]] }
 0x3bf   : > { %v4112_v32 = vmul.f32 %v14562_v33, %v4108_v36  ;;  %v4118_v29 = vmul.f32 %v14564_v55, %v4108_v36  ;;  %v4067_v51 = vadd.f32 %v4065_v42, %v4021_v40  ;;  %v14567_v63 = vstv %s11140_s15  ;;  %s11453_s15 = sld [smem:[#allocation11 + $0x10e]]  ;;  %14579 = sst [smem:[#allocation182_spill]] %s11479_s0 }
 0x3c0   : > { %v4123_v5 = vmul.f32 %v14567_v63, %v4107_v19  ;;  %v14568_v54 = vmov %v14567_v63  ;;  %v14569_v0 = vstv %s11142_s30  ;;  %v4068_v13 = vadd.f32 %v4066_v53, %v4022_v17  ;;  %s11465_s30 = sld [smem:[#allocation11 + $0xf]]  ;;  %s11495_s0 = sld [smem:[#allocation11 + $0x110]] }
 0x3c1   : > { %14566 = sst [smem:[#allocation173_spill]] %s11435_s9  ;;  %v4124_v16 = vmul.f32 %v14568_v54, %v4108_v36  ;;  %v4129_v18 = vmul.f32 %v14569_v0, %v4107_v19  ;;  %v4073_v39 = vadd.f32 %v4071_v34, %v4027_v10  ;;  %v4074_v30 = vadd.f32 %v4072_v45, %v4028_v61  ;;  %s14587_s1 = sld [smem:[#allocation182_spill]] }
 0x3c2   : > { %14570 = sst [smem:[#allocation174_spill]] %s11443_s13  ;;  %v14572_v14 = vmov %v14569_v0  ;;  %v4079_v40 = vadd.f32 %v4077_v49, %v4033_v28  ;;  %v4080_v42 = vadd.f32 %v4078_v24, %v4034_v52  ;;  %v4085_v58 = vadd.f32 %v4083_v6, %v4039_v48  ;;  %s11566_s13 = sld [smem:[#allocation11 + $0x93]] }
 0x3c3   : > { %v4130_v9 = vmul.f32 %v14572_v14, %v4108_v36  ;;  %14573 = sst [smem:[#allocation176_spill]] %s11449_s10  ;;  %v4086_v56 = vadd.f32 %v4084_v26, %v4040_v22  ;;  %v11457_v19 = vadd.f32 %v4111_v4, %v4067_v51  ;;  %v11459_v17 = vadd.f32 %v4112_v32, %v4068_v13  ;;  %s11581_s9 = sld [smem:[#allocation11 + $0x14]] }
 0x3c4   : > { %14574 = sst [smem:[#allocation177_spill]] %s11451_s12  ;;  %v11461_v10 = vadd.f32 %v4117_v15, %v4073_v39  ;;  %v11463_v61 = vadd.f32 %v4118_v29, %v4074_v30  ;;  %v11469_v28 = vadd.f32 %v4123_v5, %v4079_v40  ;;  %v11471_v52 = vadd.f32 %v4124_v16, %v4080_v42  ;;  %s11575_s12 = sld [smem:[#allocation11 + $0x193]] }
 0x3c5   : > { %14575 = sst [smem:[#allocation178_spill]] %s11453_s15  ;;  %v11473_v36 = vadd.f32 %v4129_v18, %v4085_v58  ;;  %v4261_v48 = vmul.f32 %v10998_v41, %v10908_v3  ;;  %v11481_v22 = vadd.f32 %v4130_v9, %v4086_v56  ;;  %v4262_v53 = vmul.f32 %v11010_v59, %v10910_v37  ;;  %s14618_s15 = sld [smem:[#allocation173_spill]] }
 0x3c6   : > { %v4558_v34 = vstv %s11376_s20  ;;  %v4564_v3 = vstv %s11378_s22  ;;  %v4142_v45 = vstv %s11381_s8  ;;  %v4148_v50 = vstv %s11383_s25  ;;  %s11503_s8 = sld [smem:[#allocation11 + $0x11]]  ;;  %s14616_s20 = sld [smem:[#allocation193_spill]] }
 0x3c7   : > { %v4154_v49 = vstv %s11385_s28  ;;  %v4160_v8 = vstv %s11387_s23  ;;  %v4174_v37 = vstv %s11391_s2  ;;  %v4180_v24 = vstv %s11393_s4  ;;  %s11505_s28 = sld [smem:[#allocation11 + $0x91]]  ;;  %s11555_s2 = sld [smem:[#allocation11 + $0x112]] }
 0x3c8   : > { %v4186_v27 = vstv %s11397_s17  ;;  %v4192_v6 = vstv %s11399_s5  ;;  %v14580_v60 = vstv %s11154_s26  ;;  %v14581_v20 = vstv %s11156_s16  ;;  %s11523_s5 = sld [smem:[#allocation11 + $0x111]]  ;;  %s11547_s26 = sld [smem:[#allocation11 + $0x12]] }
 0x3c9   : > { %v11509_v26 = vmul.f32 %v14580_v60, %v4261_v48  ;;  %v11513_v4 = vmul.f32 %v14581_v20, %v4261_v48  ;;  %v11517_v33 = vmul.f32 %v4276_v47, %v4261_v48  ;;  %v11521_v32 = vmul.f32 %v4282_v25, %v4261_v48  ;;  %s11525_s17 = sld [smem:[#allocation11 + $0x191]]  ;;  %s11549_s16 = sld [smem:[#allocation11 + $0x92]] }
 0x3ca   : > { %v14583_v38 = vmov %v14580_v60  ;;  %v14584_v55 = vmov %v14581_v20  ;;  %v11537_v51 = vmul.f32 %v4276_v47, %v4262_v53  ;;  %v11541_v63 = vmul.f32 %v4282_v25, %v4262_v53  ;;  %s11589_s4 = sld [smem:[#allocation11 + $0x114]]  ;;  %s14620_s10 = sld [smem:[#allocation174_spill]] }
 0x3cb   : > { %v11529_v15 = vmul.f32 %v14583_v38, %v4262_v53  ;;  %v11533_v29 = vmul.f32 %v14584_v55, %v4262_v53  ;;  %v4543_v25 = vmul.f32 %v10998_v41, %v10952_v31  ;;  %v4544_v40 = vmul.f32 %v11010_v59, %v10954_v46  ;;  %s11737_s22 = sld [smem:[#allocation11 + $0x95]]  ;;  %s14631_s23 = sld [smem:[#allocation176_spill]] }
 0x3cc   : > { %s11751_s25 = sld [smem:[#allocation11 + $0x195]] }
 0x3cd   : > { %v11597_v31 = vmul.f32 %v4546_v12, %v4543_v25  ;;  %v11601_v46 = vmul.f32 %v4552_v1, %v4543_v25  ;;  %v11605_v55 = vmul.f32 %v4546_v12, %v4544_v40  ;;  %v11609_v20 = vmul.f32 %v4552_v1, %v4544_v40 }
 0x3ce   : > { %14582 = sst [smem:[#allocation183_spill]] %s11523_s5  ;;  %v11613_v48 = vmul.f32 %v4558_v34, %v4543_v25  ;;  %v11617_v60 = vmul.f32 %v4564_v3, %v4543_v25  ;;  %v11625_v58 = vmul.f32 %v4558_v34, %v4544_v40  ;;  %v11629_v1 = vmul.f32 %v4564_v3, %v4544_v40  ;;  %v14597_v25 = vld [vmem:[#allocation124_spill] sm:$0xff]  ;;  %s14607_s5 = sld [smem:[#allocation171_spill]] }
 0x3cf   : > { %14590 = vst [vmem:[#allocation161_spill] sm:$0xff] %v11601_v46  ;;  %14591 = vst [vmem:[#allocation134_spill] sm:$0xff] %v11609_v20 }
 0x3d0   : > { %14593 = vst [vmem:[#allocation104_spill] sm:$0xff] %v11613_v48  ;;  %14594 = vst [vmem:[#allocation108_spill] sm:$0xff] %v11617_v60  ;;  %v14610_v60 = vstv %s11410_s29  ;;  %s14622_s29 = sld [smem:[#allocation175_spill]] }
 0x3d1   : > { %14595 = vst [vmem:[#allocation135_spill] sm:$0xff] %v11625_v58  ;;  %14596 = vst [vmem:[#allocation136_spill] sm:$0xff] %v11629_v1  ;;  %v14611_v58 = vmov %v14610_v60 }
 0x3df   : > { %v4134_v53 = vpop.permute.xlu0 %4133 }
 0x3e0   : > { %v4136_v38 = vpop.permute.xlu1 %4135 }
 0x3e1   : > { %v4137_v56 = vsel %vm3741_vm0, %v4134_v53, %v4136_v38  ;;  %v4138_v12 = vsel %vm3741_vm0, %v4136_v38, %v4134_v53 }
 0x3e2   : > { %v4139_v42 = vmul.f32 %v4138_v12, %v11035_v57  ;;  %v4140_v9 = vmul.f32 %v4137_v56, %v14597_v25 }
 0x3e3   : > { %v4166_v39 = vpop.permute.xlu0 %4165 }
 0x3e4   : > { %v4143_v3 = vmul.f32 %v4142_v45, %v4139_v42  ;;  %v4144_v40 = vmul.f32 %v4142_v45, %v4140_v9  ;;  %v4149_v56 = vmul.f32 %v4148_v50, %v4139_v42  ;;  %v4150_v12 = vmul.f32 %v4148_v50, %v4140_v9  ;;  %v4168_v14 = vpop.permute.xlu1 %4167 }
 0x3e5   : > { %v4155_v53 = vmul.f32 %v4154_v49, %v4139_v42  ;;  %v4156_v38 = vmul.f32 %v4154_v49, %v4140_v9  ;;  %v4161_v45 = vmul.f32 %v4160_v8, %v4139_v42  ;;  %v4162_v50 = vmul.f32 %v4160_v8, %v4140_v9 }
 0x3e6   : > { %v4145_v16 = vadd.f32 %v4143_v3, %v11457_v19  ;;  %v4146_v54 = vadd.f32 %v4144_v40, %v11459_v17  ;;  %v4151_v0 = vadd.f32 %v4149_v56, %v11461_v10  ;;  %v4152_v18 = vadd.f32 %v4150_v12, %v11463_v61  ;;  %v14601_v3 = vld [vmem:[#allocation125_spill] sm:$0xff]  ;;  %v14603_v40 = vld [vmem:[#allocation126_spill] sm:$0xff]  ;;  %v14605_v12 = vld [vmem:[#allocation156_spill] sm:$0xff] }
 0x3e7   : > { %v4198_v30 = vpop.permute.xlu0 %4197  ;;  %v4169_v49 = vsel %vm3778_vm1, %v4166_v39, %v4168_v14  ;;  %v4170_v19 = vsel %vm3778_vm1, %v4168_v14, %v4166_v39  ;;  %v4157_v61 = vadd.f32 %v4155_v53, %v11469_v28  ;;  %v4158_v56 = vadd.f32 %v4156_v38, %v11471_v52  ;;  %v14606_v14 = vld [vmem:[#allocation127_spill] sm:$0xff] }
 0x3e8   : > { %v4200_v17 = vpop.permute.xlu1 %4199  ;;  %v4171_v42 = vmul.f32 %v4170_v19, %v14601_v3  ;;  %v4172_v8 = vmul.f32 %v4169_v49, %v14603_v40  ;;  %v4163_v28 = vadd.f32 %v4161_v45, %v11473_v36  ;;  %v4164_v52 = vadd.f32 %v4162_v50, %v11481_v22 }
 0x3e9   : > { %v4201_v9 = vsel %vm3824_vm2, %v4198_v30, %v4200_v17  ;;  %v4202_v10 = vsel %vm3824_vm2, %v4200_v17, %v4198_v30  ;;  %v14608_v22 = vstv %s14607_s5  ;;  %s14617_s5 = sld [smem:[#allocation172_spill]] }
 0x3ea   : > { %v4203_v39 = vmul.f32 %v4202_v10, %v14605_v12  ;;  %v4204_v34 = vmul.f32 %v4201_v9, %v14606_v14  ;;  %v4175_v19 = vmul.f32 %v4174_v37, %v4171_v42  ;;  %v4176_v49 = vmul.f32 %v4174_v37, %v4172_v8 }
 0x3eb   : > { %v4181_v47 = vmul.f32 %v4180_v24, %v4171_v42  ;;  %v4182_v13 = vmul.f32 %v4180_v24, %v4172_v8  ;;  %v4230_v30 = vpop.permute.xlu0 %4229  ;;  %v4187_v53 = vmul.f32 %v4186_v27, %v4171_v42  ;;  %v4188_v38 = vmul.f32 %v4186_v27, %v4172_v8 }
 0x3ec   : > { %v4232_v37 = vpop.permute.xlu1 %4231  ;;  %v4177_v17 = vadd.f32 %v4175_v19, %v4145_v16  ;;  %v4178_v9 = vadd.f32 %v4176_v49, %v4146_v54  ;;  %v4193_v24 = vmul.f32 %v4192_v6, %v4171_v42  ;;  %v4194_v10 = vmul.f32 %v4192_v6, %v4172_v8 }
 0x3ed   : > { %v4183_v5 = vadd.f32 %v4181_v47, %v4151_v0  ;;  %v4184_v36 = vadd.f32 %v4182_v13, %v4152_v18  ;;  %v4189_v45 = vadd.f32 %v4187_v53, %v4157_v61  ;;  %v4190_v59 = vadd.f32 %v4188_v38, %v4158_v56  ;;  %v5138_v38 = vld [vmem:[%s14616_s20 + $0x18] sm:$0xff] }
 0x3ee   : > { %v4207_v50 = vmul.f32 %v14608_v22, %v4203_v39  ;;  %v14609_v41 = vmov %v14608_v22  ;;  %v4213_v27 = vmul.f32 %v14610_v60, %v4203_v39  ;;  %v4214_v48 = vmul.f32 %v14611_v58, %v4204_v34 }
 0x3ef   : > { %v4208_v1 = vmul.f32 %v14609_v41, %v4204_v34  ;;  %v4288_v20 = vpop.permute.xlu0 %4287  ;;  %v14612_v16 = vstv %s11421_s11  ;;  %v14614_v42 = vstv %s11423_s27  ;;  %v4195_v13 = vadd.f32 %v4193_v24, %v4163_v28  ;;  %v5136_v41 = vld [vmem:[%s14616_s20 + $0x8] sm:$0xff]  ;;  %s11735_s11 = sld [smem:[#allocation11 + $0x15]] }
 0x3f0   : > { %v4219_v19 = vmul.f32 %v14612_v16, %v4203_v39  ;;  %v14613_v54 = vmov %v14612_v16  ;;  %v4225_v46 = vmul.f32 %v14614_v42, %v4203_v39  ;;  %v14615_v6 = vmov %v14614_v42  ;;  %v4290_v18 = vpop.permute.xlu1 %4289  ;;  %s11749_s27 = sld [smem:[#allocation11 + $0x115]] }
 0x3f1   : > { %v4220_v49 = vmul.f32 %v14613_v54, %v4204_v34  ;;  %v4226_v0 = vmul.f32 %v14615_v6, %v4204_v34  ;;  %v4196_v47 = vadd.f32 %v4194_v10, %v4164_v52  ;;  %v4209_v8 = vadd.f32 %v4207_v50, %v4177_v17  ;;  %v5135_v34 = vld [vmem:[%s14616_s20] sm:$0xff]  ;;  %v14621_v10 = vld [vmem:[#allocation103_spill] sm:$0xff] }
 0x3f2   : > { %v4210_v61 = vadd.f32 %v4208_v1, %v4178_v9  ;;  %v4215_v60 = vadd.f32 %v4213_v27, %v4183_v5  ;;  %v4216_v58 = vadd.f32 %v4214_v48, %v4184_v36  ;;  %v4221_v56 = vadd.f32 %v4219_v19, %v4189_v45  ;;  %v5137_v1 = vld [vmem:[%s14616_s20 + $0x10] sm:$0xff]  ;;  %v14619_v9 = vld [vmem:[#allocation101_spill] sm:$0xff] }
 0x3f3   : > { %v4222_v53 = vadd.f32 %v4220_v49, %v4190_v59  ;;  %v4233_v39 = vsel %vm985_vm10, %v4230_v30, %v4232_v37  ;;  %v4234_v5 = vsel %vm985_vm10, %v4232_v37, %v4230_v30  ;;  %v4291_v59 = vsel %vm1396_vm11, %v4288_v20, %v4290_v18  ;;  %v4320_v28 = vpop.permute.xlu0 %4319 }
 0x3f4   : > { %v4292_v48 = vsel %vm1396_vm11, %v4290_v18, %v4288_v20  ;;  %v4227_v52 = vadd.f32 %v4225_v46, %v4195_v13  ;;  %v4228_v17 = vadd.f32 %v4226_v0, %v4196_v47  ;;  %v4235_v24 = vmul.f32 %v4234_v5, %v14619_v9  ;;  %v4322_v30 = vpop.permute.xlu1 %4321 }
 0x3f5   : > { %v4236_v36 = vmul.f32 %v4233_v39, %v14621_v10  ;;  %v4293_v37 = vmul.f32 %v4291_v59, %v11149_v7  ;;  %v4294_v20 = vmul.f32 %v4292_v48, %v11159_v2  ;;  %v7118_v45 = vpack.c.bf16 %v5138_v38, %v5136_v41 }
 0x3f6   : > { %v7120_v46 = vpack.c.bf16 %v5137_v1, %v5135_v34  ;;  %v14623_v22 = vstv %s14617_s5  ;;  %v14625_v19 = vstv %s14618_s15  ;;  %v14627_v6 = vstv %s14620_s10  ;;  %s14632_s5 = sld [smem:[#allocation177_spill]]  ;;  %s14633_s15 = sld [smem:[#allocation178_spill]] }
 0x3f7   : > { %v4239_v50 = vmul.f32 %v14623_v22, %v4235_v24  ;;  %v14624_v27 = vmov %v14623_v22  ;;  %v4245_v54 = vmul.f32 %v14625_v19, %v4235_v24  ;;  %v14626_v49 = vmov %v14625_v19  ;;  %7119 = vmatprep.subr.bf16.mxu0 %v7118_v45  ;;  %v4352_v48 = vpop.permute.xlu0 %4351  ;;  %s14636_s10 = sld [smem:[#allocation179_spill]] }
 0x3f8   : > { %v4240_v16 = vmul.f32 %v14624_v27, %v4236_v36  ;;  %v4246_v42 = vmul.f32 %v14626_v49, %v4236_v36  ;;  %v4251_v0 = vmul.f32 %v14627_v6, %v4235_v24  ;;  %v14628_v18 = vmov %v14627_v6  ;;  %v4354_v22 = vpop.permute.xlu1 %4353  ;;  %7121 = vmatpush1.bf16.msra.mxu0 %v7120_v46 }
 0x3f9   : > { %v4252_v13 = vmul.f32 %v14628_v18, %v4236_v36  ;;  %v14629_v47 = vstv %s14622_s29  ;;  %v4241_v34 = vadd.f32 %v4239_v50, %v4209_v8  ;;  %v4247_v5 = vadd.f32 %v4245_v54, %v4215_v60  ;;  %s14641_s29 = sld [smem:[#allocation180_spill]] }
 0x3fa   : > { %v4257_v39 = vmul.f32 %v14629_v47, %v4235_v24  ;;  %v14630_v41 = vmov %v14629_v47  ;;  %v4242_v1 = vadd.f32 %v4240_v16, %v4210_v61  ;;  %v4248_v59 = vadd.f32 %v4246_v42, %v4216_v58 }
 0x3fb   : > { %v4258_v38 = vmul.f32 %v14630_v41, %v4236_v36  ;;  %v4253_v27 = vadd.f32 %v4251_v0, %v4221_v56  ;;  %v4254_v19 = vadd.f32 %v4252_v13, %v4222_v53  ;;  %v4267_v36 = vadd.f32 %v11509_v26, %v4241_v34  ;;  %v4384_v0 = vpop.permute.xlu0 %4383 }
 0x3fc   : > { %v4259_v49 = vadd.f32 %v4257_v39, %v4227_v52  ;;  %v4268_v8 = vadd.f32 %v11529_v15, %v4242_v1  ;;  %v4273_v61 = vadd.f32 %v11513_v4, %v4247_v5  ;;  %v4274_v60 = vadd.f32 %v11533_v29, %v4248_v59  ;;  %v4386_v18 = vpop.permute.xlu1 %4385 }
 0x3fd   : > { %v4260_v24 = vadd.f32 %v4258_v38, %v4228_v17  ;;  %v4279_v58 = vadd.f32 %v11517_v33, %v4253_v27  ;;  %v4280_v56 = vadd.f32 %v11537_v51, %v4254_v19  ;;  %v14634_v17 = vstv %s14631_s23  ;;  %s14644_s23 = sld [smem:[#allocation181_spill]] }
 0x3fe   : > { %v4285_v53 = vadd.f32 %v11521_v32, %v4259_v49  ;;  %v4297_v26 = vmul.f32 %v14634_v17, %v4293_v37  ;;  %v14635_v45 = vmov %v14634_v17  ;;  %v4520_v46 = vstv %s11735_s11  ;;  %s14702_s11 = smov 13  }
 0x3ff   : > { %v4286_v52 = vadd.f32 %v11541_v63, %v4260_v24  ;;  %v4298_v15 = vmul.f32 %v14635_v45, %v4294_v20  ;;  %v4526_v4 = vstv %s11737_s22  ;;  %v14637_v50 = vstv %s14632_s5  ;;  %s14703_s22 = smov 1   ;;  %s12217_s5 = sld [smem:[#allocation11 + $0x1a]] }
 0x400   : > { %v4303_v29 = vmul.f32 %v14637_v50, %v4293_v37  ;;  %v14638_v16 = vmov %v14637_v50  ;;  %v4323_v51 = vsel %vm3999_vm3, %v4320_v28, %v4322_v30  ;;  %v4324_v32 = vsel %vm3999_vm3, %v4322_v30, %v4320_v28 }
 0x401   : > { %v4304_v33 = vmul.f32 %v14638_v16, %v4294_v20  ;;  %v14639_v54 = vstv %s14633_s15  ;;  %v4532_v13 = vstv %s11749_s27  ;;  %v4538_v47 = vstv %s11751_s25  ;;  %v4416_v16 = vpop.permute.xlu0 %4415  ;;  %s12213_s27 = sld [smem:[#allocation11 + $0x119]]  ;;  %s12219_s15 = sld [smem:[#allocation11 + $0x9a]] }
 0x402   : > { %v4309_v63 = vmul.f32 %v14639_v54, %v4293_v37  ;;  %v14640_v42 = vmov %v14639_v54  ;;  %v4299_v39 = vadd.f32 %v4297_v26, %v4267_v36  ;;  %v4300_v41 = vadd.f32 %v4298_v15, %v4268_v8  ;;  %s12215_s25 = sld [smem:[#allocation11 + $0x199]] }
 0x403   : > { %v4310_v6 = vmul.f32 %v14640_v42, %v4294_v20  ;;  %v14642_v38 = vstv %s14636_s10  ;;  %v4325_v28 = vmul.f32 %v4323_v51, %v11176_v43  ;;  %v4326_v30 = vmul.f32 %v4324_v32, %v11179_v35  ;;  %v4418_v51 = vpop.permute.xlu1 %4417  ;;  %s12221_s10 = sld [smem:[#allocation11 + $0x11a]] }
 0x404   : > { %v4315_v34 = vmul.f32 %v14642_v38, %v4293_v37  ;;  %v14643_v1 = vmov %v14642_v38  ;;  %v4355_v59 = vsel %vm4045_vm4, %v4352_v48, %v4354_v22  ;;  %v4356_v27 = vsel %vm4045_vm4, %v4354_v22, %v4352_v48 }
 0x405   : > { %v4316_v5 = vmul.f32 %v14643_v1, %v4294_v20  ;;  %v4305_v19 = vadd.f32 %v4303_v29, %v4273_v61  ;;  %v4306_v49 = vadd.f32 %v4304_v33, %v4274_v60  ;;  %v4357_v37 = vmul.f32 %v4355_v59, %v11192_v62 }
 0x406   : > { %v4358_v20 = vmul.f32 %v4356_v27, %v11195_v23  ;;  %v14645_v24 = vstv %s11465_s30  ;;  %v14647_v26 = vstv %s14641_s29  ;;  %v4311_v48 = vadd.f32 %v4309_v63, %v4279_v58  ;;  %s12195_s30 = sld [smem:[#allocation11 + $0x197]]  ;;  %s12223_s29 = sld [smem:[#allocation11 + $0x19a]] }
 0x407   : > { %v4329_v36 = vmul.f32 %v14645_v24, %v4325_v28  ;;  %v14646_v8 = vmov %v14645_v24  ;;  %v4335_v45 = vmul.f32 %v14647_v26, %v4325_v28  ;;  %v14648_v15 = vmov %v14647_v26 }
 0x408   : > { %v4330_v17 = vmul.f32 %v14646_v8, %v4326_v30  ;;  %v4336_v50 = vmul.f32 %v14648_v15, %v4326_v30  ;;  %v4312_v22 = vadd.f32 %v4310_v6, %v4280_v56  ;;  %v14649_v61 = vstv %s14644_s23  ;;  %s12261_s23 = sld [smem:[#allocation11 + $0x1f]] }
 0x409   : > { %v4341_v60 = vmul.f32 %v14649_v61, %v4325_v28  ;;  %v14650_v29 = vmov %v14649_v61  ;;  %v4317_v32 = vadd.f32 %v4315_v34, %v4285_v53  ;;  %v4318_v54 = vadd.f32 %v4316_v5, %v4286_v52 }
 0x40a   : > { %v4342_v33 = vmul.f32 %v14650_v29, %v4326_v30  ;;  %v14651_v42 = vstv %s14587_s1  ;;  %v4331_v27 = vadd.f32 %v4329_v36, %v4299_v39  ;;  %v4332_v24 = vadd.f32 %v4330_v17, %v4300_v41  ;;  %s14707_s1 = smov 113  }
 0x40b   : > { %v4347_v38 = vmul.f32 %v14651_v42, %v4325_v28  ;;  %v14652_v1 = vmov %v14651_v42  ;;  %v4387_v58 = vsel %vm4091_vm5, %v4384_v0, %v4386_v18  ;;  %v4388_v56 = vsel %vm4091_vm5, %v4386_v18, %v4384_v0  ;;  %v4448_v18 = vpop.permute.xlu0 %4447 }
 0x40c   : > { %v4348_v59 = vmul.f32 %v14652_v1, %v4326_v30  ;;  %v4337_v63 = vadd.f32 %v4335_v45, %v4305_v19  ;;  %v4338_v6 = vadd.f32 %v4336_v50, %v4306_v49  ;;  %v14653_v8 = vstv %s11485_s21  ;;  %v4450_v19 = vpop.permute.xlu1 %4449  ;;  %s14700_s21 = smov 15  }
 0x40d   : > { %v4361_v53 = vmul.f32 %v14653_v8, %v4357_v37  ;;  %v14654_v52 = vmov %v14653_v8  ;;  %v4343_v5 = vadd.f32 %v4341_v60, %v4311_v48  ;;  %v4344_v28 = vadd.f32 %v4342_v33, %v4312_v22 }
 0x40e   : > { %v4362_v34 = vmul.f32 %v14654_v52, %v4358_v20  ;;  %v14655_v30 = vstv %s11487_s14  ;;  %v4349_v36 = vadd.f32 %v4347_v38, %v4317_v32  ;;  %v4350_v17 = vadd.f32 %v4348_v59, %v4318_v54  ;;  %s14661_s14 = sld [smem:[#allocation183_spill]] }
 0x40f   : > { %v4367_v26 = vmul.f32 %v14655_v30, %v4357_v37  ;;  %v14656_v39 = vmov %v14655_v30  ;;  %v14657_v15 = vstv %s11495_s0  ;;  %v4363_v49 = vadd.f32 %v4361_v53, %v4331_v27  ;;  %s12279_s0 = sld [smem:[#allocation11 + $0x9b]] }
 0x410   : > { %v4368_v41 = vmul.f32 %v14656_v39, %v4358_v20  ;;  %v4373_v61 = vmul.f32 %v14657_v15, %v4357_v37  ;;  %v14658_v29 = vmov %v14657_v15  ;;  %v4364_v45 = vadd.f32 %v4362_v34, %v4332_v24 }
 0x411   : > { %v4374_v0 = vmul.f32 %v14658_v29, %v4358_v20  ;;  %v14659_v50 = vstv %s11497_s6  ;;  %v4389_v33 = vmul.f32 %v4387_v58, %v11211_v44  ;;  %v4390_v32 = vmul.f32 %v4388_v56, %v11219_v21  ;;  %s12273_s6 = sld [smem:[#allocation11 + $0x1b]] }
 0x412   : > { %v4379_v48 = vmul.f32 %v14659_v50, %v4357_v37  ;;  %v14660_v22 = vmov %v14659_v50  ;;  %v4419_v54 = vsel %vm3741_vm0, %v4416_v16, %v4418_v51  ;;  %v4420_v42 = vsel %vm3741_vm0, %v4418_v51, %v4416_v16 }
 0x413   : > { %v4380_v60 = vmul.f32 %v14660_v22, %v4358_v20  ;;  %v4369_v38 = vadd.f32 %v4367_v26, %v4337_v63  ;;  %v4370_v1 = vadd.f32 %v4368_v41, %v4338_v6  ;;  %v4421_v37 = vmul.f32 %v4420_v42, %v11035_v57  ;;  %v4480_v22 = vpop.permute.xlu0 %4479 }
 0x414   : > { %v4422_v20 = vmul.f32 %v4419_v54, %v14597_v25  ;;  %v14662_v59 = vstv %s11503_s8  ;;  %v14664_v56 = vstv %s11505_s28  ;;  %v4375_v34 = vadd.f32 %v4373_v61, %v4343_v5  ;;  %v4482_v54 = vpop.permute.xlu1 %4481  ;;  %s12281_s8 = sld [smem:[#allocation11 + $0x11b]] }
 0x415   : > { %v4393_v27 = vmul.f32 %v14662_v59, %v4389_v33  ;;  %v14663_v24 = vmov %v14662_v59  ;;  %v4399_v8 = vmul.f32 %v14664_v56, %v4389_v33  ;;  %v14665_v53 = vmov %v14664_v56  ;;  %s12283_s28 = sld [smem:[#allocation11 + $0x19b]] }
 0x416   : > { %v4394_v58 = vmul.f32 %v14663_v24, %v4390_v32  ;;  %v4400_v52 = vmul.f32 %v14665_v53, %v4390_v32  ;;  %v4376_v30 = vadd.f32 %v4374_v0, %v4344_v28  ;;  %v4381_v16 = vadd.f32 %v4379_v48, %v4349_v36 }
 0x417   : > { %v4382_v51 = vadd.f32 %v4380_v60, %v4350_v17  ;;  %v14666_v63 = vstv %s14661_s14  ;;  %v14668_v41 = vstv %s11525_s17  ;;  %v4395_v5 = vadd.f32 %v4393_v27, %v4363_v49  ;;  %s12265_s14 = sld [smem:[#allocation11 + $0x9f]]  ;;  %s12289_s17 = sld [smem:[#allocation11 + $0x11c]] }
 0x418   : > { %v4405_v6 = vmul.f32 %v14666_v63, %v4389_v33  ;;  %v14667_v26 = vmov %v14666_v63  ;;  %v4411_v15 = vmul.f32 %v14668_v41, %v4389_v33  ;;  %v14669_v29 = vmov %v14668_v41 }
 0x419   : > { %v4406_v39 = vmul.f32 %v14667_v26, %v4390_v32  ;;  %v4412_v50 = vmul.f32 %v14669_v29, %v4390_v32  ;;  %v4396_v61 = vadd.f32 %v4394_v58, %v4364_v45  ;;  %v4451_v28 = vsel %vm3778_vm1, %v4448_v18, %v4450_v19 }
 0x41a   : > { %v4452_v36 = vsel %vm3778_vm1, %v4450_v19, %v4448_v18  ;;  %v4401_v17 = vadd.f32 %v4399_v8, %v4369_v38  ;;  %v4402_v0 = vadd.f32 %v4400_v52, %v4370_v1  ;;  %v14670_v48 = vstv %s11547_s26  ;;  %s12197_s26 = sld [smem:[#allocation11 + $0x18]] }
 0x41b   : > { %v4425_v60 = vmul.f32 %v14670_v48, %v4421_v37  ;;  %v14671_v42 = vmov %v14670_v48  ;;  %v14672_v59 = vstv %s11549_s16  ;;  %v14674_v49 = vstv %s11555_s2  ;;  %s12199_s16 = sld [smem:[#allocation11 + $0x98]]  ;;  %s12285_s2 = sld [smem:[#allocation11 + $0x1c]] }
 0x41c   : > { %v4426_v33 = vmul.f32 %v14671_v42, %v4422_v20  ;;  %v4431_v32 = vmul.f32 %v14672_v59, %v4421_v37  ;;  %v14673_v24 = vmov %v14672_v59  ;;  %v4437_v45 = vmul.f32 %v14674_v49, %v4421_v37 }
 0x41d   : > { %v4432_v56 = vmul.f32 %v14673_v24, %v4422_v20  ;;  %v14675_v27 = vmov %v14674_v49  ;;  %v4407_v53 = vadd.f32 %v4405_v6, %v4375_v34  ;;  %v4408_v63 = vadd.f32 %v4406_v39, %v4376_v30  ;;  %v4512_v30 = vpop.permute.xlu0 %4511  ;;  %14709 = sst [smem:[#allocation163_spill]] %s12289_s17 }
 0x41e   : > { %v4438_v58 = vmul.f32 %v14675_v27, %v4422_v20  ;;  %v4413_v26 = vadd.f32 %v4411_v15, %v4381_v16  ;;  %v4414_v18 = vadd.f32 %v4412_v50, %v4382_v51  ;;  %v4427_v19 = vadd.f32 %v4425_v60, %v4395_v5  ;;  %v4514_v16 = vpop.permute.xlu1 %4513 }
 0x41f   : > { %v4428_v38 = vadd.f32 %v4426_v33, %v4396_v61  ;;  %v14676_v1 = vstv %s11557_s19  ;;  %v4453_v29 = vmul.f32 %v4452_v36, %v14601_v3  ;;  %v4454_v48 = vmul.f32 %v4451_v28, %v14603_v40  ;;  %s14705_s19 = smov 115  }
 0x420   : > { %v4443_v8 = vmul.f32 %v14676_v1, %v4421_v37  ;;  %v14677_v52 = vmov %v14676_v1  ;;  %v4483_v42 = vsel %vm3824_vm2, %v4480_v22, %v4482_v54  ;;  %v4484_v34 = vsel %vm3824_vm2, %v4482_v54, %v4480_v22 }
 0x421   : > { %v4444_v41 = vmul.f32 %v14677_v52, %v4422_v20  ;;  %v4433_v51 = vadd.f32 %v4431_v32, %v4401_v17  ;;  %v4434_v37 = vadd.f32 %v4432_v56, %v4402_v0  ;;  %v4439_v6 = vadd.f32 %v4437_v45, %v4407_v53 }
 0x422   : > { %v4440_v20 = vadd.f32 %v4438_v58, %v4408_v63  ;;  %v14678_v39 = vstv %s11564_s3  ;;  %v4485_v61 = vmul.f32 %v4484_v34, %v14605_v12  ;;  %v4486_v22 = vmul.f32 %v4483_v42, %v14606_v14  ;;  %s14706_s3 = smov 114  }
 0x423   : > { %v4457_v15 = vmul.f32 %v14678_v39, %v4453_v29  ;;  %v14679_v50 = vmov %v14678_v39  ;;  %v4445_v54 = vadd.f32 %v4443_v8, %v4413_v26  ;;  %v4446_v28 = vadd.f32 %v4444_v41, %v4414_v18 }
 0x424   : > { %v4458_v5 = vmul.f32 %v14679_v50, %v4454_v48  ;;  %v4515_v36 = vsel %vm985_vm10, %v4512_v30, %v4514_v16  ;;  %v4516_v17 = vsel %vm985_vm10, %v4514_v16, %v4512_v30  ;;  %v14680_v0 = vstv %s11566_s13  ;;  %s12189_s13 = sld [smem:[#allocation11 + $0x17]] }
 0x425   : > { %v4463_v60 = vmul.f32 %v14680_v0, %v4453_v29  ;;  %v14681_v33 = vmov %v14680_v0  ;;  %v14682_v32 = vstv %s11573_s18  ;;  %v4459_v45 = vadd.f32 %v4457_v15, %v4427_v19  ;;  %s12191_s18 = sld [smem:[#allocation11 + $0x97]] }
 0x426   : > { %v4464_v59 = vmul.f32 %v14681_v33, %v4454_v48  ;;  %v4469_v24 = vmul.f32 %v14682_v32, %v4453_v29  ;;  %v14683_v56 = vmov %v14682_v32  ;;  %v4460_v27 = vadd.f32 %v4458_v5, %v4428_v38 }
 0x427   : > { %v4470_v49 = vmul.f32 %v14683_v56, %v4454_v48  ;;  %v14684_v58 = vstv %s11575_s12  ;;  %v14686_v18 = vstv %s11581_s9  ;;  %v14688_v41 = vstv %s11583_s7  ;;  %s14701_s9 = smov 14   ;;  %s14704_s7 = smov 127  }
 0x428   : > { %v4475_v53 = vmul.f32 %v14684_v58, %v4453_v29  ;;  %v14685_v63 = vmov %v14684_v58  ;;  %v4489_v1 = vmul.f32 %v14686_v18, %v4485_v61  ;;  %v14687_v8 = vmov %v14686_v18  ;;  %s12193_s12 = sld [smem:[#allocation11 + $0x117]] }
 0x429   : > { %v4476_v26 = vmul.f32 %v14685_v63, %v4454_v48  ;;  %v4490_v52 = vmul.f32 %v14687_v8, %v4486_v22  ;;  %v4495_v42 = vmul.f32 %v14688_v41, %v4485_v61  ;;  %v14689_v34 = vmov %v14688_v41 }
 0x42a   : > { %v4496_v30 = vmul.f32 %v14689_v34, %v4486_v22  ;;  %v14690_v16 = vstv %s11589_s4  ;;  %v14692_v33 = vstv %s11591_s24  ;;  %v4465_v15 = vadd.f32 %v4463_v60, %v4433_v51  ;;  %s12201_s24 = sld [smem:[#allocation11 + $0x118]]  ;;  %s12287_s4 = sld [smem:[#allocation11 + $0x9c]] }
 0x42b   : > { %v4501_v39 = vmul.f32 %v14690_v16, %v4485_v61  ;;  %v14691_v50 = vmov %v14690_v16  ;;  %v4507_v32 = vmul.f32 %v14692_v33, %v4485_v61  ;;  %v14693_v19 = vmov %v14692_v33  ;;  %v14695_v16 = vld [vmem:[#allocation134_spill] sm:$0xff] }
 0x42c   : > { %v4502_v0 = vmul.f32 %v14691_v50, %v4486_v22  ;;  %v4508_v38 = vmul.f32 %v14693_v19, %v4486_v22  ;;  %v4466_v29 = vadd.f32 %v4464_v59, %v4434_v37  ;;  %v4471_v48 = vadd.f32 %v4469_v24, %v4439_v6 }
 0x42d   : > { %v4472_v5 = vadd.f32 %v4470_v49, %v4440_v20  ;;  %v4477_v56 = vadd.f32 %v4475_v53, %v4445_v54  ;;  %v4478_v58 = vadd.f32 %v4476_v26, %v4446_v28  ;;  %v4491_v63 = vadd.f32 %v4489_v1, %v4459_v45 }
 0x42e   : > { %v4492_v18 = vadd.f32 %v4490_v52, %v4460_v27  ;;  %v4497_v8 = vadd.f32 %v4495_v42, %v4465_v15  ;;  %v4498_v61 = vadd.f32 %v4496_v30, %v4466_v29  ;;  %v4517_v22 = vmul.f32 %v4516_v17, %v14619_v9  ;;  %v14694_v30 = vld [vmem:[#allocation161_spill] sm:$0xff]  ;;  %v5142_v15 = vld [vmem:[%s14616_s20 + $0x38] sm:$0xff] }
 0x42f   : > { %v4518_v51 = vmul.f32 %v4515_v36, %v14621_v10  ;;  %v4503_v37 = vadd.f32 %v4501_v39, %v4471_v48  ;;  %v4504_v60 = vadd.f32 %v4502_v0, %v4472_v5  ;;  %v4509_v6 = vadd.f32 %v4507_v32, %v4477_v56  ;;  %v14697_v0 = vld [vmem:[#allocation135_spill] sm:$0xff]  ;;  %v14698_v32 = vld [vmem:[#allocation108_spill] sm:$0xff]  ;;  %v5139_v29 = vld [vmem:[%s14616_s20 + $0x20] sm:$0xff] }
 0x430   : > { %v4510_v59 = vadd.f32 %v4508_v38, %v4478_v58  ;;  %v4521_v20 = vmul.f32 %v4520_v46, %v4517_v22  ;;  %v4527_v28 = vmul.f32 %v4526_v4, %v4517_v22  ;;  %v4533_v49 = vmul.f32 %v4532_v13, %v4517_v22  ;;  %v5141_v48 = vld [vmem:[%s14616_s20 + $0x30] sm:$0xff]  ;;  %v5144_v5 = vld [vmem:[%s14616_s20 + $0x48] sm:$0xff]  ;;  %v5146_v56 = vld [vmem:[%s14616_s20 + $0x58] sm:$0xff]  ;;  %14708 = sst [smem:[#allocation182_spill]] %s12287_s4 }
 0x431   : > { %v4522_v54 = vmul.f32 %v4520_v46, %v4518_v51  ;;  %v4528_v24 = vmul.f32 %v4526_v4, %v4518_v51  ;;  %v4534_v45 = vmul.f32 %v4532_v13, %v4518_v51  ;;  %v4539_v17 = vmul.f32 %v4538_v47, %v4517_v22  ;;  %v5148_v22 = vld [vmem:[%s14616_s20 + $0x68] sm:$0xff] }
 0x432   : > { %v4540_v36 = vmul.f32 %v4538_v47, %v4518_v51  ;;  %v4523_v27 = vadd.f32 %v4521_v20, %v4491_v63  ;;  %v4529_v26 = vadd.f32 %v4527_v28, %v4497_v8  ;;  %v4535_v52 = vadd.f32 %v4533_v49, %v4503_v37  ;;  %v14696_v47 = vld [vmem:[#allocation104_spill] sm:$0xff]  ;;  %v5145_v8 = vld [vmem:[%s14616_s20 + $0x50] sm:$0xff] }
 0x433   : > { %v4524_v53 = vadd.f32 %v4522_v54, %v4492_v18  ;;  %v4530_v1 = vadd.f32 %v4528_v24, %v4498_v61  ;;  %v4536_v41 = vadd.f32 %v4534_v45, %v4504_v60  ;;  %v4541_v42 = vadd.f32 %v4539_v17, %v4509_v6  ;;  %v5143_v18 = vld [vmem:[%s14616_s20 + $0x40] sm:$0xff]  ;;  %v5150_v51 = vld [vmem:[%s14616_s20 + $0x78] sm:$0xff]  ;;  %v5152_v54 = vld [vmem:[%s14616_s20 + $0x88] sm:$0xff] }
 0x434   : > { %v4542_v46 = vadd.f32 %v4540_v36, %v4510_v59  ;;  %v11944_v34 = vadd.f32 %v11597_v31, %v4523_v27  ;;  %v11950_v13 = vadd.f32 %v14694_v30, %v4529_v26  ;;  %v11956_v50 = vadd.f32 %v14696_v47, %v4535_v52  ;;  %v14699_v31 = vld [vmem:[#allocation136_spill] sm:$0xff]  ;;  %v5147_v6 = vld [vmem:[%s14616_s20 + $0x60] sm:$0xff]  ;;  %v5149_v59 = vld [vmem:[%s14616_s20 + $0x70] sm:$0xff] }
 0x435   : > { %v11947_v4 = vadd.f32 %v11605_v55, %v4524_v53  ;;  %v11953_v39 = vadd.f32 %v14695_v16, %v4530_v1  ;;  %v11959_v33 = vadd.f32 %v14697_v0, %v4536_v41  ;;  %v11962_v19 = vadd.f32 %v14698_v32, %v4541_v42  ;;  %v5140_v55 = vld [vmem:[%s14616_s20 + $0x28] sm:$0xff]  ;;  %v5154_v28 = vld [vmem:[%s14616_s20 + $0x98] sm:$0xff]  ;;  %v5151_v24 = vld [vmem:[%s14616_s20 + $0x80] sm:$0xff] }
 0x436   : > { %v11965_v38 = vadd.f32 %v14699_v31, %v4542_v46  ;;  %v7122_v58 = vpack.c.bf16 %v5142_v15, %v5140_v55  ;;  %v7124_v63 = vpack.c.bf16 %v5141_v48, %v5139_v29  ;;  %v7126_v61 = vpack.c.bf16 %v5146_v56, %v5144_v5  ;;  %v5153_v45 = vld [vmem:[%s14616_s20 + $0x90] sm:$0xff]  ;;  %v5156_v53 = vld [vmem:[%s14616_s20 + $0xa8] sm:$0xff]  ;;  %v5158_v26 = vld [vmem:[%s14616_s20 + $0xb8] sm:$0xff] }
 0x437   : > { %v7128_v37 = vpack.c.bf16 %v5145_v8, %v5143_v18  ;;  %v7130_v60 = vpack.c.bf16 %v5150_v51, %v5148_v22  ;;  %v7132_v20 = vpack.c.bf16 %v5149_v59, %v5147_v6  ;;  %v7134_v49 = vpack.c.bf16 %v5154_v28, %v5152_v54  ;;  %v5155_v1 = vld [vmem:[%s14616_s20 + $0xa0] sm:$0xff]  ;;  %v5157_v52 = vld [vmem:[%s14616_s20 + $0xb0] sm:$0xff]  ;;  %v5160_v46 = vld [vmem:[%s14616_s20 + $0xc8] sm:$0xff] }
 0x438   : > { %7123 = vmatprep.subr.bf16.mxu0 %v7122_v58  ;;  %v7136_v17 = vpack.c.bf16 %v5153_v45, %v5151_v24  ;;  %v7138_v41 = vpack.c.bf16 %v5158_v26, %v5156_v53  ;;  %v7140_v42 = vpack.c.bf16 %v5157_v52, %v5155_v1  ;;  %v5162_v30 = vld [vmem:[%s14616_s20 + $0xd8] sm:$0xff]  ;;  %v5159_v16 = vld [vmem:[%s14616_s20 + $0xc0] sm:$0xff]  ;;  %v5161_v0 = vld [vmem:[%s14616_s20 + $0xd0] sm:$0xff] }
 0x439   : > { %7125 = vmatpush1.bf16.msra.mxu0 %v7124_v63  ;;  %v7142_v47 = vpack.c.bf16 %v5162_v30, %v5160_v46  ;;  %v7144_v32 = vpack.c.bf16 %v5161_v0, %v5159_v16  ;;  %v5164_v31 = vld [vmem:[%s14616_s20 + $0xe8] sm:$0xff]  ;;  %v5166_v55 = vld [vmem:[%s14616_s20 + $0xf8] sm:$0xff]  ;;  %v5163_v15 = vld [vmem:[%s14616_s20 + $0xe0] sm:$0xff] }
 0x43a   : > { %7127 = vmatprep.subr.bf16.mxu0 %v7126_v61  ;;  %v7146_v29 = vpack.c.bf16 %v5166_v55, %v5164_v31  ;;  %v5165_v48 = vld [vmem:[%s14616_s20 + $0xf0] sm:$0xff]  ;;  %v5168_v56 = vld [vmem:[%s14616_s20 + $0x108] sm:$0xff]  ;;  %v5170_v58 = vld [vmem:[%s14616_s20 + $0x118] sm:$0xff] }
 0x43b   : > { %v7148_v5 = vpack.c.bf16 %v5165_v48, %v5163_v15  ;;  %v7150_v63 = vpack.c.bf16 %v5170_v58, %v5168_v56  ;;  %v5167_v18 = vld [vmem:[%s14616_s20 + $0x100] sm:$0xff]  ;;  %v5169_v8 = vld [vmem:[%s14616_s20 + $0x110] sm:$0xff]  ;;  %v5172_v22 = vld [vmem:[%s14616_s20 + $0x128] sm:$0xff] }
 0x43c   : > { %v7152_v61 = vpack.c.bf16 %v5169_v8, %v5167_v18  ;;  %v5174_v51 = vld [vmem:[%s14616_s20 + $0x138] sm:$0xff]  ;;  %v5173_v6 = vld [vmem:[%s14616_s20 + $0x130] sm:$0xff]  ;;  %v5175_v28 = vld [vmem:[%s14616_s20 + $0x140] sm:$0xff] }
 0x43d   : > { %7129 = vmatpush1.bf16.msra.mxu0 %v7128_v37  ;;  %v7154_v37 = vpack.c.bf16 %v5174_v51, %v5172_v22  ;;  %v5178_v54 = vld [vmem:[%s14616_s20 + $0x158] sm:$0xff]  ;;  %v5179_v1 = vld [vmem:[%s14616_s20 + $0x160] sm:$0xff]  ;;  %v5181_v52 = vld [vmem:[%s14616_s20 + $0x170] sm:$0xff] }
 0x43e   : > { %7131 = vmatprep.subr.bf16.mxu0 %v7130_v60  ;;  %v5171_v60 = vld [vmem:[%s14616_s20 + $0x120] sm:$0xff]  ;;  %v5182_v53 = vld [vmem:[%s14616_s20 + $0x178] sm:$0xff]  ;;  %v5188_v0 = vld [vmem:[%s14616_s20 + $0x1a8] sm:$0xff] }
 0x43f   : > { %v7156_v59 = vpack.c.bf16 %v5173_v6, %v5171_v60  ;;  %v5186_v46 = vld [vmem:[%s14616_s20 + $0x198] sm:$0xff]  ;;  %v5183_v30 = vld [vmem:[%s14616_s20 + $0x180] sm:$0xff]  ;;  %v5192_v48 = vld [vmem:[%s14616_s20 + $0x1c8] sm:$0xff] }
 0x440   : > { %v5187_v15 = vld [vmem:[%s14616_s20 + $0x1a0] sm:$0xff]  ;;  %v5193_v18 = vld [vmem:[%s14616_s20 + $0x1d0] sm:$0xff]  ;;  %v5196_v8 = vld [vmem:[%s14616_s20 + $0x1e8] sm:$0xff] }
 0x441   : > { %7133 = vmatpush1.bf16.msra.mxu0 %v7132_v20  ;;  %v5176_v20 = vld [vmem:[%s14616_s20 + $0x148] sm:$0xff]  ;;  %v5197_v60 = vld [vmem:[%s14616_s20 + $0x1f0] sm:$0xff] }
 0x442   : > { %7135 = vmatprep.subr.bf16.mxu0 %v7134_v49  ;;  %v7158_v24 = vpack.c.bf16 %v5178_v54, %v5176_v20  ;;  %v5177_v49 = vld [vmem:[%s14616_s20 + $0x150] sm:$0xff]  ;;  %v5200_v6 = vld [vmem:[%s14616_s20 + $0x208] sm:$0xff] }
 0x443   : > { %v7160_v45 = vpack.c.bf16 %v5177_v49, %v5175_v28  ;;  %v4570_v28 = vpop.permute.xlu0 %4569 }
 0x445   : > { %7137 = vmatpush1.bf16.msra.mxu0 %v7136_v17  ;;  %v5180_v17 = vld [vmem:[%s14616_s20 + $0x168] sm:$0xff] }
 0x446   : > { %7139 = vmatprep.subr.bf16.mxu0 %v7138_v41  ;;  %v7162_v26 = vpack.c.bf16 %v5182_v53, %v5180_v17  ;;  %v7164_v41 = vpack.c.bf16 %v5181_v52, %v5179_v1  ;;  %v4578_v52 = vstv %s12189_s13  ;;  %s12309_s13 = sld [smem:[#allocation11 + $0x11d]] }
 0x447   : > { %v4602_v49 = vpop.permute.xlu0 %4601 }
 0x449   : > { %7141 = vmatpush1.bf16.msra.mxu0 %v7140_v42  ;;  %v5184_v42 = vld [vmem:[%s14616_s20 + $0x188] sm:$0xff] }
 0x44a   : > { %7143 = vmatprep.subr.bf16.mxu0 %v7142_v47  ;;  %v7166_v16 = vpack.c.bf16 %v5186_v46, %v5184_v42  ;;  %v5185_v47 = vld [vmem:[%s14616_s20 + $0x190] sm:$0xff] }
 0x44b   : > { %v7168_v31 = vpack.c.bf16 %v5185_v47, %v5183_v30  ;;  %v4634_v42 = vpop.permute.xlu0 %4633  ;;  %v4590_v30 = vstv %s12193_s12  ;;  %v4610_v47 = vstv %s12197_s26  ;;  %s12321_s12 = sld [smem:[#allocation11 + $0x1e]] }
 0x44c   : > { %v12015_v36 = vpop.f32.mrb[6].mxu1  ;;  %14712 = sst [smem:[#allocation166_spill]] %s12309_s13  ;;  %s12329_s26 = sld [smem:[#allocation11 + $0x11e]] }
 0x44d   : > { %v12017_v27 = vpop.f32.mrb[7].mxu1  ;;  %4697 = vrot.lane.b32.xlu0 %v12015_v36, %s14700_s21  ;;  %7145 = vmatpush1.bf16.msra.mxu0 %v7144_v32  ;;  %v5190_v32 = vld [vmem:[%s14616_s20 + $0x1b8] sm:$0xff] }
 0x44e   : > { %4699 = vrot.lane.b32.xlu1 %v12017_v27, %s14700_s21  ;;  %7147 = vmatprep.subr.bf16.mxu0 %v7146_v29  ;;  %v7170_v55 = vpack.c.bf16 %v5190_v32, %v5188_v0  ;;  %v5189_v29 = vld [vmem:[%s14616_s20 + $0x1b0] sm:$0xff]  ;;  %v4616_v0 = vstv %s12199_s16  ;;  %v4622_v32 = vstv %s12201_s24  ;;  %s12275_s21 = sld [smem:[#allocation11 + $0x19f]]  ;;  %s12331_s16 = sld [smem:[#allocation11 + $0x19e]] }
 0x44f   : > { %v7172_v56 = vpack.c.bf16 %v5189_v29, %v5187_v15  ;;  %s12333_s24 = sld [smem:[#allocation11 + $0x20]] }
 0x451   : > { %4729 = vrot.lane.b32.xlu0 %v12015_v36, %s14701_s9  ;;  %7149 = vmatpush1.bf16.msra.mxu0 %v7148_v5  ;;  %v5194_v5 = vld [vmem:[%s14616_s20 + $0x1d8] sm:$0xff] }
 0x452   : > { %4731 = vrot.lane.b32.xlu1 %v12017_v27, %s14701_s9  ;;  %7151 = vmatprep.subr.bf16.mxu0 %v7150_v63  ;;  %v7174_v58 = vpack.c.bf16 %v5194_v5, %v5192_v48  ;;  %v5191_v63 = vld [vmem:[%s14616_s20 + $0x1c0] sm:$0xff]  ;;  %s12307_s9 = sld [smem:[#allocation11 + $0x9d]] }
 0x453   : > { %v7176_v22 = vpack.c.bf16 %v5193_v18, %v5191_v63  ;;  %v4654_v18 = vstv %s12213_s27  ;;  %s12353_s27 = sld [smem:[#allocation11 + $0x21]] }
 0x455   : > { %4761 = vrot.lane.b32.xlu0 %v12015_v36, %s14702_s11  ;;  %7153 = vmatpush1.bf16.msra.mxu0 %v7152_v61  ;;  %v5198_v61 = vld [vmem:[%s14616_s20 + $0x1f8] sm:$0xff] }
 0x456   : > { %4763 = vrot.lane.b32.xlu1 %v12017_v27, %s14702_s11  ;;  %7155 = vmatprep.subr.bf16.mxu0 %v7154_v37  ;;  %v7178_v51 = vpack.c.bf16 %v5198_v61, %v5196_v8  ;;  %v5195_v37 = vld [vmem:[%s14616_s20 + $0x1e0] sm:$0xff]  ;;  %s12205_s11 = sld [smem:[#allocation11 + $0x19]]  ;;  %v4660_v8 = vstv %s12215_s25 }
 0x457   : > { %v7180_v20 = vpack.c.bf16 %v5197_v60, %v5195_v37  ;;  %v4680_v37 = vstv %s12219_s15  ;;  %s12363_s25 = sld [smem:[#allocation11 + $0xa1]] }
 0x458   : > { %s12371_s15 = sld [smem:[#allocation11 + $0x1a1]] }
 0x459   : > { %4793 = vrot.lane.b32.xlu0 %v12015_v36, %s14703_s22  ;;  %7157 = vmatpush1.bf16.msra.mxu0 %v7156_v59  ;;  %v5202_v59 = vld [vmem:[%s14616_s20 + $0x218] sm:$0xff]  ;;  %s12381_s20 = sld [smem:[#allocation11 + $0x122]] }
 0x45a   : > { %4795 = vrot.lane.b32.xlu1 %v12017_v27, %s14703_s22  ;;  %7159 = vmatprep.subr.bf16.mxu0 %v7158_v24  ;;  %v7182_v54 = vpack.c.bf16 %v5202_v59, %v5200_v6  ;;  %v4572_v24 = vpop.permute.xlu1 %4571  ;;  %s12207_s22 = sld [smem:[#allocation11 + $0x99]]  ;;  %v4666_v59 = vpop.permute.xlu0 %4665 }
 0x45b   : > { %v4573_v17 = vsel %vm1396_vm11, %v4570_v28, %v4572_v24  ;;  %v4574_v53 = vsel %vm1396_vm11, %v4572_v24, %v4570_v28 }
 0x45c   : > { %v4576_v1 = vmul.f32 %v4574_v53, %v11159_v2  ;;  %v4642_v5 = vstv %s12205_s11  ;;  %s12341_s11 = sld [smem:[#allocation11 + $0x120]] }
 0x45d   : > { %4851 = vrot.lane.b32.xlu0 %v12015_v36, %s14704_s7  ;;  %7161 = vmatpush1.bf16.msra.mxu0 %v7160_v45 }
 0x45e   : > { %4853 = vrot.lane.b32.xlu1 %v12017_v27, %s14704_s7  ;;  %7163 = vmatprep.subr.bf16.mxu0 %v7162_v26  ;;  %v4604_v45 = vpop.permute.xlu1 %4603  ;;  %v4575_v26 = vmul.f32 %v4573_v17, %v11149_v7  ;;  %v4580_v48 = vmul.f32 %v4578_v52, %v4576_v1  ;;  %v4592_v6 = vmul.f32 %v4590_v30, %v4576_v1  ;;  %s12267_s7 = sld [smem:[#allocation11 + $0x11f]] }
 0x45f   : > { %v4606_v15 = vsel %vm3999_vm3, %v4604_v45, %v4602_v49 }
 0x460   : > { %v4579_v29 = vmul.f32 %v4578_v52, %v4575_v26  ;;  %v4591_v60 = vmul.f32 %v4590_v30, %v4575_v26 }
 0x461   : > { %4883 = vrot.lane.b32.xlu0 %v12015_v36, %s14705_s19  ;;  %7165 = vmatpush1.bf16.msra.mxu0 %v7164_v41  ;;  %v4584_v41 = vstv %s12191_s18  ;;  %s12319_s18 = sld [smem:[#allocation11 + $0x19d]] }
 0x462   : > { %4885 = vrot.lane.b32.xlu1 %v12017_v27, %s14705_s19  ;;  %7167 = vmatprep.subr.bf16.mxu0 %v7166_v16  ;;  %v4636_v46 = vpop.permute.xlu1 %4635  ;;  %v4596_v16 = vstv %s12195_s30  ;;  %v4586_v63 = vmul.f32 %v4584_v41, %v4576_v1  ;;  %v4581_v24 = vadd.f32 %v4579_v29, %v11944_v34  ;;  %s12295_s19 = sld [smem:[#allocation11 + $0x19c]]  ;;  %s12327_s30 = sld [smem:[#allocation11 + $0x9e]] }
 0x463   : > { %v4598_v17 = vmul.f32 %v4596_v16, %v4576_v1  ;;  %v4638_v30 = vsel %vm4045_vm4, %v4636_v46, %v4634_v42 }
 0x464   : > { %v4588_v52 = vadd.f32 %v4586_v63, %v11953_v39 }
 0x465   : > { %4915 = vrot.lane.b32.xlu0 %v12015_v36, %s14706_s3  ;;  %7169 = vmatpush1.bf16.msra.mxu0 %v7168_v31 }
 0x466   : > { %4917 = vrot.lane.b32.xlu1 %v12017_v27, %s14706_s3  ;;  %7171 = vmatprep.subr.bf16.mxu0 %v7170_v55  ;;  %v4605_v55 = vsel %vm3999_vm3, %v4602_v49, %v4604_v45  ;;  %v4668_v28 = vpop.permute.xlu1 %4667  ;;  %v4582_v49 = vadd.f32 %v4580_v48, %v11947_v4  ;;  %v4597_v45 = vmul.f32 %v4596_v16, %v4575_v26  ;;  %s12297_s3 = sld [smem:[#allocation11 + $0x1d]] }
 0x467   : > { %v4607_v61 = vmul.f32 %v4605_v55, %v11176_v43  ;;  %v4670_v34 = vsel %vm4091_vm5, %v4668_v28, %v4666_v59 }
 0x468   : > { %v4672_v63 = vmul.f32 %v4670_v34, %v11219_v21  ;;  %14710 = sst [smem:[#allocation164_spill]] %s12295_s19 }
 0x469   : > { %4947 = vrot.lane.b32.xlu0 %v12015_v36, %s14707_s1  ;;  %7173 = vmatpush1.bf16.msra.mxu0 %v7172_v56  ;;  %v4648_v56 = vstv %s12207_s22  ;;  %v4611_v55 = vmul.f32 %v4610_v47, %v4607_v61  ;;  %v4617_v4 = vmul.f32 %v4616_v0, %v4607_v61  ;;  %v4623_v1 = vmul.f32 %v4622_v32, %v4607_v61  ;;  %s12351_s22 = sld [smem:[#allocation11 + $0x1a0]] }
 0x46a   : > { %4949 = vrot.lane.b32.xlu1 %v12017_v27, %s14707_s1  ;;  %7175 = vmatprep.subr.bf16.mxu0 %v7174_v58  ;;  %s12203_s1 = sld [smem:[#allocation11 + $0x198]]  ;;  %v4585_v58 = vmul.f32 %v4584_v41, %v4575_v26  ;;  %v4637_v41 = vsel %vm4045_vm4, %v4634_v42, %v4636_v46  ;;  %v4640_v42 = vmul.f32 %v4638_v30, %v11195_v23  ;;  %v14713_v30 = vstv %s12223_s29  ;;  %s12379_s29 = sld [smem:[#allocation11 + $0xa2]] }
 0x46b   : > { %v4639_v29 = vmul.f32 %v4637_v41, %v11192_v62  ;;  %v4593_v46 = vadd.f32 %v4591_v60, %v11956_v50 }
 0x46c   : > { %v4587_v53 = vadd.f32 %v4585_v58, %v11950_v13  ;;  %14711 = sst [smem:[#allocation165_spill]] %s12297_s3 }
 0x46d   : > { %7177 = vmatpush1.bf16.msra.mxu0 %v7176_v22  ;;  %v4608_v22 = vmul.f32 %v4606_v15, %v11179_v35  ;;  %v4643_v60 = vmul.f32 %v4642_v5, %v4639_v29 }
 0x46e   : > { %7179 = vmatprep.subr.bf16.mxu0 %v7178_v51  ;;  %v4674_v51 = vstv %s12217_s5  ;;  %v4619_v50 = vadd.f32 %v4617_v4, %v4587_v53  ;;  %s12365_s5 = sld [smem:[#allocation11 + $0x121]] }
 0x46f   : > { %v4612_v15 = vmul.f32 %v4610_v47, %v4608_v22  ;;  %v4618_v26 = vmul.f32 %v4616_v0, %v4608_v22  ;;  %v4624_v13 = vmul.f32 %v4622_v32, %v4608_v22  ;;  %v4594_v47 = vadd.f32 %v4592_v6, %v11959_v33 }
 0x470   : > { %v4628_v31 = vstv %s12203_s1  ;;  %v4599_v0 = vadd.f32 %v4597_v45, %v11962_v19  ;;  %v4600_v32 = vadd.f32 %v4598_v17, %v11965_v38  ;;  %v4625_v19 = vadd.f32 %v4623_v1, %v4593_v46  ;;  %s12339_s1 = sld [smem:[#allocation11 + $0xa0]] }
 0x471   : > { %7181 = vmatpush1.bf16.msra.mxu0 %v7180_v20  ;;  %v4686_v20 = vstv %s12221_s10  ;;  %v4629_v39 = vmul.f32 %v4628_v31, %v4607_v61  ;;  %v4630_v16 = vmul.f32 %v4628_v31, %v4608_v22  ;;  %v4613_v31 = vadd.f32 %v4611_v55, %v4581_v24  ;;  %s12373_s10 = sld [smem:[#allocation11 + $0x22]] }
 0x472   : > { %7183 = vmatprep.subr.bf16.mxu0 %v7182_v54  ;;  %v4669_v54 = vsel %vm4091_vm5, %v4666_v59, %v4668_v28  ;;  %v4614_v48 = vadd.f32 %v4612_v15, %v4582_v49  ;;  %v4620_v33 = vadd.f32 %v4618_v26, %v4588_v52  ;;  %v4626_v38 = vadd.f32 %v4624_v13, %v4594_v47 }
 0x473   : > { %v4671_v58 = vmul.f32 %v4669_v54, %v11211_v44  ;;  %v4631_v61 = vadd.f32 %v4629_v39, %v4599_v0  ;;  %v4632_v22 = vadd.f32 %v4630_v16, %v4600_v32  ;;  %v4644_v6 = vmul.f32 %v4642_v5, %v4640_v42  ;;  %v14715_v32 = vld [vmem:[#allocation119_spill] sm:$0xff] }
 0x474   : > { %v4649_v59 = vmul.f32 %v4648_v56, %v4639_v29  ;;  %v4650_v54 = vmul.f32 %v4648_v56, %v4640_v42  ;;  %v4655_v28 = vmul.f32 %v4654_v18, %v4639_v29  ;;  %v4656_v24 = vmul.f32 %v4654_v18, %v4640_v42 }
 0x475   : > { %v4661_v5 = vmul.f32 %v4660_v8, %v4639_v29  ;;  %v4662_v49 = vmul.f32 %v4660_v8, %v4640_v42  ;;  %v4675_v45 = vmul.f32 %v4674_v51, %v4671_v58  ;;  %v4676_v17 = vmul.f32 %v4674_v51, %v4672_v63 }
 0x476   : > { %v4681_v56 = vmul.f32 %v4680_v37, %v4671_v58  ;;  %v4682_v18 = vmul.f32 %v4680_v37, %v4672_v63  ;;  %v4687_v53 = vmul.f32 %v4686_v20, %v4671_v58  ;;  %v4688_v52 = vmul.f32 %v4686_v20, %v4672_v63 }
 0x477   : > { %v4645_v8 = vadd.f32 %v4643_v60, %v4613_v31  ;;  %v4646_v41 = vadd.f32 %v4644_v6, %v4614_v48  ;;  %v4693_v51 = vmul.f32 %v14713_v30, %v4671_v58  ;;  %v14714_v55 = vmov %v14713_v30  ;;  %v14716_v48 = vld [vmem:[#allocation111_spill] sm:$0xff] }
 0x478   : > { %v4694_v15 = vmul.f32 %v14714_v55, %v4672_v63  ;;  %v4651_v34 = vadd.f32 %v4649_v59, %v4619_v50  ;;  %v4652_v37 = vadd.f32 %v4650_v54, %v4620_v33  ;;  %v4657_v4 = vadd.f32 %v4655_v28, %v4625_v19 }
 0x479   : > { %v4658_v26 = vadd.f32 %v4656_v24, %v4626_v38  ;;  %v4663_v20 = vadd.f32 %v4661_v5, %v4631_v61  ;;  %v4664_v1 = vadd.f32 %v4662_v49, %v4632_v22  ;;  %v12335_v13 = vadd.f32 %v4675_v45, %v4645_v8 }
 0x47a   : > { %v12337_v39 = vadd.f32 %v4676_v17, %v4646_v41  ;;  %v12343_v16 = vadd.f32 %v4681_v56, %v4651_v34  ;;  %v12345_v29 = vadd.f32 %v4682_v18, %v4652_v37  ;;  %v12347_v42 = vadd.f32 %v4687_v53, %v4657_v4  ;;  %v4995_v41 = vld [vmem:[#allocation3] sm:$0xf]  ;;  %v12442_v4 = vld [vmem:[#allocation3 + $0x8] sm:$0xf] }
 0x47b   : > { %v12349_v46 = vadd.f32 %v4688_v52, %v4658_v26  ;;  %v12355_v47 = vadd.f32 %v4693_v51, %v4663_v20  ;;  %v12357_v0 = vadd.f32 %v4694_v15, %v4664_v1  ;;  %v4825_v31 = vmul.f32 %v14715_v32, %v12015_v36 }
 0x47c   : > { %v4826_v58 = vmul.f32 %v14716_v48, %v12017_v27  ;;  %v4828_v63 = vstv %s12261_s23  ;;  %v4834_v50 = vstv %s12265_s14  ;;  %v4840_v33 = vstv %s12267_s7  ;;  %s12387_s23 = sld [smem:[#allocation11 + $0x1a2]]  ;;  %s12389_s14 = sld [smem:[#allocation11 + $0x23]] }
 0x47d   : > { %v4846_v19 = vstv %s12275_s21  ;;  %v4706_v36 = vstv %s12273_s6  ;;  %v4712_v38 = vstv %s12279_s0  ;;  %v4718_v61 = vstv %s12281_s8  ;;  %s12399_s7 = sld [smem:[#allocation11 + $0xa3]]  ;;  %s14776_s0 = sld [smem:[#allocation195_spill]] }
 0x47e   : > { %v4724_v22 = vstv %s12283_s28  ;;  %v4738_v27 = vstv %s12285_s2  ;;  %v4744_v60 = vstv %s12287_s4  ;;  %v4750_v6 = vstv %s12289_s17  ;;  %s12409_s21 = sld [smem:[#allocation11 + $0x123]]  ;;  %s12417_s17 = sld [smem:[#allocation12]] }
 0x47f   : > { %v4756_v59 = vstv %s12295_s19  ;;  %v12391_v54 = vmul.f32 %v4828_v63, %v4825_v31  ;;  %v12393_v28 = vmul.f32 %v4828_v63, %v4826_v58  ;;  %v12395_v24 = vmul.f32 %v4834_v50, %v4825_v31  ;;  %s12411_s19 = sld [smem:[#allocation11 + $0x1a3]]  ;;  %s12419_s4 = sld [smem:[#allocation12 + $0x1]] }
 0x480   : > { %v12397_v5 = vmul.f32 %v4840_v33, %v4825_v31  ;;  %v12401_v49 = vmul.f32 %v4834_v50, %v4826_v58  ;;  %v12403_v45 = vmul.f32 %v4840_v33, %v4826_v58  ;;  %v12405_v17 = vmul.f32 %v4846_v19, %v4825_v31 }
 0x481   : > { %v12407_v56 = vmul.f32 %v4846_v19, %v4826_v58  ;;  %v4770_v18 = vstv %s12297_s3  ;;  %v4776_v53 = vstv %s12307_s9  ;;  %v4782_v52 = vstv %s12309_s13  ;;  %s12425_s3 = sld [smem:[#allocation12 + $0x2]]  ;;  %s12427_s13 = sld [smem:[#allocation12 + $0x3]]  ;;  %v12440_v19 = vld [vmem:[#allocation3 + $0x4] sm:$0xf] }
 0x482   : > { %vm4996_vm6 = vcmp.gt.f32.partialorder %v4995_v41, 0.5  ;;  %v14717_v26 = vmov 0.0   ;;  %vm5020_vm7 = vcmp.gt.f32.partialorder %v12440_v19, 0.5  ;;  %vm5044_vm8 = vcmp.gt.f32.partialorder %v12442_v4, 0.5 }
 0x483   : > { %v12454_v37 = vsel %vm4996_vm6, 1.0, %v14717_v26  ;;  %v12468_v58 = vmul.f32 0.2, %v4995_v41  ;;  %v12476_v51 = vsel %vm5020_vm7, 1.0, %v14717_v26  ;;  %v12479_v30 = vsel %vm5044_vm8, 1.0, %v14717_v26 }
 0x4bf   : > { %v4698_v20 = vpop.permute.xlu0 %4697 }
 0x4c0   : > { %v4700_v48 = vpop.permute.xlu1 %4699 }
 0x4c1   : > { %v4701_v1 = vsel %vm3741_vm0, %v4698_v20, %v4700_v48  ;;  %v4702_v31 = vsel %vm3741_vm0, %v4700_v48, %v4698_v20  ;;  %vm5708_vm0 = vcmask 125954  }
 0x4c2   : > { %v4703_v33 = vmul.f32 %v4702_v31, %v11035_v57  ;;  %v4704_v50 = vmul.f32 %v4701_v1, %v14597_v25 }
 0x4c3   : > { %v4730_v34 = vpop.permute.xlu0 %4729 }
 0x4c4   : > { %v4707_v57 = vmul.f32 %v4706_v36, %v4703_v33  ;;  %v4708_v25 = vmul.f32 %v4706_v36, %v4704_v50  ;;  %v4732_v20 = vpop.permute.xlu1 %4731  ;;  %v4713_v15 = vmul.f32 %v4712_v38, %v4703_v33  ;;  %v4714_v32 = vmul.f32 %v4712_v38, %v4704_v50 }
 0x4c5   : > { %v4719_v36 = vmul.f32 %v4718_v61, %v4703_v33  ;;  %v4720_v31 = vmul.f32 %v4718_v61, %v4704_v50  ;;  %v4725_v63 = vmul.f32 %v4724_v22, %v4703_v33  ;;  %v4726_v41 = vmul.f32 %v4724_v22, %v4704_v50 }
 0x4c6   : > { %v4709_v38 = vadd.f32 %v4707_v57, %v12335_v13  ;;  %v4710_v48 = vadd.f32 %v4708_v25, %v12337_v39  ;;  %v4733_v1 = vsel %vm3778_vm1, %v4730_v34, %v4732_v20  ;;  %v4734_v8 = vsel %vm3778_vm1, %v4732_v20, %v4730_v34  ;;  %vm5709_vm1 = vmor %vm5708_vm0, %vm5707_vm15 }
 0x4c7   : > { %v4762_v55 = vpop.permute.xlu0 %4761  ;;  %v4735_v33 = vmul.f32 %v4734_v8, %v14601_v3  ;;  %v4736_v22 = vmul.f32 %v4733_v1, %v14603_v40  ;;  %v4715_v39 = vadd.f32 %v4713_v15, %v12343_v16  ;;  %v4716_v57 = vadd.f32 %v4714_v32, %v12345_v29 }
 0x4c8   : > { %v4764_v61 = vpop.permute.xlu1 %4763  ;;  %v4721_v16 = vadd.f32 %v4719_v36, %v12347_v42  ;;  %v4722_v29 = vadd.f32 %v4720_v31, %v12349_v46  ;;  %v4728_v32 = vadd.f32 %v4726_v41, %v12357_v0 }
 0x4c9   : > { %v4765_v50 = vsel %vm3824_vm2, %v4762_v55, %v4764_v61  ;;  %v4766_v13 = vsel %vm3824_vm2, %v4764_v61, %v4762_v55  ;;  %v4739_v3 = vmul.f32 %v4738_v27, %v4735_v33  ;;  %v4740_v40 = vmul.f32 %v4738_v27, %v4736_v22 }
 0x4ca   : > { %v4767_v34 = vmul.f32 %v4766_v13, %v14605_v12  ;;  %v4768_v25 = vmul.f32 %v4765_v50, %v14606_v14  ;;  %v4745_v8 = vmul.f32 %v4744_v60, %v4735_v33  ;;  %v4746_v20 = vmul.f32 %v4744_v60, %v4736_v22 }
 0x4cb   : > { %v4794_v55 = vpop.permute.xlu0 %4793  ;;  %v4751_v12 = vmul.f32 %v4750_v6, %v4735_v33  ;;  %v4752_v14 = vmul.f32 %v4750_v6, %v4736_v22  ;;  %v4727_v27 = vadd.f32 %v4725_v63, %v12355_v47  ;;  %v4757_v60 = vmul.f32 %v4756_v59, %v4735_v33 }
 0x4cc   : > { %v4796_v15 = vpop.permute.xlu1 %4795  ;;  %v4758_v1 = vmul.f32 %v4756_v59, %v4736_v22  ;;  %v4741_v61 = vadd.f32 %v4739_v3, %v4709_v38  ;;  %v4742_v42 = vadd.f32 %v4740_v40, %v4710_v48  ;;  %v4747_v46 = vadd.f32 %v4745_v8, %v4715_v39 }
 0x4cd   : > { %v4748_v31 = vadd.f32 %v4746_v20, %v4716_v57  ;;  %v4771_v36 = vmul.f32 %v4770_v18, %v4767_v34  ;;  %v4772_v6 = vmul.f32 %v4770_v18, %v4768_v25  ;;  %v4777_v50 = vmul.f32 %v4776_v53, %v4767_v34 }
 0x4ce   : > { %v4778_v47 = vmul.f32 %v4776_v53, %v4768_v25  ;;  %v4753_v0 = vadd.f32 %v4751_v12, %v4721_v16  ;;  %v4754_v41 = vadd.f32 %v4752_v14, %v4722_v29  ;;  %v4783_v33 = vmul.f32 %v4782_v52, %v4767_v34 }
 0x4cf   : > { %v4852_v63 = vpop.permute.xlu0 %4851  ;;  %v4784_v59 = vmul.f32 %v4782_v52, %v4768_v25  ;;  %v4759_v48 = vadd.f32 %v4757_v60, %v4727_v27  ;;  %v4760_v22 = vadd.f32 %v4758_v1, %v4728_v32  ;;  %v14723_v13 = vstv %s12319_s18 }
 0x4d0   : > { %v4854_v38 = vpop.permute.xlu1 %4853  ;;  %v4789_v39 = vmul.f32 %v14723_v13, %v4767_v34  ;;  %v14724_v57 = vmov %v14723_v13  ;;  %v4773_v40 = vadd.f32 %v4771_v36, %v4741_v61  ;;  %v4774_v18 = vadd.f32 %v4772_v6, %v4742_v42 }
 0x4d1   : > { %v4790_v3 = vmul.f32 %v14724_v57, %v4768_v25  ;;  %v4779_v8 = vadd.f32 %v4777_v50, %v4747_v46  ;;  %v4780_v20 = vadd.f32 %v4778_v47, %v4748_v31  ;;  %v4797_v53 = vsel %vm985_vm10, %v4794_v55, %v4796_v15 }
 0x4d2   : > { %v4798_v52 = vsel %vm985_vm10, %v4796_v15, %v4794_v55  ;;  %v4855_v16 = vsel %vm1396_vm11, %v4852_v63, %v4854_v38  ;;  %v4856_v34 = vsel %vm1396_vm11, %v4854_v38, %v4852_v63  ;;  %v4785_v25 = vadd.f32 %v4783_v33, %v4753_v0 }
 0x4d3   : > { %v4786_v29 = vadd.f32 %v4784_v59, %v4754_v41  ;;  %v4799_v12 = vmul.f32 %v4798_v52, %v14619_v9  ;;  %v4800_v14 = vmul.f32 %v4797_v53, %v14621_v10  ;;  %v4884_v27 = vpop.permute.xlu0 %4883  ;;  %v4791_v55 = vadd.f32 %v4789_v39, %v4759_v48 }
 0x4d4   : > { %v4886_v32 = vpop.permute.xlu1 %4885  ;;  %v4792_v15 = vadd.f32 %v4790_v3, %v4760_v22  ;;  %v4857_v60 = vmul.f32 %v4855_v16, %v11149_v7  ;;  %v4858_v1 = vmul.f32 %v4856_v34, %v11159_v2  ;;  %v14725_v61 = vstv %s12321_s12 }
 0x4d5   : > { %v4803_v42 = vmul.f32 %v14725_v61, %v4799_v12  ;;  %v14726_v46 = vmov %v14725_v61  ;;  %v14727_v36 = vstv %s12327_s30  ;;  %v14729_v63 = vstv %s12329_s26  ;;  %s14777_s30 = sld [smem:[#allocation194_spill]] }
 0x4d6   : > { %v4804_v31 = vmul.f32 %v14726_v46, %v4800_v14  ;;  %v4809_v6 = vmul.f32 %v14727_v36, %v4799_v12  ;;  %v14728_v50 = vmov %v14727_v36  ;;  %v4815_v9 = vmul.f32 %v14729_v63, %v4799_v12 }
 0x4d7   : > { %v4810_v47 = vmul.f32 %v14728_v50, %v4800_v14  ;;  %v14730_v0 = vmov %v14729_v63  ;;  %v14731_v41 = vstv %s12331_s16  ;;  %v4805_v48 = vadd.f32 %v4803_v42, %v4773_v40 }
 0x4d8   : > { %v4816_v10 = vmul.f32 %v14730_v0, %v4800_v14  ;;  %v4821_v33 = vmul.f32 %v14731_v41, %v4799_v12  ;;  %v14732_v59 = vmov %v14731_v41  ;;  %v4806_v7 = vadd.f32 %v4804_v31, %v4774_v18  ;;  %v4916_v18 = vpop.permute.xlu0 %4915 }
 0x4d9   : > { %v4822_v38 = vmul.f32 %v14732_v59, %v4800_v14  ;;  %v4811_v22 = vadd.f32 %v4809_v6, %v4779_v8  ;;  %v4812_v2 = vadd.f32 %v4810_v47, %v4780_v20  ;;  %v4817_v13 = vadd.f32 %v4815_v9, %v4785_v25  ;;  %v4918_v8 = vpop.permute.xlu1 %4917 }
 0x4da   : > { %v4818_v39 = vadd.f32 %v4816_v10, %v4786_v29  ;;  %v4823_v57 = vadd.f32 %v4821_v33, %v4791_v55  ;;  %v4831_v53 = vadd.f32 %v12391_v54, %v4805_v48  ;;  %v4832_v52 = vadd.f32 %v12393_v28, %v4806_v7 }
 0x4db   : > { %v4824_v3 = vadd.f32 %v4822_v38, %v4792_v15  ;;  %v4837_v16 = vadd.f32 %v12395_v24, %v4811_v22  ;;  %v4838_v40 = vadd.f32 %v12401_v49, %v4812_v2  ;;  %v4843_v20 = vadd.f32 %v12397_v5, %v4817_v13 }
 0x4dc   : > { %v4844_v34 = vadd.f32 %v12403_v45, %v4818_v39  ;;  %v4849_v25 = vadd.f32 %v12405_v17, %v4823_v57  ;;  %v14733_v54 = vstv %s12333_s24  ;;  %v4887_v24 = vsel %vm3999_vm3, %v4884_v27, %v4886_v32  ;;  %v4948_v41 = vpop.permute.xlu0 %4947  ;;  %s14780_s24 = sld [smem:[#allocation196_spill]] }
 0x4dd   : > { %v4850_v29 = vadd.f32 %v12407_v56, %v4824_v3  ;;  %v4861_v12 = vmul.f32 %v14733_v54, %v4857_v60  ;;  %v14734_v28 = vmov %v14733_v54  ;;  %v4888_v49 = vsel %vm3999_vm3, %v4886_v32, %v4884_v27  ;;  %v4950_v33 = vpop.permute.xlu1 %4949 }
 0x4de   : > { %v4862_v14 = vmul.f32 %v14734_v28, %v4858_v1  ;;  %v14735_v55 = vstv %s12339_s1  ;;  %v14737_v61 = vstv %s12341_s11  ;;  %v12594_v56 = vmul.f32 0.2, %v12440_v19  ;;  %s14781_s1 = sld [smem:[#allocation19_spill]] }
 0x4df   : > { %v4867_v5 = vmul.f32 %v14735_v55, %v4857_v60  ;;  %v14736_v15 = vmov %v14735_v55  ;;  %v4873_v17 = vmul.f32 %v14737_v61, %v4857_v60  ;;  %v14738_v42 = vmov %v14737_v61 }
 0x4e0   : > { %v4868_v45 = vmul.f32 %v14736_v15, %v4858_v1  ;;  %v4874_v46 = vmul.f32 %v14738_v42, %v4858_v1  ;;  %v5024_v31 = vsub.f32 1.0, %v12476_v51  ;;  %v12598_v36 = vmul.f32 0.2, %v12442_v4 }
 0x4e1   : > { %v5048_v6 = vsub.f32 1.0, %v12479_v30  ;;  %v4863_v27 = vadd.f32 %v4861_v12, %v4831_v53  ;;  %v4864_v32 = vadd.f32 %v4862_v14, %v4832_v52  ;;  %v14739_v50 = vstv %s12351_s22 }
 0x4e2   : > { %v4879_v47 = vmul.f32 %v14739_v50, %v4857_v60  ;;  %v14740_v63 = vmov %v14739_v50  ;;  %v4889_v0 = vmul.f32 %v4887_v24, %v11176_v43  ;;  %v4890_v19 = vmul.f32 %v4888_v49, %v11179_v35 }
 0x4e3   : > { %v4880_v9 = vmul.f32 %v14740_v63, %v4858_v1  ;;  %v4919_v10 = vsel %vm4045_vm4, %v4916_v18, %v4918_v8  ;;  %v4920_v4 = vsel %vm4045_vm4, %v4918_v8, %v4916_v18  ;;  %v4869_v59 = vadd.f32 %v4867_v5, %v4837_v16 }
 0x4e4   : > { %v4870_v60 = vadd.f32 %v4868_v45, %v4838_v40  ;;  %v4875_v38 = vadd.f32 %v4873_v17, %v4843_v20  ;;  %v4876_v1 = vadd.f32 %v4874_v46, %v4844_v34  ;;  %v14741_v48 = vstv %s12353_s27  ;;  %v12629_v20 = vld [vmem:[#allocation3 + $0xc] sm:$0xf]  ;;  %p6217_p0 = scmp.ne.s32.totalorder %s14781_s1, 9 }
 0x4e5   : > { %v4893_v43 = vmul.f32 %v14741_v48, %v4889_v0  ;;  %v14742_v35 = vmov %v14741_v48  ;;  %v4921_v22 = vmul.f32 %v4919_v10, %v11192_v62  ;;  %v4922_v2 = vmul.f32 %v4920_v4, %v11195_v23 }
 0x4e6   : > { %v4894_v7 = vmul.f32 %v14742_v35, %v4890_v19  ;;  %v4881_v13 = vadd.f32 %v4879_v47, %v4849_v25  ;;  %v4882_v39 = vadd.f32 %v4880_v9, %v4850_v29  ;;  %v4951_v57 = vsel %vm4091_vm5, %v4948_v41, %v4950_v33 }
 0x4e7   : > { %v4952_v3 = vsel %vm4091_vm5, %v4950_v33, %v4948_v41  ;;  %v14743_v53 = vstv %s12363_s25  ;;  %v14745_v40 = vstv %s12365_s5  ;;  %v4895_v34 = vadd.f32 %v4893_v43, %v4863_v27 }
 0x4e8   : > { %v4899_v52 = vmul.f32 %v14743_v53, %v4889_v0  ;;  %v14744_v16 = vmov %v14743_v53  ;;  %v4905_v23 = vmul.f32 %v14745_v40, %v4889_v0  ;;  %v14746_v18 = vmov %v14745_v40 }
 0x4e9   : > { %v4900_v62 = vmul.f32 %v14744_v16, %v4890_v19  ;;  %v4906_v8 = vmul.f32 %v14746_v18, %v4890_v19  ;;  %v4896_v25 = vadd.f32 %v4894_v7, %v4864_v32  ;;  %v14747_v29 = vstv %s12371_s15 }
 0x4ea   : > { %v4911_v54 = vmul.f32 %v14747_v29, %v4889_v0  ;;  %v14748_v12 = vmov %v14747_v29  ;;  %v14749_v28 = vstv %s12373_s10  ;;  %v14751_v55 = vstv %s12379_s29 }
 0x4eb   : > { %v4912_v11 = vmul.f32 %v14748_v12, %v4890_v19  ;;  %v4925_v14 = vmul.f32 %v14749_v28, %v4921_v22  ;;  %v14750_v24 = vmov %v14749_v28  ;;  %v4931_v5 = vmul.f32 %v14751_v55, %v4921_v22 }
 0x4ec   : > { %v4926_v49 = vmul.f32 %v14750_v24, %v4922_v2  ;;  %v14752_v15 = vmov %v14751_v55  ;;  %v14753_v61 = vstv %s12381_s20  ;;  %v14755_v50 = vstv %s12387_s23 }
 0x4ed   : > { %v4932_v45 = vmul.f32 %v14752_v15, %v4922_v2  ;;  %v4937_v17 = vmul.f32 %v14753_v61, %v4921_v22  ;;  %v14754_v42 = vmov %v14753_v61  ;;  %v4943_v47 = vmul.f32 %v14755_v50, %v4921_v22 }
 0x4ee   : > { %v4938_v46 = vmul.f32 %v14754_v42, %v4922_v2  ;;  %v14756_v27 = vmov %v14755_v50  ;;  %vm5068_vm10 = vcmp.gt.f32.partialorder %v12629_v20, 0.5  ;;  %v4901_v63 = vadd.f32 %v4899_v52, %v4869_v59 }
 0x4ef   : > { %v4944_v32 = vmul.f32 %v14756_v27, %v4922_v2  ;;  %v4902_v9 = vadd.f32 %v4900_v62, %v4870_v60  ;;  %v4907_v0 = vadd.f32 %v4905_v23, %v4875_v38  ;;  %v4908_v19 = vadd.f32 %v4906_v8, %v4876_v1 }
 0x4f0   : > { %v4913_v10 = vadd.f32 %v4911_v54, %v4881_v13  ;;  %v4914_v4 = vadd.f32 %v4912_v11, %v4882_v39  ;;  %v4927_v41 = vadd.f32 %v4925_v14, %v4895_v34  ;;  %v4928_v33 = vadd.f32 %v4926_v49, %v4896_v25 }
 0x4f1   : > { %v4933_v48 = vadd.f32 %v4931_v5, %v4901_v63  ;;  %v4934_v43 = vadd.f32 %v4932_v45, %v4902_v9  ;;  %v4953_v35 = vmul.f32 %v4951_v57, %v11211_v44  ;;  %v4954_v59 = vmul.f32 %v4952_v3, %v11219_v21 }
 0x4f2   : > { %v4939_v60 = vadd.f32 %v4937_v17, %v4907_v0  ;;  %v4940_v7 = vadd.f32 %v4938_v46, %v4908_v19  ;;  %v4945_v38 = vadd.f32 %v4943_v47, %v4913_v10  ;;  %v4946_v22 = vadd.f32 %v4944_v32, %v4914_v4 }
 0x4f3   : > { %v14757_v1 = vstv %s12389_s14  ;;  %v14759_v53 = vstv %s12399_s7  ;;  %v14761_v40 = vstv %s12409_s21  ;;  %v14763_v3 = vstv %s12411_s19 }
 0x4f4   : > { %v4957_v2 = vmul.f32 %v14757_v1, %v4953_v35  ;;  %v14758_v13 = vmov %v14757_v1  ;;  %v4963_v52 = vmul.f32 %v14759_v53, %v4953_v35  ;;  %v14760_v16 = vmov %v14759_v53 }
 0x4f5   : > { %v4958_v39 = vmul.f32 %v14758_v13, %v4954_v59  ;;  %v4964_v62 = vmul.f32 %v14760_v16, %v4954_v59  ;;  %v4969_v44 = vmul.f32 %v14761_v40, %v4953_v35  ;;  %v14762_v57 = vmov %v14761_v40 }
 0x4f6   : > { %v4970_v21 = vmul.f32 %v14762_v57, %v4954_v59  ;;  %v4975_v23 = vmul.f32 %v14763_v3, %v4953_v35  ;;  %v14764_v18 = vmov %v14763_v3  ;;  %v4959_v34 = vadd.f32 %v4957_v2, %v4927_v41 }
 0x4f7   : > { %v4976_v8 = vmul.f32 %v14764_v18, %v4954_v59  ;;  %v4960_v25 = vadd.f32 %v4958_v39, %v4928_v33  ;;  %v4965_v29 = vadd.f32 %v4963_v52, %v4933_v48  ;;  %v4966_v54 = vadd.f32 %v4964_v62, %v4934_v43 }
 0x4f8   : > { %v4971_v12 = vadd.f32 %v4969_v44, %v4939_v60  ;;  %v4972_v11 = vadd.f32 %v4970_v21, %v4940_v7  ;;  %v4977_v28 = vadd.f32 %v4975_v23, %v4945_v38  ;;  %v14765_v24 = vstv %s12417_s17  ;;  %s14775_s17 = sld [smem:[#allocation193_spill]] }
 0x4f9   : > { %v4978_v14 = vadd.f32 %v4976_v8, %v4946_v22  ;;  %v4981_v49 = vadd.f32 %v14765_v24, %v4959_v34  ;;  %v14766_v55 = vmov %v14765_v24  ;;  %v14767_v15 = vstv %s12419_s4 }
 0x4fa   : > { %v4982_v5 = vadd.f32 %v14766_v55, %v4960_v25  ;;  %v4985_v45 = vadd.f32 %v14767_v15, %v4965_v29  ;;  %v14768_v61 = vmov %v14767_v15  ;;  %v14769_v42 = vstv %s12425_s3 }
 0x4fb   : > { %v4986_v17 = vadd.f32 %v14768_v61, %v4966_v54  ;;  %v4989_v46 = vadd.f32 %v14769_v42, %v4971_v12  ;;  %v14770_v50 = vmov %v14769_v42  ;;  %v14771_v27 = vsub.f32 1.0, %v12454_v37 }
 0x4fc   : > { %v4990_v47 = vadd.f32 %v14770_v50, %v4972_v11  ;;  %v5004_v63 = vcombine.low %v4981_v49, %v4982_v5  ;;  %v5025_v9 = vmul.f32 %v5024_v31, %v12594_v56  ;;  %v6209_v19 = vsel %vm5068_vm10, 1.0, %v14717_v26 }
 0x4fd   : > { %v5001_v32 = vmul.f32 %v14771_v27, %v12468_v58  ;;  %v5028_v0 = vcombine.low %v4985_v45, %v4986_v17  ;;  %v14772_v10 = vstv %s12427_s13  ;;  %v5049_v48 = vmul.f32 %v5048_v6, %v12598_v36  ;;  %v14774_v58 = vld [vmem:[#allocation23_spill] sm:$0xff] }
 0x4fe   : > { %v4993_v4 = vadd.f32 %v14772_v10, %v4977_v28  ;;  %v14773_v41 = vmov %v14772_v10  ;;  %v5052_v37 = vcombine.low %v4989_v46, %v4990_v47  ;;  %v5011_v43 = vrot.slane %v5004_v63, %v14774_v58  ;;  %v5199_v36 = vld [vmem:[%s14775_s17 + $0x200] sm:$0xff]  ;;  %v5201_v6 = vld [vmem:[%s14775_s17 + $0x210] sm:$0xff]  ;;  %v5204_v13 = vld [vmem:[%s14775_s17 + $0x228] sm:$0xff] }
 0x4ff   : > { %v4994_v33 = vadd.f32 %v14773_v41, %v4978_v14  ;;  %v5035_v35 = vrot.slane %v5028_v0, %v14774_v58  ;;  %v5071_v56 = vmul.f32 0.2, %v12629_v20  ;;  %v5072_v31 = vsub.f32 1.0, %v6209_v19  ;;  %v5206_v39 = vld [vmem:[%s14775_s17 + $0x238] sm:$0xff]  ;;  %v5203_v40 = vld [vmem:[%s14775_s17 + $0x220] sm:$0xff]  ;;  %v5205_v44 = vld [vmem:[%s14775_s17 + $0x230] sm:$0xff] }
 0x500   : > { %v5059_v51 = vrot.slane %v5052_v37, %v14774_v58  ;;  %v5013_v59 = vadd.f32 %v5011_v43, %v5001_v32  ;;  %v7184_v16 = vpack.c.bf16 %v5201_v6, %v5199_v36  ;;  %v7186_v62 = vpack.c.bf16 %v5206_v39, %v5204_v13  ;;  %v5208_v3 = vld [vmem:[%s14775_s17 + $0x248] sm:$0xff]  ;;  %v5210_v23 = vld [vmem:[%s14775_s17 + $0x258] sm:$0xff]  ;;  %v5207_v34 = vld [vmem:[%s14775_s17 + $0x240] sm:$0xff] }
 0x501   : > { %v5037_v60 = vadd.f32 %v5035_v35, %v5025_v9  ;;  %v5076_v38 = vcombine.low %v4993_v4, %v4994_v33  ;;  %v5073_v22 = vmul.f32 %v5072_v31, %v5071_v56  ;;  %v7188_v18 = vpack.c.bf16 %v5205_v44, %v5203_v40  ;;  %v5209_v25 = vld [vmem:[%s14775_s17 + $0x250] sm:$0xff]  ;;  %v5212_v29 = vld [vmem:[%s14775_s17 + $0x268] sm:$0xff]  ;;  %v5214_v54 = vld [vmem:[%s14775_s17 + $0x278] sm:$0xff] }
 0x502   : > { %v12702_v7 = vadd.f32 %v5059_v51, %v5049_v48  ;;  %5014 = vst [vmem:[#allocation3] sm:$0xf] %v5013_v59  ;;  %vm5015_vm11 = vcmp.gt.f32.partialorder %v5013_v59, 0.5  ;;  %v7190_v8 = vpack.c.bf16 %v5210_v23, %v5208_v3  ;;  %v7192_v12 = vpack.c.bf16 %v5209_v25, %v5207_v34  ;;  %v5211_v28 = vld [vmem:[%s14775_s17 + $0x260] sm:$0xff]  ;;  %v5213_v14 = vld [vmem:[%s14775_s17 + $0x270] sm:$0xff]  ;;  %v5216_v24 = vld [vmem:[%s14775_s17 + $0x288] sm:$0xff] }
 0x503   : > { %5038 = vst [vmem:[#allocation3 + $0x4] sm:$0xf] %v5037_v60  ;;  %vm5039_vm9 = vcmp.gt.f32.partialorder %v5037_v60, 0.5  ;;  %v6204_v30 = vsel %vm5015_vm11, 1.0, %v14717_v26  ;;  %v5083_v53 = vrot.slane %v5076_v38, %v14774_v58  ;;  %v7194_v11 = vpack.c.bf16 %v5214_v54, %v5212_v29  ;;  %v5218_v49 = vld [vmem:[%s14775_s17 + $0x298] sm:$0xff]  ;;  %v5215_v15 = vld [vmem:[%s14775_s17 + $0x280] sm:$0xff] }
 0x504   : > { %v6206_v20 = vsel %vm5039_vm9, 1.0, %v14717_v26  ;;  %5062 = vst [vmem:[#allocation3 + $0x8] sm:$0xf] %v12702_v7  ;;  %v5097_v1 = vrot.slane %v6204_v30, %v14774_v58  ;;  %v7196_v55 = vpack.c.bf16 %v5213_v14, %v5211_v28  ;;  %v7198_v5 = vpack.c.bf16 %v5218_v49, %v5216_v24  ;;  %v5217_v45 = vld [vmem:[%s14775_s17 + $0x290] sm:$0xff]  ;;  %v5220_v61 = vld [vmem:[%s14775_s17 + $0x2a8] sm:$0xff]  ;;  %v5222_v17 = vld [vmem:[%s14775_s17 + $0x2b8] sm:$0xff] }
 0x505   : > { %v12715_v2 = vrot.slane %v6206_v20, %v14774_v58  ;;  %v12730_v57 = vadd.f32 %v5083_v53, %v5073_v22  ;;  %v7200_v42 = vpack.c.bf16 %v5217_v45, %v5215_v15  ;;  %v7202_v46 = vpack.c.bf16 %v5222_v17, %v5220_v61  ;;  %v5219_v50 = vld [vmem:[%s14775_s17 + $0x2a0] sm:$0xff]  ;;  %v5221_v47 = vld [vmem:[%s14775_s17 + $0x2b0] sm:$0xff]  ;;  %v5224_v27 = vld [vmem:[%s14775_s17 + $0x2c8] sm:$0xff] }
 0x506   : > { %v5098_v52 = vcombine.high %v5097_v1, %v5097_v1  ;;  %v5226_v32 = vld [vmem:[%s14775_s17 + $0x2d8] sm:$0xff]  ;;  %v7204_v63 = vpack.c.bf16 %v5221_v47, %v5219_v50  ;;  %v5223_v0 = vld [vmem:[%s14775_s17 + $0x2c0] sm:$0xff]  ;;  %v5225_v19 = vld [vmem:[%s14775_s17 + $0x2d0] sm:$0xff]  ;;  %vm5063_vm12 = vcmp.gt.f32.partialorder %v12702_v7, 0.5  ;;  %vm5743_vm3 = vcmask 130048  }
 0x507   : > { %v5109_v21 = vcombine.high %v12715_v2, %v12715_v2  ;;  %5086 = vst [vmem:[#allocation3 + $0xc] sm:$0xf] %v12730_v57  ;;  %v7206_v9 = vpack.c.bf16 %v5226_v32, %v5224_v27  ;;  %v5228_v10 = vld [vmem:[%s14775_s17 + $0x2e8] sm:$0xff]  ;;  %v5230_v4 = vld [vmem:[%s14775_s17 + $0x2f8] sm:$0xff]  ;;  %v7208_v41 = vpack.c.bf16 %v5225_v19, %v5223_v0  ;;  %v5227_v48 = vld [vmem:[%s14775_s17 + $0x2e0] sm:$0xff]  ;;  %v6208_v7 = vsel %vm5063_vm12, 1.0, %v14717_v26 }
 0x508   : > { %5455 = vmatprep.mubr.f32.mxu0 %v5098_v52  ;;  %v7210_v33 = vpack.c.bf16 %v5230_v4, %v5228_v10  ;;  %v5229_v37 = vld [vmem:[%s14775_s17 + $0x2f0] sm:$0xff]  ;;  %v5232_v43 = vld [vmem:[%s14775_s17 + $0x308] sm:$0xff]  ;;  %v5234_v35 = vld [vmem:[%s14775_s17 + $0x318] sm:$0xff]  ;;  %v12918_v4 = vrot.slane %v6208_v7, %v14774_v58  ;;  %vm5087_vm13 = vcmp.gt.f32.partialorder %v12730_v57, 0.5  ;;  %vm5831_vm5 = vcmask 74752  }
 0x509   : > { %5456 = vmatmul.mubr.f32.vlgmr.msra.gmra.mrb[4].mxu0 %v5097_v1  ;;  %v7212_v51 = vpack.c.bf16 %v5229_v37, %v5227_v48  ;;  %v7214_v56 = vpack.c.bf16 %v5234_v35, %v5232_v43  ;;  %v5231_v31 = vld [vmem:[%s14775_s17 + $0x300] sm:$0xff]  ;;  %v5233_v59 = vld [vmem:[%s14775_s17 + $0x310] sm:$0xff]  ;;  %v5236_v60 = vld [vmem:[%s14775_s17 + $0x328] sm:$0xff]  ;;  %v6210_v57 = vsel %vm5087_vm13, 1.0, %v14717_v26 }
 0x50a   : > { %7185 = vmatpush1.bf16.msra.mxu0 %v7184_v16  ;;  %5526 = vmatprep.mubr.f32.mxu0 %v5109_v21  ;;  %v5238_v38 = vld [vmem:[%s14775_s17 + $0x338] sm:$0xff]  ;;  %v7216_v30 = vpack.c.bf16 %v5233_v59, %v5231_v31  ;;  %v5235_v6 = vld [vmem:[%s14775_s17 + $0x320] sm:$0xff]  ;;  %v5237_v20 = vld [vmem:[%s14775_s17 + $0x330] sm:$0xff] }
 0x50b   : > { %7187 = vmatprep.subr.bf16.mxu0 %v7186_v62  ;;  %v7218_v36 = vpack.c.bf16 %v5238_v38, %v5236_v60  ;;  %v5240_v22 = vld [vmem:[%s14775_s17 + $0x348] sm:$0xff]  ;;  %v5242_v1 = vld [vmem:[%s14775_s17 + $0x358] sm:$0xff]  ;;  %v7220_v13 = vpack.c.bf16 %v5237_v20, %v5235_v6  ;;  %v5239_v53 = vld [vmem:[%s14775_s17 + $0x340] sm:$0xff] }
 0x50c   : > { %v7222_v39 = vpack.c.bf16 %v5242_v1, %v5240_v22  ;;  %v5241_v52 = vld [vmem:[%s14775_s17 + $0x350] sm:$0xff]  ;;  %v5244_v16 = vld [vmem:[%s14775_s17 + $0x368] sm:$0xff]  ;;  %v5246_v62 = vld [vmem:[%s14775_s17 + $0x378] sm:$0xff]  ;;  %v7711_v1 = vmov 0.0|0.0  }
 0x50d   : > { %v7224_v40 = vpack.c.bf16 %v5241_v52, %v5239_v53  ;;  %v7226_v44 = vpack.c.bf16 %v5246_v62, %v5244_v16  ;;  %v5243_v21 = vld [vmem:[%s14775_s17 + $0x360] sm:$0xff]  ;;  %v5245_v3 = vld [vmem:[%s14775_s17 + $0x370] sm:$0xff]  ;;  %v5248_v23 = vld [vmem:[%s14775_s17 + $0x388] sm:$0xff]  ;;  %7374 = vmatprep.subr.bf16.mxu1 %v7711_v1 }
 0x50e   : > { %7189 = vmatpush1.bf16.msra.mxu0 %v7188_v18  ;;  %v5250_v18 = vld [vmem:[%s14775_s17 + $0x398] sm:$0xff]  ;;  %v5247_v25 = vld [vmem:[%s14775_s17 + $0x380] sm:$0xff]  ;;  %v5249_v29 = vld [vmem:[%s14775_s17 + $0x390] sm:$0xff] }
 0x50f   : > { %7191 = vmatprep.subr.bf16.mxu0 %v7190_v8  ;;  %v7228_v8 = vpack.c.bf16 %v5245_v3, %v5243_v21  ;;  %v7230_v34 = vpack.c.bf16 %v5250_v18, %v5248_v23  ;;  %v5252_v54 = vld [vmem:[%s14775_s17 + $0x3a8] sm:$0xff]  ;;  %v5251_v14 = vld [vmem:[%s14775_s17 + $0x3a0] sm:$0xff]  ;;  %v5253_v24 = vld [vmem:[%s14775_s17 + $0x3b0] sm:$0xff] }
 0x510   : > { %v5256_v49 = vld [vmem:[%s14775_s17 + $0x3c8] sm:$0xff]  ;;  %v5255_v45 = vld [vmem:[%s14775_s17 + $0x3c0] sm:$0xff]  ;;  %v5257_v61 = vld [vmem:[%s14775_s17 + $0x3d0] sm:$0xff] }
 0x511   : > { %v5260_v17 = vld [vmem:[%s14775_s17 + $0x3e8] sm:$0xff]  ;;  %v5259_v47 = vld [vmem:[%s14775_s17 + $0x3e0] sm:$0xff]  ;;  %v5261_v27 = vld [vmem:[%s14775_s17 + $0x3f0] sm:$0xff] }
 0x512   : > { %7193 = vmatpush1.bf16.msra.mxu0 %v7192_v12  ;;  %v5254_v12 = vld [vmem:[%s14775_s17 + $0x3b8] sm:$0xff]  ;;  %v5264_v32 = vld [vmem:[%s14775_s17 + $0x408] sm:$0xff]  ;;  %v5263_v19 = vld [vmem:[%s14775_s17 + $0x400] sm:$0xff] }
 0x513   : > { %7195 = vmatprep.subr.bf16.mxu0 %v7194_v11  ;;  %v7232_v11 = vpack.c.bf16 %v5249_v29, %v5247_v25  ;;  %v7234_v28 = vpack.c.bf16 %v5254_v12, %v5252_v54  ;;  %v5265_v10 = vld [vmem:[%s14775_s17 + $0x410] sm:$0xff]  ;;  %v5267_v43 = vld [vmem:[%s14775_s17 + $0x420] sm:$0xff]  ;;  %v5274_v31 = vld [vmem:[%s14775_s17 + $0x458] sm:$0xff] }
 0x514   : > { %v7248_v48 = vpack.c.bf16 %v5265_v10, %v5263_v19  ;;  %v5269_v35 = vld [vmem:[%s14775_s17 + $0x430] sm:$0xff]  ;;  %v5715_v59 = vld [vmem:[%s14776_s0] sm:$0xff]  ;;  %v5716_v60 = vld [vmem:[%s14776_s0 + $0x8] sm:$0xff] }
 0x515   : > { %v5717_v38 = vld [vmem:[%s14776_s0 + $0x10] sm:$0xff]  ;;  %v5271_v20 = vld [vmem:[%s14775_s17 + $0x440] sm:$0xff]  ;;  %v5720_v16 = vld [vmem:[%s14776_s0 + $0x28] sm:$0xff] }
 0x516   : > { %7197 = vmatpush1.bf16.msra.mxu0 %v7196_v55  ;;  %v5258_v55 = vld [vmem:[%s14775_s17 + $0x3d8] sm:$0xff]  ;;  %v5273_v22 = vld [vmem:[%s14775_s17 + $0x450] sm:$0xff]  ;;  %v5719_v52 = vld [vmem:[%s14776_s0 + $0x20] sm:$0xff] }
 0x517   : > { %7199 = vmatprep.subr.bf16.mxu0 %v7198_v5  ;;  %v7236_v5 = vpack.c.bf16 %v5253_v24, %v5251_v14  ;;  %v7238_v15 = vpack.c.bf16 %v5258_v55, %v5256_v49  ;;  %v7256_v62 = vpack.c.bf16 %v5273_v22, %v5271_v20  ;;  %v5277_v21 = vld [vmem:[%s14775_s17 + $0x470] sm:$0xff]  ;;  %v5280_v3 = vld [vmem:[%s14775_s17 + $0x488] sm:$0xff]  ;;  %v5282_v23 = vld [vmem:[%s14775_s17 + $0x498] sm:$0xff]  ;;  %v7381_v18 = vpack.c.bf16 %v5720_v16, %v5719_v52 }
 0x518   : > { %v7262_v29 = vpack.c.bf16 %v5282_v23, %v5280_v3  ;;  %v5279_v54 = vld [vmem:[%s14775_s17 + $0x480] sm:$0xff]  ;;  %v5281_v12 = vld [vmem:[%s14775_s17 + $0x490] sm:$0xff]  ;;  %v5724_v49 = vld [vmem:[%s14776_s0 + $0x48] sm:$0xff] }
 0x519   : > { %v5723_v24 = vld [vmem:[%s14776_s0 + $0x40] sm:$0xff]  ;;  %v7264_v55 = vpack.c.bf16 %v5281_v12, %v5279_v54  ;;  %v5293_v19 = vld [vmem:[%s14775_s17 + $0x4f0] sm:$0xff]  ;;  %v5296_v10 = vld [vmem:[%s14775_s17 + $0x508] sm:$0xff] }
 0x51a   : > { %7201 = vmatpush1.bf16.msra.mxu0 %v7200_v42  ;;  %v5262_v42 = vld [vmem:[%s14775_s17 + $0x3f8] sm:$0xff]  ;;  %v5305_v20 = vld [vmem:[%s14775_s17 + $0x550] sm:$0xff]  ;;  %v5308_v22 = vld [vmem:[%s14775_s17 + $0x568] sm:$0xff] }
 0x51b   : > { %7203 = vmatprep.subr.bf16.mxu0 %v7202_v46  ;;  %v7240_v46 = vpack.c.bf16 %v5257_v61, %v5255_v45  ;;  %v7242_v50 = vpack.c.bf16 %v5262_v42, %v5260_v17  ;;  %v5285_v45 = vld [vmem:[%s14775_s17 + $0x4b0] sm:$0xff]  ;;  %v5288_v61 = vld [vmem:[%s14775_s17 + $0x4c8] sm:$0xff]  ;;  %v5290_v17 = vld [vmem:[%s14775_s17 + $0x4d8] sm:$0xff]  ;;  %v7387_v42 = vpack.c.bf16 %v5724_v49, %v5723_v24 }
 0x51c   : > { %v5307_v52 = vld [vmem:[%s14775_s17 + $0x560] sm:$0xff]  ;;  %v5309_v16 = vld [vmem:[%s14775_s17 + $0x570] sm:$0xff]  ;;  %v5320_v12 = vld [vmem:[%s14775_s17 + $0x5c8] sm:$0xff] }
 0x51d   : > { %v5311_v3 = vld [vmem:[%s14775_s17 + $0x580] sm:$0xff]  ;;  %v5313_v23 = vld [vmem:[%s14775_s17 + $0x590] sm:$0xff] }
 0x51e   : > { %7205 = vmatpush1.bf16.msra.mxu0 %v7204_v63  ;;  %v5266_v63 = vld [vmem:[%s14775_s17 + $0x418] sm:$0xff]  ;;  %v5317_v54 = vld [vmem:[%s14775_s17 + $0x5b0] sm:$0xff]  ;;  %v5319_v24 = vld [vmem:[%s14775_s17 + $0x5c0] sm:$0xff] }
 0x51f   : > { %7207 = vmatprep.subr.bf16.mxu0 %v7206_v9  ;;  %v7244_v9 = vpack.c.bf16 %v5261_v27, %v5259_v47  ;;  %v7246_v0 = vpack.c.bf16 %v5266_v63, %v5264_v32  ;;  %v5287_v47 = vld [vmem:[%s14775_s17 + $0x4c0] sm:$0xff]  ;;  %v5289_v27 = vld [vmem:[%s14775_s17 + $0x4d0] sm:$0xff]  ;;  %v5292_v32 = vld [vmem:[%s14775_s17 + $0x4e8] sm:$0xff] }
 0x520   : > { %v5294_v63 = vld [vmem:[%s14775_s17 + $0x4f8] sm:$0xff]  ;;  %v7272_v7 = vpack.c.bf16 %v5289_v27, %v5287_v47  ;;  %v5321_v49 = vld [vmem:[%s14775_s17 + $0x5d0] sm:$0xff]  ;;  %v5327_v27 = vld [vmem:[%s14775_s17 + $0x600] sm:$0xff] }
 0x522   : > { %7209 = vmatpush1.bf16.msra.mxu0 %v7208_v41  ;;  %v5268_v41 = vld [vmem:[%s14775_s17 + $0x428] sm:$0xff] }
 0x523   : > { %7211 = vmatprep.subr.bf16.mxu0 %v7210_v33  ;;  %v5270_v33 = vld [vmem:[%s14775_s17 + $0x438] sm:$0xff] }
 0x524   : > { %v7250_v37 = vpack.c.bf16 %v5270_v33, %v5268_v41  ;;  %v5298_v41 = vld [vmem:[%s14775_s17 + $0x518] sm:$0xff] }
 0x526   : > { %7213 = vmatpush1.bf16.msra.mxu0 %v7212_v51  ;;  %v5120_v51 = vcombine.high %v12918_v4, %v12918_v4 }
 0x527   : > { %7215 = vmatprep.subr.bf16.mxu0 %v7214_v56  ;;  %v5272_v56 = vld [vmem:[%s14775_s17 + $0x448] sm:$0xff] }
 0x528   : > { %v7254_v6 = vpack.c.bf16 %v5274_v31, %v5272_v56 }
 0x52a   : > { %7217 = vmatpush1.bf16.msra.mxu0 %v7216_v30  ;;  %v7252_v30 = vpack.c.bf16 %v5269_v35, %v5267_v43  ;;  %v5297_v43 = vld [vmem:[%s14775_s17 + $0x510] sm:$0xff]  ;;  %v5300_v35 = vld [vmem:[%s14775_s17 + $0x528] sm:$0xff] }
 0x52b   : > { %7219 = vmatprep.subr.bf16.mxu0 %v7218_v36  ;;  %v7375_v36 = vpack.c.bf16 %v5716_v60, %v5715_v59  ;;  %v5299_v59 = vld [vmem:[%s14775_s17 + $0x520] sm:$0xff]  ;;  %v5301_v60 = vld [vmem:[%s14775_s17 + $0x530] sm:$0xff] }
 0x52d   : > { %7376 = vmatpush1.bf16.msra.mxu1 %v7375_v36  ;;  %v7284_v36 = vpack.c.bf16 %v5301_v60, %v5299_v59 }
 0x52e   : > { %7221 = vmatpush1.bf16.msra.mxu0 %v7220_v13  ;;  %v5276_v13 = vld [vmem:[%s14775_s17 + $0x468] sm:$0xff]  ;;  %7377 = vmatprep.subr.bf16.mxu1 %v7711_v1 }
 0x52f   : > { %7223 = vmatprep.subr.bf16.mxu0 %v7222_v39  ;;  %v5278_v39 = vld [vmem:[%s14775_s17 + $0x478] sm:$0xff] }
 0x532   : > { %7225 = vmatpush1.bf16.msra.mxu0 %v7224_v40  ;;  %v7258_v40 = vpack.c.bf16 %v5278_v39, %v5276_v13  ;;  %v5310_v13 = vld [vmem:[%s14775_s17 + $0x578] sm:$0xff] }
 0x533   : > { %7227 = vmatprep.subr.bf16.mxu0 %v7226_v44  ;;  %v5275_v44 = vld [vmem:[%s14775_s17 + $0x460] sm:$0xff] }
 0x534   : > { %v7260_v25 = vpack.c.bf16 %v5277_v21, %v5275_v44  ;;  %v7292_v44 = vpack.c.bf16 %v5309_v16, %v5307_v52 }
 0x536   : > { %7229 = vmatpush1.bf16.msra.mxu0 %v7228_v8  ;;  %v5721_v8 = vld [vmem:[%s14776_s0 + $0x30] sm:$0xff] }
 0x537   : > { %7231 = vmatprep.subr.bf16.mxu0 %v7230_v34  ;;  %v5722_v34 = vld [vmem:[%s14776_s0 + $0x38] sm:$0xff] }
 0x538   : > { %v7384_v14 = vpack.c.bf16 %v5722_v34, %v5721_v8  ;;  %v5318_v8 = vld [vmem:[%s14775_s17 + $0x5b8] sm:$0xff]  ;;  %v7296_v34 = vpack.c.bf16 %v5313_v23, %v5311_v3 }
 0x53a   : > { %7233 = vmatpush1.bf16.msra.mxu0 %v7232_v11  ;;  %v5284_v11 = vld [vmem:[%s14775_s17 + $0x4a8] sm:$0xff] }
 0x53b   : > { %7235 = vmatprep.subr.bf16.mxu0 %v7234_v28  ;;  %v5286_v28 = vld [vmem:[%s14775_s17 + $0x4b8] sm:$0xff] }
 0x53e   : > { %7237 = vmatpush1.bf16.msra.mxu0 %v7236_v5  ;;  %v7266_v5 = vpack.c.bf16 %v5286_v28, %v5284_v11  ;;  %v5322_v11 = vld [vmem:[%s14775_s17 + $0x5d8] sm:$0xff] }
 0x53f   : > { %7239 = vmatprep.subr.bf16.mxu0 %v7238_v15  ;;  %v5283_v15 = vld [vmem:[%s14775_s17 + $0x4a0] sm:$0xff] }
 0x542   : > { %7241 = vmatpush1.bf16.msra.mxu0 %v7240_v46  ;;  %v7268_v46 = vpack.c.bf16 %v5285_v45, %v5283_v15  ;;  %v7304_v15 = vpack.c.bf16 %v5321_v49, %v5319_v24 }
 0x543   : > { %7243 = vmatprep.subr.bf16.mxu0 %v7242_v50  ;;  %v7270_v50 = vpack.c.bf16 %v5290_v17, %v5288_v61  ;;  %v5323_v61 = vld [vmem:[%s14775_s17 + $0x5e0] sm:$0xff]  ;;  %v5325_v17 = vld [vmem:[%s14775_s17 + $0x5f0] sm:$0xff] }
 0x546   : > { %7245 = vmatpush1.bf16.msra.mxu0 %v7244_v9  ;;  %v7274_v9 = vpack.c.bf16 %v5294_v63, %v5292_v32  ;;  %v5329_v32 = vld [vmem:[%s14775_s17 + $0x610] sm:$0xff]  ;;  %v13154_v63 = vrot.slane %v6210_v57, %v14774_v58  ;;  %v5368_v57 = vld [vmem:[%s14775_s17 + $0x748] sm:$0xff] }
 0x547   : > { %7247 = vmatprep.subr.bf16.mxu0 %v7246_v0  ;;  %v5291_v0 = vld [vmem:[%s14775_s17 + $0x4e0] sm:$0xff] }
 0x548   : > { %v7276_v33 = vpack.c.bf16 %v5293_v19, %v5291_v0  ;;  %v7312_v0 = vpack.c.bf16 %v5329_v32, %v5327_v27  ;;  %v5367_v32 = vld [vmem:[%s14775_s17 + $0x740] sm:$0xff] }
 0x549   : > { %5527 = vmatmul.mubr.f32.vlgmr.msra.gmra.mrb[4].mxu0 %v12715_v2  ;;  %v5718_v2 = vld [vmem:[%s14776_s0 + $0x18] sm:$0xff] }
 0x54a   : > { %7249 = vmatpush1.bf16.msra.mxu0 %v7248_v48  ;;  %5597 = vmatprep.mubr.f32.mxu0 %v5120_v51  ;;  %v7378_v53 = vpack.c.bf16 %v5718_v2, %v5717_v38  ;;  %v7278_v48 = vpack.c.bf16 %v5298_v41, %v5296_v10  ;;  %v5302_v51 = vld [vmem:[%s14775_s17 + $0x538] sm:$0xff]  ;;  %v5304_v38 = vld [vmem:[%s14775_s17 + $0x548] sm:$0xff]  ;;  %v5331_v10 = vld [vmem:[%s14775_s17 + $0x620] sm:$0xff] }
 0x54b   : > { %7251 = vmatprep.subr.bf16.mxu0 %v7250_v37  ;;  %v5295_v37 = vld [vmem:[%s14775_s17 + $0x500] sm:$0xff]  ;;  %v7282_v31 = vpack.c.bf16 %v5302_v51, %v5300_v35  ;;  %v5333_v41 = vld [vmem:[%s14775_s17 + $0x630] sm:$0xff] }
 0x54c   : > { %7379 = vmatpush1.bf16.msra.mxu1 %v7378_v53  ;;  %v7280_v56 = vpack.c.bf16 %v5297_v43, %v5295_v37  ;;  %v7290_v53 = vpack.c.bf16 %v5310_v13, %v5308_v22  ;;  %v5338_v37 = vld [vmem:[%s14775_s17 + $0x658] sm:$0xff]  ;;  %v7316_v43 = vpack.c.bf16 %v5333_v41, %v5331_v10  ;;  %v5335_v51 = vld [vmem:[%s14775_s17 + $0x640] sm:$0xff]  ;;  %v5345_v13 = vld [vmem:[%s14775_s17 + $0x690] sm:$0xff] }
 0x54d   : > { %7380 = vmatprep.subr.bf16.mxu1 %v7711_v1  ;;  %v5343_v22 = vld [vmem:[%s14775_s17 + $0x680] sm:$0xff] }
 0x54e   : > { %7253 = vmatpush1.bf16.msra.mxu0 %v7252_v30  ;;  %v5306_v30 = vld [vmem:[%s14775_s17 + $0x558] sm:$0xff]  ;;  %v7328_v52 = vpack.c.bf16 %v5345_v13, %v5343_v22  ;;  %v5371_v41 = vld [vmem:[%s14775_s17 + $0x760] sm:$0xff]  ;;  %v5385_v13 = vld [vmem:[%s14775_s17 + $0x7d0] sm:$0xff] }
 0x54f   : > { %7255 = vmatprep.subr.bf16.mxu0 %v7254_v6  ;;  %v7286_v2 = vpack.c.bf16 %v5306_v30, %v5304_v38  ;;  %v5303_v6 = vld [vmem:[%s14775_s17 + $0x540] sm:$0xff]  ;;  %v5341_v30 = vld [vmem:[%s14775_s17 + $0x670] sm:$0xff] }
 0x550   : > { %7382 = vmatpush1.bf16.msra.mxu1 %v7381_v18  ;;  %v7288_v39 = vpack.c.bf16 %v5305_v20, %v5303_v6  ;;  %v5316_v18 = vld [vmem:[%s14775_s17 + $0x5a8] sm:$0xff]  ;;  %v5339_v38 = vld [vmem:[%s14775_s17 + $0x660] sm:$0xff] }
 0x551   : > { %7383 = vmatprep.subr.bf16.mxu1 %v7711_v1  ;;  %v7324_v6 = vpack.c.bf16 %v5341_v30, %v5339_v38  ;;  %v5379_v38 = vld [vmem:[%s14775_s17 + $0x7a0] sm:$0xff]  ;;  %v5381_v30 = vld [vmem:[%s14775_s17 + $0x7b0] sm:$0xff] }
 0x552   : > { %7257 = vmatpush1.bf16.msra.mxu0 %v7256_v62  ;;  %v5312_v62 = vld [vmem:[%s14775_s17 + $0x588] sm:$0xff]  ;;  %v5383_v22 = vld [vmem:[%s14775_s17 + $0x7c0] sm:$0xff] }
 0x553   : > { %7259 = vmatprep.subr.bf16.mxu0 %v7258_v40  ;;  %v5314_v40 = vld [vmem:[%s14775_s17 + $0x598] sm:$0xff] }
 0x554   : > { %7385 = vmatpush1.bf16.msra.mxu1 %v7384_v14  ;;  %v7294_v21 = vpack.c.bf16 %v5314_v40, %v5312_v62  ;;  %v7302_v14 = vpack.c.bf16 %v5322_v11, %v5320_v12  ;;  %v5347_v62 = vld [vmem:[%s14775_s17 + $0x6a0] sm:$0xff]  ;;  %v5349_v40 = vld [vmem:[%s14775_s17 + $0x6b0] sm:$0xff] }
 0x555   : > { %7386 = vmatprep.subr.bf16.mxu1 %v7711_v1  ;;  %v7332_v3 = vpack.c.bf16 %v5349_v40, %v5347_v62  ;;  %v5355_v12 = vld [vmem:[%s14775_s17 + $0x6e0] sm:$0xff]  ;;  %v5357_v11 = vld [vmem:[%s14775_s17 + $0x6f0] sm:$0xff] }
 0x556   : > { %7261 = vmatpush1.bf16.msra.mxu0 %v7260_v25  ;;  %v7298_v25 = vpack.c.bf16 %v5318_v8, %v5316_v18  ;;  %v5351_v18 = vld [vmem:[%s14775_s17 + $0x6c0] sm:$0xff]  ;;  %v5353_v8 = vld [vmem:[%s14775_s17 + $0x6d0] sm:$0xff]  ;;  %v7340_v24 = vpack.c.bf16 %v5357_v11, %v5355_v12  ;;  %v5732_v12 = vld [vmem:[%s14776_s0 + $0x88] sm:$0xff] }
 0x557   : > { %7263 = vmatprep.subr.bf16.mxu0 %v7262_v29  ;;  %v5315_v29 = vld [vmem:[%s14775_s17 + $0x5a0] sm:$0xff]  ;;  %v5389_v40 = vld [vmem:[%s14775_s17 + $0x7f0] sm:$0xff] }
 0x558   : > { %7388 = vmatpush1.bf16.msra.mxu1 %v7387_v42  ;;  %v7300_v28 = vpack.c.bf16 %v5317_v54, %v5315_v29  ;;  %v5328_v42 = vld [vmem:[%s14775_s17 + $0x608] sm:$0xff]  ;;  %v7336_v29 = vpack.c.bf16 %v5353_v8, %v5351_v18  ;;  %v5387_v62 = vld [vmem:[%s14775_s17 + $0x7e0] sm:$0xff] }
 0x559   : > { %7389 = vmatprep.subr.bf16.mxu1 %v7711_v1  ;;  %v5728_v8 = vld [vmem:[%s14776_s0 + $0x68] sm:$0xff] }
 0x55a   : > { %7265 = vmatpush1.bf16.msra.mxu0 %v7264_v55  ;;  %v5324_v55 = vld [vmem:[%s14775_s17 + $0x5e8] sm:$0xff] }
 0x55b   : > { %7267 = vmatprep.subr.bf16.mxu0 %v7266_v5  ;;  %v5326_v5 = vld [vmem:[%s14775_s17 + $0x5f8] sm:$0xff] }
 0x55c   : > { %v7306_v45 = vpack.c.bf16 %v5326_v5, %v5324_v55  ;;  %v5359_v55 = vld [vmem:[%s14775_s17 + $0x700] sm:$0xff]  ;;  %v5361_v5 = vld [vmem:[%s14775_s17 + $0x710] sm:$0xff] }
 0x55e   : > { %7269 = vmatpush1.bf16.msra.mxu0 %v7268_v46  ;;  %v5330_v46 = vld [vmem:[%s14775_s17 + $0x618] sm:$0xff] }
 0x55f   : > { %7271 = vmatprep.subr.bf16.mxu0 %v7270_v50  ;;  %v7308_v50 = vpack.c.bf16 %v5325_v17, %v5323_v61  ;;  %v7310_v47 = vpack.c.bf16 %v5330_v46, %v5328_v42  ;;  %v7344_v61 = vpack.c.bf16 %v5361_v5, %v5359_v55  ;;  %v5363_v42 = vld [vmem:[%s14775_s17 + $0x720] sm:$0xff]  ;;  %v5365_v46 = vld [vmem:[%s14775_s17 + $0x730] sm:$0xff]  ;;  %v14779_v5 = vld [vmem:[#allocation66_spill] sm:$0xff] }
 0x562   : > { %7273 = vmatpush1.bf16.msra.mxu0 %v7272_v7  ;;  %v5332_v7 = vld [vmem:[%s14775_s17 + $0x628] sm:$0xff] }
 0x563   : > { %7275 = vmatprep.subr.bf16.mxu0 %v7274_v9  ;;  %v5334_v9 = vld [vmem:[%s14775_s17 + $0x638] sm:$0xff] }
 0x564   : > { %v7314_v19 = vpack.c.bf16 %v5334_v9, %v5332_v7  ;;  %v5369_v7 = vld [vmem:[%s14775_s17 + $0x750] sm:$0xff]  ;;  %v5372_v9 = vld [vmem:[%s14775_s17 + $0x768] sm:$0xff] }
 0x566   : > { %7277 = vmatpush1.bf16.msra.mxu0 %v7276_v33  ;;  %v5131_v33 = vcombine.high %v13154_v63, %v13154_v63 }
 0x567   : > { %7279 = vmatprep.subr.bf16.mxu0 %v7278_v48  ;;  %v5336_v48 = vld [vmem:[%s14775_s17 + $0x648] sm:$0xff] }
 0x568   : > { %v7318_v35 = vpack.c.bf16 %v5338_v37, %v5336_v48  ;;  %v5376_v48 = vld [vmem:[%s14775_s17 + $0x788] sm:$0xff]  ;;  %v5378_v37 = vld [vmem:[%s14775_s17 + $0x798] sm:$0xff] }
 0x56a   : > { %7281 = vmatpush1.bf16.msra.mxu0 %v7280_v56  ;;  %v5337_v56 = vld [vmem:[%s14775_s17 + $0x650] sm:$0xff] }
 0x56b   : > { %7283 = vmatprep.subr.bf16.mxu0 %v7282_v31  ;;  %v5340_v31 = vld [vmem:[%s14775_s17 + $0x668] sm:$0xff]  ;;  %v7320_v59 = vpack.c.bf16 %v5337_v56, %v5335_v51  ;;  %v5375_v51 = vld [vmem:[%s14775_s17 + $0x780] sm:$0xff]  ;;  %v5377_v56 = vld [vmem:[%s14775_s17 + $0x790] sm:$0xff] }
 0x56e   : > { %7285 = vmatpush1.bf16.msra.mxu0 %v7284_v36  ;;  %v5344_v36 = vld [vmem:[%s14775_s17 + $0x688] sm:$0xff] }
 0x56f   : > { %7287 = vmatprep.subr.bf16.mxu0 %v7286_v2  ;;  %v5346_v2 = vld [vmem:[%s14775_s17 + $0x698] sm:$0xff] }
 0x570   : > { %v7326_v20 = vpack.c.bf16 %v5346_v2, %v5344_v36  ;;  %v5384_v36 = vld [vmem:[%s14775_s17 + $0x7c8] sm:$0xff]  ;;  %v5386_v2 = vld [vmem:[%s14775_s17 + $0x7d8] sm:$0xff] }
 0x572   : > { %7289 = vmatpush1.bf16.msra.mxu0 %v7288_v39  ;;  %v5348_v39 = vld [vmem:[%s14775_s17 + $0x6a8] sm:$0xff] }
 0x573   : > { %7291 = vmatprep.subr.bf16.mxu0 %v7290_v53  ;;  %v5350_v53 = vld [vmem:[%s14775_s17 + $0x6b8] sm:$0xff] }
 0x574   : > { %v7330_v16 = vpack.c.bf16 %v5350_v53, %v5348_v39  ;;  %v5388_v39 = vld [vmem:[%s14775_s17 + $0x7e8] sm:$0xff]  ;;  %v5390_v53 = vld [vmem:[%s14775_s17 + $0x7f8] sm:$0xff] }
 0x576   : > { %7293 = vmatpush1.bf16.msra.mxu0 %v7292_v44  ;;  %v5352_v44 = vld [vmem:[%s14775_s17 + $0x6c8] sm:$0xff] }
 0x577   : > { %7295 = vmatprep.subr.bf16.mxu0 %v7294_v21  ;;  %v5354_v21 = vld [vmem:[%s14775_s17 + $0x6d8] sm:$0xff] }
 0x578   : > { %v7334_v23 = vpack.c.bf16 %v5354_v21, %v5352_v44  ;;  %v7372_v44 = vpack.c.bf16 %v5389_v40, %v5387_v62  ;;  %v5725_v21 = vld [vmem:[%s14776_s0 + $0x50] sm:$0xff] }
 0x57a   : > { %7297 = vmatpush1.bf16.msra.mxu0 %v7296_v34  ;;  %v5356_v34 = vld [vmem:[%s14775_s17 + $0x6e8] sm:$0xff] }
 0x57b   : > { %7299 = vmatprep.subr.bf16.mxu0 %v7298_v25  ;;  %v5358_v25 = vld [vmem:[%s14775_s17 + $0x6f8] sm:$0xff] }
 0x57c   : > { %v7338_v54 = vpack.c.bf16 %v5358_v25, %v5356_v34  ;;  %v5730_v25 = vld [vmem:[%s14776_s0 + $0x78] sm:$0xff] }
 0x57e   : > { %7301 = vmatpush1.bf16.msra.mxu0 %v7300_v28  ;;  %v5360_v28 = vld [vmem:[%s14775_s17 + $0x708] sm:$0xff] }
 0x57f   : > { %7303 = vmatprep.subr.bf16.mxu0 %v7302_v14  ;;  %v5362_v14 = vld [vmem:[%s14775_s17 + $0x718] sm:$0xff] }
 0x580   : > { %v7342_v49 = vpack.c.bf16 %v5362_v14, %v5360_v28  ;;  %v5688_v28 = vld [vmem:[#allocation4] sm:$0xf]  ;;  %v5134_v14 = vld [vmem:[%s14777_s30] sm:$0x3] }
 0x581   : > { %vm5689_vm14 = vcmp.gt.f32.partialorder %v5688_v28, 0.5 }
 0x582   : > { %7305 = vmatpush1.bf16.msra.mxu0 %v7304_v15  ;;  %v5364_v15 = vld [vmem:[%s14775_s17 + $0x728] sm:$0xff]  ;;  %v6211_v55 = vsel %vm5689_vm14, 1.0, %v14717_v26 }
 0x583   : > { %7307 = vmatprep.subr.bf16.mxu0 %v7306_v45  ;;  %v5366_v45 = vld [vmem:[%s14775_s17 + $0x738] sm:$0xff] }
 0x584   : > { %v7346_v17 = vpack.c.bf16 %v5366_v45, %v5364_v15  ;;  %v5683_v15 = vrot.slane %v5134_v14, %v14779_v5 }
 0x586   : > { %7309 = vmatpush1.bf16.msra.mxu0 %v7308_v50  ;;  %v5370_v50 = vld [vmem:[%s14775_s17 + $0x758] sm:$0xff] }
 0x587   : > { %7311 = vmatprep.subr.bf16.mxu0 %v7310_v47  ;;  %v7348_v47 = vpack.c.bf16 %v5365_v46, %v5363_v42  ;;  %v7350_v27 = vpack.c.bf16 %v5370_v50, %v5368_v57 }
 0x589   : > { %5598 = vmatmul.mubr.f32.vlgmr.msra.gmra.mrb[4].mxu0 %v12918_v4  ;;  %v5342_v4 = vld [vmem:[%s14775_s17 + $0x678] sm:$0xff] }
 0x58a   : > { %7313 = vmatpush1.bf16.msra.mxu0 %v7312_v0  ;;  %5668 = vmatprep.mubr.f32.mxu0 %v5131_v33  ;;  %v7322_v60 = vpack.c.bf16 %v5342_v4, %v5340_v31  ;;  %v5374_v0 = vld [vmem:[%s14775_s17 + $0x778] sm:$0xff]  ;;  %v5373_v33 = vld [vmem:[%s14775_s17 + $0x770] sm:$0xff]  ;;  %v5380_v31 = vld [vmem:[%s14775_s17 + $0x7a8] sm:$0xff] }
 0x58b   : > { %7315 = vmatprep.subr.bf16.mxu0 %v7314_v19  ;;  %v7352_v19 = vpack.c.bf16 %v5369_v7, %v5367_v32  ;;  %v7354_v10 = vpack.c.bf16 %v5374_v0, %v5372_v9  ;;  %v5382_v4 = vld [vmem:[%s14775_s17 + $0x7b8] sm:$0xff]  ;;  %v5823_v0 = vld [vmem:[#allocation5] sm:$0x3] }
 0x58c   : > { %vm5824_vm4 = vcmp.gt.f32.partialorder %v5823_v0, 0.5 }
 0x58e   : > { %7317 = vmatpush1.bf16.msra.mxu0 %v7316_v43  ;;  %v7356_v43 = vpack.c.bf16 %v5373_v33, %v5371_v41  ;;  %v6214_v33 = vld [vmem:[%s14780_s24] ss:$0 sm:$0xff] }
 0x58f   : > { %7319 = vmatprep.subr.bf16.mxu0 %v7318_v35  ;;  %v7358_v35 = vpack.c.bf16 %v5378_v37, %v5376_v48 }
 0x592   : > { %7321 = vmatpush1.bf16.msra.mxu0 %v7320_v59  ;;  %v7360_v59 = vpack.c.bf16 %v5377_v56, %v5375_v51  ;;  %v5836_v51 = vld [vmem:[#allocation14] sm:$0x3] }
 0x593   : > { %7323 = vmatprep.subr.bf16.mxu0 %v7322_v60  ;;  %v7362_v60 = vpack.c.bf16 %v5382_v4, %v5380_v31 }
 0x596   : > { %7325 = vmatpush1.bf16.msra.mxu0 %v7324_v6  ;;  %v7364_v6 = vpack.c.bf16 %v5381_v30, %v5379_v38 }
 0x597   : > { %7327 = vmatprep.subr.bf16.mxu0 %v7326_v20  ;;  %v7366_v20 = vpack.c.bf16 %v5386_v2, %v5384_v36 }
 0x59a   : > { %7329 = vmatpush1.bf16.msra.mxu0 %v7328_v52  ;;  %v7368_v52 = vpack.c.bf16 %v5385_v13, %v5383_v22 }
 0x59b   : > { %7331 = vmatprep.subr.bf16.mxu0 %v7330_v16  ;;  %v7370_v16 = vpack.c.bf16 %v5390_v53, %v5388_v39 }
 0x59e   : > { %7333 = vmatpush1.bf16.msra.mxu0 %v7332_v3  ;;  %v5726_v3 = vld [vmem:[%s14776_s0 + $0x58] sm:$0xff] }
 0x59f   : > { %7335 = vmatprep.subr.bf16.mxu0 %v7334_v23  ;;  %v5727_v23 = vld [vmem:[%s14776_s0 + $0x60] sm:$0xff]  ;;  %v7390_v18 = vpack.c.bf16 %v5726_v3, %v5725_v21 }
 0x5a0   : > { %v7393_v34 = vpack.c.bf16 %v5728_v8, %v5727_v23 }
 0x5a1   : > { %7391 = vmatpush1.bf16.msra.mxu1 %v7390_v18 }
 0x5a2   : > { %7337 = vmatpush1.bf16.msra.mxu0 %v7336_v29  ;;  %7392 = vmatprep.subr.bf16.mxu1 %v7711_v1 }
 0x5a3   : > { %7339 = vmatprep.subr.bf16.mxu0 %v7338_v54  ;;  %v5731_v54 = vld [vmem:[%s14776_s0 + $0x80] sm:$0xff] }
 0x5a4   : > { %v7399_v11 = vpack.c.bf16 %v5732_v12, %v5731_v54 }
 0x5a5   : > { %7394 = vmatpush1.bf16.msra.mxu1 %v7393_v34 }
 0x5a6   : > { %7341 = vmatpush1.bf16.msra.mxu0 %v7340_v24  ;;  %7395 = vmatprep.subr.bf16.mxu1 %v7711_v1  ;;  %v14778_v24 = vld [vmem:[#allocation65_spill] sm:$0xff] }
 0x5a7   : > { %7343 = vmatprep.subr.bf16.mxu0 %v7342_v49  ;;  %v5679_v49 = vrot.slane %v5134_v14, %v14778_v24 }
 0x5aa   : > { %7345 = vmatpush1.bf16.msra.mxu0 %v7344_v61  ;;  %v5692_v61 = vmul.f32 0.2, %v5688_v28 }
 0x5ab   : > { %7347 = vmatprep.subr.bf16.mxu0 %v7346_v17  ;;  %v5693_v17 = vsub.f32 1.0, %v6211_v55 }
 0x5ae   : > { %7349 = vmatpush1.bf16.msra.mxu0 %v7348_v47 }
 0x5af   : > { %7351 = vmatprep.subr.bf16.mxu0 %v7350_v27 }
 0x5b2   : > { %7353 = vmatpush1.bf16.msra.mxu0 %v7352_v19  ;;  %v6215_v19 = vsel %vm5824_vm4, 1.0, %v14717_v26 }
 0x5b3   : > { %7355 = vmatprep.subr.bf16.mxu0 %v7354_v10  ;;  %v5827_v10 = vmul.f32 0.2, %v5823_v0  ;;  %v5828_v41 = vsub.f32 1.0, %v6215_v19 }
 0x5b5   : > { %v5829_v48 = vmul.f32 %v5828_v41, %v5827_v10 }
 0x5b6   : > { %7357 = vmatpush1.bf16.msra.mxu0 %v7356_v43 }
 0x5b7   : > { %7359 = vmatprep.subr.bf16.mxu0 %v7358_v35 }
 0x5ba   : > { %7361 = vmatpush1.bf16.msra.mxu0 %v7360_v59 }
 0x5bb   : > { %7363 = vmatprep.subr.bf16.mxu0 %v7362_v60 }
 0x5be   : > { %7365 = vmatpush1.bf16.msra.mxu0 %v7364_v6 }
 0x5bf   : > { %7367 = vmatprep.subr.bf16.mxu0 %v7366_v20 }
 0x5c2   : > { %7369 = vmatpush1.bf16.msra.mxu0 %v7368_v52 }
 0x5c3   : > { %7371 = vmatprep.subr.bf16.mxu0 %v7370_v16 }
 0x5c6   : > { %7373 = vmatpush1.bf16.msra.mxu0 %v7372_v44 }
 0x5c9   : > { %5669 = vmatmul.mubr.f32.vlgmr.msra.gmra.mrb[4].mxu0 %v13154_v63  ;;  %v5729_v63 = vld [vmem:[%s14776_s0 + $0x70] sm:$0xff] }
 0x5ca   : > { %v7396_v29 = vpack.c.bf16 %v5730_v25, %v5729_v63 }
 0x5cc   : > { %7397 = vmatpush1.bf16.msra.mxu1 %v7396_v29 }
 0x5cd   : > { %7398 = vmatprep.subr.bf16.mxu1 %v7711_v1  ;;  %v5694_v1 = vmul.f32 %v5693_v17, %v5692_v61 }
 0x5d0   : > { %7400 = vmatpush1.bf16.msra.mxu1 %v7399_v11 }
 0x69c   : > { %v5670_v45 = vpop.f32.mrb[4].mxu0 }
 0x69d   : > { %v5686_v42 = vadd.f32 %v5679_v49, %v5670_v45  ;;  %v5672_v46 = vpop.f32.mrb[5].mxu0 }
 0x69e   : > { %v5687_v57 = vadd.f32 %v5683_v15, %v5672_v46 }
 0x6a0   : > { %v5697_v50 = vcombine.low %v5686_v42, %v5687_v57 }
 0x6a2   : > { %v5704_v47 = vrot.slane %v5697_v50, %v14774_v58 }
 0x6a4   : > { %v5706_v27 = vadd.f32 %v5704_v47, %v5694_v1 }
 0x6a6   : > { %5710 = vst.msk [vmem:[#allocation4] sm:$0xf] %vm5709_vm1, %v5706_v27  ;;  %vm5711_vm2 = vcmp.gt.f32.partialorder %v5706_v27, 0.5 }
 0x6a7   : > { %v6212_v32 = vsel %vm5711_vm2, 1.0, %v14717_v26 }
 0x6a8   : > { %v5740_v7 = vrot.slane %v6212_v32, %v14774_v58 }
 0x6aa   : > { %v5741_v9 = vcombine.high %v5740_v7, %v5740_v7 }
 0x6ac   : > { %6213 = vmatprep.mubr.msk.f32.mxu1 %vm5743_vm3, %v5741_v9 }
 0x6ad   : > { %5811 = vmatmul.mubr.f32.vlgmr.msra.gmra.mrb[8].mxu1 %v5740_v7 }
 0x780   : > { %v5812_v37 = vpop.f32.mrb[8].mxu1 }
 0x781   : > { %v5822_v43 = vadd.f32 %v6214_v33, %v5812_v37  ;;  %v5814_v35 = vpop.f32.mrb[9].mxu1 }
 0x783   : > { %v5830_v58 = vadd.f32 %v5829_v48, %v5822_v43  ;;  %5842 = sbr.rel (%p6217_p0) target bundleno = 1940 (0x794), region = 96 }
 0x785   : > { %5832 = vst.msk [vmem:[#allocation5] sm:$0x3] %vm5831_vm5, %v5830_v58  ;;  %vm5833_vm6 = vcmp.gt.f32.partialorder %v5830_v58, 0.5 }
 0x786   : > { %v6216_v56 = vsel %vm5833_vm6, 1.0, %v14717_v26 }
 0x787   : > { %v5837_v31 = vadd.f32 %v6216_v56, %v5836_v51 }
 0x789   : > { %5838 = vst.msk [vmem:[#allocation14] sm:$0x3] %vm5831_vm5, %v5837_v31 }
 0x790   : > { %v5843_v4 = vld [vmem:[#allocation14] sm:$0x3] }
 0x791   : > { %v5844_v59 = vmul.f32 0.1, %v5843_v4 }
 0x793   : > { %5845 = vst.msk [vmem:[#allocation14] sm:$0x3] %vm5831_vm5, %v5844_v59 }
 0x794 PF: > { %s14782_s11 = sld [smem:[#allocation21_spill]]  ;;  %s7712_s25 = smov [#allocation14]  }
 0x795   : > { %s5855_s5 = sshll.u32 %s7712_s25, 4  ;;  %s5856_s5 = int_to_ptr.vmem [resolvable:$true] %s5855_s5 }
 0x796   : > { %s7624_s15 = scalar_lea.vmem %s5856_s5, 32  ;;  %p7631_p9 = scmp.lt.s32.totalorder %s5856_s5, %s5856_s5 }
 0x797   : > { %p7625_p4 = scmp.ne.s32.totalorder %s5856_s5, %s7624_s15  ;;  %p7632_p11 = scmp.lt.s32.totalorder %s7624_s15, %s7624_s15 }
 0x799   : > { %p7633_p10 = por %p7632_p11, %p7631_p9 }
 0x79a   : > { %s14783_s22 = sadd.s32 4294967295, %s14782_s11  }
 0x79b   : > { %p13384_p1 = scmp.eq.s32.totalorder %s14783_s22, 9 }
 0x79d   : > { %p7626_p2 = pnand %p7625_p4, %p13384_p1 }
 0x79f   : > { %p7627_p7 = pneg %p7626_p2 }
 0x7a1   : > { %p7634_p6 = pnand %p7633_p10, %p7627_p7 }
 0x7a3   : > { %7637 = shalt.err (!%p7634_p6)
}
 0x7a4   : > { %s14785_s23 = sld [smem:[#allocation197_spill]] }
 0x7aa   : > { %s7638_s14 = scalar_lea.hbm %s14785_s23, 32 }
 0x7ab   : > { %p7639_p3 = scmp.ne.s32.totalorder %s14785_s23, %s7638_s14  ;;  %p7644_p5 = scmp.lt.u32.totalorder %s7638_s14, %s14785_s23 }
 0x7ad   : > { %p7640_p12 = pnand %p7639_p3, %p13384_p1 }
 0x7af   : > { %p7641_p13 = pneg %p7640_p12 }
 0x7b1   : > { %p7646_p8 = pnand %p7644_p5, %p7641_p13 }
 0x7b3   : > { %7649 = shalt.err (!%p7646_p8)
}
 0x7b4   : > { %7449 = dma.vmem_to_hbm [thread:$0]  (%p13384_p1), %s5856_s5, 32, %s14785_s23, [#allocation7]  }
 0x7b5   : > { %7675 = dma.done.wait (%p13384_p1), [#allocation7], 32  }
 0x7b6   : > { %7677 = vsyncadd (%p13384_p1), [#allocation7], 4294967264 }
 0x7b7 PF: > { %s14786_s20 = sld [smem:[#allocation21_spill]]  ;;  %s14787_s25 = sld [smem:[#allocation20_spill]] }
 0x7b8   : > { %s14788_s26 = sld [smem:[#allocation22_spill]] }
 0x7bd   : > { %s27_s27 = sadd.s32 1, %s14786_s20  }
 0x7be   : > { %p24_p0 = scmp.ge.s32.totalorder %s27_s27, 12  }
 0x7c0   :  { %26 = sbr.rel (!%p24_p0) target bundleno = 20 (0x14), region = 150 }
 0x7c7   :  { %5868 = vsyncpa [#allocation7], 1 }
 0x7c8   :  { %5870 = vsyncpa [#allocation7 + $0x1], 1 }
 0x7c9   :  { %5871 = vsyncpa [#allocation8], 1 }
 0x7ca   :  { %5873 = vsyncpa [#allocation8 + $0x1], 1 }
 0x7cb   :  { %5874 = vsyncpa [#allocation10], 1 }
 0x7cc   :  { %5875 = vsyncpa [#allocation13], 1 }

</bundles_post_ra>
